<compile_context>
chip_gen: v7x
topology: tpu7x:2x2x1
jax: 0.10.0
libtpu: 0.0.40
codegen_flags: <defaults>
</compile_context>

<pallas_src>
import functools
import math

import jax
import jax.numpy as jnp
from jax.experimental import pallas as pl
from jax.experimental.pallas import tpu as pltpu

GN_EPS = 1e-6   # nn.GroupNorm(32, C, eps=1e-06)
LN_EPS = 1e-5   # nn.LayerNorm default eps
N_GROUPS = 32


# ---------------------------------------------------------------------------
# In-kernel helpers (traced inside the Pallas kernel body)
# ---------------------------------------------------------------------------
def _linear(x, w_bf16, b=None):
    """y = x @ w.T (+ b); bf16 MXU operands, f32 accumulation, f32 bias/output."""
    y = jax.lax.dot_general(
        x.astype(jnp.bfloat16), w_bf16,
        (((x.ndim - 1,), (1,)), ((), ())),
        preferred_element_type=jnp.float32)
    if b is not None:
        y = y + b
    return y


def _layernorm(x, g, b):
    mu = jnp.mean(x, axis=-1, keepdims=True)
    var = jnp.mean((x - mu) * (x - mu), axis=-1, keepdims=True)
    return (x - mu) * jax.lax.rsqrt(var + LN_EPS) * g + b


def _split_heads(t, n_head, dh):
    """(L, C) -> (H, L, dh): head becomes a leading batch dim (no lane-dim reshapes)."""
    return jnp.stack([t[:, h * dh:(h + 1) * dh] for h in range(n_head)], axis=0)


def _mha(x_q, k_h, v_h, wq, wo_h, bo, n_head, dh):
    """Batched-head attention.

    x_q:  (Lq, C) f32      k_h/v_h: (H, Lk, dh) bf16
    wq:   (C, C)  bf16     wo_h:    (H, dh, C)  bf16 (out-proj, pre-split per head)
    """
    q = _linear(x_q, wq)                                          # (Lq, C) f32
    q_h = _split_heads(q, n_head, dh).astype(jnp.bfloat16)        # (H, Lq, dh)
    s = jnp.einsum('hqd,hkd->hqk', q_h, k_h,
                   preferred_element_type=jnp.float32)
    s = s * (1.0 / math.sqrt(dh))
    s = s - jnp.max(s, axis=-1, keepdims=True)                    # f32 softmax
    p = jnp.exp(s)
    l = jnp.sum(p, axis=-1, keepdims=True)
    o = jnp.einsum('hqk,hkd->hqd', p.astype(jnp.bfloat16), v_h,
                   preferred_element_type=jnp.float32)            # (H, Lq, dh)
    o = o * pl.reciprocal(l, approx=True)     # fold 1/l after PV (EUP slot, ~free)
    y = jnp.einsum('hqd,hdc->hqc', o.astype(jnp.bfloat16), wo_h,
                   preferred_element_type=jnp.float32)            # (H, Lq, C)
    return jnp.sum(y, axis=0) + bo                                # (Lq, C) f32


# ---------------------------------------------------------------------------
# Fused kernel: grid = (batch, query tile).
# ---------------------------------------------------------------------------
def _unet_attn_block_kernel(n_head, tq,
                            x_ref, ctx_ref,
                            gn_g_ref, gn_b_ref,
                            cin_w_ref, cin_b_ref,
                            ln1_g_ref, ln1_b_ref,
                            a1_wq_ref, a1_wk_ref, a1_wv_ref, a1_woh_ref, a1_bo_ref,
                            ln2_g_ref, ln2_b_ref,
                            a2_wq_ref, a2_wk_ref, a2_wv_ref, a2_woh_ref, a2_bo_ref,
                            ln3_g_ref, ln3_b_ref,
                            gga_w_ref, gga_b_ref, ggg_w_ref, ggg_b_ref,
                            gg2_w_ref, gg2_b_ref,
                            cout_w_ref, cout_b_ref,
                            o_ref,
                            y_scr, k1_scr, v1_scr, k2_scr, v2_scr):
    qi = pl.program_id(1)
    hw, c = x_ref.shape
    dh = c // n_head
    f32 = jnp.float32

    # ---- per-batch preamble (runs once, at query tile 0) ----------------------
    @pl.when(qi == 0)
    def _():
        x_f = x_ref[...]                                   # (HW, C) f32, residue_1
        # GroupNorm(32, C, eps=1e-6): group stats via a one-hot (C, G) membership
        # matrix generated in-kernel (no extra HBM operand / DMA).
        cpg = c // N_GROUPS
        ch = jax.lax.broadcasted_iota(jnp.int32, (c, N_GROUPS), 0)
        gp = jax.lax.broadcasted_iota(jnp.int32, (c, N_GROUPS), 1)
        gmat = ((ch >= gp * cpg) & (ch < (gp + 1) * cpg)).astype(f32)
        inv_cnt = 1.0 / float(hw * cpg)
        hi = jax.lax.Precision.HIGHEST                     # keep stats in true f32
        colsum = jnp.sum(x_f, axis=0, keepdims=True)       # (1, C)
        colsq = jnp.sum(x_f * x_f, axis=0, keepdims=True)  # (1, C)
        gmean = jnp.dot(colsum, gmat, precision=hi,
                        preferred_element_type=f32) * inv_cnt          # (1, G)
        gmsq = jnp.dot(colsq, gmat, precision=hi,
                       preferred_element_type=f32) * inv_cnt           # (1, G)
        grstd = jax.lax.rsqrt(gmsq - gmean * gmean + GN_EPS)
        mean_c = jax.lax.dot_general(gmean, gmat, (((1,), (1,)), ((), ())),
                                     precision=hi, preferred_element_type=f32)
        rstd_c = jax.lax.dot_general(grstd, gmat, (((1,), (1,)), ((), ())),
                                     precision=hi, preferred_element_type=f32)
        xn = (x_f - mean_c) * rstd_c * gn_g_ref[...] + gn_b_ref[...]

        # conv_input (1x1 conv == per-token linear); cached -> residue_2 source.
        y = _linear(xn, cin_w_ref[...], cin_b_ref[...])    # (HW, C) f32
        y_scr[...] = y

        # Self-attention K/V for the whole image, cached per head (bf16) in VMEM.
        h1 = _layernorm(y, ln1_g_ref[...], ln1_b_ref[...])
        k1_scr[...] = _split_heads(_linear(h1, a1_wk_ref[...]),
                                   n_head, dh).astype(jnp.bfloat16)
        v1_scr[...] = _split_heads(_linear(h1, a1_wv_ref[...]),
                                   n_head, dh).astype(jnp.bfloat16)

        # Cross-attention K/V from the (small) context, cached per head.
        ctx = ctx_ref[...]                                 # (S_ctx, D_ctx) f32
        k2_scr[...] = _split_heads(_linear(ctx, a2_wk_ref[...]),
                                   n_head, dh).astype(jnp.bfloat16)
        v2_scr[...] = _split_heads(_linear(ctx, a2_wv_ref[...]),
                                   n_head, dh).astype(jnp.bfloat16)

    # ---- per-query-tile body ---------------------------------------------------
    r0 = pl.multiple_of(qi * tq, tq)
    x0_t = x_ref[pl.ds(r0, tq), :]            # residue_1 tile (original input)
    y_t = y_scr[pl.ds(r0, tq), :]             # residue_2 tile (post conv_input)

    # layernorm_1 + self-attention + residual
    h = _layernorm(y_t, ln1_g_ref[...], ln1_b_ref[...])
    xt = _mha(h, k1_scr[...], v1_scr[...], a1_wq_ref[...],
              a1_woh_ref[...], a1_bo_ref[...], n_head, dh) + y_t

    # layernorm_2 + cross-attention(context) + residual
    h = _layernorm(xt, ln2_g_ref[...], ln2_b_ref[...])
    xt = _mha(h, k2_scr[...], v2_scr[...], a2_wq_ref[...],
              a2_woh_ref[...], a2_bo_ref[...], n_head, dh) + xt

    # layernorm_3 + GeGLU + residual  (geglu_1 pre-split: no (tq, 8C) intermediate)
    h = _layernorm(xt, ln3_g_ref[...], ln3_b_ref[...])
    u = _linear(h, gga_w_ref[...], gga_b_ref[...])         # (tq, 4C) value half
    g = _linear(h, ggg_w_ref[...], ggg_b_ref[...])         # (tq, 4C) gate half
    t = u * (g * jax.nn.sigmoid(g))                        # u * silu(gate), f32
    xt = _linear(t, gg2_w_ref[...], gg2_b_ref[...]) + xt

    # conv_output (1x1) + residue_1
    o_ref[...] = _linear(xt, cout_w_ref[...], cout_b_ref[...]) + x0_t


# ---------------------------------------------------------------------------
# Wrapper: NCHW <-> (N, HW, C) plumbing + pallas_call
# ---------------------------------------------------------------------------
def unet_attention_block(x_nchw, context, params, n_head, *, q_tile=None):
    N, C, H, W = x_nchw.shape
    HW = H * W
    S_ctx, D_ctx = context.shape[1], context.shape[2]
    dh = C // n_head
    assert C % N_GROUPS == 0 and C % n_head == 0

    if q_tile is None:
        q_tile = min(HW, 512)
    assert HW % q_tile == 0 and (q_tile % 8 == 0 or q_tile == HW)
    n_q = HW // q_tile

    # token-major layout (N, HW, C); lane dim = channels.
    # TODO(synk): fold the NCHW<->token-major transposes into the kernel and pad C to a
    # multiple of 128 (with masked GN/LN stats + per-head dh padding) for lane-dense
    # stores at production shapes (SD: C=320 -> 384).
    x_seq = jnp.transpose(x_nchw.reshape(N, C, HW), (0, 2, 1)).astype(jnp.float32)

    bf16 = lambda a: a.astype(jnp.bfloat16)
    rowvec = lambda v: v.reshape(1, -1).astype(jnp.float32)
    # out-proj weight pre-split per head: wo (C, C) -> (H, dh, C),
    # wo_heads[h, d, c] = wo[c, h*dh + d]  so that  o @ wo.T == sum_h o_h @ wo_heads[h].
    wo_heads = lambda w: bf16(jnp.transpose(w).reshape(n_head, dh, C))

    weights = [
        rowvec(params['gn_g']), rowvec(params['gn_b']),
        bf16(params['cin_w']), rowvec(params['cin_b']),
        rowvec(params['ln1_g']), rowvec(params['ln1_b']),
        bf16(params['a1_wq']), bf16(params['a1_wk']), bf16(params['a1_wv']),
        wo_heads(params['a1_wo']), rowvec(params['a1_bo']),
        rowvec(params['ln2_g']), rowvec(params['ln2_b']),
        bf16(params['a2_wq']), bf16(params['a2_wk']), bf16(params['a2_wv']),
        wo_heads(params['a2_wo']), rowvec(params['a2_bo']),
        rowvec(params['ln3_g']), rowvec(params['ln3_b']),
        bf16(params['gg1_w'][:4 * C]), rowvec(params['gg1_b'][:4 * C]),   # GeGLU value
        bf16(params['gg1_w'][4 * C:]), rowvec(params['gg1_b'][4 * C:]),   # GeGLU gate
        bf16(params['gg2_w']), rowvec(params['gg2_b']),
        bf16(params['cout_w']), rowvec(params['cout_b']),
    ]

    scratch_shapes = [
        pltpu.VMEM((HW, C), jnp.float32),                # conv_input output (residue_2)
        pltpu.VMEM((n_head, HW, dh), jnp.bfloat16),      # self-attn K (per head)
        pltpu.VMEM((n_head, HW, dh), jnp.bfloat16),      # self-attn V (per head)
        pltpu.VMEM((n_head, S_ctx, dh), jnp.bfloat16),   # cross-attn K (per head)
        pltpu.VMEM((n_head, S_ctx, dh), jnp.bfloat16),   # cross-attn V (per head)
    ]

    # explicit scoped-VMEM budget: operands (double-buffered) + scratch + a generous
    # allowance for in-kernel temporaries, capped at 64 MiB (v7x physical VMEM).
    operand_bytes = (HW * C + S_ctx * D_ctx) * 4 + sum(
        int(a.size) * a.dtype.itemsize for a in weights)
    scratch_bytes = HW * C * 4 + 2 * n_head * (HW + S_ctx) * max(dh, 128) * 2
    temp_bytes = 4 * (n_head * q_tile * (HW + S_ctx) + 8 * q_tile * 4 * C + 8 * HW * C)
    vmem_limit = int(min(64 << 20,
                         2 * (operand_bytes + q_tile * C * 4)
                         + scratch_bytes + 2 * temp_bytes + (8 << 20)))

    kernel = functools.partial(_unet_attn_block_kernel, n_head, q_tile)
    out_shape = jax.ShapeDtypeStruct((N, HW, C), jnp.float32)

    def make_call(single_buffer_weights):
        def wspec(a):
            kwargs = {}
            if single_buffer_weights:
                # constant-index weights: one VMEM buffer is enough (saves VMEM).
                kwargs['pipeline_mode'] = pl.Buffered(1)
            return pl.BlockSpec(a.shape, lambda n, q, _r=a.ndim: (0,) * _r, **kwargs)

        in_specs = [
            pl.BlockSpec((None, HW, C), lambda n, q: (n, 0, 0)),          # x (full image)
            pl.BlockSpec((None, S_ctx, D_ctx), lambda n, q: (n, 0, 0)),   # context
        ] + [wspec(a) for a in weights]
        out_spec = pl.BlockSpec((None, q_tile, C), lambda n, q: (n, q, 0))

        return pl.pallas_call(
            kernel,
            out_shape=out_shape,
            grid_spec=pltpu.PrefetchScalarGridSpec(
                num_scalar_prefetch=0,
                grid=(N, n_q),
                in_specs=in_specs,
                out_specs=out_spec,
                scratch_shapes=scratch_shapes),
            compiler_params=pltpu.CompilerParams(
                dimension_semantics=("parallel", "arbitrary"),
                vmem_limit_bytes=vmem_limit),
        )

    try:
        out_seq = make_call(True)(x_seq, context, *weights)
    except Exception:  # pl.Buffered(1) single-buffering unsupported on this jax build
        out_seq = make_call(False)(x_seq, context, *weights)

    return jnp.transpose(out_seq, (0, 2, 1)).reshape(N, C, H, W)


# ---------------------------------------------------------------------------
# Deterministic parameter init (PyTorch module shapes; synthetic values)
# ---------------------------------------------------------------------------
def init_params(key, n_head, n_embd, d_context):
    c = n_head * n_embd
    ks = iter(jax.random.split(key, 32))

    def w(shape, scale=0.08):
        return jax.random.normal(next(ks), shape, jnp.float32) * scale

    def affine():
        g = 1.0 + 0.1 * jax.random.normal(next(ks), (c,), jnp.float32)
        b = 0.05 * jax.random.normal(next(ks), (c,), jnp.float32)
        return g, b

    p = {}
    p['gn_g'], p['gn_b'] = affine()
    p['cin_w'], p['cin_b'] = w((c, c)), w((c,))
    p['ln1_g'], p['ln1_b'] = affine()
    p['a1_wq'], p['a1_wk'], p['a1_wv'] = w((c, c)), w((c, c)), w((c, c))
    p['a1_wo'], p['a1_bo'] = w((c, c)), w((c,))
    p['ln2_g'], p['ln2_b'] = affine()
    p['a2_wq'] = w((c, c))
    p['a2_wk'], p['a2_wv'] = w((c, d_context)), w((c, d_context))
    p['a2_wo'], p['a2_bo'] = w((c, c)), w((c,))
    p['ln3_g'], p['ln3_b'] = affine()
    p['gg1_w'], p['gg1_b'] = w((8 * c, c)), w((8 * c,))
    p['gg2_w'], p['gg2_b'] = w((c, 4 * c)), w((c,))
    p['cout_w'], p['cout_b'] = w((c, c)), w((c,))
    return p


# ---------------------------------------------------------------------------
# Pure-JAX reference (mirrors the PyTorch forward) for a numerical sanity check
# ---------------------------------------------------------------------------
def ref_forward(x, context, p, n_head):
    N, C, H, W = x.shape
    G = N_GROUPS
    xg = x.reshape(N, G, C // G, H, W)
    mu = xg.mean(axis=(2, 3, 4), keepdims=True)
    var = xg.var(axis=(2, 3, 4), keepdims=True)
    xn = ((xg - mu) / jnp.sqrt(var + GN_EPS)).reshape(N, C, H, W)
    xn = xn * p['gn_g'][None, :, None, None] + p['gn_b'][None, :, None, None]
    y = jnp.einsum('nihw,oi->nohw', xn, p['cin_w']) + p['cin_b'][None, :, None, None]
    s = y.reshape(N, C, H * W).transpose(0, 2, 1)

    def ln(t, g, b):
        m = t.mean(-1, keepdims=True)
        v = ((t - m) ** 2).mean(-1, keepdims=True)
        return (t - m) / jnp.sqrt(v + LN_EPS) * g + b

    def mha(xq, xkv, wq, wk, wv, wo, bo):
        q, k, v = xq @ wq.T, xkv @ wk.T, xkv @ wv.T
        dh = C // n_head

        def split(t):
            return t.reshape(N, -1, n_head, dh).transpose(0, 2, 1, 3)

        q, k, v = split(q), split(k), split(v)
        sc = jnp.einsum('nhqd,nhkd->nhqk', q, k) / jnp.sqrt(dh)
        pr = jax.nn.softmax(sc, axis=-1)
        o = jnp.einsum('nhqk,nhkd->nhqd', pr, v).transpose(0, 2, 1, 3).reshape(N, -1, C)
        return o @ wo.T + bo

    r2 = s
    s = mha(ln(s, p['ln1_g'], p['ln1_b']),
            ln(s, p['ln1_g'], p['ln1_b']),
            p['a1_wq'], p['a1_wk'], p['a1_wv'], p['a1_wo'], p['a1_bo']) + r2
    r2 = s
    s = mha(ln(s, p['ln2_g'], p['ln2_b']), context,
            p['a2_wq'], p['a2_wk'], p['a2_wv'], p['a2_wo'], p['a2_bo']) + r2
    r2 = s
    t = ln(s, p['ln3_g'], p['ln3_b'])
    h = t @ p['gg1_w'].T + p['gg1_b']
    xa, gate = jnp.split(h, 2, axis=-1)
    t = (xa * jax.nn.silu(gate)) @ p['gg2_w'].T + p['gg2_b']
    s = t + r2

    out = s.transpose(0, 2, 1).reshape(N, C, H, W)
    out = jnp.einsum('nihw,oi->nohw', out, p['cout_w']) \
        + p['cout_b'][None, :, None, None] + x
    return out


if __name__ == "__main__":
    n_head, n_embd, d_context = 2, 32, 64     # channels = 64 (divisible by 32 groups)
    N, H, W = 2, 8, 8                         # HW = 64 tokens
    S_ctx = 16
    C = n_head * n_embd

    key = jax.random.PRNGKey(0)
    kx, kc, kp = jax.random.split(key, 3)
    x = jax.random.normal(kx, (N, C, H, W), jnp.float32)        # NCHW, like PyTorch
    context = jax.random.normal(kc, (N, S_ctx, d_context), jnp.float32)
    params = init_params(kp, n_head, n_embd, d_context)

    # q_tile=32 -> grid (2 batches, 2 query tiles): exercises the preamble + tiled path.
    out = unet_attention_block(x, context, params, n_head, q_tile=32)
    out = jax.block_until_ready(out)
    assert out.shape == x.shape

    with jax.default_matmul_precision("highest"):
        ref = jax.block_until_ready(ref_forward(x, context, params, n_head))
    err = float(jnp.max(jnp.abs(out - ref)))
    # kernel uses bf16 MXU operands with f32 accumulation vs. an f32 reference
    if err > 5e-2:
        raise AssertionError(f"kernel/reference mismatch: max abs err = {err}")
    print("KERNEL_OK")
</pallas_src>

<mosaic_0001>
module attributes {stable_mosaic.version = 11 : i64} {
  func.func @_unet_attn_block_kernel(%arg0: i32, %arg1: i32, %arg2: memref<1x64x64xf32, #tpu.memory_space<vmem>>, %arg3: memref<1x16x64xf32, #tpu.memory_space<vmem>>, %arg4: memref<1x64xf32, #tpu.memory_space<vmem>>, %arg5: memref<1x64xf32, #tpu.memory_space<vmem>>, %arg6: memref<64x64xbf16, #tpu.memory_space<vmem>>, %arg7: memref<1x64xf32, #tpu.memory_space<vmem>>, %arg8: memref<1x64xf32, #tpu.memory_space<vmem>>, %arg9: memref<1x64xf32, #tpu.memory_space<vmem>>, %arg10: memref<64x64xbf16, #tpu.memory_space<vmem>>, %arg11: memref<64x64xbf16, #tpu.memory_space<vmem>>, %arg12: memref<64x64xbf16, #tpu.memory_space<vmem>>, %arg13: memref<2x32x64xbf16, #tpu.memory_space<vmem>>, %arg14: memref<1x64xf32, #tpu.memory_space<vmem>>, %arg15: memref<1x64xf32, #tpu.memory_space<vmem>>, %arg16: memref<1x64xf32, #tpu.memory_space<vmem>>, %arg17: memref<64x64xbf16, #tpu.memory_space<vmem>>, %arg18: memref<64x64xbf16, #tpu.memory_space<vmem>>, %arg19: memref<64x64xbf16, #tpu.memory_space<vmem>>, %arg20: memref<2x32x64xbf16, #tpu.memory_space<vmem>>, %arg21: memref<1x64xf32, #tpu.memory_space<vmem>>, %arg22: memref<1x64xf32, #tpu.memory_space<vmem>>, %arg23: memref<1x64xf32, #tpu.memory_space<vmem>>, %arg24: memref<256x64xbf16, #tpu.memory_space<vmem>>, %arg25: memref<1x256xf32, #tpu.memory_space<vmem>>, %arg26: memref<256x64xbf16, #tpu.memory_space<vmem>>, %arg27: memref<1x256xf32, #tpu.memory_space<vmem>>, %arg28: memref<64x256xbf16, #tpu.memory_space<vmem>>, %arg29: memref<1x64xf32, #tpu.memory_space<vmem>>, %arg30: memref<64x64xbf16, #tpu.memory_space<vmem>>, %arg31: memref<1x64xf32, #tpu.memory_space<vmem>>, %arg32: memref<1x32x64xf32, #tpu.memory_space<vmem>>, %arg33: memref<64x64xf32, #tpu.memory_space<vmem>>, %arg34: memref<2x64x32xbf16, #tpu.memory_space<vmem>>, %arg35: memref<2x64x32xbf16, #tpu.memory_space<vmem>>, %arg36: memref<2x16x32xbf16, #tpu.memory_space<vmem>>, %arg37: memref<2x16x32xbf16, #tpu.memory_space<vmem>>) attributes {dimension_semantics = [#tpu.dimension_semantics<parallel>, #tpu.dimension_semantics<arbitrary>], iteration_bounds = array<i64: 2, 2>, scalar_prefetch = 0 : i64, scratch_operands = 5 : i64, tpu.core_type = #tpu.core_type<tc>, window_params = [{transform_indices = @transform_0, window_bounds = array<i64: 1, 64, 64>}, {transform_indices = @transform_1, window_bounds = array<i64: 1, 16, 64>}, {pipeline_mode = #tpu.pipeline_mode<synchronous>, transform_indices = @transform_2, window_bounds = array<i64: 1, 64>}, {pipeline_mode = #tpu.pipeline_mode<synchronous>, transform_indices = @transform_3, window_bounds = array<i64: 1, 64>}, {pipeline_mode = #tpu.pipeline_mode<synchronous>, transform_indices = @transform_4, window_bounds = array<i64: 64, 64>}, {pipeline_mode = #tpu.pipeline_mode<synchronous>, transform_indices = @transform_5, window_bounds = array<i64: 1, 64>}, {pipeline_mode = #tpu.pipeline_mode<synchronous>, transform_indices = @transform_6, window_bounds = array<i64: 1, 64>}, {pipeline_mode = #tpu.pipeline_mode<synchronous>, transform_indices = @transform_7, window_bounds = array<i64: 1, 64>}, {pipeline_mode = #tpu.pipeline_mode<synchronous>, transform_indices = @transform_8, window_bounds = array<i64: 64, 64>}, {pipeline_mode = #tpu.pipeline_mode<synchronous>, transform_indices = @transform_9, window_bounds = array<i64: 64, 64>}, {pipeline_mode = #tpu.pipeline_mode<synchronous>, transform_indices = @transform_10, window_bounds = array<i64: 64, 64>}, {pipeline_mode = #tpu.pipeline_mode<synchronous>, transform_indices = @transform_11, window_bounds = array<i64: 2, 32, 64>}, {pipeline_mode = #tpu.pipeline_mode<synchronous>, transform_indices = @transform_12, window_bounds = array<i64: 1, 64>}, {pipeline_mode = #tpu.pipeline_mode<synchronous>, transform_indices = @transform_13, window_bounds = array<i64: 1, 64>}, {pipeline_mode = #tpu.pipeline_mode<synchronous>, transform_indices = @transform_14, window_bounds = array<i64: 1, 64>}, {pipeline_mode = #tpu.pipeline_mode<synchronous>, transform_indices = @transform_15, window_bounds = array<i64: 64, 64>}, {pipeline_mode = #tpu.pipeline_mode<synchronous>, transform_indices = @transform_16, window_bounds = array<i64: 64, 64>}, {pipeline_mode = #tpu.pipeline_mode<synchronous>, transform_indices = @transform_17, window_bounds = array<i64: 64, 64>}, {pipeline_mode = #tpu.pipeline_mode<synchronous>, transform_indices = @transform_18, window_bounds = array<i64: 2, 32, 64>}, {pipeline_mode = #tpu.pipeline_mode<synchronous>, transform_indices = @transform_19, window_bounds = array<i64: 1, 64>}, {pipeline_mode = #tpu.pipeline_mode<synchronous>, transform_indices = @transform_20, window_bounds = array<i64: 1, 64>}, {pipeline_mode = #tpu.pipeline_mode<synchronous>, transform_indices = @transform_21, window_bounds = array<i64: 1, 64>}, {pipeline_mode = #tpu.pipeline_mode<synchronous>, transform_indices = @transform_22, window_bounds = array<i64: 256, 64>}, {pipeline_mode = #tpu.pipeline_mode<synchronous>, transform_indices = @transform_23, window_bounds = array<i64: 1, 256>}, {pipeline_mode = #tpu.pipeline_mode<synchronous>, transform_indices = @transform_24, window_bounds = array<i64: 256, 64>}, {pipeline_mode = #tpu.pipeline_mode<synchronous>, transform_indices = @transform_25, window_bounds = array<i64: 1, 256>}, {pipeline_mode = #tpu.pipeline_mode<synchronous>, transform_indices = @transform_26, window_bounds = array<i64: 64, 256>}, {pipeline_mode = #tpu.pipeline_mode<synchronous>, transform_indices = @transform_27, window_bounds = array<i64: 1, 64>}, {pipeline_mode = #tpu.pipeline_mode<synchronous>, transform_indices = @transform_28, window_bounds = array<i64: 64, 64>}, {pipeline_mode = #tpu.pipeline_mode<synchronous>, transform_indices = @transform_29, window_bounds = array<i64: 1, 64>}, {transform_indices = @transform_30, window_bounds = array<i64: 1, 32, 64>}]} {
    %c0_i32 = arith.constant 0 : i32
    %0 = arith.cmpi eq, %arg1, %c0_i32 : i32
    %1 = arith.extui %0 : i1 to i32
    %c0_i32_0 = arith.constant 0 : i32
    %2 = arith.cmpi ne, %1, %c0_i32_0 : i32
    scf.if %2 {
      %c0_95 = arith.constant 0 : index
      %c0_96 = arith.constant 0 : index
      %c0_97 = arith.constant 0 : index
      %192 = vector.load %arg2[%c0_95, %c0_96, %c0_97] : memref<1x64x64xf32, #tpu.memory_space<vmem>>, vector<1x64x64xf32>
      %193 = vector.shape_cast %192 : vector<1x64x64xf32> to vector<64x64xf32>
      %194 = tpu.iota {dimensions = array<i32: 0>} : vector<64x32xi32>
      %195 = tpu.iota {dimensions = array<i32: 1>} : vector<64x32xi32>
      %c2_i32 = arith.constant 2 : i32
      %196 = vector.broadcast %c2_i32 : i32 to vector<64x32xi32>
      %197 = arith.muli %195, %196 : vector<64x32xi32>
      %198 = arith.cmpi sge, %194, %197 : vector<64x32xi32>
      %c1_i32 = arith.constant 1 : i32
      %199 = vector.broadcast %c1_i32 : i32 to vector<64x32xi32>
      %200 = arith.addi %195, %199 : vector<64x32xi32>
      %c2_i32_98 = arith.constant 2 : i32
      %201 = vector.broadcast %c2_i32_98 : i32 to vector<64x32xi32>
      %202 = arith.muli %200, %201 : vector<64x32xi32>
      %203 = arith.cmpi slt, %194, %202 : vector<64x32xi32>
      %204 = arith.andi %198, %203 : vector<64x32xi1>
      %205 = arith.extui %204 : vector<64x32xi1> to vector<64x32xi32>
      %206 = arith.sitofp %205 : vector<64x32xi32> to vector<64x32xf32>
      %cst_99 = arith.constant dense<0.000000e+00> : vector<64xf32>
      %207 = vector.multi_reduction <add>, %193, %cst_99 [0] : vector<64x64xf32> to vector<64xf32>
      %208 = vector.shape_cast %207 : vector<64xf32> to vector<1x64xf32>
      %209 = arith.mulf %193, %193 : vector<64x64xf32>
      %cst_100 = arith.constant dense<0.000000e+00> : vector<64xf32>
      %210 = vector.multi_reduction <add>, %209, %cst_100 [0] : vector<64x64xf32> to vector<64xf32>
      %211 = vector.shape_cast %210 : vector<64xf32> to vector<1x64xf32>
      %cst_101 = arith.constant dense<0.000000e+00> : vector<1x32xf32>
      %212 = tpu.matmul %208, %206, %cst_101 {dimension_numbers = #tpu.dot_dimension_numbers<[1], [0], [0], [1], [0, 0, 1, 1], [], []>, precision = #tpu.contract_precision<fp32>} : vector<1x64xf32>, vector<64x32xf32>, vector<1x32xf32> -> vector<1x32xf32>
      %cst_102 = arith.constant 7.812500e-03 : f32
      %213 = vector.broadcast %cst_102 : f32 to vector<1x32xf32>
      %214 = arith.mulf %212, %213 : vector<1x32xf32>
      %cst_103 = arith.constant dense<0.000000e+00> : vector<1x32xf32>
      %215 = tpu.matmul %211, %206, %cst_103 {dimension_numbers = #tpu.dot_dimension_numbers<[1], [0], [0], [1], [0, 0, 1, 1], [], []>, precision = #tpu.contract_precision<fp32>} : vector<1x64xf32>, vector<64x32xf32>, vector<1x32xf32> -> vector<1x32xf32>
      %cst_104 = arith.constant 7.812500e-03 : f32
      %216 = vector.broadcast %cst_104 : f32 to vector<1x32xf32>
      %217 = arith.mulf %215, %216 : vector<1x32xf32>
      %218 = arith.mulf %214, %214 : vector<1x32xf32>
      %219 = arith.subf %217, %218 : vector<1x32xf32>
      %cst_105 = arith.constant 9.99999997E-7 : f32
      %220 = vector.broadcast %cst_105 : f32 to vector<1x32xf32>
      %221 = arith.addf %219, %220 : vector<1x32xf32>
      %222 = math.rsqrt %221 : vector<1x32xf32>
      %cst_106 = arith.constant dense<0.000000e+00> : vector<1x64xf32>
      %223 = tpu.matmul %214, %206, %cst_106 {dimension_numbers = #tpu.dot_dimension_numbers<[1], [1], [0], [0], [0, 0, 1, 0], [], []>, precision = #tpu.contract_precision<fp32>} : vector<1x32xf32>, vector<64x32xf32>, vector<1x64xf32> -> vector<1x64xf32>
      %cst_107 = arith.constant dense<0.000000e+00> : vector<1x64xf32>
      %224 = tpu.matmul %222, %206, %cst_107 {dimension_numbers = #tpu.dot_dimension_numbers<[1], [1], [0], [0], [0, 0, 1, 0], [], []>, precision = #tpu.contract_precision<fp32>} : vector<1x32xf32>, vector<64x32xf32>, vector<1x64xf32> -> vector<1x64xf32>
      %225 = vector.broadcast %223 : vector<1x64xf32> to vector<64x64xf32>
      %226 = arith.subf %193, %225 : vector<64x64xf32>
      %227 = vector.broadcast %224 : vector<1x64xf32> to vector<64x64xf32>
      %228 = arith.mulf %226, %227 : vector<64x64xf32>
      %c0_108 = arith.constant 0 : index
      %c0_109 = arith.constant 0 : index
      %229 = vector.load %arg4[%c0_108, %c0_109] : memref<1x64xf32, #tpu.memory_space<vmem>>, vector<1x64xf32>
      %230 = vector.broadcast %229 : vector<1x64xf32> to vector<64x64xf32>
      %231 = arith.mulf %228, %230 : vector<64x64xf32>
      %c0_110 = arith.constant 0 : index
      %c0_111 = arith.constant 0 : index
      %232 = vector.load %arg5[%c0_110, %c0_111] : memref<1x64xf32, #tpu.memory_space<vmem>>, vector<1x64xf32>
      %233 = vector.broadcast %232 : vector<1x64xf32> to vector<64x64xf32>
      %234 = arith.addf %231, %233 : vector<64x64xf32>
      %c0_112 = arith.constant 0 : index
      %c0_113 = arith.constant 0 : index
      %235 = vector.load %arg6[%c0_112, %c0_113] : memref<64x64xbf16, #tpu.memory_space<vmem>>, vector<64x64xbf16>
      %c0_114 = arith.constant 0 : index
      %c0_115 = arith.constant 0 : index
      %236 = vector.load %arg7[%c0_114, %c0_115] : memref<1x64xf32, #tpu.memory_space<vmem>>, vector<1x64xf32>
      %237 = arith.truncf %234 : vector<64x64xf32> to vector<64x64xbf16>
      %cst_116 = arith.constant dense<0.000000e+00> : vector<64x64xf32>
      %238 = tpu.matmul %237, %235, %cst_116 {dimension_numbers = #tpu.dot_dimension_numbers<[1], [1], [0], [0], [0, 0, 1, 0], [], []>} : vector<64x64xbf16>, vector<64x64xbf16>, vector<64x64xf32> -> vector<64x64xf32>
      %239 = vector.broadcast %236 : vector<1x64xf32> to vector<64x64xf32>
      %240 = arith.addf %238, %239 : vector<64x64xf32>
      %c0_117 = arith.constant 0 : index
      %c0_118 = arith.constant 0 : index
      %241 = vector.load %arg33[%c0_117, %c0_118] : memref<64x64xf32, #tpu.memory_space<vmem>>, vector<64x64xf32>
      tpu.vector_store %arg33[%c0_117, %c0_118], %240 {strides = array<i32>} : memref<64x64xf32, #tpu.memory_space<vmem>>, vector<64x64xf32>,
      %c0_119 = arith.constant 0 : index
      %c0_120 = arith.constant 0 : index
      %242 = vector.load %arg8[%c0_119, %c0_120] : memref<1x64xf32, #tpu.memory_space<vmem>>, vector<1x64xf32>
      %c0_121 = arith.constant 0 : index
      %c0_122 = arith.constant 0 : index
      %243 = vector.load %arg9[%c0_121, %c0_122] : memref<1x64xf32, #tpu.memory_space<vmem>>, vector<1x64xf32>
      %cst_123 = arith.constant dense<0.000000e+00> : vector<64xf32>
      %244 = vector.multi_reduction <add>, %240, %cst_123 [1] : vector<64x64xf32> to vector<64xf32>
      %245 = vector.shape_cast %244 : vector<64xf32> to vector<64x1xf32>
      %cst_124 = arith.constant 6.400000e+01 : f32
      %246 = vector.broadcast %cst_124 : f32 to vector<64x1xf32>
      %247 = arith.divf %245, %246 : vector<64x1xf32>
      %248 = vector.broadcast %247 : vector<64x1xf32> to vector<64x64xf32>
      %249 = arith.subf %240, %248 : vector<64x64xf32>
      %250 = vector.broadcast %247 : vector<64x1xf32> to vector<64x64xf32>
      %251 = arith.subf %240, %250 : vector<64x64xf32>
      %252 = arith.mulf %249, %251 : vector<64x64xf32>
      %cst_125 = arith.constant dense<0.000000e+00> : vector<64xf32>
      %253 = vector.multi_reduction <add>, %252, %cst_125 [1] : vector<64x64xf32> to vector<64xf32>
      %254 = vector.shape_cast %253 : vector<64xf32> to vector<64x1xf32>
      %cst_126 = arith.constant 6.400000e+01 : f32
      %255 = vector.broadcast %cst_126 : f32 to vector<64x1xf32>
      %256 = arith.divf %254, %255 : vector<64x1xf32>
      %257 = vector.broadcast %247 : vector<64x1xf32> to vector<64x64xf32>
      %258 = arith.subf %240, %257 : vector<64x64xf32>
      %cst_127 = arith.constant 9.99999974E-6 : f32
      %259 = vector.broadcast %cst_127 : f32 to vector<64x1xf32>
      %260 = arith.addf %256, %259 : vector<64x1xf32>
      %261 = math.rsqrt %260 : vector<64x1xf32>
      %262 = vector.broadcast %261 : vector<64x1xf32> to vector<64x64xf32>
      %263 = arith.mulf %258, %262 : vector<64x64xf32>
      %264 = vector.broadcast %242 : vector<1x64xf32> to vector<64x64xf32>
      %265 = arith.mulf %263, %264 : vector<64x64xf32>
      %266 = vector.broadcast %243 : vector<1x64xf32> to vector<64x64xf32>
      %267 = arith.addf %265, %266 : vector<64x64xf32>
      %c0_128 = arith.constant 0 : index
      %c0_129 = arith.constant 0 : index
      %268 = vector.load %arg11[%c0_128, %c0_129] : memref<64x64xbf16, #tpu.memory_space<vmem>>, vector<64x64xbf16>
      %269 = arith.truncf %267 : vector<64x64xf32> to vector<64x64xbf16>
      %cst_130 = arith.constant dense<0.000000e+00> : vector<64x64xf32>
      %270 = tpu.matmul %269, %268, %cst_130 {dimension_numbers = #tpu.dot_dimension_numbers<[1], [1], [0], [0], [0, 0, 1, 0], [], []>} : vector<64x64xbf16>, vector<64x64xbf16>, vector<64x64xf32> -> vector<64x64xf32>
      %271 = vector.extract_strided_slice %270 {offsets = [0, 0], sizes = [64, 32], strides = [1, 1]} : vector<64x64xf32> to vector<64x32xf32>
      %272 = vector.extract_strided_slice %270 {offsets = [0, 32], sizes = [64, 32], strides = [1, 1]} : vector<64x64xf32> to vector<64x32xf32>
      %273 = vector.shape_cast %271 : vector<64x32xf32> to vector<1x64x32xf32>
      %274 = vector.shape_cast %272 : vector<64x32xf32> to vector<1x64x32xf32>
      %275 = tpu.concatenate %273, %274 in 0 : vector<1x64x32xf32>, vector<1x64x32xf32> -> vector<2x64x32xf32>
      %276 = arith.truncf %275 : vector<2x64x32xf32> to vector<2x64x32xbf16>
      %c0_131 = arith.constant 0 : index
      %c0_132 = arith.constant 0 : index
      %c0_133 = arith.constant 0 : index
      %277 = vector.load %arg34[%c0_131, %c0_132, %c0_133] : memref<2x64x32xbf16, #tpu.memory_space<vmem>>, vector<2x64x32xbf16>
      tpu.vector_store %arg34[%c0_131, %c0_132, %c0_133], %276 {strides = array<i32>} : memref<2x64x32xbf16, #tpu.memory_space<vmem>>, vector<2x64x32xbf16>,
      %c0_134 = arith.constant 0 : index
      %c0_135 = arith.constant 0 : index
      %278 = vector.load %arg12[%c0_134, %c0_135] : memref<64x64xbf16, #tpu.memory_space<vmem>>, vector<64x64xbf16>
      %279 = arith.truncf %267 : vector<64x64xf32> to vector<64x64xbf16>
      %cst_136 = arith.constant dense<0.000000e+00> : vector<64x64xf32>
      %280 = tpu.matmul %279, %278, %cst_136 {dimension_numbers = #tpu.dot_dimension_numbers<[1], [1], [0], [0], [0, 0, 1, 0], [], []>} : vector<64x64xbf16>, vector<64x64xbf16>, vector<64x64xf32> -> vector<64x64xf32>
      %281 = vector.extract_strided_slice %280 {offsets = [0, 0], sizes = [64, 32], strides = [1, 1]} : vector<64x64xf32> to vector<64x32xf32>
      %282 = vector.extract_strided_slice %280 {offsets = [0, 32], sizes = [64, 32], strides = [1, 1]} : vector<64x64xf32> to vector<64x32xf32>
      %283 = vector.shape_cast %281 : vector<64x32xf32> to vector<1x64x32xf32>
      %284 = vector.shape_cast %282 : vector<64x32xf32> to vector<1x64x32xf32>
      %285 = tpu.concatenate %283, %284 in 0 : vector<1x64x32xf32>, vector<1x64x32xf32> -> vector<2x64x32xf32>
      %286 = arith.truncf %285 : vector<2x64x32xf32> to vector<2x64x32xbf16>
      %c0_137 = arith.constant 0 : index
      %c0_138 = arith.constant 0 : index
      %c0_139 = arith.constant 0 : index
      %287 = vector.load %arg35[%c0_137, %c0_138, %c0_139] : memref<2x64x32xbf16, #tpu.memory_space<vmem>>, vector<2x64x32xbf16>
      tpu.vector_store %arg35[%c0_137, %c0_138, %c0_139], %286 {strides = array<i32>} : memref<2x64x32xbf16, #tpu.memory_space<vmem>>, vector<2x64x32xbf16>,
      %c0_140 = arith.constant 0 : index
      %c0_141 = arith.constant 0 : index
      %c0_142 = arith.constant 0 : index
      %288 = vector.load %arg3[%c0_140, %c0_141, %c0_142] : memref<1x16x64xf32, #tpu.memory_space<vmem>>, vector<1x16x64xf32>
      %289 = vector.shape_cast %288 : vector<1x16x64xf32> to vector<16x64xf32>
      %c0_143 = arith.constant 0 : index
      %c0_144 = arith.constant 0 : index
      %290 = vector.load %arg18[%c0_143, %c0_144] : memref<64x64xbf16, #tpu.memory_space<vmem>>, vector<64x64xbf16>
      %291 = arith.truncf %289 : vector<16x64xf32> to vector<16x64xbf16>
      %cst_145 = arith.constant dense<0.000000e+00> : vector<16x64xf32>
      %292 = tpu.matmul %291, %290, %cst_145 {dimension_numbers = #tpu.dot_dimension_numbers<[1], [1], [0], [0], [0, 0, 1, 0], [], []>} : vector<16x64xbf16>, vector<64x64xbf16>, vector<16x64xf32> -> vector<16x64xf32>
      %293 = vector.extract_strided_slice %292 {offsets = [0, 0], sizes = [16, 32], strides = [1, 1]} : vector<16x64xf32> to vector<16x32xf32>
      %294 = vector.extract_strided_slice %292 {offsets = [0, 32], sizes = [16, 32], strides = [1, 1]} : vector<16x64xf32> to vector<16x32xf32>
      %295 = vector.shape_cast %293 : vector<16x32xf32> to vector<1x16x32xf32>
      %296 = vector.shape_cast %294 : vector<16x32xf32> to vector<1x16x32xf32>
      %297 = tpu.concatenate %295, %296 in 0 : vector<1x16x32xf32>, vector<1x16x32xf32> -> vector<2x16x32xf32>
      %298 = arith.truncf %297 : vector<2x16x32xf32> to vector<2x16x32xbf16>
      %c0_146 = arith.constant 0 : index
      %c0_147 = arith.constant 0 : index
      %c0_148 = arith.constant 0 : index
      %299 = vector.load %arg36[%c0_146, %c0_147, %c0_148] : memref<2x16x32xbf16, #tpu.memory_space<vmem>>, vector<2x16x32xbf16>
      tpu.vector_store %arg36[%c0_146, %c0_147, %c0_148], %298 {strides = array<i32>} : memref<2x16x32xbf16, #tpu.memory_space<vmem>>, vector<2x16x32xbf16>,
      %c0_149 = arith.constant 0 : index
      %c0_150 = arith.constant 0 : index
      %300 = vector.load %arg19[%c0_149, %c0_150] : memref<64x64xbf16, #tpu.memory_space<vmem>>, vector<64x64xbf16>
      %301 = arith.truncf %289 : vector<16x64xf32> to vector<16x64xbf16>
      %cst_151 = arith.constant dense<0.000000e+00> : vector<16x64xf32>
      %302 = tpu.matmul %301, %300, %cst_151 {dimension_numbers = #tpu.dot_dimension_numbers<[1], [1], [0], [0], [0, 0, 1, 0], [], []>} : vector<16x64xbf16>, vector<64x64xbf16>, vector<16x64xf32> -> vector<16x64xf32>
      %303 = vector.extract_strided_slice %302 {offsets = [0, 0], sizes = [16, 32], strides = [1, 1]} : vector<16x64xf32> to vector<16x32xf32>
      %304 = vector.extract_strided_slice %302 {offsets = [0, 32], sizes = [16, 32], strides = [1, 1]} : vector<16x64xf32> to vector<16x32xf32>
      %305 = vector.shape_cast %303 : vector<16x32xf32> to vector<1x16x32xf32>
      %306 = vector.shape_cast %304 : vector<16x32xf32> to vector<1x16x32xf32>
      %307 = tpu.concatenate %305, %306 in 0 : vector<1x16x32xf32>, vector<1x16x32xf32> -> vector<2x16x32xf32>
      %308 = arith.truncf %307 : vector<2x16x32xf32> to vector<2x16x32xbf16>
      %c0_152 = arith.constant 0 : index
      %c0_153 = arith.constant 0 : index
      %c0_154 = arith.constant 0 : index
      %309 = vector.load %arg37[%c0_152, %c0_153, %c0_154] : memref<2x16x32xbf16, #tpu.memory_space<vmem>>, vector<2x16x32xbf16>
      tpu.vector_store %arg37[%c0_152, %c0_153, %c0_154], %308 {strides = array<i32>} : memref<2x16x32xbf16, #tpu.memory_space<vmem>>, vector<2x16x32xbf16>,
    } else {
    }
    %c32_i32 = arith.constant 32 : i32
    %3 = arith.muli %arg1, %c32_i32 : i32
    %4 = tpu.assume_multiple %3, 32 : i32
    %c0 = arith.constant 0 : index
    %5 = arith.index_cast %4 : i32 to index
    %c0_1 = arith.constant 0 : index
    %6 = vector.load %arg2[%c0, %5, %c0_1] : memref<1x64x64xf32, #tpu.memory_space<vmem>>, vector<1x32x64xf32>
    %7 = vector.shape_cast %6 : vector<1x32x64xf32> to vector<32x64xf32>
    %8 = arith.index_cast %4 : i32 to index
    %c0_2 = arith.constant 0 : index
    %9 = vector.load %arg33[%8, %c0_2] : memref<64x64xf32, #tpu.memory_space<vmem>>, vector<32x64xf32>
    %c0_3 = arith.constant 0 : index
    %c0_4 = arith.constant 0 : index
    %10 = vector.load %arg8[%c0_3, %c0_4] : memref<1x64xf32, #tpu.memory_space<vmem>>, vector<1x64xf32>
    %c0_5 = arith.constant 0 : index
    %c0_6 = arith.constant 0 : index
    %11 = vector.load %arg9[%c0_5, %c0_6] : memref<1x64xf32, #tpu.memory_space<vmem>>, vector<1x64xf32>
    %cst = arith.constant dense<0.000000e+00> : vector<32xf32>
    %12 = vector.multi_reduction <add>, %9, %cst [1] : vector<32x64xf32> to vector<32xf32>
    %13 = vector.shape_cast %12 : vector<32xf32> to vector<32x1xf32>
    %cst_7 = arith.constant 6.400000e+01 : f32
    %14 = vector.broadcast %cst_7 : f32 to vector<32x1xf32>
    %15 = arith.divf %13, %14 : vector<32x1xf32>
    %16 = vector.broadcast %15 : vector<32x1xf32> to vector<32x64xf32>
    %17 = arith.subf %9, %16 : vector<32x64xf32>
    %18 = vector.broadcast %15 : vector<32x1xf32> to vector<32x64xf32>
    %19 = arith.subf %9, %18 : vector<32x64xf32>
    %20 = arith.mulf %17, %19 : vector<32x64xf32>
    %cst_8 = arith.constant dense<0.000000e+00> : vector<32xf32>
    %21 = vector.multi_reduction <add>, %20, %cst_8 [1] : vector<32x64xf32> to vector<32xf32>
    %22 = vector.shape_cast %21 : vector<32xf32> to vector<32x1xf32>
    %cst_9 = arith.constant 6.400000e+01 : f32
    %23 = vector.broadcast %cst_9 : f32 to vector<32x1xf32>
    %24 = arith.divf %22, %23 : vector<32x1xf32>
    %25 = vector.broadcast %15 : vector<32x1xf32> to vector<32x64xf32>
    %26 = arith.subf %9, %25 : vector<32x64xf32>
    %cst_10 = arith.constant 9.99999974E-6 : f32
    %27 = vector.broadcast %cst_10 : f32 to vector<32x1xf32>
    %28 = arith.addf %24, %27 : vector<32x1xf32>
    %29 = math.rsqrt %28 : vector<32x1xf32>
    %30 = vector.broadcast %29 : vector<32x1xf32> to vector<32x64xf32>
    %31 = arith.mulf %26, %30 : vector<32x64xf32>
    %32 = vector.broadcast %10 : vector<1x64xf32> to vector<32x64xf32>
    %33 = arith.mulf %31, %32 : vector<32x64xf32>
    %34 = vector.broadcast %11 : vector<1x64xf32> to vector<32x64xf32>
    %35 = arith.addf %33, %34 : vector<32x64xf32>
    %c0_11 = arith.constant 0 : index
    %c0_12 = arith.constant 0 : index
    %c0_13 = arith.constant 0 : index
    %36 = vector.load %arg34[%c0_11, %c0_12, %c0_13] : memref<2x64x32xbf16, #tpu.memory_space<vmem>>, vector<2x64x32xbf16>
    %c0_14 = arith.constant 0 : index
    %c0_15 = arith.constant 0 : index
    %c0_16 = arith.constant 0 : index
    %37 = vector.load %arg35[%c0_14, %c0_15, %c0_16] : memref<2x64x32xbf16, #tpu.memory_space<vmem>>, vector<2x64x32xbf16>
    %c0_17 = arith.constant 0 : index
    %c0_18 = arith.constant 0 : index
    %38 = vector.load %arg10[%c0_17, %c0_18] : memref<64x64xbf16, #tpu.memory_space<vmem>>, vector<64x64xbf16>
    %c0_19 = arith.constant 0 : index
    %c0_20 = arith.constant 0 : index
    %c0_21 = arith.constant 0 : index
    %39 = vector.load %arg13[%c0_19, %c0_20, %c0_21] : memref<2x32x64xbf16, #tpu.memory_space<vmem>>, vector<2x32x64xbf16>
    %c0_22 = arith.constant 0 : index
    %c0_23 = arith.constant 0 : index
    %40 = vector.load %arg14[%c0_22, %c0_23] : memref<1x64xf32, #tpu.memory_space<vmem>>, vector<1x64xf32>
    %41 = arith.truncf %35 : vector<32x64xf32> to vector<32x64xbf16>
    %cst_24 = arith.constant dense<0.000000e+00> : vector<32x64xf32>
    %42 = tpu.matmul %41, %38, %cst_24 {dimension_numbers = #tpu.dot_dimension_numbers<[1], [1], [0], [0], [0, 0, 1, 0], [], []>} : vector<32x64xbf16>, vector<64x64xbf16>, vector<32x64xf32> -> vector<32x64xf32>
    %43 = vector.extract_strided_slice %42 {offsets = [0, 0], sizes = [32, 32], strides = [1, 1]} : vector<32x64xf32> to vector<32x32xf32>
    %44 = vector.extract_strided_slice %42 {offsets = [0, 32], sizes = [32, 32], strides = [1, 1]} : vector<32x64xf32> to vector<32x32xf32>
    %45 = vector.shape_cast %43 : vector<32x32xf32> to vector<1x32x32xf32>
    %46 = vector.shape_cast %44 : vector<32x32xf32> to vector<1x32x32xf32>
    %47 = tpu.concatenate %45, %46 in 0 : vector<1x32x32xf32>, vector<1x32x32xf32> -> vector<2x32x32xf32>
    %48 = arith.truncf %47 : vector<2x32x32xf32> to vector<2x32x32xbf16>
    "tpu.trace_start"() <{level = 10 : i32, message = "hqd,hkd->hqk"}> : () -> ()
    %cst_25 = arith.constant dense<0.000000e+00> : vector<2x32x64xf32>
    %49 = tpu.matmul %48, %36, %cst_25 {dimension_numbers = #tpu.dot_dimension_numbers<[2], [2], [1], [1], [0, 0, 0, 1, 1, 1], [0], [0]>} : vector<2x32x32xbf16>, vector<2x64x32xbf16>, vector<2x32x64xf32> -> vector<2x32x64xf32>
    "tpu.trace_stop"() : () -> ()
    %cst_26 = arith.constant 0.176776692 : f32
    %50 = vector.broadcast %cst_26 : f32 to vector<2x32x64xf32>
    %51 = arith.mulf %49, %50 : vector<2x32x64xf32>
    %cst_27 = arith.constant dense<0xFF800000> : vector<2x32xf32>
    %52 = vector.multi_reduction <maximumf>, %51, %cst_27 [2] : vector<2x32x64xf32> to vector<2x32xf32>
    %53 = vector.shape_cast %52 : vector<2x32xf32> to vector<2x32x1xf32>
    %54 = vector.broadcast %53 : vector<2x32x1xf32> to vector<2x32x64xf32>
    %55 = arith.subf %51, %54 : vector<2x32x64xf32>
    %56 = math.exp %55 : vector<2x32x64xf32>
    %cst_28 = arith.constant dense<0.000000e+00> : vector<2x32xf32>
    %57 = vector.multi_reduction <add>, %56, %cst_28 [2] : vector<2x32x64xf32> to vector<2x32xf32>
    %58 = vector.shape_cast %57 : vector<2x32xf32> to vector<2x32x1xf32>
    %59 = arith.truncf %56 : vector<2x32x64xf32> to vector<2x32x64xbf16>
    "tpu.trace_start"() <{level = 10 : i32, message = "hqk,hkd->hqd"}> : () -> ()
    %cst_29 = arith.constant dense<0.000000e+00> : vector<2x32x32xf32>
    %60 = tpu.matmul %59, %37, %cst_29 {dimension_numbers = #tpu.dot_dimension_numbers<[2], [1], [1], [2], [0, 0, 0, 1, 1, 2], [0], [0]>} : vector<2x32x64xbf16>, vector<2x64x32xbf16>, vector<2x32x32xf32> -> vector<2x32x32xf32>
    "tpu.trace_stop"() : () -> ()
    %61 = tpu.reciprocal %58 {approx = true} : vector<2x32x1xf32> -> vector<2x32x1xf32>
    %62 = vector.broadcast %61 : vector<2x32x1xf32> to vector<2x32x32xf32>
    %63 = arith.mulf %60, %62 : vector<2x32x32xf32>
    %64 = arith.truncf %63 : vector<2x32x32xf32> to vector<2x32x32xbf16>
    "tpu.trace_start"() <{level = 10 : i32, message = "hqd,hdc->hqc"}> : () -> ()
    %cst_30 = arith.constant dense<0.000000e+00> : vector<2x32x64xf32>
    %65 = tpu.matmul %64, %39, %cst_30 {dimension_numbers = #tpu.dot_dimension_numbers<[2], [1], [1], [2], [0, 0, 0, 1, 1, 2], [0], [0]>} : vector<2x32x32xbf16>, vector<2x32x64xbf16>, vector<2x32x64xf32> -> vector<2x32x64xf32>
    "tpu.trace_stop"() : () -> ()
    %cst_31 = arith.constant dense<0.000000e+00> : vector<32x64xf32>
    %66 = vector.multi_reduction <add>, %65, %cst_31 [0] : vector<2x32x64xf32> to vector<32x64xf32>
    %67 = vector.broadcast %40 : vector<1x64xf32> to vector<32x64xf32>
    %68 = arith.addf %66, %67 : vector<32x64xf32>
    %69 = arith.addf %68, %9 : vector<32x64xf32>
    %c0_32 = arith.constant 0 : index
    %c0_33 = arith.constant 0 : index
    %70 = vector.load %arg15[%c0_32, %c0_33] : memref<1x64xf32, #tpu.memory_space<vmem>>, vector<1x64xf32>
    %c0_34 = arith.constant 0 : index
    %c0_35 = arith.constant 0 : index
    %71 = vector.load %arg16[%c0_34, %c0_35] : memref<1x64xf32, #tpu.memory_space<vmem>>, vector<1x64xf32>
    %cst_36 = arith.constant dense<0.000000e+00> : vector<32xf32>
    %72 = vector.multi_reduction <add>, %69, %cst_36 [1] : vector<32x64xf32> to vector<32xf32>
    %73 = vector.shape_cast %72 : vector<32xf32> to vector<32x1xf32>
    %cst_37 = arith.constant 6.400000e+01 : f32
    %74 = vector.broadcast %cst_37 : f32 to vector<32x1xf32>
    %75 = arith.divf %73, %74 : vector<32x1xf32>
    %76 = vector.broadcast %75 : vector<32x1xf32> to vector<32x64xf32>
    %77 = arith.subf %69, %76 : vector<32x64xf32>
    %78 = vector.broadcast %75 : vector<32x1xf32> to vector<32x64xf32>
    %79 = arith.subf %69, %78 : vector<32x64xf32>
    %80 = arith.mulf %77, %79 : vector<32x64xf32>
    %cst_38 = arith.constant dense<0.000000e+00> : vector<32xf32>
    %81 = vector.multi_reduction <add>, %80, %cst_38 [1] : vector<32x64xf32> to vector<32xf32>
    %82 = vector.shape_cast %81 : vector<32xf32> to vector<32x1xf32>
    %cst_39 = arith.constant 6.400000e+01 : f32
    %83 = vector.broadcast %cst_39 : f32 to vector<32x1xf32>
    %84 = arith.divf %82, %83 : vector<32x1xf32>
    %85 = vector.broadcast %75 : vector<32x1xf32> to vector<32x64xf32>
    %86 = arith.subf %69, %85 : vector<32x64xf32>
    %cst_40 = arith.constant 9.99999974E-6 : f32
    %87 = vector.broadcast %cst_40 : f32 to vector<32x1xf32>
    %88 = arith.addf %84, %87 : vector<32x1xf32>
    %89 = math.rsqrt %88 : vector<32x1xf32>
    %90 = vector.broadcast %89 : vector<32x1xf32> to vector<32x64xf32>
    %91 = arith.mulf %86, %90 : vector<32x64xf32>
    %92 = vector.broadcast %70 : vector<1x64xf32> to vector<32x64xf32>
    %93 = arith.mulf %91, %92 : vector<32x64xf32>
    %94 = vector.broadcast %71 : vector<1x64xf32> to vector<32x64xf32>
    %95 = arith.addf %93, %94 : vector<32x64xf32>
    %c0_41 = arith.constant 0 : index
    %c0_42 = arith.constant 0 : index
    %c0_43 = arith.constant 0 : index
    %96 = vector.load %arg36[%c0_41, %c0_42, %c0_43] : memref<2x16x32xbf16, #tpu.memory_space<vmem>>, vector<2x16x32xbf16>
    %c0_44 = arith.constant 0 : index
    %c0_45 = arith.constant 0 : index
    %c0_46 = arith.constant 0 : index
    %97 = vector.load %arg37[%c0_44, %c0_45, %c0_46] : memref<2x16x32xbf16, #tpu.memory_space<vmem>>, vector<2x16x32xbf16>
    %c0_47 = arith.constant 0 : index
    %c0_48 = arith.constant 0 : index
    %98 = vector.load %arg17[%c0_47, %c0_48] : memref<64x64xbf16, #tpu.memory_space<vmem>>, vector<64x64xbf16>
    %c0_49 = arith.constant 0 : index
    %c0_50 = arith.constant 0 : index
    %c0_51 = arith.constant 0 : index
    %99 = vector.load %arg20[%c0_49, %c0_50, %c0_51] : memref<2x32x64xbf16, #tpu.memory_space<vmem>>, vector<2x32x64xbf16>
    %c0_52 = arith.constant 0 : index
    %c0_53 = arith.constant 0 : index
    %100 = vector.load %arg21[%c0_52, %c0_53] : memref<1x64xf32, #tpu.memory_space<vmem>>, vector<1x64xf32>
    %101 = arith.truncf %95 : vector<32x64xf32> to vector<32x64xbf16>
    %cst_54 = arith.constant dense<0.000000e+00> : vector<32x64xf32>
    %102 = tpu.matmul %101, %98, %cst_54 {dimension_numbers = #tpu.dot_dimension_numbers<[1], [1], [0], [0], [0, 0, 1, 0], [], []>} : vector<32x64xbf16>, vector<64x64xbf16>, vector<32x64xf32> -> vector<32x64xf32>
    %103 = vector.extract_strided_slice %102 {offsets = [0, 0], sizes = [32, 32], strides = [1, 1]} : vector<32x64xf32> to vector<32x32xf32>
    %104 = vector.extract_strided_slice %102 {offsets = [0, 32], sizes = [32, 32], strides = [1, 1]} : vector<32x64xf32> to vector<32x32xf32>
    %105 = vector.shape_cast %103 : vector<32x32xf32> to vector<1x32x32xf32>
    %106 = vector.shape_cast %104 : vector<32x32xf32> to vector<1x32x32xf32>
    %107 = tpu.concatenate %105, %106 in 0 : vector<1x32x32xf32>, vector<1x32x32xf32> -> vector<2x32x32xf32>
    %108 = arith.truncf %107 : vector<2x32x32xf32> to vector<2x32x32xbf16>
    "tpu.trace_start"() <{level = 10 : i32, message = "hqd,hkd->hqk"}> : () -> ()
    %cst_55 = arith.constant dense<0.000000e+00> : vector<2x32x16xf32>
    %109 = tpu.matmul %108, %96, %cst_55 {dimension_numbers = #tpu.dot_dimension_numbers<[2], [2], [1], [1], [0, 0, 0, 1, 1, 1], [0], [0]>} : vector<2x32x32xbf16>, vector<2x16x32xbf16>, vector<2x32x16xf32> -> vector<2x32x16xf32>
    "tpu.trace_stop"() : () -> ()
    %cst_56 = arith.constant 0.176776692 : f32
    %110 = vector.broadcast %cst_56 : f32 to vector<2x32x16xf32>
    %111 = arith.mulf %109, %110 : vector<2x32x16xf32>
    %cst_57 = arith.constant dense<0xFF800000> : vector<2x32xf32>
    %112 = vector.multi_reduction <maximumf>, %111, %cst_57 [2] : vector<2x32x16xf32> to vector<2x32xf32>
    %113 = vector.shape_cast %112 : vector<2x32xf32> to vector<2x32x1xf32>
    %114 = vector.broadcast %113 : vector<2x32x1xf32> to vector<2x32x16xf32>
    %115 = arith.subf %111, %114 : vector<2x32x16xf32>
    %116 = math.exp %115 : vector<2x32x16xf32>
    %cst_58 = arith.constant dense<0.000000e+00> : vector<2x32xf32>
    %117 = vector.multi_reduction <add>, %116, %cst_58 [2] : vector<2x32x16xf32> to vector<2x32xf32>
    %118 = vector.shape_cast %117 : vector<2x32xf32> to vector<2x32x1xf32>
    %119 = arith.truncf %116 : vector<2x32x16xf32> to vector<2x32x16xbf16>
    "tpu.trace_start"() <{level = 10 : i32, message = "hqk,hkd->hqd"}> : () -> ()
    %cst_59 = arith.constant dense<0.000000e+00> : vector<2x32x32xf32>
    %120 = tpu.matmul %119, %97, %cst_59 {dimension_numbers = #tpu.dot_dimension_numbers<[2], [1], [1], [2], [0, 0, 0, 1, 1, 2], [0], [0]>} : vector<2x32x16xbf16>, vector<2x16x32xbf16>, vector<2x32x32xf32> -> vector<2x32x32xf32>
    "tpu.trace_stop"() : () -> ()
    %121 = tpu.reciprocal %118 {approx = true} : vector<2x32x1xf32> -> vector<2x32x1xf32>
    %122 = vector.broadcast %121 : vector<2x32x1xf32> to vector<2x32x32xf32>
    %123 = arith.mulf %120, %122 : vector<2x32x32xf32>
    %124 = arith.truncf %123 : vector<2x32x32xf32> to vector<2x32x32xbf16>
    "tpu.trace_start"() <{level = 10 : i32, message = "hqd,hdc->hqc"}> : () -> ()
    %cst_60 = arith.constant dense<0.000000e+00> : vector<2x32x64xf32>
    %125 = tpu.matmul %124, %99, %cst_60 {dimension_numbers = #tpu.dot_dimension_numbers<[2], [1], [1], [2], [0, 0, 0, 1, 1, 2], [0], [0]>} : vector<2x32x32xbf16>, vector<2x32x64xbf16>, vector<2x32x64xf32> -> vector<2x32x64xf32>
    "tpu.trace_stop"() : () -> ()
    %cst_61 = arith.constant dense<0.000000e+00> : vector<32x64xf32>
    %126 = vector.multi_reduction <add>, %125, %cst_61 [0] : vector<2x32x64xf32> to vector<32x64xf32>
    %127 = vector.broadcast %100 : vector<1x64xf32> to vector<32x64xf32>
    %128 = arith.addf %126, %127 : vector<32x64xf32>
    %129 = arith.addf %128, %69 : vector<32x64xf32>
    %c0_62 = arith.constant 0 : index
    %c0_63 = arith.constant 0 : index
    %130 = vector.load %arg22[%c0_62, %c0_63] : memref<1x64xf32, #tpu.memory_space<vmem>>, vector<1x64xf32>
    %c0_64 = arith.constant 0 : index
    %c0_65 = arith.constant 0 : index
    %131 = vector.load %arg23[%c0_64, %c0_65] : memref<1x64xf32, #tpu.memory_space<vmem>>, vector<1x64xf32>
    %cst_66 = arith.constant dense<0.000000e+00> : vector<32xf32>
    %132 = vector.multi_reduction <add>, %129, %cst_66 [1] : vector<32x64xf32> to vector<32xf32>
    %133 = vector.shape_cast %132 : vector<32xf32> to vector<32x1xf32>
    %cst_67 = arith.constant 6.400000e+01 : f32
    %134 = vector.broadcast %cst_67 : f32 to vector<32x1xf32>
    %135 = arith.divf %133, %134 : vector<32x1xf32>
    %136 = vector.broadcast %135 : vector<32x1xf32> to vector<32x64xf32>
    %137 = arith.subf %129, %136 : vector<32x64xf32>
    %138 = vector.broadcast %135 : vector<32x1xf32> to vector<32x64xf32>
    %139 = arith.subf %129, %138 : vector<32x64xf32>
    %140 = arith.mulf %137, %139 : vector<32x64xf32>
    %cst_68 = arith.constant dense<0.000000e+00> : vector<32xf32>
    %141 = vector.multi_reduction <add>, %140, %cst_68 [1] : vector<32x64xf32> to vector<32xf32>
    %142 = vector.shape_cast %141 : vector<32xf32> to vector<32x1xf32>
    %cst_69 = arith.constant 6.400000e+01 : f32
    %143 = vector.broadcast %cst_69 : f32 to vector<32x1xf32>
    %144 = arith.divf %142, %143 : vector<32x1xf32>
    %145 = vector.broadcast %135 : vector<32x1xf32> to vector<32x64xf32>
    %146 = arith.subf %129, %145 : vector<32x64xf32>
    %cst_70 = arith.constant 9.99999974E-6 : f32
    %147 = vector.broadcast %cst_70 : f32 to vector<32x1xf32>
    %148 = arith.addf %144, %147 : vector<32x1xf32>
    %149 = math.rsqrt %148 : vector<32x1xf32>
    %150 = vector.broadcast %149 : vector<32x1xf32> to vector<32x64xf32>
    %151 = arith.mulf %146, %150 : vector<32x64xf32>
    %152 = vector.broadcast %130 : vector<1x64xf32> to vector<32x64xf32>
    %153 = arith.mulf %151, %152 : vector<32x64xf32>
    %154 = vector.broadcast %131 : vector<1x64xf32> to vector<32x64xf32>
    %155 = arith.addf %153, %154 : vector<32x64xf32>
    %c0_71 = arith.constant 0 : index
    %c0_72 = arith.constant 0 : index
    %156 = vector.load %arg24[%c0_71, %c0_72] : memref<256x64xbf16, #tpu.memory_space<vmem>>, vector<256x64xbf16>
    %c0_73 = arith.constant 0 : index
    %c0_74 = arith.constant 0 : index
    %157 = vector.load %arg25[%c0_73, %c0_74] : memref<1x256xf32, #tpu.memory_space<vmem>>, vector<1x256xf32>
    %158 = arith.truncf %155 : vector<32x64xf32> to vector<32x64xbf16>
    %cst_75 = arith.constant dense<0.000000e+00> : vector<32x256xf32>
    %159 = tpu.matmul %158, %156, %cst_75 {dimension_numbers = #tpu.dot_dimension_numbers<[1], [1], [0], [0], [0, 0, 1, 0], [], []>} : vector<32x64xbf16>, vector<256x64xbf16>, vector<32x256xf32> -> vector<32x256xf32>
    %160 = vector.broadcast %157 : vector<1x256xf32> to vector<32x256xf32>
    %161 = arith.addf %159, %160 : vector<32x256xf32>
    %c0_76 = arith.constant 0 : index
    %c0_77 = arith.constant 0 : index
    %162 = vector.load %arg26[%c0_76, %c0_77] : memref<256x64xbf16, #tpu.memory_space<vmem>>, vector<256x64xbf16>
    %c0_78 = arith.constant 0 : index
    %c0_79 = arith.constant 0 : index
    %163 = vector.load %arg27[%c0_78, %c0_79] : memref<1x256xf32, #tpu.memory_space<vmem>>, vector<1x256xf32>
    %164 = arith.truncf %155 : vector<32x64xf32> to vector<32x64xbf16>
    %cst_80 = arith.constant dense<0.000000e+00> : vector<32x256xf32>
    %165 = tpu.matmul %164, %162, %cst_80 {dimension_numbers = #tpu.dot_dimension_numbers<[1], [1], [0], [0], [0, 0, 1, 0], [], []>} : vector<32x64xbf16>, vector<256x64xbf16>, vector<32x256xf32> -> vector<32x256xf32>
    %166 = vector.broadcast %163 : vector<1x256xf32> to vector<32x256xf32>
    %167 = arith.addf %165, %166 : vector<32x256xf32>
    %168 = arith.negf %167 : vector<32x256xf32>
    %169 = math.exp %168 : vector<32x256xf32>
    %cst_81 = arith.constant 1.000000e+00 : f32
    %170 = vector.broadcast %cst_81 : f32 to vector<32x256xf32>
    %171 = arith.addf %170, %169 : vector<32x256xf32>
    %172 = arith.divf %170, %171 : vector<32x256xf32>
    %173 = arith.mulf %167, %172 : vector<32x256xf32>
    %174 = arith.mulf %161, %173 : vector<32x256xf32>
    %c0_82 = arith.constant 0 : index
    %c0_83 = arith.constant 0 : index
    %175 = vector.load %arg28[%c0_82, %c0_83] : memref<64x256xbf16, #tpu.memory_space<vmem>>, vector<64x256xbf16>
    %c0_84 = arith.constant 0 : index
    %c0_85 = arith.constant 0 : index
    %176 = vector.load %arg29[%c0_84, %c0_85] : memref<1x64xf32, #tpu.memory_space<vmem>>, vector<1x64xf32>
    %177 = arith.truncf %174 : vector<32x256xf32> to vector<32x256xbf16>
    %cst_86 = arith.constant dense<0.000000e+00> : vector<32x64xf32>
    %178 = tpu.matmul %177, %175, %cst_86 {dimension_numbers = #tpu.dot_dimension_numbers<[1], [1], [0], [0], [0, 0, 1, 0], [], []>} : vector<32x256xbf16>, vector<64x256xbf16>, vector<32x64xf32> -> vector<32x64xf32>
    %179 = vector.broadcast %176 : vector<1x64xf32> to vector<32x64xf32>
    %180 = arith.addf %178, %179 : vector<32x64xf32>
    %181 = arith.addf %180, %129 : vector<32x64xf32>
    %c0_87 = arith.constant 0 : index
    %c0_88 = arith.constant 0 : index
    %182 = vector.load %arg30[%c0_87, %c0_88] : memref<64x64xbf16, #tpu.memory_space<vmem>>, vector<64x64xbf16>
    %c0_89 = arith.constant 0 : index
    %c0_90 = arith.constant 0 : index
    %183 = vector.load %arg31[%c0_89, %c0_90] : memref<1x64xf32, #tpu.memory_space<vmem>>, vector<1x64xf32>
    %184 = arith.truncf %181 : vector<32x64xf32> to vector<32x64xbf16>
    %cst_91 = arith.constant dense<0.000000e+00> : vector<32x64xf32>
    %185 = tpu.matmul %184, %182, %cst_91 {dimension_numbers = #tpu.dot_dimension_numbers<[1], [1], [0], [0], [0, 0, 1, 0], [], []>} : vector<32x64xbf16>, vector<64x64xbf16>, vector<32x64xf32> -> vector<32x64xf32>
    %186 = vector.broadcast %183 : vector<1x64xf32> to vector<32x64xf32>
    %187 = arith.addf %185, %186 : vector<32x64xf32>
    %188 = arith.addf %187, %7 : vector<32x64xf32>
    %c0_92 = arith.constant 0 : index
    %c0_93 = arith.constant 0 : index
    %c0_94 = arith.constant 0 : index
    %189 = vector.load %arg32[%c0_92, %c0_93, %c0_94] : memref<1x32x64xf32, #tpu.memory_space<vmem>>, vector<1x32x64xf32>
    %190 = vector.shape_cast %189 : vector<1x32x64xf32> to vector<32x64xf32>
    %191 = vector.shape_cast %188 : vector<32x64xf32> to vector<1x32x64xf32>
    tpu.vector_store %arg32[%c0_92, %c0_93, %c0_94], %191 {strides = array<i32>} : memref<1x32x64xf32, #tpu.memory_space<vmem>>, vector<1x32x64xf32>,
    return
  }
  func.func @transform_0(%arg0: i32, %arg1: i32) -> (i32, i32, i32) {
    %c0_i32 = arith.constant 0 : i32
    %c0_i32_0 = arith.constant 0 : i32
    %c0_i32_1 = arith.constant 0 : i32
    return %arg0, %c0_i32, %c0_i32_0 : i32, i32, i32
  }
  func.func @transform_1(%arg0: i32, %arg1: i32) -> (i32, i32, i32) {
    %c0_i32 = arith.constant 0 : i32
    %c0_i32_0 = arith.constant 0 : i32
    %c0_i32_1 = arith.constant 0 : i32
    return %arg0, %c0_i32, %c0_i32_0 : i32, i32, i32
  }
  func.func @transform_2(%arg0: i32, %arg1: i32) -> (i32, i32) {
    %c0_i32 = arith.constant 0 : i32
    %c0_i32_0 = arith.constant 0 : i32
    %c0_i32_1 = arith.constant 0 : i32
    return %c0_i32, %c0_i32_0 : i32, i32
  }
  func.func @transform_3(%arg0: i32, %arg1: i32) -> (i32, i32) {
    %c0_i32 = arith.constant 0 : i32
    %c0_i32_0 = arith.constant 0 : i32
    %c0_i32_1 = arith.constant 0 : i32
    return %c0_i32, %c0_i32_0 : i32, i32
  }
  func.func @transform_4(%arg0: i32, %arg1: i32) -> (i32, i32) {
    %c0_i32 = arith.constant 0 : i32
    %c0_i32_0 = arith.constant 0 : i32
    %c0_i32_1 = arith.constant 0 : i32
    return %c0_i32, %c0_i32_0 : i32, i32
  }
  func.func @transform_5(%arg0: i32, %arg1: i32) -> (i32, i32) {
    %c0_i32 = arith.constant 0 : i32
    %c0_i32_0 = arith.constant 0 : i32
    %c0_i32_1 = arith.constant 0 : i32
    return %c0_i32, %c0_i32_0 : i32, i32
  }
  func.func @transform_6(%arg0: i32, %arg1: i32) -> (i32, i32) {
    %c0_i32 = arith.constant 0 : i32
    %c0_i32_0 = arith.constant 0 : i32
    %c0_i32_1 = arith.constant 0 : i32
    return %c0_i32, %c0_i32_0 : i32, i32
  }
  func.func @transform_7(%arg0: i32, %arg1: i32) -> (i32, i32) {
    %c0_i32 = arith.constant 0 : i32
    %c0_i32_0 = arith.constant 0 : i32
    %c0_i32_1 = arith.constant 0 : i32
    return %c0_i32, %c0_i32_0 : i32, i32
  }
  func.func @transform_8(%arg0: i32, %arg1: i32) -> (i32, i32) {
    %c0_i32 = arith.constant 0 : i32
    %c0_i32_0 = arith.constant 0 : i32
    %c0_i32_1 = arith.constant 0 : i32
    return %c0_i32, %c0_i32_0 : i32, i32
  }
  func.func @transform_9(%arg0: i32, %arg1: i32) -> (i32, i32) {
    %c0_i32 = arith.constant 0 : i32
    %c0_i32_0 = arith.constant 0 : i32
    %c0_i32_1 = arith.constant 0 : i32
    return %c0_i32, %c0_i32_0 : i32, i32
  }
  func.func @transform_10(%arg0: i32, %arg1: i32) -> (i32, i32) {
    %c0_i32 = arith.constant 0 : i32
    %c0_i32_0 = arith.constant 0 : i32
    %c0_i32_1 = arith.constant 0 : i32
    return %c0_i32, %c0_i32_0 : i32, i32
  }
  func.func @transform_11(%arg0: i32, %arg1: i32) -> (i32, i32, i32) {
    %c0_i32 = arith.constant 0 : i32
    %c0_i32_0 = arith.constant 0 : i32
    %c0_i32_1 = arith.constant 0 : i32
    %c0_i32_2 = arith.constant 0 : i32
    return %c0_i32, %c0_i32_0, %c0_i32_1 : i32, i32, i32
  }
  func.func @transform_12(%arg0: i32, %arg1: i32) -> (i32, i32) {
    %c0_i32 = arith.constant 0 : i32
    %c0_i32_0 = arith.constant 0 : i32
    %c0_i32_1 = arith.constant 0 : i32
    return %c0_i32, %c0_i32_0 : i32, i32
  }
  func.func @transform_13(%arg0: i32, %arg1: i32) -> (i32, i32) {
    %c0_i32 = arith.constant 0 : i32
    %c0_i32_0 = arith.constant 0 : i32
    %c0_i32_1 = arith.constant 0 : i32
    return %c0_i32, %c0_i32_0 : i32, i32
  }
  func.func @transform_14(%arg0: i32, %arg1: i32) -> (i32, i32) {
    %c0_i32 = arith.constant 0 : i32
    %c0_i32_0 = arith.constant 0 : i32
    %c0_i32_1 = arith.constant 0 : i32
    return %c0_i32, %c0_i32_0 : i32, i32
  }
  func.func @transform_15(%arg0: i32, %arg1: i32) -> (i32, i32) {
    %c0_i32 = arith.constant 0 : i32
    %c0_i32_0 = arith.constant 0 : i32
    %c0_i32_1 = arith.constant 0 : i32
    return %c0_i32, %c0_i32_0 : i32, i32
  }
  func.func @transform_16(%arg0: i32, %arg1: i32) -> (i32, i32) {
    %c0_i32 = arith.constant 0 : i32
    %c0_i32_0 = arith.constant 0 : i32
    %c0_i32_1 = arith.constant 0 : i32
    return %c0_i32, %c0_i32_0 : i32, i32
  }
  func.func @transform_17(%arg0: i32, %arg1: i32) -> (i32, i32) {
    %c0_i32 = arith.constant 0 : i32
    %c0_i32_0 = arith.constant 0 : i32
    %c0_i32_1 = arith.constant 0 : i32
    return %c0_i32, %c0_i32_0 : i32, i32
  }
  func.func @transform_18(%arg0: i32, %arg1: i32) -> (i32, i32, i32) {
    %c0_i32 = arith.constant 0 : i32
    %c0_i32_0 = arith.constant 0 : i32
    %c0_i32_1 = arith.constant 0 : i32
    %c0_i32_2 = arith.constant 0 : i32
    return %c0_i32, %c0_i32_0, %c0_i32_1 : i32, i32, i32
  }
  func.func @transform_19(%arg0: i32, %arg1: i32) -> (i32, i32) {
    %c0_i32 = arith.constant 0 : i32
    %c0_i32_0 = arith.constant 0 : i32
    %c0_i32_1 = arith.constant 0 : i32
    return %c0_i32, %c0_i32_0 : i32, i32
  }
  func.func @transform_20(%arg0: i32, %arg1: i32) -> (i32, i32) {
    %c0_i32 = arith.constant 0 : i32
    %c0_i32_0 = arith.constant 0 : i32
    %c0_i32_1 = arith.constant 0 : i32
    return %c0_i32, %c0_i32_0 : i32, i32
  }
  func.func @transform_21(%arg0: i32, %arg1: i32) -> (i32, i32) {
    %c0_i32 = arith.constant 0 : i32
    %c0_i32_0 = arith.constant 0 : i32
    %c0_i32_1 = arith.constant 0 : i32
    return %c0_i32, %c0_i32_0 : i32, i32
  }
  func.func @transform_22(%arg0: i32, %arg1: i32) -> (i32, i32) {
    %c0_i32 = arith.constant 0 : i32
    %c0_i32_0 = arith.constant 0 : i32
    %c0_i32_1 = arith.constant 0 : i32
    return %c0_i32, %c0_i32_0 : i32, i32
  }
  func.func @transform_23(%arg0: i32, %arg1: i32) -> (i32, i32) {
    %c0_i32 = arith.constant 0 : i32
    %c0_i32_0 = arith.constant 0 : i32
    %c0_i32_1 = arith.constant 0 : i32
    return %c0_i32, %c0_i32_0 : i32, i32
  }
  func.func @transform_24(%arg0: i32, %arg1: i32) -> (i32, i32) {
    %c0_i32 = arith.constant 0 : i32
    %c0_i32_0 = arith.constant 0 : i32
    %c0_i32_1 = arith.constant 0 : i32
    return %c0_i32, %c0_i32_0 : i32, i32
  }
  func.func @transform_25(%arg0: i32, %arg1: i32) -> (i32, i32) {
    %c0_i32 = arith.constant 0 : i32
    %c0_i32_0 = arith.constant 0 : i32
    %c0_i32_1 = arith.constant 0 : i32
    return %c0_i32, %c0_i32_0 : i32, i32
  }
  func.func @transform_26(%arg0: i32, %arg1: i32) -> (i32, i32) {
    %c0_i32 = arith.constant 0 : i32
    %c0_i32_0 = arith.constant 0 : i32
    %c0_i32_1 = arith.constant 0 : i32
    return %c0_i32, %c0_i32_0 : i32, i32
  }
  func.func @transform_27(%arg0: i32, %arg1: i32) -> (i32, i32) {
    %c0_i32 = arith.constant 0 : i32
    %c0_i32_0 = arith.constant 0 : i32
    %c0_i32_1 = arith.constant 0 : i32
    return %c0_i32, %c0_i32_0 : i32, i32
  }
  func.func @transform_28(%arg0: i32, %arg1: i32) -> (i32, i32) {
    %c0_i32 = arith.constant 0 : i32
    %c0_i32_0 = arith.constant 0 : i32
    %c0_i32_1 = arith.constant 0 : i32
    return %c0_i32, %c0_i32_0 : i32, i32
  }
  func.func @transform_29(%arg0: i32, %arg1: i32) -> (i32, i32) {
    %c0_i32 = arith.constant 0 : i32
    %c0_i32_0 = arith.constant 0 : i32
    %c0_i32_1 = arith.constant 0 : i32
    return %c0_i32, %c0_i32_0 : i32, i32
  }
  func.func @transform_30(%arg0: i32, %arg1: i32) -> (i32, i32, i32) {
    %c0_i32 = arith.constant 0 : i32
    %c0_i32_0 = arith.constant 0 : i32
    return %arg0, %arg1, %c0_i32 : i32, i32, i32
  }
}

module attributes {stable_mosaic.version = 11 : i64} {
  func.func @_unet_attn_block_kernel(%arg0: i32, %arg1: i32, %arg2: memref<1x64x64xf32, #tpu.memory_space<vmem>>, %arg3: memref<1x16x64xf32, #tpu.memory_space<vmem>>, %arg4: memref<1x64xf32, #tpu.memory_space<vmem>>, %arg5: memref<1x64xf32, #tpu.memory_space<vmem>>, %arg6: memref<64x64xbf16, #tpu.memory_space<vmem>>, %arg7: memref<1x64xf32, #tpu.memory_space<vmem>>, %arg8: memref<1x64xf32, #tpu.memory_space<vmem>>, %arg9: memref<1x64xf32, #tpu.memory_space<vmem>>, %arg10: memref<64x64xbf16, #tpu.memory_space<vmem>>, %arg11: memref<64x64xbf16, #tpu.memory_space<vmem>>, %arg12: memref<64x64xbf16, #tpu.memory_space<vmem>>, %arg13: memref<2x32x64xbf16, #tpu.memory_space<vmem>>, %arg14: memref<1x64xf32, #tpu.memory_space<vmem>>, %arg15: memref<1x64xf32, #tpu.memory_space<vmem>>, %arg16: memref<1x64xf32, #tpu.memory_space<vmem>>, %arg17: memref<64x64xbf16, #tpu.memory_space<vmem>>, %arg18: memref<64x64xbf16, #tpu.memory_space<vmem>>, %arg19: memref<64x64xbf16, #tpu.memory_space<vmem>>, %arg20: memref<2x32x64xbf16, #tpu.memory_space<vmem>>, %arg21: memref<1x64xf32, #tpu.memory_space<vmem>>, %arg22: memref<1x64xf32, #tpu.memory_space<vmem>>, %arg23: memref<1x64xf32, #tpu.memory_space<vmem>>, %arg24: memref<256x64xbf16, #tpu.memory_space<vmem>>, %arg25: memref<1x256xf32, #tpu.memory_space<vmem>>, %arg26: memref<256x64xbf16, #tpu.memory_space<vmem>>, %arg27: memref<1x256xf32, #tpu.memory_space<vmem>>, %arg28: memref<64x256xbf16, #tpu.memory_space<vmem>>, %arg29: memref<1x64xf32, #tpu.memory_space<vmem>>, %arg30: memref<64x64xbf16, #tpu.memory_space<vmem>>, %arg31: memref<1x64xf32, #tpu.memory_space<vmem>>, %arg32: memref<1x32x64xf32, #tpu.memory_space<vmem>>, %arg33: memref<64x64xf32, #tpu.memory_space<vmem>>, %arg34: memref<2x64x32xbf16, #tpu.memory_space<vmem>>, %arg35: memref<2x64x32xbf16, #tpu.memory_space<vmem>>, %arg36: memref<2x16x32xbf16, #tpu.memory_space<vmem>>, %arg37: memref<2x16x32xbf16, #tpu.memory_space<vmem>>) attributes {dimension_semantics = [#tpu.dimension_semantics<parallel>, #tpu.dimension_semantics<arbitrary>], iteration_bounds = array<i64: 2, 2>, scalar_prefetch = 0 : i64, scratch_operands = 5 : i64, tpu.core_type = #tpu.core_type<tc>, window_params = [{transform_indices = @transform_0, window_bounds = array<i64: 1, 64, 64>}, {transform_indices = @transform_1, window_bounds = array<i64: 1, 16, 64>}, {pipeline_mode = #tpu.pipeline_mode<synchronous>, transform_indices = @transform_2, window_bounds = array<i64: 1, 64>}, {pipeline_mode = #tpu.pipeline_mode<synchronous>, transform_indices = @transform_3, window_bounds = array<i64: 1, 64>}, {pipeline_mode = #tpu.pipeline_mode<synchronous>, transform_indices = @transform_4, window_bounds = array<i64: 64, 64>}, {pipeline_mode = #tpu.pipeline_mode<synchronous>, transform_indices = @transform_5, window_bounds = array<i64: 1, 64>}, {pipeline_mode = #tpu.pipeline_mode<synchronous>, transform_indices = @transform_6, window_bounds = array<i64: 1, 64>}, {pipeline_mode = #tpu.pipeline_mode<synchronous>, transform_indices = @transform_7, window_bounds = array<i64: 1, 64>}, {pipeline_mode = #tpu.pipeline_mode<synchronous>, transform_indices = @transform_8, window_bounds = array<i64: 64, 64>}, {pipeline_mode = #tpu.pipeline_mode<synchronous>, transform_indices = @transform_9, window_bounds = array<i64: 64, 64>}, {pipeline_mode = #tpu.pipeline_mode<synchronous>, transform_indices = @transform_10, window_bounds = array<i64: 64, 64>}, {pipeline_mode = #tpu.pipeline_mode<synchronous>, transform_indices = @transform_11, window_bounds = array<i64: 2, 32, 64>}, {pipeline_mode = #tpu.pipeline_mode<synchronous>, transform_indices = @transform_12, window_bounds = array<i64: 1, 64>}, {pipeline_mode = #tpu.pipeline_mode<synchronous>, transform_indices = @transform_13, window_bounds = array<i64: 1, 64>}, {pipeline_mode = #tpu.pipeline_mode<synchronous>, transform_indices = @transform_14, window_bounds = array<i64: 1, 64>}, {pipeline_mode = #tpu.pipeline_mode<synchronous>, transform_indices = @transform_15, window_bounds = array<i64: 64, 64>}, {pipeline_mode = #tpu.pipeline_mode<synchronous>, transform_indices = @transform_16, window_bounds = array<i64: 64, 64>}, {pipeline_mode = #tpu.pipeline_mode<synchronous>, transform_indices = @transform_17, window_bounds = array<i64: 64, 64>}, {pipeline_mode = #tpu.pipeline_mode<synchronous>, transform_indices = @transform_18, window_bounds = array<i64: 2, 32, 64>}, {pipeline_mode = #tpu.pipeline_mode<synchronous>, transform_indices = @transform_19, window_bounds = array<i64: 1, 64>}, {pipeline_mode = #tpu.pipeline_mode<synchronous>, transform_indices = @transform_20, window_bounds = array<i64: 1, 64>}, {pipeline_mode = #tpu.pipeline_mode<synchronous>, transform_indices = @transform_21, window_bounds = array<i64: 1, 64>}, {pipeline_mode = #tpu.pipeline_mode<synchronous>, transform_indices = @transform_22, window_bounds = array<i64: 256, 64>}, {pipeline_mode = #tpu.pipeline_mode<synchronous>, transform_indices = @transform_23, window_bounds = array<i64: 1, 256>}, {pipeline_mode = #tpu.pipeline_mode<synchronous>, transform_indices = @transform_24, window_bounds = array<i64: 256, 64>}, {pipeline_mode = #tpu.pipeline_mode<synchronous>, transform_indices = @transform_25, window_bounds = array<i64: 1, 256>}, {pipeline_mode = #tpu.pipeline_mode<synchronous>, transform_indices = @transform_26, window_bounds = array<i64: 64, 256>}, {pipeline_mode = #tpu.pipeline_mode<synchronous>, transform_indices = @transform_27, window_bounds = array<i64: 1, 64>}, {pipeline_mode = #tpu.pipeline_mode<synchronous>, transform_indices = @transform_28, window_bounds = array<i64: 64, 64>}, {pipeline_mode = #tpu.pipeline_mode<synchronous>, transform_indices = @transform_29, window_bounds = array<i64: 1, 64>}, {transform_indices = @transform_30, window_bounds = array<i64: 1, 32, 64>}]} {
    %c0_i32 = arith.constant 0 : i32
    %0 = arith.cmpi eq, %arg1, %c0_i32 : i32
    %1 = arith.extui %0 : i1 to i32
    %c0_i32_0 = arith.constant 0 : i32
    %2 = arith.cmpi ne, %1, %c0_i32_0 : i32
    scf.if %2 {
      %c0_95 = arith.constant 0 : index
      %c0_96 = arith.constant 0 : index
      %c0_97 = arith.constant 0 : index
      %192 = vector.load %arg2[%c0_95, %c0_96, %c0_97] : memref<1x64x64xf32, #tpu.memory_space<vmem>>, vector<1x64x64xf32>
      %193 = vector.shape_cast %192 : vector<1x64x64xf32> to vector<64x64xf32>
      %194 = tpu.iota {dimensions = array<i32: 0>} : vector<64x32xi32>
      %195 = tpu.iota {dimensions = array<i32: 1>} : vector<64x32xi32>
      %c2_i32 = arith.constant 2 : i32
      %196 = vector.broadcast %c2_i32 : i32 to vector<64x32xi32>
      %197 = arith.muli %195, %196 : vector<64x32xi32>
      %198 = arith.cmpi sge, %194, %197 : vector<64x32xi32>
      %c1_i32 = arith.constant 1 : i32
      %199 = vector.broadcast %c1_i32 : i32 to vector<64x32xi32>
      %200 = arith.addi %195, %199 : vector<64x32xi32>
      %c2_i32_98 = arith.constant 2 : i32
      %201 = vector.broadcast %c2_i32_98 : i32 to vector<64x32xi32>
      %202 = arith.muli %200, %201 : vector<64x32xi32>
      %203 = arith.cmpi slt, %194, %202 : vector<64x32xi32>
      %204 = arith.andi %198, %203 : vector<64x32xi1>
      %205 = arith.extui %204 : vector<64x32xi1> to vector<64x32xi32>
      %206 = arith.sitofp %205 : vector<64x32xi32> to vector<64x32xf32>
      %cst_99 = arith.constant dense<0.000000e+00> : vector<64xf32>
      %207 = vector.multi_reduction <add>, %193, %cst_99 [0] : vector<64x64xf32> to vector<64xf32>
      %208 = vector.shape_cast %207 : vector<64xf32> to vector<1x64xf32>
      %209 = arith.mulf %193, %193 : vector<64x64xf32>
      %cst_100 = arith.constant dense<0.000000e+00> : vector<64xf32>
      %210 = vector.multi_reduction <add>, %209, %cst_100 [0] : vector<64x64xf32> to vector<64xf32>
      %211 = vector.shape_cast %210 : vector<64xf32> to vector<1x64xf32>
      %cst_101 = arith.constant dense<0.000000e+00> : vector<1x32xf32>
      %212 = tpu.matmul %208, %206, %cst_101 {dimension_numbers = #tpu.dot_dimension_numbers<[1], [0], [0], [1], [0, 0, 1, 1], [], []>, precision = #tpu.contract_precision<fp32>} : vector<1x64xf32>, vector<64x32xf32>, vector<1x32xf32> -> vector<1x32xf32>
      %cst_102 = arith.constant 7.812500e-03 : f32
      %213 = vector.broadcast %cst_102 : f32 to vector<1x32xf32>
      %214 = arith.mulf %212, %213 : vector<1x32xf32>
      %cst_103 = arith.constant dense<0.000000e+00> : vector<1x32xf32>
      %215 = tpu.matmul %211, %206, %cst_103 {dimension_numbers = #tpu.dot_dimension_numbers<[1], [0], [0], [1], [0, 0, 1, 1], [], []>, precision = #tpu.contract_precision<fp32>} : vector<1x64xf32>, vector<64x32xf32>, vector<1x32xf32> -> vector<1x32xf32>
      %cst_104 = arith.constant 7.812500e-03 : f32
      %216 = vector.broadcast %cst_104 : f32 to vector<1x32xf32>
      %217 = arith.mulf %215, %216 : vector<1x32xf32>
      %218 = arith.mulf %214, %214 : vector<1x32xf32>
      %219 = arith.subf %217, %218 : vector<1x32xf32>
      %cst_105 = arith.constant 9.99999997E-7 : f32
      %220 = vector.broadcast %cst_105 : f32 to vector<1x32xf32>
      %221 = arith.addf %219, %220 : vector<1x32xf32>
      %222 = math.rsqrt %221 : vector<1x32xf32>
      %cst_106 = arith.constant dense<0.000000e+00> : vector<1x64xf32>
      %223 = tpu.matmul %214, %206, %cst_106 {dimension_numbers = #tpu.dot_dimension_numbers<[1], [1], [0], [0], [0, 0, 1, 0], [], []>, precision = #tpu.contract_precision<fp32>} : vector<1x32xf32>, vector<64x32xf32>, vector<1x64xf32> -> vector<1x64xf32>
      %cst_107 = arith.constant dense<0.000000e+00> : vector<1x64xf32>
      %224 = tpu.matmul %222, %206, %cst_107 {dimension_numbers = #tpu.dot_dimension_numbers<[1], [1], [0], [0], [0, 0, 1, 0], [], []>, precision = #tpu.contract_precision<fp32>} : vector<1x32xf32>, vector<64x32xf32>, vector<1x64xf32> -> vector<1x64xf32>
      %225 = vector.broadcast %223 : vector<1x64xf32> to vector<64x64xf32>
      %226 = arith.subf %193, %225 : vector<64x64xf32>
      %227 = vector.broadcast %224 : vector<1x64xf32> to vector<64x64xf32>
      %228 = arith.mulf %226, %227 : vector<64x64xf32>
      %c0_108 = arith.constant 0 : index
      %c0_109 = arith.constant 0 : index
      %229 = vector.load %arg4[%c0_108, %c0_109] : memref<1x64xf32, #tpu.memory_space<vmem>>, vector<1x64xf32>
      %230 = vector.broadcast %229 : vector<1x64xf32> to vector<64x64xf32>
      %231 = arith.mulf %228, %230 : vector<64x64xf32>
      %c0_110 = arith.constant 0 : index
      %c0_111 = arith.constant 0 : index
      %232 = vector.load %arg5[%c0_110, %c0_111] : memref<1x64xf32, #tpu.memory_space<vmem>>, vector<1x64xf32>
      %233 = vector.broadcast %232 : vector<1x64xf32> to vector<64x64xf32>
      %234 = arith.addf %231, %233 : vector<64x64xf32>
      %c0_112 = arith.constant 0 : index
      %c0_113 = arith.constant 0 : index
      %235 = vector.load %arg6[%c0_112, %c0_113] : memref<64x64xbf16, #tpu.memory_space<vmem>>, vector<64x64xbf16>
      %c0_114 = arith.constant 0 : index
      %c0_115 = arith.constant 0 : index
      %236 = vector.load %arg7[%c0_114, %c0_115] : memref<1x64xf32, #tpu.memory_space<vmem>>, vector<1x64xf32>
      %237 = arith.truncf %234 : vector<64x64xf32> to vector<64x64xbf16>
      %cst_116 = arith.constant dense<0.000000e+00> : vector<64x64xf32>
      %238 = tpu.matmul %237, %235, %cst_116 {dimension_numbers = #tpu.dot_dimension_numbers<[1], [1], [0], [0], [0, 0, 1, 0], [], []>} : vector<64x64xbf16>, vector<64x64xbf16>, vector<64x64xf32> -> vector<64x64xf32>
      %239 = vector.broadcast %236 : vector<1x64xf32> to vector<64x64xf32>
      %240 = arith.addf %238, %239 : vector<64x64xf32>
      %c0_117 = arith.constant 0 : index
      %c0_118 = arith.constant 0 : index
      %241 = vector.load %arg33[%c0_117, %c0_118] : memref<64x64xf32, #tpu.memory_space<vmem>>, vector<64x64xf32>
      tpu.vector_store %arg33[%c0_117, %c0_118], %240 {strides = array<i32>} : memref<64x64xf32, #tpu.memory_space<vmem>>, vector<64x64xf32>,
      %c0_119 = arith.constant 0 : index
      %c0_120 = arith.constant 0 : index
      %242 = vector.load %arg8[%c0_119, %c0_120] : memref<1x64xf32, #tpu.memory_space<vmem>>, vector<1x64xf32>
      %c0_121 = arith.constant 0 : index
      %c0_122 = arith.constant 0 : index
      %243 = vector.load %arg9[%c0_121, %c0_122] : memref<1x64xf32, #tpu.memory_space<vmem>>, vector<1x64xf32>
      %cst_123 = arith.constant dense<0.000000e+00> : vector<64xf32>
      %244 = vector.multi_reduction <add>, %240, %cst_123 [1] : vector<64x64xf32> to vector<64xf32>
      %245 = vector.shape_cast %244 : vector<64xf32> to vector<64x1xf32>
      %cst_124 = arith.constant 6.400000e+01 : f32
      %246 = vector.broadcast %cst_124 : f32 to vector<64x1xf32>
      %247 = arith.divf %245, %246 : vector<64x1xf32>
      %248 = vector.broadcast %247 : vector<64x1xf32> to vector<64x64xf32>
      %249 = arith.subf %240, %248 : vector<64x64xf32>
      %250 = vector.broadcast %247 : vector<64x1xf32> to vector<64x64xf32>
      %251 = arith.subf %240, %250 : vector<64x64xf32>
      %252 = arith.mulf %249, %251 : vector<64x64xf32>
      %cst_125 = arith.constant dense<0.000000e+00> : vector<64xf32>
      %253 = vector.multi_reduction <add>, %252, %cst_125 [1] : vector<64x64xf32> to vector<64xf32>
      %254 = vector.shape_cast %253 : vector<64xf32> to vector<64x1xf32>
      %cst_126 = arith.constant 6.400000e+01 : f32
      %255 = vector.broadcast %cst_126 : f32 to vector<64x1xf32>
      %256 = arith.divf %254, %255 : vector<64x1xf32>
      %257 = vector.broadcast %247 : vector<64x1xf32> to vector<64x64xf32>
      %258 = arith.subf %240, %257 : vector<64x64xf32>
      %cst_127 = arith.constant 9.99999974E-6 : f32
      %259 = vector.broadcast %cst_127 : f32 to vector<64x1xf32>
      %260 = arith.addf %256, %259 : vector<64x1xf32>
      %261 = math.rsqrt %260 : vector<64x1xf32>
      %262 = vector.broadcast %261 : vector<64x1xf32> to vector<64x64xf32>
      %263 = arith.mulf %258, %262 : vector<64x64xf32>
      %264 = vector.broadcast %242 : vector<1x64xf32> to vector<64x64xf32>
      %265 = arith.mulf %263, %264 : vector<64x64xf32>
      %266 = vector.broadcast %243 : vector<1x64xf32> to vector<64x64xf32>
      %267 = arith.addf %265, %266 : vector<64x64xf32>
      %c0_128 = arith.constant 0 : index
      %c0_129 = arith.constant 0 : index
      %268 = vector.load %arg11[%c0_128, %c0_129] : memref<64x64xbf16, #tpu.memory_space<vmem>>, vector<64x64xbf16>
      %269 = arith.truncf %267 : vector<64x64xf32> to vector<64x64xbf16>
      %cst_130 = arith.constant dense<0.000000e+00> : vector<64x64xf32>
      %270 = tpu.matmul %269, %268, %cst_130 {dimension_numbers = #tpu.dot_dimension_numbers<[1], [1], [0], [0], [0, 0, 1, 0], [], []>} : vector<64x64xbf16>, vector<64x64xbf16>, vector<64x64xf32> -> vector<64x64xf32>
      %271 = vector.extract_strided_slice %270 {offsets = [0, 0], sizes = [64, 32], strides = [1, 1]} : vector<64x64xf32> to vector<64x32xf32>
      %272 = vector.extract_strided_slice %270 {offsets = [0, 32], sizes = [64, 32], strides = [1, 1]} : vector<64x64xf32> to vector<64x32xf32>
      %273 = vector.shape_cast %271 : vector<64x32xf32> to vector<1x64x32xf32>
      %274 = vector.shape_cast %272 : vector<64x32xf32> to vector<1x64x32xf32>
      %275 = tpu.concatenate %273, %274 in 0 : vector<1x64x32xf32>, vector<1x64x32xf32> -> vector<2x64x32xf32>
      %276 = arith.truncf %275 : vector<2x64x32xf32> to vector<2x64x32xbf16>
      %c0_131 = arith.constant 0 : index
      %c0_132 = arith.constant 0 : index
      %c0_133 = arith.constant 0 : index
      %277 = vector.load %arg34[%c0_131, %c0_132, %c0_133] : memref<2x64x32xbf16, #tpu.memory_space<vmem>>, vector<2x64x32xbf16>
      tpu.vector_store %arg34[%c0_131, %c0_132, %c0_133], %276 {strides = array<i32>} : memref<2x64x32xbf16, #tpu.memory_space<vmem>>, vector<2x64x32xbf16>,
      %c0_134 = arith.constant 0 : index
      %c0_135 = arith.constant 0 : index
      %278 = vector.load %arg12[%c0_134, %c0_135] : memref<64x64xbf16, #tpu.memory_space<vmem>>, vector<64x64xbf16>
      %279 = arith.truncf %267 : vector<64x64xf32> to vector<64x64xbf16>
      %cst_136 = arith.constant dense<0.000000e+00> : vector<64x64xf32>
      %280 = tpu.matmul %279, %278, %cst_136 {dimension_numbers = #tpu.dot_dimension_numbers<[1], [1], [0], [0], [0, 0, 1, 0], [], []>} : vector<64x64xbf16>, vector<64x64xbf16>, vector<64x64xf32> -> vector<64x64xf32>
      %281 = vector.extract_strided_slice %280 {offsets = [0, 0], sizes = [64, 32], strides = [1, 1]} : vector<64x64xf32> to vector<64x32xf32>
      %282 = vector.extract_strided_slice %280 {offsets = [0, 32], sizes = [64, 32], strides = [1, 1]} : vector<64x64xf32> to vector<64x32xf32>
      %283 = vector.shape_cast %281 : vector<64x32xf32> to vector<1x64x32xf32>
      %284 = vector.shape_cast %282 : vector<64x32xf32> to vector<1x64x32xf32>
      %285 = tpu.concatenate %283, %284 in 0 : vector<1x64x32xf32>, vector<1x64x32xf32> -> vector<2x64x32xf32>
      %286 = arith.truncf %285 : vector<2x64x32xf32> to vector<2x64x32xbf16>
      %c0_137 = arith.constant 0 : index
      %c0_138 = arith.constant 0 : index
      %c0_139 = arith.constant 0 : index
      %287 = vector.load %arg35[%c0_137, %c0_138, %c0_139] : memref<2x64x32xbf16, #tpu.memory_space<vmem>>, vector<2x64x32xbf16>
      tpu.vector_store %arg35[%c0_137, %c0_138, %c0_139], %286 {strides = array<i32>} : memref<2x64x32xbf16, #tpu.memory_space<vmem>>, vector<2x64x32xbf16>,
      %c0_140 = arith.constant 0 : index
      %c0_141 = arith.constant 0 : index
      %c0_142 = arith.constant 0 : index
      %288 = vector.load %arg3[%c0_140, %c0_141, %c0_142] : memref<1x16x64xf32, #tpu.memory_space<vmem>>, vector<1x16x64xf32>
      %289 = vector.shape_cast %288 : vector<1x16x64xf32> to vector<16x64xf32>
      %c0_143 = arith.constant 0 : index
      %c0_144 = arith.constant 0 : index
      %290 = vector.load %arg18[%c0_143, %c0_144] : memref<64x64xbf16, #tpu.memory_space<vmem>>, vector<64x64xbf16>
      %291 = arith.truncf %289 : vector<16x64xf32> to vector<16x64xbf16>
      %cst_145 = arith.constant dense<0.000000e+00> : vector<16x64xf32>
      %292 = tpu.matmul %291, %290, %cst_145 {dimension_numbers = #tpu.dot_dimension_numbers<[1], [1], [0], [0], [0, 0, 1, 0], [], []>} : vector<16x64xbf16>, vector<64x64xbf16>, vector<16x64xf32> -> vector<16x64xf32>
      %293 = vector.extract_strided_slice %292 {offsets = [0, 0], sizes = [16, 32], strides = [1, 1]} : vector<16x64xf32> to vector<16x32xf32>
      %294 = vector.extract_strided_slice %292 {offsets = [0, 32], sizes = [16, 32], strides = [1, 1]} : vector<16x64xf32> to vector<16x32xf32>
      %295 = vector.shape_cast %293 : vector<16x32xf32> to vector<1x16x32xf32>
      %296 = vector.shape_cast %294 : vector<16x32xf32> to vector<1x16x32xf32>
      %297 = tpu.concatenate %295, %296 in 0 : vector<1x16x32xf32>, vector<1x16x32xf32> -> vector<2x16x32xf32>
      %298 = arith.truncf %297 : vector<2x16x32xf32> to vector<2x16x32xbf16>
      %c0_146 = arith.constant 0 : index
      %c0_147 = arith.constant 0 : index
      %c0_148 = arith.constant 0 : index
      %299 = vector.load %arg36[%c0_146, %c0_147, %c0_148] : memref<2x16x32xbf16, #tpu.memory_space<vmem>>, vector<2x16x32xbf16>
      tpu.vector_store %arg36[%c0_146, %c0_147, %c0_148], %298 {strides = array<i32>} : memref<2x16x32xbf16, #tpu.memory_space<vmem>>, vector<2x16x32xbf16>,
      %c0_149 = arith.constant 0 : index
      %c0_150 = arith.constant 0 : index
      %300 = vector.load %arg19[%c0_149, %c0_150] : memref<64x64xbf16, #tpu.memory_space<vmem>>, vector<64x64xbf16>
      %301 = arith.truncf %289 : vector<16x64xf32> to vector<16x64xbf16>
      %cst_151 = arith.constant dense<0.000000e+00> : vector<16x64xf32>
      %302 = tpu.matmul %301, %300, %cst_151 {dimension_numbers = #tpu.dot_dimension_numbers<[1], [1], [0], [0], [0, 0, 1, 0], [], []>} : vector<16x64xbf16>, vector<64x64xbf16>, vector<16x64xf32> -> vector<16x64xf32>
      %303 = vector.extract_strided_slice %302 {offsets = [0, 0], sizes = [16, 32], strides = [1, 1]} : vector<16x64xf32> to vector<16x32xf32>
      %304 = vector.extract_strided_slice %302 {offsets = [0, 32], sizes = [16, 32], strides = [1, 1]} : vector<16x64xf32> to vector<16x32xf32>
      %305 = vector.shape_cast %303 : vector<16x32xf32> to vector<1x16x32xf32>
      %306 = vector.shape_cast %304 : vector<16x32xf32> to vector<1x16x32xf32>
      %307 = tpu.concatenate %305, %306 in 0 : vector<1x16x32xf32>, vector<1x16x32xf32> -> vector<2x16x32xf32>
      %308 = arith.truncf %307 : vector<2x16x32xf32> to vector<2x16x32xbf16>
      %c0_152 = arith.constant 0 : index
      %c0_153 = arith.constant 0 : index
      %c0_154 = arith.constant 0 : index
      %309 = vector.load %arg37[%c0_152, %c0_153, %c0_154] : memref<2x16x32xbf16, #tpu.memory_space<vmem>>, vector<2x16x32xbf16>
      tpu.vector_store %arg37[%c0_152, %c0_153, %c0_154], %308 {strides = array<i32>} : memref<2x16x32xbf16, #tpu.memory_space<vmem>>, vector<2x16x32xbf16>,
    } else {
    }
    %c32_i32 = arith.constant 32 : i32
    %3 = arith.muli %arg1, %c32_i32 : i32
    %4 = tpu.assume_multiple %3, 32 : i32
    %c0 = arith.constant 0 : index
    %5 = arith.index_cast %4 : i32 to index
    %c0_1 = arith.constant 0 : index
    %6 = vector.load %arg2[%c0, %5, %c0_1] : memref<1x64x64xf32, #tpu.memory_space<vmem>>, vector<1x32x64xf32>
    %7 = vector.shape_cast %6 : vector<1x32x64xf32> to vector<32x64xf32>
    %8 = arith.index_cast %4 : i32 to index
    %c0_2 = arith.constant 0 : index
    %9 = vector.load %arg33[%8, %c0_2] : memref<64x64xf32, #tpu.memory_space<vmem>>, vector<32x64xf32>
    %c0_3 = arith.constant 0 : index
    %c0_4 = arith.constant 0 : index
    %10 = vector.load %arg8[%c0_3, %c0_4] : memref<1x64xf32, #tpu.memory_space<vmem>>, vector<1x64xf32>
    %c0_5 = arith.constant 0 : index
    %c0_6 = arith.constant 0 : index
    %11 = vector.load %arg9[%c0_5, %c0_6] : memref<1x64xf32, #tpu.memory_space<vmem>>, vector<1x64xf32>
    %cst = arith.constant dense<0.000000e+00> : vector<32xf32>
    %12 = vector.multi_reduction <add>, %9, %cst [1] : vector<32x64xf32> to vector<32xf32>
    %13 = vector.shape_cast %12 : vector<32xf32> to vector<32x1xf32>
    %cst_7 = arith.constant 6.400000e+01 : f32
    %14 = vector.broadcast %cst_7 : f32 to vector<32x1xf32>
    %15 = arith.divf %13, %14 : vector<32x1xf32>
    %16 = vector.broadcast %15 : vector<32x1xf32> to vector<32x64xf32>
    %17 = arith.subf %9, %16 : vector<32x64xf32>
    %18 = vector.broadcast %15 : vector<32x1xf32> to vector<32x64xf32>
    %19 = arith.subf %9, %18 : vector<32x64xf32>
    %20 = arith.mulf %17, %19 : vector<32x64xf32>
    %cst_8 = arith.constant dense<0.000000e+00> : vector<32xf32>
    %21 = vector.multi_reduction <add>, %20, %cst_8 [1] : vector<32x64xf32> to vector<32xf32>
    %22 = vector.shape_cast %21 : vector<32xf32> to vector<32x1xf32>
    %cst_9 = arith.constant 6.400000e+01 : f32
    %23 = vector.broadcast %cst_9 : f32 to vector<32x1xf32>
    %24 = arith.divf %22, %23 : vector<32x1xf32>
    %25 = vector.broadcast %15 : vector<32x1xf32> to vector<32x64xf32>
    %26 = arith.subf %9, %25 : vector<32x64xf32>
    %cst_10 = arith.constant 9.99999974E-6 : f32
    %27 = vector.broadcast %cst_10 : f32 to vector<32x1xf32>
    %28 = arith.addf %24, %27 : vector<32x1xf32>
    %29 = math.rsqrt %28 : vector<32x1xf32>
    %30 = vector.broadcast %29 : vector<32x1xf32> to vector<32x64xf32>
    %31 = arith.mulf %26, %30 : vector<32x64xf32>
    %32 = vector.broadcast %10 : vector<1x64xf32> to vector<32x64xf32>
    %33 = arith.mulf %31, %32 : vector<32x64xf32>
    %34 = vector.broadcast %11 : vector<1x64xf32> to vector<32x64xf32>
    %35 = arith.addf %33, %34 : vector<32x64xf32>
    %c0_11 = arith.constant 0 : index
    %c0_12 = arith.constant 0 : index
    %c0_13 = arith.constant 0 : index
    %36 = vector.load %arg34[%c0_11, %c0_12, %c0_13] : memref<2x64x32xbf16, #tpu.memory_space<vmem>>, vector<2x64x32xbf16>
    %c0_14 = arith.constant 0 : index
    %c0_15 = arith.constant 0 : index
    %c0_16 = arith.constant 0 : index
    %37 = vector.load %arg35[%c0_14, %c0_15, %c0_16] : memref<2x64x32xbf16, #tpu.memory_space<vmem>>, vector<2x64x32xbf16>
    %c0_17 = arith.constant 0 : index
    %c0_18 = arith.constant 0 : index
    %38 = vector.load %arg10[%c0_17, %c0_18] : memref<64x64xbf16, #tpu.memory_space<vmem>>, vector<64x64xbf16>
    %c0_19 = arith.constant 0 : index
    %c0_20 = arith.constant 0 : index
    %c0_21 = arith.constant 0 : index
    %39 = vector.load %arg13[%c0_19, %c0_20, %c0_21] : memref<2x32x64xbf16, #tpu.memory_space<vmem>>, vector<2x32x64xbf16>
    %c0_22 = arith.constant 0 : index
    %c0_23 = arith.constant 0 : index
    %40 = vector.load %arg14[%c0_22, %c0_23] : memref<1x64xf32, #tpu.memory_space<vmem>>, vector<1x64xf32>
    %41 = arith.truncf %35 : vector<32x64xf32> to vector<32x64xbf16>
    %cst_24 = arith.constant dense<0.000000e+00> : vector<32x64xf32>
    %42 = tpu.matmul %41, %38, %cst_24 {dimension_numbers = #tpu.dot_dimension_numbers<[1], [1], [0], [0], [0, 0, 1, 0], [], []>} : vector<32x64xbf16>, vector<64x64xbf16>, vector<32x64xf32> -> vector<32x64xf32>
    %43 = vector.extract_strided_slice %42 {offsets = [0, 0], sizes = [32, 32], strides = [1, 1]} : vector<32x64xf32> to vector<32x32xf32>
    %44 = vector.extract_strided_slice %42 {offsets = [0, 32], sizes = [32, 32], strides = [1, 1]} : vector<32x64xf32> to vector<32x32xf32>
    %45 = vector.shape_cast %43 : vector<32x32xf32> to vector<1x32x32xf32>
    %46 = vector.shape_cast %44 : vector<32x32xf32> to vector<1x32x32xf32>
    %47 = tpu.concatenate %45, %46 in 0 : vector<1x32x32xf32>, vector<1x32x32xf32> -> vector<2x32x32xf32>
    %48 = arith.truncf %47 : vector<2x32x32xf32> to vector<2x32x32xbf16>
    "tpu.trace_start"() <{level = 10 : i32, message = "hqd,hkd->hqk"}> : () -> ()
    %cst_25 = arith.constant dense<0.000000e+00> : vector<2x32x64xf32>
    %49 = tpu.matmul %48, %36, %cst_25 {dimension_numbers = #tpu.dot_dimension_numbers<[2], [2], [1], [1], [0, 0, 0, 1, 1, 1], [0], [0]>} : vector<2x32x32xbf16>, vector<2x64x32xbf16>, vector<2x32x64xf32> -> vector<2x32x64xf32>
    "tpu.trace_stop"() : () -> ()
    %cst_26 = arith.constant 0.176776692 : f32
    %50 = vector.broadcast %cst_26 : f32 to vector<2x32x64xf32>
    %51 = arith.mulf %49, %50 : vector<2x32x64xf32>
    %cst_27 = arith.constant dense<0xFF800000> : vector<2x32xf32>
    %52 = vector.multi_reduction <maximumf>, %51, %cst_27 [2] : vector<2x32x64xf32> to vector<2x32xf32>
    %53 = vector.shape_cast %52 : vector<2x32xf32> to vector<2x32x1xf32>
    %54 = vector.broadcast %53 : vector<2x32x1xf32> to vector<2x32x64xf32>
    %55 = arith.subf %51, %54 : vector<2x32x64xf32>
    %56 = math.exp %55 : vector<2x32x64xf32>
    %cst_28 = arith.constant dense<0.000000e+00> : vector<2x32xf32>
    %57 = vector.multi_reduction <add>, %56, %cst_28 [2] : vector<2x32x64xf32> to vector<2x32xf32>
    %58 = vector.shape_cast %57 : vector<2x32xf32> to vector<2x32x1xf32>
    %59 = arith.truncf %56 : vector<2x32x64xf32> to vector<2x32x64xbf16>
    "tpu.trace_start"() <{level = 10 : i32, message = "hqk,hkd->hqd"}> : () -> ()
    %cst_29 = arith.constant dense<0.000000e+00> : vector<2x32x32xf32>
    %60 = tpu.matmul %59, %37, %cst_29 {dimension_numbers = #tpu.dot_dimension_numbers<[2], [1], [1], [2], [0, 0, 0, 1, 1, 2], [0], [0]>} : vector<2x32x64xbf16>, vector<2x64x32xbf16>, vector<2x32x32xf32> -> vector<2x32x32xf32>
    "tpu.trace_stop"() : () -> ()
    %61 = tpu.reciprocal %58 {approx = true} : vector<2x32x1xf32> -> vector<2x32x1xf32>
    %62 = vector.broadcast %61 : vector<2x32x1xf32> to vector<2x32x32xf32>
    %63 = arith.mulf %60, %62 : vector<2x32x32xf32>
    %64 = arith.truncf %63 : vector<2x32x32xf32> to vector<2x32x32xbf16>
    "tpu.trace_start"() <{level = 10 : i32, message = "hqd,hdc->hqc"}> : () -> ()
    %cst_30 = arith.constant dense<0.000000e+00> : vector<2x32x64xf32>
    %65 = tpu.matmul %64, %39, %cst_30 {dimension_numbers = #tpu.dot_dimension_numbers<[2], [1], [1], [2], [0, 0, 0, 1, 1, 2], [0], [0]>} : vector<2x32x32xbf16>, vector<2x32x64xbf16>, vector<2x32x64xf32> -> vector<2x32x64xf32>
    "tpu.trace_stop"() : () -> ()
    %cst_31 = arith.constant dense<0.000000e+00> : vector<32x64xf32>
    %66 = vector.multi_reduction <add>, %65, %cst_31 [0] : vector<2x32x64xf32> to vector<32x64xf32>
    %67 = vector.broadcast %40 : vector<1x64xf32> to vector<32x64xf32>
    %68 = arith.addf %66, %67 : vector<32x64xf32>
    %69 = arith.addf %68, %9 : vector<32x64xf32>
    %c0_32 = arith.constant 0 : index
    %c0_33 = arith.constant 0 : index
    %70 = vector.load %arg15[%c0_32, %c0_33] : memref<1x64xf32, #tpu.memory_space<vmem>>, vector<1x64xf32>
    %c0_34 = arith.constant 0 : index
    %c0_35 = arith.constant 0 : index
    %71 = vector.load %arg16[%c0_34, %c0_35] : memref<1x64xf32, #tpu.memory_space<vmem>>, vector<1x64xf32>
    %cst_36 = arith.constant dense<0.000000e+00> : vector<32xf32>
    %72 = vector.multi_reduction <add>, %69, %cst_36 [1] : vector<32x64xf32> to vector<32xf32>
    %73 = vector.shape_cast %72 : vector<32xf32> to vector<32x1xf32>
    %cst_37 = arith.constant 6.400000e+01 : f32
    %74 = vector.broadcast %cst_37 : f32 to vector<32x1xf32>
    %75 = arith.divf %73, %74 : vector<32x1xf32>
    %76 = vector.broadcast %75 : vector<32x1xf32> to vector<32x64xf32>
    %77 = arith.subf %69, %76 : vector<32x64xf32>
    %78 = vector.broadcast %75 : vector<32x1xf32> to vector<32x64xf32>
    %79 = arith.subf %69, %78 : vector<32x64xf32>
    %80 = arith.mulf %77, %79 : vector<32x64xf32>
    %cst_38 = arith.constant dense<0.000000e+00> : vector<32xf32>
    %81 = vector.multi_reduction <add>, %80, %cst_38 [1] : vector<32x64xf32> to vector<32xf32>
    %82 = vector.shape_cast %81 : vector<32xf32> to vector<32x1xf32>
    %cst_39 = arith.constant 6.400000e+01 : f32
    %83 = vector.broadcast %cst_39 : f32 to vector<32x1xf32>
    %84 = arith.divf %82, %83 : vector<32x1xf32>
    %85 = vector.broadcast %75 : vector<32x1xf32> to vector<32x64xf32>
    %86 = arith.subf %69, %85 : vector<32x64xf32>
    %cst_40 = arith.constant 9.99999974E-6 : f32
    %87 = vector.broadcast %cst_40 : f32 to vector<32x1xf32>
    %88 = arith.addf %84, %87 : vector<32x1xf32>
    %89 = math.rsqrt %88 : vector<32x1xf32>
    %90 = vector.broadcast %89 : vector<32x1xf32> to vector<32x64xf32>
    %91 = arith.mulf %86, %90 : vector<32x64xf32>
    %92 = vector.broadcast %70 : vector<1x64xf32> to vector<32x64xf32>
    %93 = arith.mulf %91, %92 : vector<32x64xf32>
    %94 = vector.broadcast %71 : vector<1x64xf32> to vector<32x64xf32>
    %95 = arith.addf %93, %94 : vector<32x64xf32>
    %c0_41 = arith.constant 0 : index
    %c0_42 = arith.constant 0 : index
    %c0_43 = arith.constant 0 : index
    %96 = vector.load %arg36[%c0_41, %c0_42, %c0_43] : memref<2x16x32xbf16, #tpu.memory_space<vmem>>, vector<2x16x32xbf16>
    %c0_44 = arith.constant 0 : index
    %c0_45 = arith.constant 0 : index
    %c0_46 = arith.constant 0 : index
    %97 = vector.load %arg37[%c0_44, %c0_45, %c0_46] : memref<2x16x32xbf16, #tpu.memory_space<vmem>>, vector<2x16x32xbf16>
    %c0_47 = arith.constant 0 : index
    %c0_48 = arith.constant 0 : index
    %98 = vector.load %arg17[%c0_47, %c0_48] : memref<64x64xbf16, #tpu.memory_space<vmem>>, vector<64x64xbf16>
    %c0_49 = arith.constant 0 : index
    %c0_50 = arith.constant 0 : index
    %c0_51 = arith.constant 0 : index
    %99 = vector.load %arg20[%c0_49, %c0_50, %c0_51] : memref<2x32x64xbf16, #tpu.memory_space<vmem>>, vector<2x32x64xbf16>
    %c0_52 = arith.constant 0 : index
    %c0_53 = arith.constant 0 : index
    %100 = vector.load %arg21[%c0_52, %c0_53] : memref<1x64xf32, #tpu.memory_space<vmem>>, vector<1x64xf32>
    %101 = arith.truncf %95 : vector<32x64xf32> to vector<32x64xbf16>
    %cst_54 = arith.constant dense<0.000000e+00> : vector<32x64xf32>
    %102 = tpu.matmul %101, %98, %cst_54 {dimension_numbers = #tpu.dot_dimension_numbers<[1], [1], [0], [0], [0, 0, 1, 0], [], []>} : vector<32x64xbf16>, vector<64x64xbf16>, vector<32x64xf32> -> vector<32x64xf32>
    %103 = vector.extract_strided_slice %102 {offsets = [0, 0], sizes = [32, 32], strides = [1, 1]} : vector<32x64xf32> to vector<32x32xf32>
    %104 = vector.extract_strided_slice %102 {offsets = [0, 32], sizes = [32, 32], strides = [1, 1]} : vector<32x64xf32> to vector<32x32xf32>
    %105 = vector.shape_cast %103 : vector<32x32xf32> to vector<1x32x32xf32>
    %106 = vector.shape_cast %104 : vector<32x32xf32> to vector<1x32x32xf32>
    %107 = tpu.concatenate %105, %106 in 0 : vector<1x32x32xf32>, vector<1x32x32xf32> -> vector<2x32x32xf32>
    %108 = arith.truncf %107 : vector<2x32x32xf32> to vector<2x32x32xbf16>
    "tpu.trace_start"() <{level = 10 : i32, message = "hqd,hkd->hqk"}> : () -> ()
    %cst_55 = arith.constant dense<0.000000e+00> : vector<2x32x16xf32>
    %109 = tpu.matmul %108, %96, %cst_55 {dimension_numbers = #tpu.dot_dimension_numbers<[2], [2], [1], [1], [0, 0, 0, 1, 1, 1], [0], [0]>} : vector<2x32x32xbf16>, vector<2x16x32xbf16>, vector<2x32x16xf32> -> vector<2x32x16xf32>
    "tpu.trace_stop"() : () -> ()
    %cst_56 = arith.constant 0.176776692 : f32
    %110 = vector.broadcast %cst_56 : f32 to vector<2x32x16xf32>
    %111 = arith.mulf %109, %110 : vector<2x32x16xf32>
    %cst_57 = arith.constant dense<0xFF800000> : vector<2x32xf32>
    %112 = vector.multi_reduction <maximumf>, %111, %cst_57 [2] : vector<2x32x16xf32> to vector<2x32xf32>
    %113 = vector.shape_cast %112 : vector<2x32xf32> to vector<2x32x1xf32>
    %114 = vector.broadcast %113 : vector<2x32x1xf32> to vector<2x32x16xf32>
    %115 = arith.subf %111, %114 : vector<2x32x16xf32>
    %116 = math.exp %115 : vector<2x32x16xf32>
    %cst_58 = arith.constant dense<0.000000e+00> : vector<2x32xf32>
    %117 = vector.multi_reduction <add>, %116, %cst_58 [2] : vector<2x32x16xf32> to vector<2x32xf32>
    %118 = vector.shape_cast %117 : vector<2x32xf32> to vector<2x32x1xf32>
    %119 = arith.truncf %116 : vector<2x32x16xf32> to vector<2x32x16xbf16>
    "tpu.trace_start"() <{level = 10 : i32, message = "hqk,hkd->hqd"}> : () -> ()
    %cst_59 = arith.constant dense<0.000000e+00> : vector<2x32x32xf32>
    %120 = tpu.matmul %119, %97, %cst_59 {dimension_numbers = #tpu.dot_dimension_numbers<[2], [1], [1], [2], [0, 0, 0, 1, 1, 2], [0], [0]>} : vector<2x32x16xbf16>, vector<2x16x32xbf16>, vector<2x32x32xf32> -> vector<2x32x32xf32>
    "tpu.trace_stop"() : () -> ()
    %121 = tpu.reciprocal %118 {approx = true} : vector<2x32x1xf32> -> vector<2x32x1xf32>
    %122 = vector.broadcast %121 : vector<2x32x1xf32> to vector<2x32x32xf32>
    %123 = arith.mulf %120, %122 : vector<2x32x32xf32>
    %124 = arith.truncf %123 : vector<2x32x32xf32> to vector<2x32x32xbf16>
    "tpu.trace_start"() <{level = 10 : i32, message = "hqd,hdc->hqc"}> : () -> ()
    %cst_60 = arith.constant dense<0.000000e+00> : vector<2x32x64xf32>
    %125 = tpu.matmul %124, %99, %cst_60 {dimension_numbers = #tpu.dot_dimension_numbers<[2], [1], [1], [2], [0, 0, 0, 1, 1, 2], [0], [0]>} : vector<2x32x32xbf16>, vector<2x32x64xbf16>, vector<2x32x64xf32> -> vector<2x32x64xf32>
    "tpu.trace_stop"() : () -> ()
    %cst_61 = arith.constant dense<0.000000e+00> : vector<32x64xf32>
    %126 = vector.multi_reduction <add>, %125, %cst_61 [0] : vector<2x32x64xf32> to vector<32x64xf32>
    %127 = vector.broadcast %100 : vector<1x64xf32> to vector<32x64xf32>
    %128 = arith.addf %126, %127 : vector<32x64xf32>
    %129 = arith.addf %128, %69 : vector<32x64xf32>
    %c0_62 = arith.constant 0 : index
    %c0_63 = arith.constant 0 : index
    %130 = vector.load %arg22[%c0_62, %c0_63] : memref<1x64xf32, #tpu.memory_space<vmem>>, vector<1x64xf32>
    %c0_64 = arith.constant 0 : index
    %c0_65 = arith.constant 0 : index
    %131 = vector.load %arg23[%c0_64, %c0_65] : memref<1x64xf32, #tpu.memory_space<vmem>>, vector<1x64xf32>
    %cst_66 = arith.constant dense<0.000000e+00> : vector<32xf32>
    %132 = vector.multi_reduction <add>, %129, %cst_66 [1] : vector<32x64xf32> to vector<32xf32>
    %133 = vector.shape_cast %132 : vector<32xf32> to vector<32x1xf32>
    %cst_67 = arith.constant 6.400000e+01 : f32
    %134 = vector.broadcast %cst_67 : f32 to vector<32x1xf32>
    %135 = arith.divf %133, %134 : vector<32x1xf32>
    %136 = vector.broadcast %135 : vector<32x1xf32> to vector<32x64xf32>
    %137 = arith.subf %129, %136 : vector<32x64xf32>
    %138 = vector.broadcast %135 : vector<32x1xf32> to vector<32x64xf32>
    %139 = arith.subf %129, %138 : vector<32x64xf32>
    %140 = arith.mulf %137, %139 : vector<32x64xf32>
    %cst_68 = arith.constant dense<0.000000e+00> : vector<32xf32>
    %141 = vector.multi_reduction <add>, %140, %cst_68 [1] : vector<32x64xf32> to vector<32xf32>
    %142 = vector.shape_cast %141 : vector<32xf32> to vector<32x1xf32>
    %cst_69 = arith.constant 6.400000e+01 : f32
    %143 = vector.broadcast %cst_69 : f32 to vector<32x1xf32>
    %144 = arith.divf %142, %143 : vector<32x1xf32>
    %145 = vector.broadcast %135 : vector<32x1xf32> to vector<32x64xf32>
    %146 = arith.subf %129, %145 : vector<32x64xf32>
    %cst_70 = arith.constant 9.99999974E-6 : f32
    %147 = vector.broadcast %cst_70 : f32 to vector<32x1xf32>
    %148 = arith.addf %144, %147 : vector<32x1xf32>
    %149 = math.rsqrt %148 : vector<32x1xf32>
    %150 = vector.broadcast %149 : vector<32x1xf32> to vector<32x64xf32>
    %151 = arith.mulf %146, %150 : vector<32x64xf32>
    %152 = vector.broadcast %130 : vector<1x64xf32> to vector<32x64xf32>
    %153 = arith.mulf %151, %152 : vector<32x64xf32>
    %154 = vector.broadcast %131 : vector<1x64xf32> to vector<32x64xf32>
    %155 = arith.addf %153, %154 : vector<32x64xf32>
    %c0_71 = arith.constant 0 : index
    %c0_72 = arith.constant 0 : index
    %156 = vector.load %arg24[%c0_71, %c0_72] : memref<256x64xbf16, #tpu.memory_space<vmem>>, vector<256x64xbf16>
    %c0_73 = arith.constant 0 : index
    %c0_74 = arith.constant 0 : index
    %157 = vector.load %arg25[%c0_73, %c0_74] : memref<1x256xf32, #tpu.memory_space<vmem>>, vector<1x256xf32>
    %158 = arith.truncf %155 : vector<32x64xf32> to vector<32x64xbf16>
    %cst_75 = arith.constant dense<0.000000e+00> : vector<32x256xf32>
    %159 = tpu.matmul %158, %156, %cst_75 {dimension_numbers = #tpu.dot_dimension_numbers<[1], [1], [0], [0], [0, 0, 1, 0], [], []>} : vector<32x64xbf16>, vector<256x64xbf16>, vector<32x256xf32> -> vector<32x256xf32>
    %160 = vector.broadcast %157 : vector<1x256xf32> to vector<32x256xf32>
    %161 = arith.addf %159, %160 : vector<32x256xf32>
    %c0_76 = arith.constant 0 : index
    %c0_77 = arith.constant 0 : index
    %162 = vector.load %arg26[%c0_76, %c0_77] : memref<256x64xbf16, #tpu.memory_space<vmem>>, vector<256x64xbf16>
    %c0_78 = arith.constant 0 : index
    %c0_79 = arith.constant 0 : index
    %163 = vector.load %arg27[%c0_78, %c0_79] : memref<1x256xf32, #tpu.memory_space<vmem>>, vector<1x256xf32>
    %164 = arith.truncf %155 : vector<32x64xf32> to vector<32x64xbf16>
    %cst_80 = arith.constant dense<0.000000e+00> : vector<32x256xf32>
    %165 = tpu.matmul %164, %162, %cst_80 {dimension_numbers = #tpu.dot_dimension_numbers<[1], [1], [0], [0], [0, 0, 1, 0], [], []>} : vector<32x64xbf16>, vector<256x64xbf16>, vector<32x256xf32> -> vector<32x256xf32>
    %166 = vector.broadcast %163 : vector<1x256xf32> to vector<32x256xf32>
    %167 = arith.addf %165, %166 : vector<32x256xf32>
    %168 = arith.negf %167 : vector<32x256xf32>
    %169 = math.exp %168 : vector<32x256xf32>
    %cst_81 = arith.constant 1.000000e+00 : f32
    %170 = vector.broadcast %cst_81 : f32 to vector<32x256xf32>
    %171 = arith.addf %170, %169 : vector<32x256xf32>
    %172 = arith.divf %170, %171 : vector<32x256xf32>
    %173 = arith.mulf %167, %172 : vector<32x256xf32>
    %174 = arith.mulf %161, %173 : vector<32x256xf32>
    %c0_82 = arith.constant 0 : index
    %c0_83 = arith.constant 0 : index
    %175 = vector.load %arg28[%c0_82, %c0_83] : memref<64x256xbf16, #tpu.memory_space<vmem>>, vector<64x256xbf16>
    %c0_84 = arith.constant 0 : index
    %c0_85 = arith.constant 0 : index
    %176 = vector.load %arg29[%c0_84, %c0_85] : memref<1x64xf32, #tpu.memory_space<vmem>>, vector<1x64xf32>
    %177 = arith.truncf %174 : vector<32x256xf32> to vector<32x256xbf16>
    %cst_86 = arith.constant dense<0.000000e+00> : vector<32x64xf32>
    %178 = tpu.matmul %177, %175, %cst_86 {dimension_numbers = #tpu.dot_dimension_numbers<[1], [1], [0], [0], [0, 0, 1, 0], [], []>} : vector<32x256xbf16>, vector<64x256xbf16>, vector<32x64xf32> -> vector<32x64xf32>
    %179 = vector.broadcast %176 : vector<1x64xf32> to vector<32x64xf32>
    %180 = arith.addf %178, %179 : vector<32x64xf32>
    %181 = arith.addf %180, %129 : vector<32x64xf32>
    %c0_87 = arith.constant 0 : index
    %c0_88 = arith.constant 0 : index
    %182 = vector.load %arg30[%c0_87, %c0_88] : memref<64x64xbf16, #tpu.memory_space<vmem>>, vector<64x64xbf16>
    %c0_89 = arith.constant 0 : index
    %c0_90 = arith.constant 0 : index
    %183 = vector.load %arg31[%c0_89, %c0_90] : memref<1x64xf32, #tpu.memory_space<vmem>>, vector<1x64xf32>
    %184 = arith.truncf %181 : vector<32x64xf32> to vector<32x64xbf16>
    %cst_91 = arith.constant dense<0.000000e+00> : vector<32x64xf32>
    %185 = tpu.matmul %184, %182, %cst_91 {dimension_numbers = #tpu.dot_dimension_numbers<[1], [1], [0], [0], [0, 0, 1, 0], [], []>} : vector<32x64xbf16>, vector<64x64xbf16>, vector<32x64xf32> -> vector<32x64xf32>
    %186 = vector.broadcast %183 : vector<1x64xf32> to vector<32x64xf32>
    %187 = arith.addf %185, %186 : vector<32x64xf32>
    %188 = arith.addf %187, %7 : vector<32x64xf32>
    %c0_92 = arith.constant 0 : index
    %c0_93 = arith.constant 0 : index
    %c0_94 = arith.constant 0 : index
    %189 = vector.load %arg32[%c0_92, %c0_93, %c0_94] : memref<1x32x64xf32, #tpu.memory_space<vmem>>, vector<1x32x64xf32>
    %190 = vector.shape_cast %189 : vector<1x32x64xf32> to vector<32x64xf32>
    %191 = vector.shape_cast %188 : vector<32x64xf32> to vector<1x32x64xf32>
    tpu.vector_store %arg32[%c0_92, %c0_93, %c0_94], %191 {strides = array<i32>} : memref<1x32x64xf32, #tpu.memory_space<vmem>>, vector<1x32x64xf32>,
    return
  }
  func.func @transform_0(%arg0: i32, %arg1: i32) -> (i32, i32, i32) {
    %c0_i32 = arith.constant 0 : i32
    %c0_i32_0 = arith.constant 0 : i32
    %c0_i32_1 = arith.constant 0 : i32
    return %arg0, %c0_i32, %c0_i32_0 : i32, i32, i32
  }
  func.func @transform_1(%arg0: i32, %arg1: i32) -> (i32, i32, i32) {
    %c0_i32 = arith.constant 0 : i32
    %c0_i32_0 = arith.constant 0 : i32
    %c0_i32_1 = arith.constant 0 : i32
    return %arg0, %c0_i32, %c0_i32_0 : i32, i32, i32
  }
  func.func @transform_2(%arg0: i32, %arg1: i32) -> (i32, i32) {
    %c0_i32 = arith.constant 0 : i32
    %c0_i32_0 = arith.constant 0 : i32
    %c0_i32_1 = arith.constant 0 : i32
    return %c0_i32, %c0_i32_0 : i32, i32
  }
  func.func @transform_3(%arg0: i32, %arg1: i32) -> (i32, i32) {
    %c0_i32 = arith.constant 0 : i32
    %c0_i32_0 = arith.constant 0 : i32
    %c0_i32_1 = arith.constant 0 : i32
    return %c0_i32, %c0_i32_0 : i32, i32
  }
  func.func @transform_4(%arg0: i32, %arg1: i32) -> (i32, i32) {
    %c0_i32 = arith.constant 0 : i32
    %c0_i32_0 = arith.constant 0 : i32
    %c0_i32_1 = arith.constant 0 : i32
    return %c0_i32, %c0_i32_0 : i32, i32
  }
  func.func @transform_5(%arg0: i32, %arg1: i32) -> (i32, i32) {
    %c0_i32 = arith.constant 0 : i32
    %c0_i32_0 = arith.constant 0 : i32
    %c0_i32_1 = arith.constant 0 : i32
    return %c0_i32, %c0_i32_0 : i32, i32
  }
  func.func @transform_6(%arg0: i32, %arg1: i32) -> (i32, i32) {
    %c0_i32 = arith.constant 0 : i32
    %c0_i32_0 = arith.constant 0 : i32
    %c0_i32_1 = arith.constant 0 : i32
    return %c0_i32, %c0_i32_0 : i32, i32
  }
  func.func @transform_7(%arg0: i32, %arg1: i32) -> (i32, i32) {
    %c0_i32 = arith.constant 0 : i32
    %c0_i32_0 = arith.constant 0 : i32
    %c0_i32_1 = arith.constant 0 : i32
    return %c0_i32, %c0_i32_0 : i32, i32
  }
  func.func @transform_8(%arg0: i32, %arg1: i32) -> (i32, i32) {
    %c0_i32 = arith.constant 0 : i32
    %c0_i32_0 = arith.constant 0 : i32
    %c0_i32_1 = arith.constant 0 : i32
    return %c0_i32, %c0_i32_0 : i32, i32
  }
  func.func @transform_9(%arg0: i32, %arg1: i32) -> (i32, i32) {
    %c0_i32 = arith.constant 0 : i32
    %c0_i32_0 = arith.constant 0 : i32
    %c0_i32_1 = arith.constant 0 : i32
    return %c0_i32, %c0_i32_0 : i32, i32
  }
  func.func @transform_10(%arg0: i32, %arg1: i32) -> (i32, i32) {
    %c0_i32 = arith.constant 0 : i32
    %c0_i32_0 = arith.constant 0 : i32
    %c0_i32_1 = arith.constant 0 : i32
    return %c0_i32, %c0_i32_0 : i32, i32
  }
  func.func @transform_11(%arg0: i32, %arg1: i32) -> (i32, i32, i32) {
    %c0_i32 = arith.constant 0 : i32
    %c0_i32_0 = arith.constant 0 : i32
    %c0_i32_1 = arith.constant 0 : i32
    %c0_i32_2 = arith.constant 0 : i32
    return %c0_i32, %c0_i32_0, %c0_i32_1 : i32, i32, i32
  }
  func.func @transform_12(%arg0: i32, %arg1: i32) -> (i32, i32) {
    %c0_i32 = arith.constant 0 : i32
    %c0_i32_0 = arith.constant 0 : i32
    %c0_i32_1 = arith.constant 0 : i32
    return %c0_i32, %c0_i32_0 : i32, i32
  }
  func.func @transform_13(%arg0: i32, %arg1: i32) -> (i32, i32) {
    %c0_i32 = arith.constant 0 : i32
    %c0_i32_0 = arith.constant 0 : i32
    %c0_i32_1 = arith.constant 0 : i32
    return %c0_i32, %c0_i32_0 : i32, i32
  }
  func.func @transform_14(%arg0: i32, %arg1: i32) -> (i32, i32) {
    %c0_i32 = arith.constant 0 : i32
    %c0_i32_0 = arith.constant 0 : i32
    %c0_i32_1 = arith.constant 0 : i32
    return %c0_i32, %c0_i32_0 : i32, i32
  }
  func.func @transform_15(%arg0: i32, %arg1: i32) -> (i32, i32) {
    %c0_i32 = arith.constant 0 : i32
    %c0_i32_0 = arith.constant 0 : i32
    %c0_i32_1 = arith.constant 0 : i32
    return %c0_i32, %c0_i32_0 : i32, i32
  }
  func.func @transform_16(%arg0: i32, %arg1: i32) -> (i32, i32) {
    %c0_i32 = arith.constant 0 : i32
    %c0_i32_0 = arith.constant 0 : i32
    %c0_i32_1 = arith.constant 0 : i32
    return %c0_i32, %c0_i32_0 : i32, i32
  }
  func.func @transform_17(%arg0: i32, %arg1: i32) -> (i32, i32) {
    %c0_i32 = arith.constant 0 : i32
    %c0_i32_0 = arith.constant 0 : i32
    %c0_i32_1 = arith.constant 0 : i32
    return %c0_i32, %c0_i32_0 : i32, i32
  }
  func.func @transform_18(%arg0: i32, %arg1: i32) -> (i32, i32, i32) {
    %c0_i32 = arith.constant 0 : i32
    %c0_i32_0 = arith.constant 0 : i32
    %c0_i32_1 = arith.constant 0 : i32
    %c0_i32_2 = arith.constant 0 : i32
    return %c0_i32, %c0_i32_0, %c0_i32_1 : i32, i32, i32
  }
  func.func @transform_19(%arg0: i32, %arg1: i32) -> (i32, i32) {
    %c0_i32 = arith.constant 0 : i32
    %c0_i32_0 = arith.constant 0 : i32
    %c0_i32_1 = arith.constant 0 : i32
    return %c0_i32, %c0_i32_0 : i32, i32
  }
  func.func @transform_20(%arg0: i32, %arg1: i32) -> (i32, i32) {
    %c0_i32 = arith.constant 0 : i32
    %c0_i32_0 = arith.constant 0 : i32
    %c0_i32_1 = arith.constant 0 : i32
    return %c0_i32, %c0_i32_0 : i32, i32
  }
  func.func @transform_21(%arg0: i32, %arg1: i32) -> (i32, i32) {
    %c0_i32 = arith.constant 0 : i32
    %c0_i32_0 = arith.constant 0 : i32
    %c0_i32_1 = arith.constant 0 : i32
    return %c0_i32, %c0_i32_0 : i32, i32
  }
  func.func @transform_22(%arg0: i32, %arg1: i32) -> (i32, i32) {
    %c0_i32 = arith.constant 0 : i32
    %c0_i32_0 = arith.constant 0 : i32
    %c0_i32_1 = arith.constant 0 : i32
    return %c0_i32, %c0_i32_0 : i32, i32
  }
  func.func @transform_23(%arg0: i32, %arg1: i32) -> (i32, i32) {
    %c0_i32 = arith.constant 0 : i32
    %c0_i32_0 = arith.constant 0 : i32
    %c0_i32_1 = arith.constant 0 : i32
    return %c0_i32, %c0_i32_0 : i32, i32
  }
  func.func @transform_24(%arg0: i32, %arg1: i32) -> (i32, i32) {
    %c0_i32 = arith.constant 0 : i32
    %c0_i32_0 = arith.constant 0 : i32
    %c0_i32_1 = arith.constant 0 : i32
    return %c0_i32, %c0_i32_0 : i32, i32
  }
  func.func @transform_25(%arg0: i32, %arg1: i32) -> (i32, i32) {
    %c0_i32 = arith.constant 0 : i32
    %c0_i32_0 = arith.constant 0 : i32
    %c0_i32_1 = arith.constant 0 : i32
    return %c0_i32, %c0_i32_0 : i32, i32
  }
  func.func @transform_26(%arg0: i32, %arg1: i32) -> (i32, i32) {
    %c0_i32 = arith.constant 0 : i32
    %c0_i32_0 = arith.constant 0 : i32
    %c0_i32_1 = arith.constant 0 : i32
    return %c0_i32, %c0_i32_0 : i32, i32
  }
  func.func @transform_27(%arg0: i32, %arg1: i32) -> (i32, i32) {
    %c0_i32 = arith.constant 0 : i32
    %c0_i32_0 = arith.constant 0 : i32
    %c0_i32_1 = arith.constant 0 : i32
    return %c0_i32, %c0_i32_0 : i32, i32
  }
  func.func @transform_28(%arg0: i32, %arg1: i32) -> (i32, i32) {
    %c0_i32 = arith.constant 0 : i32
    %c0_i32_0 = arith.constant 0 : i32
    %c0_i32_1 = arith.constant 0 : i32
    return %c0_i32, %c0_i32_0 : i32, i32
  }
  func.func @transform_29(%arg0: i32, %arg1: i32) -> (i32, i32) {
    %c0_i32 = arith.constant 0 : i32
    %c0_i32_0 = arith.constant 0 : i32
    %c0_i32_1 = arith.constant 0 : i32
    return %c0_i32, %c0_i32_0 : i32, i32
  }
  func.func @transform_30(%arg0: i32, %arg1: i32) -> (i32, i32, i32) {
    %c0_i32 = arith.constant 0 : i32
    %c0_i32_0 = arith.constant 0 : i32
    return %arg0, %arg1, %c0_i32 : i32, i32, i32
  }
}

</mosaic_0001>

<bundles_post_ra>
// kernel: tpu_custom_call.1
= control target key start
LH: loop header
LB: loop body
LE: loop exit
PB: predicated region body
PF: predicated region fallthrough
CT: control target
= control target key end

     0   :  { %s9944_s6 = smov 1   ;;  %s9945_s10 = smov 2   ;;  %s11997_s0 = inlined_call_operand.smem [shape: u32[31], index: -1, kind: input, shape index: {}] }
   0x1   :  { %s10012_s5 = sld [smem:[%s11997_s0]]   ;;  %s9946_s14 = smov 3  }
   0x2   :  { %s10017_s9 = sld [smem:[%s11997_s0 + %s9944_s6]]   ;;  %s9947_s18 = smov 4  }
   0x3   :  { %s10022_s13 = sld [smem:[%s11997_s0 + %s9945_s10]]   ;;  %s9948_s22 = smov 5  }
   0x4   :  { %s10027_s17 = sld [smem:[%s11997_s0 + %s9946_s14]]   ;;  %s9949_s26 = smov 6  }
   0x5   :  { %s10032_s21 = sld [smem:[%s11997_s0 + %s9947_s18]]   ;;  %s9950_s30 = smov 7  }
   0x6   :  { %s10037_s25 = sld [smem:[%s11997_s0 + %s9948_s22]]   ;;  %s9951_s4 = smov 8  }
   0x7   :  { %12034 = sst [smem:[#allocation49_spill]] %s10012_s5  ;;  %s9952_s10 = smov 9  }
   0x8   :  { %12035 = sst [smem:[#allocation50_spill]] %s10017_s9  ;;  %s9953_s15 = smov 10  }
   0x9   :  { %s10042_s29 = sld [smem:[%s11997_s0 + %s9949_s26]]   ;;  %s9954_s20 = smov 11  }
   0xa   :  { %12036 = sst [smem:[#allocation51_spill]] %s10027_s17  ;;  %s9955_s26 = smov 12  }
   0xb   :  { %12037 = sst [smem:[#allocation52_spill]] %s10032_s21  ;;  %s9956_s1 = smov 13  }
   0xc   :  { %s10047_s3 = sld [smem:[%s11997_s0 + %s9950_s30]]   ;;  %s9957_s7 = smov 14  }
   0xd   :  { %s10052_s8 = sld [smem:[%s11997_s0 + %s9951_s4]]   ;;  %s9959_s22 = smov 16  }
   0xe   :  { %s10057_s14 = sld [smem:[%s11997_s0 + %s9952_s10]]   ;;  %s9960_s28 = smov 17  }
   0xf   :  { %12038 = sst [smem:[#allocation53_spill]] %s10042_s29 }
  0x10   :  { %s10062_s19 = sld [smem:[%s11997_s0 + %s9953_s15]]   ;;  %s9958_s15 = smov 15  }
  0x11   :  { %s10067_s24 = sld [smem:[%s11997_s0 + %s9954_s20]]  }
  0x12   :  { %12039 = sst [smem:[#allocation54_spill]] %s10047_s3 }
  0x13   :  { %12040 = sst [smem:[#allocation55_spill]] %s10052_s8 }
  0x14   :  { %12041 = sst [smem:[#allocation56_spill]] %s10057_s14 }
  0x15   :  { %s10072_s30 = sld [smem:[%s11997_s0 + %s9955_s26]]  }
  0x16   :  { %s10077_s6 = sld [smem:[%s11997_s0 + %s9956_s1]]  }
  0x17   :  { %s10082_s12 = sld [smem:[%s11997_s0 + %s9957_s7]]   ;;  %s9961_s7 = smov 18  }
  0x18   :  { %s10087_s20 = sld [smem:[%s11997_s0 + %s9958_s15]]   ;;  %s9962_s15 = smov 19  }
  0x19   :  { %s10092_s27 = sld [smem:[%s11997_s0 + %s9959_s22]]   ;;  %s9963_s22 = smov 20  }
  0x1a   :  { %s10097_s4 = sld [smem:[%s11997_s0 + %s9960_s28]]   ;;  %s9964_s28 = smov 21  }
  0x1b   :  { %s10102_s8 = sld [smem:[%s11997_s0 + %s9961_s7]]   ;;  %s9965_s7 = smov 22  }
  0x1c   :  { %12042 = sst [smem:[#allocation57_spill]] %s10077_s6 }
  0x1d   :  { %s10107_s14 = sld [smem:[%s11997_s0 + %s9962_s15]]   ;;  %s9966_s15 = smov 23  }
  0x1e   :  { %12043 = sst [smem:[#allocation58_spill]] %s10087_s20 }
  0x1f   :  { %s10112_s21 = sld [smem:[%s11997_s0 + %s9963_s22]]   ;;  %s9967_s22 = smov 24  }
  0x20   :  { %12044 = sst [smem:[#allocation59_spill]] %s10097_s4 }
  0x21   :  { %12045 = sst [smem:[#allocation60_spill]] %s10102_s8 }
  0x22   :  { %s10117_s9 = sld [smem:[%s11997_s0 + %s9964_s28]]   ;;  %s9968_s28 = smov 25  }
  0x23   :  { %12046 = sst [smem:[#allocation61_spill]] %s10107_s14 }
  0x24   :  { %s10122_s5 = sld [smem:[%s11997_s0 + %s9965_s7]]   ;;  %s9969_s7 = smov 26  }
  0x25   :  { %s10127_s14 = sld [smem:[%s11997_s0 + %s9966_s15]]   ;;  %s9970_s15 = smov 27  }
  0x26   :  { %s10132_s4 = sld [smem:[%s11997_s0 + %s9967_s22]]   ;;  %s9971_s22 = smov 28  }
  0x28   :  { %12047 = sst [smem:[#allocation62_spill]] %s10117_s9 }
  0x29   :  { %s10137_s9 = sld [smem:[%s11997_s0 + %s9968_s28]]   ;;  %s9972_s28 = smov 29  }
  0x2a   :  { %12048 = sst [smem:[#allocation63_spill]] %s10122_s5 }
  0x2b   :  { %12049 = sst [smem:[#allocation64_spill]] %s10127_s14 }
  0x2c   :  { %12050 = sst [smem:[#allocation65_spill]] %s10132_s4 }
  0x2d   :  { %s10142_s5 = sld [smem:[%s11997_s0 + %s9969_s7]]   ;;  %s9973_s7 = smov 30  }
  0x2e   :  { %s10147_s14 = sld [smem:[%s11997_s0 + %s9970_s15]]  }
  0x2f   :  { %s10152_s4 = sld [smem:[%s11997_s0 + %s9971_s22]]  }
  0x30   :  { %s10157_s20 = sld [smem:[%s11997_s0 + %s9972_s28]]  }
  0x33   :  { %12051 = sst [smem:[#allocation66_spill]] %s10142_s5 }
  0x34   :  { %s10162_s5 = sld [smem:[%s11997_s0 + %s9973_s7]]  }
  0x35   :  { %12052 = sst [smem:[#allocation67_spill]] %s10152_s4 }
  0x36   :  { %12053 = sst [smem:[#allocation68_spill]] %s10157_s20 }
  0x3a   :  { %12054 = sst [smem:[#allocation69_spill]] %s10162_s5 }
  0x3b   :  { %66 = vsyncpa [#allocation8], 0 }
  0x3c   :  { %67 = vsyncpa [#allocation11], 0 }
  0x3d   :  { %68 = vsyncpa [#allocation14], 0 }
  0x3e   :  { %69 = vsyncpa [#allocation17], 0 }
  0x3f   :  { %70 = vsyncpa [#allocation20], 0 }
  0x40   :  { %71 = vsyncpa [#allocation23], 0 }
  0x41   :  { %72 = vsyncpa [#allocation26], 0 }
  0x42   :  { %73 = vsyncpa [#allocation29], 0 }
  0x43   :  { %74 = vsyncpa [#allocation32], 0 }
  0x44   :  { %75 = vsyncpa [#allocation35], 0 }
  0x45   :  { %76 = vsyncpa [#allocation9], 0 }
  0x46   :  { %78 = vsyncpa [#allocation9 + $0x1], 0  ;;  %s10164_s15 = smov 0   ;;  %s10166_s16 = smov 0  }
  0x47   :  { %s10168_s18 = smov 0   ;;  %s10170_s0 = smov 0  }
  0x48   :  { %12055 = sst [smem:[#allocation70_spill]] %s10170_s0  ;;  %s10172_s22 = smov 0  }
  0x49   :  { %s10174_s23 = smov 0   ;;  %s10176_s26 = smov 0  }
  0x4a   :  { %s10178_s28 = smov 0  }
  0x4b LB: > { %s12057_s8 = sld [smem:[#allocation60_spill]]  ;;  %s12058_s6 = sld [smem:[#allocation57_spill]]  ;;  %s9930_s22 = sphi %s10172_s22, %s12124_s22   ;;  %s9922_s18 = sphi %s10168_s18, %s12129_s18   ;;  %s9918_s16 = sphi %s10166_s16, %s12128_s16   ;;  %s9914_s15 = sphi %s10164_s15, %s12127_s15   ;;  %s9942_s28 = sphi %s10178_s28, %s84_s28   ;;  %s9938_s26 = sphi %s10176_s26, %s12126_s26   ;;  %s9934_s23 = sphi %s10174_s23, %s12125_s23  }
  0x4c   : > { %s12059_s3 = sld [smem:[#allocation54_spill]]  ;;  %s12060_s29 = sld [smem:[#allocation53_spill]] }
  0x4d   : > { %s12061_s17 = sld [smem:[#allocation51_spill]]  ;;  %s12062_s0 = sld [smem:[#allocation70_spill]] }
  0x4e   : > { %12063 = sst [smem:[#allocation70_spill]] %s9914_s15  ;;  %s6936_s1 = sadd.s32 4294967295, %s9942_s28  }
  0x4f   : > { %12065 = sst [smem:[#allocation72_spill]] %s9934_s23  ;;  %s6937_s2 = sadd.s32 4294967294, %s9942_s28  }
  0x50   : > { %12066 = sst [smem:[#allocation73_spill]] %s9938_s26  ;;  %s93_s7 = sadd.s32 1, %s9934_s23 }
  0x51   : > { %s96_s10 = sadd.s32 1, %s9938_s26  ;;  %p94_p0 = scmp.ge.s32.totalorder %s93_s7, 2 }
  0x52   : > { %s745_s11 = sadd.s32 1, %s9922_s18  ;;  %p755_p1 = scmp.ne.s32.totalorder %s9922_s18, %s9918_s16 }
  0x53   : > { %12064 = sst [smem:[#allocation71_spill]] %s12062_s0  ;;  %p756_p2 = scmp.eq.s32.totalorder %s6936_s1, 3 }
  0x54   : > { %s12132_s7 = smov (%p94_p0, %s93_s7), 0  ;;  %s12134_s10 = smov (!%p94_p0, %s96_s10), %s9938_s26 }
  0x55   : > { %12067 = sst [smem:[#allocation74_spill]] %s12132_s7  ;;  %s741_s5 = ssub.s32 %s9934_s23, %s12132_s7 }
  0x56   : > { %p10216_p3 = por %p756_p2, %p755_p1  ;;  %p98_p4 = scmp.ge.s32.totalorder %s12134_s10, 2 }
  0x57   : > { %p761_p5 = scmp.ne.s32.totalorder %s9918_s16, %s9914_s15  ;;  %p762_p6 = scmp.eq.s32.totalorder %s6937_s2, 3 }
  0x58   : > { %s12068_s20 = scalar_select %p10216_p3, 1, 0 }
  0x59   : > { %p6938_p7 = scmp.ge.s32.totalorder %s9942_s28, 1  ;;  %s12136_s10 = smov (%p98_p4, %s12134_s10), 0 }
  0x5a   : > { %12069 = sst [smem:[#allocation75_spill]] %s12136_s10  ;;  %p10225_p8 = por %p762_p6, %p761_p5 }
  0x5b   : > { %p769_p9 = scmp.lt.s32.totalorder %s9942_s28, 5  ;;  %s740_s0 = ssub.s32 %s9938_s26, %s12136_s10 }
  0x5c   : > { %s12070_s4 = scalar_select %p10225_p8, 1, 0 }
  0x5d   : > { %s742_s7 = sor.u32 %s741_s5, %s740_s0  ;;  %p10232_p10 = pnand %p6938_p7, %p769_p9 }
  0x5e   : > { %12071 = sst [smem:[#allocation76_spill]] %s12070_s4  ;;  %p743_p11 = scmp.eq.s32.totalorder %s742_s7, 0 }
  0x5f   : > { %s12072_s23 = scalar_select %p10232_p10, 1, 0 }
  0x60   : > { %p10236_p12 = scmp.eq.s32.totalorder %s6936_s1, 0  ;;  %p8756_p13 = pneg %p10232_p10 }
  0x61   : > { %s10243_s15 = scalar_select %p743_p11, %s9922_s18, %s745_s11  }
  0x62   : > { %s12073_s2 = scalar_select %p10236_p12, 1, 0 }
  0x63   : > { %12074 = sst [smem:[#allocation77_spill]] %s10243_s15  ;;  %p10247_p0 = pnand %p10236_p12, %p8756_p13 }
  0x64   : > { %s9974_s5 = smov [#allocation10]   ;;  %s9975_s26 = smov [#allocation13]  }
  0x65   : > { %s793_s0 = sshll.u32 %s9974_s5, 4  ;;  %s818_s7 = sshll.u32 %s9975_s26, 4  ;;  %s794_s0 = int_to_ptr.vmem [resolvable:$true] %s793_s0  ;;  %s819_s7 = int_to_ptr.vmem [resolvable:$true] %s818_s7 }
  0x66   : > { %s9276_s1 = scalar_lea.hbm %s12061_s17, 16  ;;  %p10255_p2 = pneg %p10247_p0 }
  0x67   : > { %p9277_p1 = scmp.ne.s32.totalorder %s12061_s17, %s9276_s1  ;;  %p9283_p6 = scmp.lt.u32.totalorder %s9276_s1, %s12061_s17 }
  0x69   : > { %p9279_p4 = pnand %p10255_p2, %p9277_p1 }
  0x6b   : > { %p9280_p5 = pneg %p9279_p4 }
  0x6d   : > { %p9285_p7 = pnand %p9283_p6, %p9280_p5 }
  0x6f   : > { %9288 = shalt.err (!%p9285_p7)
}
  0x70   : > { %s9289_s11 = scalar_lea.vmem %s794_s0, 16  ;;  %s9296_s26 = scalar_lea.vmem %s794_s0, 32 }
  0x71   : > { %p9290_p9 = scmp.ne.s32.totalorder %s794_s0, %s9289_s11  ;;  %p9297_p8 = scmp.lt.s32.totalorder %s794_s0, %s794_s0 }
  0x72   : > { %p9298_p3 = scmp.lt.s32.totalorder %s9296_s26, %s9289_s11 }
  0x73   : > { %p9292_p11 = pnand %p9290_p9, %p10255_p2 }
  0x74   : > { %p9299_p12 = por %p9298_p3, %p9297_p8 }
  0x75   : > { %p9293_p13 = pneg %p9292_p11 }
  0x77   : > { %p9300_p10 = pnand %p9299_p12, %p9293_p13 }
  0x79   : > { %9303 = shalt.err (!%p9300_p10)
}
  0x7a   : > { %8762 = dma.hbm_to_vmem [thread:$0]  (!%p10247_p0), %s12061_s17, 16, %s794_s0, [#allocation11]  }
  0x7b   : > { %s9304_s5 = scalar_lea.hbm %s12060_s29, 16 }
  0x7c   : > { %p9305_p1 = scmp.ne.s32.totalorder %s12060_s29, %s9304_s5  ;;  %p9311_p6 = scmp.lt.u32.totalorder %s9304_s5, %s12060_s29 }
  0x7e   : > { %p9307_p4 = pnand %p9305_p1, %p10255_p2 }
  0x80   : > { %p9308_p5 = pneg %p9307_p4 }
  0x82   : > { %p9313_p7 = pnand %p9311_p6, %p9308_p5 }
  0x84   : > { %9316 = shalt.err (!%p9313_p7)
}
  0x85   : > { %s9317_s1 = scalar_lea.vmem %s819_s7, 16  ;;  %s9324_s11 = scalar_lea.vmem %s819_s7, 32 }
  0x86   : > { %p9318_p3 = scmp.ne.s32.totalorder %s819_s7, %s9317_s1  ;;  %p9325_p12 = scmp.lt.s32.totalorder %s819_s7, %s819_s7 }
  0x87   : > { %p9326_p9 = scmp.lt.s32.totalorder %s9324_s11, %s9317_s1 }
  0x88   : > { %p9320_p8 = pnand %p9318_p3, %p10255_p2 }
  0x89   : > { %p9327_p11 = por %p9326_p9, %p9325_p12 }
  0x8a   : > { %p9321_p10 = pneg %p9320_p8 }
  0x8c   : > { %p9328_p13 = pnand %p9327_p11, %p9321_p10 }
  0x8e   : > { %9331 = shalt.err (!%p9328_p13)
}
  0x8f   : > { %8768 = dma.hbm_to_vmem [thread:$0]  (!%p10247_p0), %s12060_s29, 16, %s819_s7, [#allocation14]  }
  0x90   : > { %s9976_s0 = smov [#allocation16]   ;;  %s9332_s5 = scalar_lea.hbm %s10062_s19, 512 }
  0x91   : > { %s845_s26 = sshll.u32 %s9976_s0, 4  ;;  %p9333_p1 = scmp.ne.s32.totalorder %s10062_s19, %s9332_s5  ;;  %s846_s26 = int_to_ptr.vmem [resolvable:$true] %s845_s26 }
  0x92   : > { %p9339_p6 = scmp.lt.u32.totalorder %s9332_s5, %s10062_s19 }
  0x93   : > { %p9335_p4 = pnand %p9333_p1, %p10255_p2 }
  0x95   : > { %p9336_p5 = pneg %p9335_p4 }
  0x97   : > { %p9341_p7 = pnand %p9339_p6, %p9336_p5 }
  0x99   : > { %9344 = shalt.err (!%p9341_p7)
}
  0x9a   : > { %s9345_s1 = scalar_lea.vmem %s846_s26, 512  ;;  %p9353_p12 = scmp.lt.s32.totalorder %s846_s26, %s846_s26 }
  0x9b   : > { %p9346_p3 = scmp.ne.s32.totalorder %s846_s26, %s9345_s1  ;;  %p9354_p9 = scmp.lt.s32.totalorder %s9345_s1, %s9345_s1 }
  0x9d   : > { %p9348_p8 = pnand %p9346_p3, %p10255_p2  ;;  %p9355_p11 = por %p9354_p9, %p9353_p12 }
  0x9f   : > { %p9349_p10 = pneg %p9348_p8 }
  0xa1   : > { %p9356_p13 = pnand %p9355_p11, %p9349_p10 }
  0xa3   : > { %9359 = shalt.err (!%p9356_p13)
}
  0xa4   : > { %s9977_s7 = smov 64   ;;  %s9978_s11 = smov 4  }
  0xa5   : > { %8774 = dma.hbm_to_vmem [thread:$0]  (!%p10247_p0), %s10062_s19, 512, %s846_s26, [#allocation17], %s9977_s7, %s9977_s7, %s9978_s11  }
  0xa6   : > { %s9979_s0 = smov [#allocation19]   ;;  %s9980_s17 = smov [#allocation22]  }
  0xa7   : > { %s872_s5 = sshll.u32 %s9979_s0, 4  ;;  %s894_s1 = sshll.u32 %s9980_s17, 4  ;;  %s873_s5 = int_to_ptr.vmem [resolvable:$true] %s872_s5  ;;  %s10290_s1 = int_to_ptr.vmem [resolvable:$true] %s894_s1 }
  0xa8   : > { %s9360_s29 = scalar_lea.hbm %s10072_s30, 16 }
  0xa9   : > { %p9361_p1 = scmp.ne.s32.totalorder %s10072_s30, %s9360_s29  ;;  %p9367_p6 = scmp.lt.u32.totalorder %s9360_s29, %s10072_s30 }
  0xab   : > { %p9363_p4 = pnand %p9361_p1, %p10255_p2 }
  0xad   : > { %p9364_p5 = pneg %p9363_p4 }
  0xaf   : > { %p9369_p7 = pnand %p9367_p6, %p9364_p5 }
  0xb1   : > { %9372 = shalt.err (!%p9369_p7)
}
  0xb2   : > { %s9373_s15 = scalar_lea.vmem %s873_s5, 16  ;;  %s9380_s26 = scalar_lea.vmem %s873_s5, 32 }
  0xb3   : > { %p9374_p3 = scmp.ne.s32.totalorder %s873_s5, %s9373_s15  ;;  %p9381_p12 = scmp.lt.s32.totalorder %s873_s5, %s873_s5 }
  0xb4   : > { %p9382_p9 = scmp.lt.s32.totalorder %s9380_s26, %s9373_s15 }
  0xb5   : > { %p9376_p8 = pnand %p9374_p3, %p10255_p2 }
  0xb6   : > { %p9383_p11 = por %p9382_p9, %p9381_p12 }
  0xb7   : > { %p9377_p10 = pneg %p9376_p8 }
  0xb9   : > { %p9384_p13 = pnand %p9383_p11, %p9377_p10 }
  0xbb   : > { %9387 = shalt.err (!%p9384_p13)
}
  0xbc   : > { %8780 = dma.hbm_to_vmem [thread:$0]  (!%p10247_p0), %s10072_s30, 16, %s873_s5, [#allocation20]  }
  0xbd   : > { %s9388_s17 = scalar_lea.hbm %s10082_s12, 16 }
  0xbe   : > { %p9389_p1 = scmp.ne.s32.totalorder %s10082_s12, %s9388_s17  ;;  %p9395_p6 = scmp.lt.u32.totalorder %s9388_s17, %s10082_s12 }
  0xc0   : > { %p9391_p4 = pnand %p9389_p1, %p10255_p2 }
  0xc2   : > { %p9392_p5 = pneg %p9391_p4 }
  0xc4   : > { %p9397_p7 = pnand %p9395_p6, %p9392_p5 }
  0xc6   : > { %9400 = shalt.err (!%p9397_p7)
}
  0xc7   : > { %s9401_s29 = scalar_lea.vmem %s10290_s1, 16  ;;  %s9408_s15 = scalar_lea.vmem %s10290_s1, 32 }
  0xc8   : > { %p9402_p3 = scmp.ne.s32.totalorder %s10290_s1, %s9401_s29  ;;  %p9409_p12 = scmp.lt.s32.totalorder %s10290_s1, %s10290_s1 }
  0xc9   : > { %p9410_p9 = scmp.lt.s32.totalorder %s9408_s15, %s9401_s29 }
  0xca   : > { %p9404_p8 = pnand %p9402_p3, %p10255_p2 }
  0xcb   : > { %p9411_p11 = por %p9410_p9, %p9409_p12 }
  0xcc   : > { %p9405_p10 = pneg %p9404_p8 }
  0xce   : > { %p9412_p13 = pnand %p9411_p11, %p9405_p10 }
  0xd0   : > { %9415 = shalt.err (!%p9412_p13)
}
  0xd1   : > { %8786 = dma.hbm_to_vmem [thread:$0]  (!%p10247_p0), %s10082_s12, 16, %s10290_s1, [#allocation23]  }
  0xd2   : > { %s9981_s0 = smov [#allocation25]   ;;  %s9982_s26 = smov [#allocation28]  }
  0xd3   : > { %s917_s5 = sshll.u32 %s9981_s0, 4  ;;  %s943_s17 = sshll.u32 %s9982_s26, 4  ;;  %s918_s5 = int_to_ptr.vmem [resolvable:$true] %s917_s5  ;;  %s10318_s17 = int_to_ptr.vmem [resolvable:$true] %s943_s17 }
  0xd4   : > { %s9416_s29 = scalar_lea.hbm %s10092_s27, 512 }
  0xd5   : > { %p9417_p1 = scmp.ne.s32.totalorder %s10092_s27, %s9416_s29  ;;  %p9423_p6 = scmp.lt.u32.totalorder %s9416_s29, %s10092_s27 }
  0xd7   : > { %p9419_p4 = pnand %p9417_p1, %p10255_p2 }
  0xd9   : > { %p9420_p5 = pneg %p9419_p4 }
  0xdb   : > { %p9425_p7 = pnand %p9423_p6, %p9420_p5 }
  0xdd   : > { %9428 = shalt.err (!%p9425_p7)
}
  0xde   : > { %s9429_s15 = scalar_lea.vmem %s918_s5, 512  ;;  %p9437_p12 = scmp.lt.s32.totalorder %s918_s5, %s918_s5 }
  0xdf   : > { %p9430_p3 = scmp.ne.s32.totalorder %s918_s5, %s9429_s15  ;;  %p9438_p9 = scmp.lt.s32.totalorder %s9429_s15, %s9429_s15 }
  0xe1   : > { %p9432_p8 = pnand %p9430_p3, %p10255_p2  ;;  %p9439_p11 = por %p9438_p9, %p9437_p12 }
  0xe3   : > { %p9433_p10 = pneg %p9432_p8 }
  0xe5   : > { %p9440_p13 = pnand %p9439_p11, %p9433_p10 }
  0xe7   : > { %9443 = shalt.err (!%p9440_p13)
}
  0xe8   : > { %8792 = dma.hbm_to_vmem [thread:$0]  (!%p10247_p0), %s10092_s27, 512, %s918_s5, [#allocation26], %s9977_s7, %s9977_s7, %s9978_s11  }
  0xe9   : > { %s9444_s1 = scalar_lea.hbm %s12057_s8, 512 }
  0xea   : > { %p9445_p1 = scmp.ne.s32.totalorder %s12057_s8, %s9444_s1  ;;  %p9451_p6 = scmp.lt.u32.totalorder %s9444_s1, %s12057_s8 }
  0xec   : > { %p9447_p4 = pnand %p9445_p1, %p10255_p2 }
  0xee   : > { %p9448_p5 = pneg %p9447_p4 }
  0xf0   : > { %p9453_p7 = pnand %p9451_p6, %p9448_p5 }
  0xf2   : > { %9456 = shalt.err (!%p9453_p7)
}
  0xf3   : > { %s9457_s0 = scalar_lea.vmem %s10318_s17, 512  ;;  %p9465_p12 = scmp.lt.s32.totalorder %s10318_s17, %s10318_s17 }
  0xf4   : > { %p9458_p3 = scmp.ne.s32.totalorder %s10318_s17, %s9457_s0  ;;  %p9466_p9 = scmp.lt.s32.totalorder %s9457_s0, %s9457_s0 }
  0xf6   : > { %p9460_p8 = pnand %p9458_p3, %p10255_p2  ;;  %p9467_p11 = por %p9466_p9, %p9465_p12 }
  0xf8   : > { %p9461_p10 = pneg %p9460_p8 }
  0xfa   : > { %p9468_p13 = pnand %p9467_p11, %p9461_p10 }
  0xfc   : > { %9471 = shalt.err (!%p9468_p13)
}
  0xfd   : > { %8798 = dma.hbm_to_vmem [thread:$0]  (!%p10247_p0), %s12057_s8, 512, %s10318_s17, [#allocation29], %s9977_s7, %s9977_s7, %s9978_s11  }
  0xfe   : > { %s9983_s5 = smov [#allocation31]   ;;  %s9984_s29 = smov [#allocation34]  }
  0xff   : > { %s968_s26 = sshll.u32 %s9983_s5, 4  ;;  %s999_s15 = sshll.u32 %s9984_s29, 4  ;;  %s969_s26 = int_to_ptr.vmem [resolvable:$true] %s968_s26  ;;  %s10351_s15 = int_to_ptr.vmem [resolvable:$true] %s999_s15 }
 0x100   : > { %s9472_s1 = scalar_lea.hbm %s10112_s21, 16 }
 0x101   : > { %p9473_p1 = scmp.ne.s32.totalorder %s10112_s21, %s9472_s1  ;;  %p9479_p6 = scmp.lt.u32.totalorder %s9472_s1, %s10112_s21 }
 0x103   : > { %p9475_p4 = pnand %p9473_p1, %p10255_p2 }
 0x105   : > { %p9476_p5 = pneg %p9475_p4 }
 0x107   : > { %p9481_p7 = pnand %p9479_p6, %p9476_p5 }
 0x109   : > { %9484 = shalt.err (!%p9481_p7)
}
 0x10a   : > { %s9485_s0 = scalar_lea.vmem %s969_s26, 16  ;;  %s9492_s17 = scalar_lea.vmem %s969_s26, 32 }
 0x10b   : > { %p9486_p3 = scmp.ne.s32.totalorder %s969_s26, %s9485_s0  ;;  %p9493_p12 = scmp.lt.s32.totalorder %s969_s26, %s969_s26 }
 0x10c   : > { %p9494_p9 = scmp.lt.s32.totalorder %s9492_s17, %s9485_s0 }
 0x10d   : > { %p9488_p8 = pnand %p9486_p3, %p10255_p2 }
 0x10e   : > { %p9495_p11 = por %p9494_p9, %p9493_p12 }
 0x10f   : > { %p9489_p10 = pneg %p9488_p8 }
 0x111   : > { %p9496_p13 = pnand %p9495_p11, %p9489_p10 }
 0x113   : > { %9499 = shalt.err (!%p9496_p13)
}
 0x114   : > { %8804 = dma.hbm_to_vmem [thread:$0]  (!%p10247_p0), %s10112_s21, 16, %s969_s26, [#allocation32]  }
 0x115   : > { %s9500_s5 = scalar_lea.hbm %s10137_s9, 32 }
 0x116   : > { %p9501_p1 = scmp.ne.s32.totalorder %s10137_s9, %s9500_s5  ;;  %p9507_p6 = scmp.lt.u32.totalorder %s9500_s5, %s10137_s9 }
 0x118   : > { %p9503_p4 = pnand %p9501_p1, %p10255_p2 }
 0x11a   : > { %p9504_p5 = pneg %p9503_p4 }
 0x11c   : > { %p9509_p7 = pnand %p9507_p6, %p9504_p5 }
 0x11e   : > { %9512 = shalt.err (!%p9509_p7)
}
 0x11f   : > { %s9513_s29 = scalar_lea.vmem %s10351_s15, 32  ;;  %p9521_p12 = scmp.lt.s32.totalorder %s10351_s15, %s10351_s15 }
 0x120   : > { %p9514_p3 = scmp.ne.s32.totalorder %s10351_s15, %s9513_s29  ;;  %p9522_p9 = scmp.lt.s32.totalorder %s9513_s29, %s9513_s29 }
 0x122   : > { %p9516_p8 = pnand %p9514_p3, %p10255_p2  ;;  %p9523_p11 = por %p9522_p9, %p9521_p12 }
 0x124   : > { %p9517_p10 = pneg %p9516_p8 }
 0x126   : > { %p9524_p13 = pnand %p9523_p11, %p9517_p10 }
 0x128   : > { %9527 = shalt.err (!%p9524_p13)
}
 0x129   : > { %8810 = dma.hbm_to_vmem [thread:$0]  (!%p10247_p0), %s10137_s9, 32, %s10351_s15, [#allocation35]  }
 0x12a   : > { %s9985_s26 = smov [#allocation7]   ;;  %s9986_s0 = smov [#allocation12]  }
 0x12b   : > { %s782_s1 = sshll.u32 %s9985_s26, 4  ;;  %s807_s17 = sshll.u32 %s9986_s0, 4  ;;  %s783_s1 = int_to_ptr.vmem [resolvable:$true] %s782_s1  ;;  %s10378_s17 = int_to_ptr.vmem [resolvable:$true] %s807_s17 }
 0x12c   : > { %s9528_s5 = scalar_lea.hbm %s10022_s13, 16 }
 0x12d   : > { %p9529_p1 = scmp.ne.s32.totalorder %s10022_s13, %s9528_s5  ;;  %p9535_p6 = scmp.lt.u32.totalorder %s9528_s5, %s10022_s13 }
 0x12f   : > { %p9531_p4 = pnand %p9529_p1, %p10255_p2 }
 0x131   : > { %p9532_p5 = pneg %p9531_p4 }
 0x133   : > { %p9537_p7 = pnand %p9535_p6, %p9532_p5 }
 0x135   : > { %9540 = shalt.err (!%p9537_p7)
}
 0x136   : > { %s9541_s29 = scalar_lea.vmem %s783_s1, 16  ;;  %s9548_s15 = scalar_lea.vmem %s783_s1, 32 }
 0x137   : > { %p9542_p3 = scmp.ne.s32.totalorder %s783_s1, %s9541_s29  ;;  %p9549_p12 = scmp.lt.s32.totalorder %s783_s1, %s783_s1 }
 0x138   : > { %p9550_p9 = scmp.lt.s32.totalorder %s9548_s15, %s9541_s29 }
 0x139   : > { %p9544_p8 = pnand %p9542_p3, %p10255_p2 }
 0x13a   : > { %p9551_p11 = por %p9550_p9, %p9549_p12 }
 0x13b   : > { %p9545_p10 = pneg %p9544_p8 }
 0x13d   : > { %p9552_p13 = pnand %p9551_p11, %p9545_p10 }
 0x13f   : > { %9555 = shalt.err (!%p9552_p13)
}
 0x140   : > { %8759 = dma.hbm_to_vmem [thread:$0]  (!%p10247_p0), %s10022_s13, 16, %s783_s1, [#allocation8]  }
 0x141   : > { %s9556_s26 = scalar_lea.hbm %s10037_s25, 16 }
 0x142   : > { %p9557_p1 = scmp.ne.s32.totalorder %s10037_s25, %s9556_s26  ;;  %p9563_p6 = scmp.lt.u32.totalorder %s9556_s26, %s10037_s25 }
 0x144   : > { %p9559_p4 = pnand %p9557_p1, %p10255_p2 }
 0x146   : > { %p9560_p5 = pneg %p9559_p4 }
 0x148   : > { %p9565_p7 = pnand %p9563_p6, %p9560_p5 }
 0x14a   : > { %9568 = shalt.err (!%p9565_p7)
}
 0x14b   : > { %s9569_s0 = scalar_lea.vmem %s10378_s17, 16  ;;  %s9576_s5 = scalar_lea.vmem %s10378_s17, 32 }
 0x14c   : > { %p9570_p3 = scmp.ne.s32.totalorder %s10378_s17, %s9569_s0  ;;  %p9577_p12 = scmp.lt.s32.totalorder %s10378_s17, %s10378_s17 }
 0x14d   : > { %p9578_p9 = scmp.lt.s32.totalorder %s9576_s5, %s9569_s0 }
 0x14e   : > { %p9572_p8 = pnand %p9570_p3, %p10255_p2 }
 0x14f   : > { %p9579_p11 = por %p9578_p9, %p9577_p12 }
 0x150   : > { %p9573_p10 = pneg %p9572_p8 }
 0x152   : > { %p9580_p13 = pnand %p9579_p11, %p9573_p10 }
 0x154   : > { %9583 = shalt.err (!%p9580_p13)
}
 0x155   : > { %8765 = dma.hbm_to_vmem [thread:$0]  (!%p10247_p0), %s10037_s25, 16, %s10378_s17, [#allocation11]  }
 0x156   : > { %s9987_s1 = smov [#allocation15]   ;;  %s9988_s15 = smov [#allocation18]  }
 0x157   : > { %s829_s29 = sshll.u32 %s9987_s1, 4  ;;  %s858_s26 = sshll.u32 %s9988_s15, 4  ;;  %s830_s29 = int_to_ptr.vmem [resolvable:$true] %s829_s29  ;;  %s10406_s26 = int_to_ptr.vmem [resolvable:$true] %s858_s26 }
 0x158   : > { %s9584_s0 = scalar_lea.hbm %s12059_s3, 16 }
 0x159   : > { %p9585_p1 = scmp.ne.s32.totalorder %s12059_s3, %s9584_s0  ;;  %p9591_p6 = scmp.lt.u32.totalorder %s9584_s0, %s12059_s3 }
 0x15b   : > { %p9587_p4 = pnand %p9585_p1, %p10255_p2 }
 0x15d   : > { %p9588_p5 = pneg %p9587_p4 }
 0x15f   : > { %p9593_p7 = pnand %p9591_p6, %p9588_p5 }
 0x161   : > { %9596 = shalt.err (!%p9593_p7)
}
 0x162   : > { %s9597_s5 = scalar_lea.vmem %s830_s29, 16  ;;  %s9604_s17 = scalar_lea.vmem %s830_s29, 32 }
 0x163   : > { %p9598_p3 = scmp.ne.s32.totalorder %s830_s29, %s9597_s5  ;;  %p9605_p12 = scmp.lt.s32.totalorder %s830_s29, %s830_s29 }
 0x164   : > { %p9606_p9 = scmp.lt.s32.totalorder %s9604_s17, %s9597_s5 }
 0x165   : > { %p9600_p8 = pnand %p9598_p3, %p10255_p2 }
 0x166   : > { %p9607_p11 = por %p9606_p9, %p9605_p12 }
 0x167   : > { %p9601_p10 = pneg %p9600_p8 }
 0x169   : > { %p9608_p13 = pnand %p9607_p11, %p9601_p10 }
 0x16b   : > { %9611 = shalt.err (!%p9608_p13)
}
 0x16c   : > { %8771 = dma.hbm_to_vmem [thread:$0]  (!%p10247_p0), %s12059_s3, 16, %s830_s29, [#allocation14]  }
 0x16d   : > { %s9612_s1 = scalar_lea.hbm %s10067_s24, 512 }
 0x16e   : > { %p9613_p1 = scmp.ne.s32.totalorder %s10067_s24, %s9612_s1  ;;  %p9619_p6 = scmp.lt.u32.totalorder %s9612_s1, %s10067_s24 }
 0x170   : > { %p9615_p4 = pnand %p9613_p1, %p10255_p2 }
 0x172   : > { %p9616_p5 = pneg %p9615_p4 }
 0x174   : > { %p9621_p7 = pnand %p9619_p6, %p9616_p5 }
 0x176   : > { %9624 = shalt.err (!%p9621_p7)
}
 0x177   : > { %s9625_s15 = scalar_lea.vmem %s10406_s26, 512  ;;  %p9633_p12 = scmp.lt.s32.totalorder %s10406_s26, %s10406_s26 }
 0x178   : > { %p9626_p3 = scmp.ne.s32.totalorder %s10406_s26, %s9625_s15  ;;  %p9634_p9 = scmp.lt.s32.totalorder %s9625_s15, %s9625_s15 }
 0x17a   : > { %p9628_p8 = pnand %p9626_p3, %p10255_p2  ;;  %p9635_p11 = por %p9634_p9, %p9633_p12 }
 0x17c   : > { %p9629_p10 = pneg %p9628_p8 }
 0x17e   : > { %p9636_p13 = pnand %p9635_p11, %p9629_p10 }
 0x180   : > { %9639 = shalt.err (!%p9636_p13)
}
 0x181   : > { %8777 = dma.hbm_to_vmem [thread:$0]  (!%p10247_p0), %s10067_s24, 512, %s10406_s26, [#allocation17], %s9977_s7, %s9977_s7, %s9978_s11  }
 0x182   : > { %s9989_s29 = smov [#allocation21]   ;;  %s9990_s5 = smov [#allocation24]  }
 0x183   : > { %s883_s0 = sshll.u32 %s9989_s29, 4  ;;  %s904_s17 = sshll.u32 %s9990_s5, 4  ;;  %s884_s0 = int_to_ptr.vmem [resolvable:$true] %s883_s0  ;;  %s10436_s17 = int_to_ptr.vmem [resolvable:$true] %s904_s17 }
 0x184   : > { %s9640_s1 = scalar_lea.hbm %s12058_s6, 16 }
 0x185   : > { %p9641_p1 = scmp.ne.s32.totalorder %s12058_s6, %s9640_s1  ;;  %p9647_p6 = scmp.lt.u32.totalorder %s9640_s1, %s12058_s6 }
 0x187   : > { %p9643_p4 = pnand %p9641_p1, %p10255_p2 }
 0x189   : > { %p9644_p5 = pneg %p9643_p4 }
 0x18b   : > { %p9649_p7 = pnand %p9647_p6, %p9644_p5 }
 0x18d   : > { %9652 = shalt.err (!%p9649_p7)
}
 0x18e   : > { %s9653_s15 = scalar_lea.vmem %s884_s0, 16  ;;  %s9660_s26 = scalar_lea.vmem %s884_s0, 32 }
 0x18f   : > { %p9654_p3 = scmp.ne.s32.totalorder %s884_s0, %s9653_s15  ;;  %p9661_p12 = scmp.lt.s32.totalorder %s884_s0, %s884_s0 }
 0x190   : > { %p9662_p9 = scmp.lt.s32.totalorder %s9660_s26, %s9653_s15 }
 0x191   : > { %p9656_p8 = pnand %p9654_p3, %p10255_p2 }
 0x192   : > { %p9663_p11 = por %p9662_p9, %p9661_p12 }
 0x193   : > { %p9657_p10 = pneg %p9656_p8 }
 0x195   : > { %p9664_p13 = pnand %p9663_p11, %p9657_p10 }
 0x197   : > { %9667 = shalt.err (!%p9664_p13)
}
 0x198   : > { %s12077_s29 = sld [smem:[#allocation58_spill]] }
 0x199   : > { %8783 = dma.hbm_to_vmem [thread:$0]  (!%p10247_p0), %s12058_s6, 16, %s884_s0, [#allocation20]  }
 0x19e   : > { %s9668_s5 = scalar_lea.hbm %s12077_s29, 512 }
 0x19f   : > { %p9669_p1 = scmp.ne.s32.totalorder %s12077_s29, %s9668_s5  ;;  %p9675_p6 = scmp.lt.u32.totalorder %s9668_s5, %s12077_s29 }
 0x1a1   : > { %p9671_p4 = pnand %p9669_p1, %p10255_p2 }
 0x1a3   : > { %p9672_p5 = pneg %p9671_p4 }
 0x1a5   : > { %p9677_p7 = pnand %p9675_p6, %p9672_p5 }
 0x1a7   : > { %9680 = shalt.err (!%p9677_p7)
}
 0x1a8   : > { %s9681_s1 = scalar_lea.vmem %s10436_s17, 512  ;;  %p9689_p12 = scmp.lt.s32.totalorder %s10436_s17, %s10436_s17 }
 0x1a9   : > { %p9682_p3 = scmp.ne.s32.totalorder %s10436_s17, %s9681_s1  ;;  %p9690_p9 = scmp.lt.s32.totalorder %s9681_s1, %s9681_s1 }
 0x1ab   : > { %p9684_p8 = pnand %p9682_p3, %p10255_p2  ;;  %p9691_p11 = por %p9690_p9, %p9689_p12 }
 0x1ad   : > { %p9685_p10 = pneg %p9684_p8 }
 0x1af   : > { %p9692_p13 = pnand %p9691_p11, %p9685_p10 }
 0x1b1   : > { %9695 = shalt.err (!%p9692_p13)
}
 0x1b2   : > { %s12078_s0 = sld [smem:[#allocation59_spill]]  ;;  %s9991_s15 = smov [#allocation27]  }
 0x1b3   : > { %8789 = dma.hbm_to_vmem [thread:$0]  (!%p10247_p0), %s12077_s29, 512, %s10436_s17, [#allocation23], %s9977_s7, %s9977_s7, %s9978_s11  }
 0x1b4   : > { %s930_s26 = sshll.u32 %s9991_s15, 4  ;;  %s9992_s3 = smov [#allocation30]   ;;  %s931_s26 = int_to_ptr.vmem [resolvable:$true] %s930_s26 }
 0x1b5   : > { %s957_s6 = sshll.u32 %s9992_s3, 4  ;;  %s10466_s6 = int_to_ptr.vmem [resolvable:$true] %s957_s6 }
 0x1b8   : > { %s12079_s5 = smov %s12078_s0  ;;  %s9696_s1 = scalar_lea.hbm %s12078_s0, 512 }
 0x1b9   : > { %p9697_p1 = scmp.ne.s32.totalorder %s12079_s5, %s9696_s1  ;;  %p9703_p6 = scmp.lt.u32.totalorder %s9696_s1, %s12079_s5 }
 0x1bb   : > { %p9699_p4 = pnand %p9697_p1, %p10255_p2 }
 0x1bd   : > { %p9700_p5 = pneg %p9699_p4 }
 0x1bf   : > { %p9705_p7 = pnand %p9703_p6, %p9700_p5 }
 0x1c1   : > { %9708 = shalt.err (!%p9705_p7)
}
 0x1c2   : > { %s9709_s8 = scalar_lea.vmem %s931_s26, 512  ;;  %p9717_p12 = scmp.lt.s32.totalorder %s931_s26, %s931_s26 }
 0x1c3   : > { %p9710_p3 = scmp.ne.s32.totalorder %s931_s26, %s9709_s8  ;;  %p9718_p9 = scmp.lt.s32.totalorder %s9709_s8, %s9709_s8 }
 0x1c5   : > { %p9712_p8 = pnand %p9710_p3, %p10255_p2  ;;  %p9719_p11 = por %p9718_p9, %p9717_p12 }
 0x1c7   : > { %p9713_p10 = pneg %p9712_p8 }
 0x1c9   : > { %p9720_p13 = pnand %p9719_p11, %p9713_p10 }
 0x1cb   : > { %9723 = shalt.err (!%p9720_p13)
}
 0x1cc   : > { %s12080_s3 = sld [smem:[#allocation61_spill]] }
 0x1cd   : > { %8795 = dma.hbm_to_vmem [thread:$0]  (!%p10247_p0), %s12079_s5, 512, %s931_s26, [#allocation26], %s9977_s7, %s9977_s7, %s9978_s11  }
 0x1d2   : > { %s9724_s17 = scalar_lea.hbm %s12080_s3, 16 }
 0x1d3   : > { %p9725_p1 = scmp.ne.s32.totalorder %s12080_s3, %s9724_s17  ;;  %p9731_p6 = scmp.lt.u32.totalorder %s9724_s17, %s12080_s3 }
 0x1d5   : > { %p9727_p4 = pnand %p9725_p1, %p10255_p2 }
 0x1d7   : > { %p9728_p5 = pneg %p9727_p4 }
 0x1d9   : > { %p9733_p7 = pnand %p9731_p6, %p9728_p5 }
 0x1db   : > { %9736 = shalt.err (!%p9733_p7)
}
 0x1dc   : > { %s9737_s8 = scalar_lea.vmem %s10466_s6, 16  ;;  %s9744_s0 = scalar_lea.vmem %s10466_s6, 32 }
 0x1dd   : > { %p9738_p3 = scmp.ne.s32.totalorder %s10466_s6, %s9737_s8  ;;  %p9745_p12 = scmp.lt.s32.totalorder %s10466_s6, %s10466_s6 }
 0x1de   : > { %p9746_p9 = scmp.lt.s32.totalorder %s9744_s0, %s9737_s8 }
 0x1df   : > { %p9740_p8 = pnand %p9738_p3, %p10255_p2 }
 0x1e0   : > { %p9747_p11 = por %p9746_p9, %p9745_p12 }
 0x1e1   : > { %p9741_p10 = pneg %p9740_p8 }
 0x1e3   : > { %p9748_p13 = pnand %p9747_p11, %p9741_p10 }
 0x1e5   : > { %9751 = shalt.err (!%p9748_p13)
}
 0x1e6   : > { %s12081_s7 = sld [smem:[#allocation62_spill]]  ;;  %s9993_s11 = smov [#allocation33]  }
 0x1e7   : > { %8801 = dma.hbm_to_vmem [thread:$0]  (!%p10247_p0), %s12080_s3, 16, %s10466_s6, [#allocation29]  }
 0x1e8   : > { %s979_s15 = sshll.u32 %s9993_s11, 4  ;;  %s9994_s26 = smov [#allocation36]   ;;  %s980_s15 = int_to_ptr.vmem [resolvable:$true] %s979_s15 }
 0x1e9   : > { %s1013_s1 = sshll.u32 %s9994_s26, 4  ;;  %s10497_s1 = int_to_ptr.vmem [resolvable:$true] %s1013_s1 }
 0x1ec   : > { %s9752_s17 = scalar_lea.hbm %s12081_s7, 16 }
 0x1ed   : > { %p9753_p1 = scmp.ne.s32.totalorder %s12081_s7, %s9752_s17  ;;  %p9759_p6 = scmp.lt.u32.totalorder %s9752_s17, %s12081_s7 }
 0x1ef   : > { %p9755_p4 = pnand %p9753_p1, %p10255_p2 }
 0x1f1   : > { %p9756_p5 = pneg %p9755_p4 }
 0x1f3   : > { %p9761_p7 = pnand %p9759_p6, %p9756_p5 }
 0x1f5   : > { %9764 = shalt.err (!%p9761_p7)
}
 0x1f6   : > { %s9765_s8 = scalar_lea.vmem %s980_s15, 16  ;;  %s9772_s6 = scalar_lea.vmem %s980_s15, 32 }
 0x1f7   : > { %p9766_p3 = scmp.ne.s32.totalorder %s980_s15, %s9765_s8  ;;  %p9773_p12 = scmp.lt.s32.totalorder %s980_s15, %s980_s15 }
 0x1f8   : > { %p9774_p9 = scmp.lt.s32.totalorder %s9772_s6, %s9765_s8 }
 0x1f9   : > { %p9768_p8 = pnand %p9766_p3, %p10255_p2 }
 0x1fa   : > { %p9775_p11 = por %p9774_p9, %p9773_p12 }
 0x1fb   : > { %p9769_p10 = pneg %p9768_p8 }
 0x1fd   : > { %p9776_p13 = pnand %p9775_p11, %p9769_p10 }
 0x1ff   : > { %9779 = shalt.err (!%p9776_p13)
}
 0x200   : > { %8807 = dma.hbm_to_vmem [thread:$0]  (!%p10247_p0), %s12081_s7, 16, %s980_s15, [#allocation32]  }
 0x201   : > { %s9780_s0 = scalar_lea.hbm %s10147_s14, 16 }
 0x202   : > { %p9781_p1 = scmp.ne.s32.totalorder %s10147_s14, %s9780_s0  ;;  %p9787_p6 = scmp.lt.u32.totalorder %s9780_s0, %s10147_s14 }
 0x204   : > { %p9783_p4 = pnand %p9781_p1, %p10255_p2 }
 0x206   : > { %p9784_p5 = pneg %p9783_p4 }
 0x208   : > { %p9789_p7 = pnand %p9787_p6, %p9784_p5 }
 0x20a   : > { %9792 = shalt.err (!%p9789_p7)
}
 0x20b   : > { %s9793_s11 = scalar_lea.vmem %s10497_s1, 16  ;;  %s9800_s26 = scalar_lea.vmem %s10497_s1, 32 }
 0x20c   : > { %p9794_p3 = scmp.ne.s32.totalorder %s10497_s1, %s9793_s11  ;;  %p9801_p12 = scmp.lt.s32.totalorder %s10497_s1, %s10497_s1 }
 0x20d   : > { %p9802_p9 = scmp.lt.s32.totalorder %s9800_s26, %s9793_s11 }
 0x20e   : > { %p9796_p8 = pnand %p9794_p3, %p10255_p2 }
 0x20f   : > { %p9803_p11 = por %p9802_p9, %p9801_p12 }
 0x210   : > { %p9797_p10 = pneg %p9796_p8 }
 0x212   : > { %p9804_p13 = pnand %p9803_p11, %p9797_p10 }
 0x214   : > { %9807 = shalt.err (!%p9804_p13)
}
 0x215   : > { %8813 = dma.hbm_to_vmem [thread:$0]  (!%p10247_p0), %s10147_s14, 16, %s10497_s1, [#allocation35]  }
 0x216   : > { %p12082_p1 = scmp.ne.s32.totalorder %s12072_s23, 0 }
 0x217   : > { %p12083_p4 = scmp.ne.s32.totalorder (!%p12082_p1), %s12073_s2, 0 }
 0x218   : > { %1048 = sbr.rel (%p12082_p1) target bundleno = 6242 (0x1862), region = 140 }
 0x21f   : > { %9869 = dma.done.wait (%p12083_p4), [#allocation8], 16  }
 0x220   : > { %9871 = vsyncadd (%p12083_p4), [#allocation8], 4294967280 }
 0x221   : > { %9873 = dma.done.wait (%p12083_p4), [#allocation11], 32  }
 0x222   : > { %9875 = vsyncadd (%p12083_p4), [#allocation11], 4294967264 }
 0x223   : > { %9877 = dma.done.wait (%p12083_p4), [#allocation14], 32  }
 0x224   : > { %9879 = vsyncadd (%p12083_p4), [#allocation14], 4294967264 }
 0x225   : > { %9881 = dma.done.wait (%p12083_p4), [#allocation17], 1024  }
 0x226   : > { %9883 = vsyncadd (%p12083_p4), [#allocation17], 4294966272 }
 0x227   : > { %9885 = dma.done.wait (%p12083_p4), [#allocation20], 32  }
 0x228   : > { %9887 = vsyncadd (%p12083_p4), [#allocation20], 4294967264 }
 0x229   : > { %9889 = dma.done.wait (%p12083_p4), [#allocation23], 528  }
 0x22a   : > { %9891 = vsyncadd (%p12083_p4), [#allocation23], 4294966768 }
 0x22b   : > { %9893 = dma.done.wait (%p12083_p4), [#allocation26], 1024  }
 0x22c   : > { %9895 = vsyncadd (%p12083_p4), [#allocation26], 4294966272 }
 0x22d   : > { %9897 = dma.done.wait (%p12083_p4), [#allocation29], 528  }
 0x22e   : > { %9899 = vsyncadd (%p12083_p4), [#allocation29], 4294966768 }
 0x22f   : > { %9901 = dma.done.wait (%p12083_p4), [#allocation32], 32  }
 0x230   : > { %9903 = vsyncadd (%p12083_p4), [#allocation32], 4294967264 }
 0x231   : > { %9905 = dma.done.wait (%p12083_p4), [#allocation35], 48  }
 0x232   : > { %9907 = vsyncadd (%p12083_p4), [#allocation35], 4294967248  ;;  %s12084_s4 = sld [smem:[#allocation49_spill]]  ;;  %s12085_s23 = sld [smem:[#allocation50_spill]] }
 0x233   : > { %s12026_s10 = sand.u32 1, %s9918_s16   ;;  %p1203_p0 = scmp.lt.s32.totalorder %s9930_s22, 1 }
 0x234   : > { %s6979_s15 = sshll.u32 %s12026_s10, 5  ;;  %s12086_s2 = sld [smem:[#allocation71_spill]] }
 0x235   : > { %s1204_s1 = scalar_select %p1203_p0, %s9930_s22, 1 }
 0x236   : > { %s10578_s11 = scalar_lea.vmem [#allocation37], %s6979_s15 }
 0x237   : > { %s7247_s17 = sshll.u32 %s1204_s1, 6  ;;  %s7248_s8 = sshll.u32 %s1204_s1, 4 }
 0x238   : > { %s10573_s6 = scalar_lea.vmem %s12084_s4, %s7247_s17  ;;  %s10576_s0 = scalar_lea.vmem %s12085_s23, %s7248_s8 }
 0x23a   : > { %p6984_p2 = scmp.ne.s32.totalorder %s12086_s2, 0 }
 0x23b   : > { %v1227_v0 = vlaneseq (!%p6984_p2)  ;;  %v10582_v1 = vld [vmem:[%s10573_s6] sm:$0xff] (!%p6984_p2)  ;;  %v10585_v2 = vld [vmem:[%s10573_s6 + $0x8] sm:$0xff] (!%p6984_p2)  ;;  %v9995_v3 = vmov (!%p6984_p2), 0.0|0.0   ;;  %v10590_v4 = vld [vmem:[%s10573_s6 + $0x10] sm:$0xff] (!%p6984_p2)  ;;  %vm9996_vm0 = vmmov (!%p6984_p2), 0   ;;  %v9997_v7 = vmov (!%p6984_p2), 0.0  }
 0x23c   : > { %1218 = sbr.rel (%p6984_p2) target bundleno = 2243 (0x8c3), region = 220  ;;  %8289 = vmatprep.subr.bf16.mxu0 (!%p6984_p2), %v9995_v3  ;;  %8277 = vmatprep.subr.bf16.mxu1 (!%p6984_p2), %v9995_v3  ;;  %v10597_v8 = vld [vmem:[%s10573_s6 + $0x18] sm:$0xff] (!%p6984_p2)  ;;  %vm1281_vm1 = vcmask (!%p6984_p2), 523264   ;;  %v10638_v24 = vld [vmem:[%s10573_s6 + $0x20] sm:$0xff] (!%p6984_p2)  ;;  %v10654_v29 = vld [vmem:[%s10573_s6 + $0x28] sm:$0xff] (!%p6984_p2)  ;;  %s12099_s26 = sld [smem:[#allocation52_spill]] (!%p6984_p2) }
 0x23d   : > { %v10592_v5 = vshrl.u32 (!%p6984_p2), %v1227_v0, 7  ;;  %v1237_v6 = vand.u32 (!%p6984_p2), 127, %v1227_v0  ;;  %7644 = vmatprep.mubr.msk.f32.mxu0 (!%p6984_p2), %vm9996_vm0, %v9997_v7  ;;  %7625 = vmatprep.mubr.msk.f32.mxu1 (!%p6984_p2), %vm9996_vm0, %v9997_v7  ;;  %v1282_v9 = vsel (!%p6984_p2), %vm1281_vm1, %v10582_v1, 0.0  ;;  %v1283_v10 = vsel (!%p6984_p2), %vm1281_vm1, %v10585_v2, 0.0  ;;  %v10699_v40 = vld [vmem:[%s10573_s6 + $0x30] sm:$0xff] (!%p6984_p2)  ;;  %v10744_v54 = vld [vmem:[%s10573_s6 + $0x38] sm:$0xff] (!%p6984_p2) }
 0x23e   : > { %v1285_v14 = vsel (!%p6984_p2), %vm1281_vm1, %v10590_v4, 0.0  ;;  %v1287_v18 = vsel (!%p6984_p2), %vm1281_vm1, %v10597_v8, 0.0  ;;  %v1284_v25 = vadd.f32 (!%p6984_p2), %v1283_v10, %v1282_v9  ;;  %v9998_v32 = vmov (!%p6984_p2), 1.0|1.0   ;;  %s12101_s23 = sld [smem:[#allocation56_spill]] (!%p6984_p2)  ;;  %s9999_s15 = smov (!%p6984_p2), 96  }
 0x23f   : > { %v1229_v11 = vadd.s32 (!%p6984_p2), 8, %v10592_v5  ;;  %v10606_v12 = vmul.u32 (!%p6984_p2), 2, %v1237_v6  ;;  %v1247_v13 = vadd.s32 (!%p6984_p2), 1, %v1237_v6  ;;  %v1230_v15 = vadd.s32 (!%p6984_p2), 16, %v10592_v5 }
 0x240   : > { %v1231_v16 = vadd.s32 (!%p6984_p2), 24, %v10592_v5  ;;  %v1232_v17 = vadd.s32 (!%p6984_p2), 32, %v10592_v5  ;;  %v1233_v20 = vadd.s32 (!%p6984_p2), 40, %v10592_v5  ;;  %v1234_v21 = vadd.s32 (!%p6984_p2), 48, %v10592_v5 }
 0x241   : > { %vm1239_vm2 = vcmp.ge.s32.totalorder (!%p6984_p2), %v10592_v5, %v10606_v12  ;;  %v10617_v19 = vmul.u32 (!%p6984_p2), 2, %v1247_v13  ;;  %vm1240_vm3 = vcmp.ge.s32.totalorder (!%p6984_p2), %v1229_v11, %v10606_v12  ;;  %v10623_v22 = vadd.s32 (!%p6984_p2), 56, %v10592_v5 }
 0x242   : > { %vm1241_vm7 = vcmp.ge.s32.totalorder (!%p6984_p2), %v1230_v15, %v10606_v12  ;;  %vm1242_vm8 = vcmp.ge.s32.totalorder (!%p6984_p2), %v1231_v16, %v10606_v12  ;;  %vm1243_vm10 = vcmp.ge.s32.totalorder (!%p6984_p2), %v1232_v17, %v10606_v12  ;;  %vm1244_vm13 = vcmp.ge.s32.totalorder (!%p6984_p2), %v1233_v20, %v10606_v12  ;;  %s12100_s4 = smov (!%p6984_p2), %s12099_s26 }
 0x243   : > { %vm1249_vm4 = vcmp.lt.s32.totalorder %v10592_v5, %v10617_v19  ;;  %vm1250_vm5 = vcmp.lt.s32.totalorder %v1229_v11, %v10617_v19  ;;  %vm1251_vm9 = vcmp.lt.s32.totalorder %v1230_v15, %v10617_v19  ;;  %vm1252_vm12 = vcmp.lt.s32.totalorder %v1231_v16, %v10617_v19 }
 0x244   : > { %vm1257_vm6 = vmand %vm1239_vm2, %vm1249_vm4  ;;  %vm1253_vm15 = vcmp.lt.s32.totalorder %v1232_v17, %v10617_v19  ;;  %vm1254_vm2 = vcmp.lt.s32.totalorder %v1233_v20, %v10617_v19  ;;  %vm1245_vm4 = vcmp.ge.s32.totalorder %v1234_v21, %v10606_v12  ;;  %v1286_v35 = vadd.f32 %v1285_v14, %v1284_v25  ;;  %s12102_s1 = smov %s12101_s23 }
 0x245   : > { %vm1258_vm11 = vmand %vm1240_vm3, %vm1250_vm5  ;;  %v10633_v23 = vsel %vm1257_vm6, 1.0, %v9997_v7  ;;  %vm1246_vm5 = vcmp.ge.s32.totalorder %v10623_v22, %v10606_v12  ;;  %v1289_v44 = vsel %vm1281_vm1, %v10638_v24, 0.0  ;;  %v1291_v48 = vsel %vm1281_vm1, %v10654_v29, 0.0 }
 0x246   : > { %v10641_v26 = vsel %vm1258_vm11, 1.0, %v9997_v7  ;;  %v10645_v27 = vsub.f32 %v10633_v23, %v10633_v23  ;;  %vm10647_vm14 = vmpackc.low %vm1258_vm11, %vm1257_vm6  ;;  %vm1255_vm11 = vcmp.lt.s32.totalorder %v1234_v21, %v10617_v19  ;;  %v1288_v43 = vadd.f32 %v1287_v18, %v1286_v35 }
 0x247   : > { %v10658_v30 = vsub.f32 %v10641_v26, %v10641_v26  ;;  %v10662_v31 = vpack.c.bf16 %v10641_v26, %v10633_v23  ;;  %8279 = vmatpush3.bf16.msk.msra.mxu1 %vm10647_vm14, %v9998_v32  ;;  %vm1259_vm3 = vmand %vm1241_vm7, %vm1251_vm9  ;;  %v1293_v59 = vsel %vm1281_vm1, %v10699_v40, 0.0  ;;  %v1295_v18 = vsel %vm1281_vm1, %v10744_v54, 0.0 }
 0x248   : > { %v1421_v33 = vand.u32 4294901760, %v10645_v27  ;;  %vm1260_vm6 = vmand %vm1242_vm8, %vm1252_vm12  ;;  %v10680_v34 = vsel %vm1259_vm3, 1.0, %v9997_v7  ;;  %8280 = vmatprep.subr.bf16.mxu1 %v9995_v3  ;;  %vm1256_vm8 = vcmp.lt.s32.totalorder %v10623_v22, %v10617_v19  ;;  %v1290_v63 = vadd.f32 %v1289_v44, %v1288_v43 }
 0x249   : > { %v1428_v36 = vand.u32 4294901760, %v10658_v30  ;;  %v10686_v37 = vsel %vm1260_vm6, 1.0, %v9997_v7  ;;  %v10690_v38 = vsub.f32 %v10680_v34, %v10680_v34  ;;  %vm10692_vm7 = vmpackc.low %vm1260_vm6, %vm1259_vm3  ;;  %v1304_v43 = vmul.f32 %v10585_v2, %v10585_v2 }
 0x24a   : > { %v1422_v41 = vsub.f32 %v10645_v27, %v1421_v33  ;;  %v10706_v42 = vsub.f32 %v10686_v37, %v10686_v37  ;;  %vm1261_vm9 = vmand %vm1243_vm10, %vm1253_vm15  ;;  %v1292_v17 = vadd.f32 %v1291_v48, %v1290_v63  ;;  %v1305_v48 = vmul.f32 %v10590_v4, %v10590_v4 }
 0x24b   : > { %v1429_v45 = vsub.f32 %v10658_v30, %v1428_v36  ;;  %v1435_v46 = vand.u32 4294901760, %v10690_v38  ;;  %8282 = vmatpush3.bf16.msk.msra.mxu1 %vm10692_vm7, %v9998_v32  ;;  %vm1262_vm12 = vmand %vm1244_vm13, %vm1254_vm2  ;;  %v10726_v47 = vsel %vm1261_vm9, 1.0, %v9997_v7  ;;  %v1306_v2 = vmul.f32 %v10597_v8, %v10597_v8 }
 0x24c   : > { %v1423_v49 = vand.u32 4294901760, %v1422_v41  ;;  %v1442_v50 = vand.u32 4294901760, %v10706_v42  ;;  %v10732_v51 = vsel %vm1262_vm12, 1.0, %v9997_v7  ;;  %v10736_v52 = vsub.f32 %v10726_v47, %v10726_v47  ;;  %8283 = vmatprep.subr.bf16.mxu1 %v9995_v3  ;;  %vm10739_vm10 = vmpackc.low %vm1262_vm12, %vm1261_vm9 }
 0x24d   : > { %v1430_v55 = vand.u32 4294901760, %v1429_v45  ;;  %v1436_v56 = vsub.f32 %v10690_v38, %v1435_v46  ;;  %v10751_v57 = vsub.f32 %v10732_v51, %v10732_v51  ;;  %vm10757_vm13 = vmand %vm1245_vm4, %vm1255_vm11  ;;  %v1294_v35 = vadd.f32 %v1293_v59, %v1292_v17 }
 0x24e   : > { %v1443_v60 = vsub.f32 %v10706_v42, %v1442_v50  ;;  %v1449_v61 = vand.u32 4294901760, %v10736_v52  ;;  %vm1264_vm15 = vmand %vm1246_vm5, %vm1256_vm8  ;;  %v10776_v62 = vsel %vm10757_vm13, 1.0, %v9997_v7  ;;  %v1303_v41 = vmul.f32 %v10582_v1, %v10582_v1 }
 0x24f   : > { %v10778_v0 = vpack.c.bf16 %v1430_v55, %v1423_v49  ;;  %v1437_v6 = vand.u32 4294901760, %v1436_v56  ;;  %v1456_v9 = vand.u32 4294901760, %v10751_v57  ;;  %8285 = vmatpush3.bf16.msk.msra.mxu1 %vm10739_vm10, %v9998_v32  ;;  %v10785_v10 = vsel %vm1264_vm15, 1.0, %v9997_v7  ;;  %vm10801_vm2 = vmpackc.low %vm1264_vm15, %vm10757_vm13 }
 0x250   : > { %v1444_v11 = vand.u32 4294901760, %v1443_v60  ;;  %v1450_v12 = vsub.f32 %v10736_v52, %v1449_v61  ;;  %v10792_v13 = vsub.f32 %v10776_v62, %v10776_v62  ;;  %v10796_v14 = vsub.f32 %v10785_v10, %v10785_v10  ;;  %8286 = vmatprep.subr.bf16.mxu1 %v9995_v3 }
 0x251   : > { %8291 = vmatpush3.bf16.msra.mxu0 %v10778_v0  ;;  %v1457_v16 = vsub.f32 %v10751_v57, %v1456_v9  ;;  %v1296_v1 = vadd.f32 %v1295_v18, %v1294_v35  ;;  %v1307_v59 = vmul.f32 %v10638_v24, %v10638_v24  ;;  %v1311_v4 = vsel %vm1281_vm1, %v1303_v41, 0.0 }
 0x252   : > { %8292 = vmatprep.subr.bf16.mxu0 %v9995_v3  ;;  %v10812_v19 = vpack.c.bf16 %v1444_v11, %v1437_v6  ;;  %v1451_v20 = vand.u32 4294901760, %v1450_v12  ;;  %v1463_v21 = vand.u32 4294901760, %v10792_v13  ;;  %v1470_v22 = vand.u32 4294901760, %v10796_v14 }
 0x253   : > { %v1458_v25 = vand.u32 4294901760, %v1457_v16  ;;  %8288 = vmatpush3.bf16.msk.msra.mxu1 %vm10801_vm2, %v9998_v32  ;;  %v1297_v58 = vrot.slane %v1296_v1, 4  ;;  %v1312_v60 = vsel %vm1281_vm1, %v1304_v43, 0.0  ;;  %v1314_v6 = vsel %vm1281_vm1, %v1305_v48, 0.0 }
 0x254   : > { %v1464_v44 = vsub.f32 %v10792_v13, %v1463_v21  ;;  %v1471_v45 = vsub.f32 %v10796_v14, %v1470_v22  ;;  %8349 = vmatprep.subr.bf16.mxu1 %v9995_v3  ;;  %v1313_v63 = vadd.f32 %v1312_v60, %v1311_v4  ;;  %v1308_v12 = vmul.f32 %v10654_v29, %v10654_v29 }
 0x255   : > { %8294 = vmatpush3.bf16.msra.mxu0 %v10812_v19  ;;  %v10833_v49 = vpack.c.bf16 %v1458_v25, %v1451_v20  ;;  %v1298_v8 = vadd.f32 %v1297_v58, %v1296_v1  ;;  %v1316_v16 = vsel %vm1281_vm1, %v1306_v2, 0.0  ;;  %v1309_v20 = vmul.f32 %v10699_v40, %v10699_v40 }
 0x256   : > { %8295 = vmatprep.subr.bf16.mxu0 %v9995_v3  ;;  %v1465_v55 = vand.u32 4294901760, %v1464_v44  ;;  %v1472_v56 = vand.u32 4294901760, %v1471_v45  ;;  %v1315_v17 = vadd.f32 %v1314_v6, %v1313_v63  ;;  %v1318_v25 = vsel %vm1281_vm1, %v1307_v59, 0.0 }
 0x257   : > { %v1299_v18 = vrot.slane %v1298_v8, 2  ;;  %v1310_v43 = vmul.f32 %v10744_v54, %v10744_v54  ;;  %v1320_v44 = vsel %vm1281_vm1, %v1308_v12, 0.0  ;;  %v1322_v1 = vsel %vm1281_vm1, %v1309_v20, 0.0 }
 0x258   : > { %v10844_v11 = vpack.c.bf16 %v1472_v56, %v1465_v55  ;;  %v1317_v35 = vadd.f32 %v1316_v16, %v1315_v17  ;;  %v10863_v4 = vpack.c.bf16 %v10658_v30, %v10645_v27  ;;  %v10872_v12 = vpack.c.bf16 %v10706_v42, %v10690_v38 }
 0x259   : > { %8297 = vmatpush3.bf16.msra.mxu0 %v10833_v49  ;;  %v1300_v41 = vadd.f32 %v1299_v18, %v1298_v8  ;;  %v1324_v56 = vsel %vm1281_vm1, %v1310_v43, 0.0  ;;  %v8332_v27 = vpack.c.bf16 %v1456_v9, %v1449_v61  ;;  %v8335_v30 = vpack.c.bf16 %v1470_v22, %v1463_v21 }
 0x25a   : > { %8298 = vmatprep.subr.bf16.mxu0 %v9995_v3  ;;  %v1319_v45 = vadd.f32 %v1318_v25, %v1317_v35  ;;  %v10880_v25 = vpack.c.bf16 %v10751_v57, %v10736_v52  ;;  %vm2418_vm3 = vcmask 261120   ;;  %v11052_v28 = vpack.c.bf16 %v10686_v37, %v10680_v34 }
 0x25b   : > { %v1301_v48 = vrot.slane %v1300_v41, 1  ;;  %vm11038_vm4 = vmpackc.low %vm2418_vm3, %vm2418_vm3  ;;  %v2423_v38 = vsel %vm2418_vm3, %v10633_v23, 0  ;;  %v2426_v39 = vsel %vm2418_vm3, %v10641_v26, 0 }
 0x25c   : > { %v1321_v2 = vadd.f32 %v1320_v44, %v1319_v45  ;;  %v10889_v44 = vpack.c.bf16 %v10796_v14, %v10792_v13  ;;  %v11105_v42 = vsub.f32 %v2423_v38, %v2423_v38 }
 0x25d   : > { %8300 = vmatpush3.bf16.msra.mxu0 %v10844_v11  ;;  %v1302_v55 = vadd.f32 %v1301_v48, %v1300_v41 }
 0x25e   : > { %8301 = vmatprep.subr.bf16.mxu0 %v9995_v3  ;;  %v1323_v58 = vadd.f32 %v1322_v1, %v1321_v2 }
 0x25f   : > { %v1333_v59 = vsel %vm1281_vm1, %v1302_v55, 0 }
 0x260   : > { %v10865_v60 = vand.u32 4294901760, %v1333_v59  ;;  %v1325_v63 = vadd.f32 %v1324_v56, %v1323_v58 }
 0x262   : > { %7645 = vmatmul.mubr.f32.vlgmr.msra.gmra.mrb[0].mxu0 %v10865_v60  ;;  %v1409_v6 = vsub.f32 %v1333_v59, %v10865_v60  ;;  %v1326_v8 = vrot.slane %v1325_v63, 4 }
 0x263   : > { %8303 = vmatpush3.bf16.msra.mxu0 %v10863_v4  ;;  %7663 = vmatprep.mubr.msk.f32.mxu0 %vm9996_vm0, %v9997_v7 }
 0x264   : > { %v1410_v16 = vand.u32 4294901760, %v1409_v6  ;;  %8304 = vmatprep.subr.bf16.mxu0 %v9995_v3  ;;  %v1327_v17 = vadd.f32 %v1326_v8, %v1325_v63 }
 0x266   : > { %v1411_v18 = vsub.f32 %v1409_v6, %v1410_v16  ;;  %v1328_v20 = vrot.slane %v1327_v17, 2 }
 0x267   : > { %8306 = vmatpush3.bf16.msra.mxu0 %v10872_v12 }
 0x268   : > { %v1412_v35 = vand.u32 4294901760, %v1411_v18  ;;  %8307 = vmatprep.subr.bf16.mxu0 %v9995_v3  ;;  %v1329_v41 = vadd.f32 %v1328_v20, %v1327_v17  ;;  %v2438_v17 = vsel %vm2418_vm3, %v10732_v51, 0 }
 0x26a   : > { %7626 = vmatmul.mubr.f32.vlgmr.msra.gmra.mrb[0].mxu1 %v1412_v35  ;;  %v1330_v43 = vrot.slane %v1329_v41, 1 }
 0x26b   : > { %8351 = vmatpush3.bf16.msk.msra.mxu1 %vm10647_vm14, %v9998_v32  ;;  %8309 = vmatpush3.bf16.msra.mxu0 %v10880_v25 }
 0x26c   : > { %8352 = vmatprep.subr.bf16.mxu1 %v9995_v3  ;;  %8310 = vmatprep.subr.bf16.mxu0 %v9995_v3  ;;  %v1331_v45 = vadd.f32 %v1330_v43, %v1329_v41  ;;  %v11155_v41 = vsub.f32 %v2438_v17, %v2438_v17 }
 0x26d   : > { %7739 = vmatprep.mubr.msk.f32.mxu1 %vm9996_vm0, %v9997_v7 }
 0x26e   : > { %v1874_v48 = vsel %vm1281_vm1, %v1331_v45, 0  ;;  %v2567_v45 = vand.u32 4294901760, %v11155_v41 }
 0x26f   : > { %8354 = vmatpush3.bf16.msk.msra.mxu1 %vm10692_vm7, %v9998_v32  ;;  %8312 = vmatpush3.bf16.msra.mxu0 %v10889_v44  ;;  %v10900_v1 = vand.u32 4294901760, %v1874_v48 }
 0x270   : > { %8355 = vmatprep.subr.bf16.mxu1 %v9995_v3  ;;  %8313 = vmatprep.subr.bf16.mxu0 %v9995_v3 }
 0x271   : > { %v10905_v2 = vsub.f32 %v1874_v48, %v10900_v1  ;;  %v2441_v48 = vsel %vm2418_vm3, %v10776_v62, 0 }
 0x272   : > { %7664 = vmatmul.mubr.f32.vlgmr.msra.gmra.mrb[0].mxu0 %v1409_v6 }
 0x273   : > { %8357 = vmatpush3.bf16.msk.msra.mxu1 %vm10739_vm10, %v9998_v32  ;;  %8315 = vmatpush3.bf16.msk.msra.mxu0 %vm10647_vm14, %v9998_v32  ;;  %v1951_v55 = vand.u32 4294901760, %v10905_v2 }
 0x274   : > { %8358 = vmatprep.subr.bf16.mxu1 %v9995_v3  ;;  %8316 = vmatprep.subr.bf16.mxu0 %v9995_v3 }
 0x275   : > { %v1952_v56 = vsub.f32 %v10905_v2, %v1951_v55  ;;  %7682 = vmatprep.mubr.msk.f32.mxu0 %vm9996_vm0, %v9997_v7 }
 0x277   : > { %8360 = vmatpush3.bf16.msk.msra.mxu1 %vm10801_vm2, %v9998_v32  ;;  %v1953_v58 = vand.u32 4294901760, %v1952_v56  ;;  %8318 = vmatpush3.bf16.msk.msra.mxu0 %vm10692_vm7, %v9998_v32  ;;  %v2568_v56 = vsub.f32 %v11155_v41, %v2567_v45 }
 0x278   : > { %8361 = vmatprep.subr.bf16.mxu1 %v9995_v3  ;;  %8319 = vmatprep.subr.bf16.mxu0 %v9995_v3 }
 0x27a   : > { %7740 = vmatmul.mubr.f32.vlgmr.msra.gmra.mrb[2].mxu1 %v1953_v58  ;;  %v11173_v58 = vsub.f32 %v2441_v48, %v2441_v48  ;;  %v9071_v48 = vld [vmem:[%s10573_s6 + $0x18] sm:$0xff] }
 0x27b   : > { %8363 = vmatpush3.bf16.msra.mxu1 %v10778_v0  ;;  %8321 = vmatpush3.bf16.msk.msra.mxu0 %vm10739_vm10, %v9998_v32  ;;  %v8326_v0 = vpack.c.bf16 %v1428_v36, %v1421_v33  ;;  %v11069_v36 = vpack.c.bf16 %v10732_v51, %v10726_v47  ;;  %v9033_v33 = vld [vmem:[%s12100_s4 + $0x18] sm:$0xff]  }
 0x27c   : > { %8364 = vmatprep.subr.bf16.mxu1 %v9995_v3  ;;  %8322 = vmatprep.subr.bf16.mxu0 %v9995_v3 }
 0x27d   : > { %7758 = vmatprep.mubr.msk.f32.mxu1 %vm9996_vm0, %v9997_v7 }
 0x27f   : > { %8366 = vmatpush3.bf16.msra.mxu1 %v10812_v19  ;;  %8324 = vmatpush3.bf16.msk.msra.mxu0 %vm10801_vm2, %v9998_v32  ;;  %v8329_v19 = vpack.c.bf16 %v1442_v50, %v1435_v46  ;;  %v11107_v46 = vsub.f32 %v2426_v39, %v2426_v39  ;;  %v2532_v50 = vand.u32 4294901760, %v11105_v42 }
 0x280   : > { %8367 = vmatprep.subr.bf16.mxu1 %v9995_v3  ;;  %8325 = vmatprep.subr.bf16.mxu0 %v9995_v3 }
 0x281   : > { %v2539_v52 = vand.u32 4294901760, %v11107_v46  ;;  %v2533_v53 = vsub.f32 %v11105_v42, %v2532_v50  ;;  %v11121_v26 = vpack.c.bf16 %v11107_v46, %v11105_v42 }
 0x282   : > { %7683 = vmatmul.mubr.f32.vlgmr.msra.gmra.mrb[0].mxu0 %v1410_v16 }
 0x283   : > { %8369 = vmatpush3.bf16.msra.mxu1 %v10833_v49  ;;  %8327 = vmatpush3.bf16.msra.mxu0 %v8326_v0  ;;  %v2540_v57 = vsub.f32 %v11107_v46, %v2539_v52  ;;  %v2534_v23 = vand.u32 4294901760, %v2533_v53  ;;  %v2429_v49 = vsel %vm2418_vm3, %v10680_v34, 0 }
 0x284   : > { %8370 = vmatprep.subr.bf16.mxu1 %v9995_v3  ;;  %8328 = vmatprep.subr.bf16.mxu0 %v9995_v3 }
 0x285   : > { %7701 = vmatprep.mubr.msk.f32.mxu0 %vm9996_vm0, %v9997_v7  ;;  %v2541_v61 = vand.u32 4294901760, %v2540_v57 }
 0x287   : > { %8372 = vmatpush3.bf16.msra.mxu1 %v10844_v11  ;;  %8330 = vmatpush3.bf16.msra.mxu0 %v8329_v19  ;;  %v11117_v9 = vpack.c.bf16 %v2541_v61, %v2534_v23  ;;  %v2432_v11 = vsel %vm2418_vm3, %v10686_v37, 0  ;;  %v2435_v37 = vsel %vm2418_vm3, %v10726_v47, 0 }
 0x288   : > { %8373 = vmatprep.subr.bf16.mxu1 %v9995_v3  ;;  %8331 = vmatprep.subr.bf16.mxu0 %v9995_v3  ;;  %v11153_v35 = vsub.f32 %v2435_v37, %v2435_v37 }
 0x28a   : > { %7759 = vmatmul.mubr.f32.vlgmr.msra.gmra.mrb[2].mxu1 %v10900_v1  ;;  %v8456_v17 = vpack.c.bf16 %v11155_v41, %v11153_v35 }
 0x28b   : > { %8375 = vmatpush3.bf16.msra.mxu1 %v10863_v4  ;;  %8333 = vmatpush3.bf16.msra.mxu0 %v8332_v27  ;;  %v11127_v4 = vsub.f32 %v2429_v49, %v2429_v49 }
 0x28c   : > { %8376 = vmatprep.subr.bf16.mxu1 %v9995_v3  ;;  %8334 = vmatprep.subr.bf16.mxu0 %v9995_v3 }
 0x28d   : > { %7777 = vmatprep.mubr.msk.f32.mxu1 %vm9996_vm0, %v9997_v7 }
 0x28f   : > { %8378 = vmatpush3.bf16.msra.mxu1 %v10872_v12  ;;  %8336 = vmatpush3.bf16.msra.mxu0 %v8335_v30  ;;  %v2546_v12 = vand.u32 4294901760, %v11127_v4 }
 0x290   : > { %8379 = vmatprep.subr.bf16.mxu1 %v9995_v3  ;;  %8337 = vmatprep.subr.bf16.mxu0 %v9995_v3 }
 0x291   : > { %v2547_v20 = vsub.f32 %v11127_v4, %v2546_v12 }
 0x292   : > { %7702 = vmatmul.mubr.f32.vlgmr.msra.gmra.mrb[0].mxu0 %v10865_v60 }
 0x293   : > { %8381 = vmatpush3.bf16.msra.mxu1 %v10880_v25  ;;  %8339 = vmatpush3.bf16.msk.msra.mxu0 %vm10647_vm14, %v9998_v32  ;;  %v2548_v43 = vand.u32 4294901760, %v2547_v20 }
 0x294   : > { %8382 = vmatprep.subr.bf16.mxu1 %v9995_v3  ;;  %8340 = vmatprep.subr.bf16.mxu0 %v9995_v3 }
 0x295   : > { %7720 = vmatprep.mubr.msk.f32.mxu0 %vm9996_vm0, %v9997_v7 }
 0x297   : > { %8384 = vmatpush3.bf16.msra.mxu1 %v10889_v44  ;;  %8342 = vmatpush3.bf16.msk.msra.mxu0 %vm10692_vm7, %v9998_v32  ;;  %v2560_v44 = vand.u32 4294901760, %v11153_v35 }
 0x298   : > { %8385 = vmatprep.subr.bf16.mxu1 %v9995_v3  ;;  %8343 = vmatprep.subr.bf16.mxu0 %v9995_v3 }
 0x299   : > { %v8484_v46 = vpack.c.bf16 %v2567_v45, %v2560_v44 }
 0x29a   : > { %7778 = vmatmul.mubr.f32.vlgmr.msra.gmra.mrb[2].mxu1 %v10905_v2 }
 0x29b   : > { %8387 = vmatpush3.bf16.msk.msra.mxu1 %vm10647_vm14, %v9998_v32  ;;  %8345 = vmatpush3.bf16.msk.msra.mxu0 %vm10739_vm10, %v9998_v32 }
 0x29c   : > { %8388 = vmatprep.subr.bf16.mxu1 %v9995_v3  ;;  %8346 = vmatprep.subr.bf16.mxu0 %v9995_v3 }
 0x29d   : > { %7796 = vmatprep.mubr.msk.f32.mxu1 %vm9996_vm0, %v9997_v7 }
 0x29f   : > { %8390 = vmatpush3.bf16.msk.msra.mxu1 %vm10692_vm7, %v9998_v32  ;;  %8348 = vmatpush3.bf16.msk.msra.mxu0 %vm10801_vm2, %v9998_v32 }
 0x2a0   : > { %8391 = vmatprep.subr.bf16.mxu1 %v9995_v3  ;;  %8421 = vmatprep.subr.bf16.mxu0 %v9995_v3 }
 0x2a2   : > { %7721 = vmatmul.mubr.f32.vlgmr.msra.gmra.mrb[0].mxu0 %v10865_v60  ;;  %v11129_v60 = vsub.f32 %v2432_v11, %v2432_v11 }
 0x2a3   : > { %8393 = vmatpush3.bf16.msk.msra.mxu1 %vm10739_vm10, %v9998_v32  ;;  %7853 = vmatprep.mubr.msk.f32.mxu0 %vm9996_vm0, %v9997_v7 }
 0x2a4   : > { %8394 = vmatprep.subr.bf16.mxu1 %v9995_v3  ;;  %v2553_v16 = vand.u32 4294901760, %v11129_v60  ;;  %v8453_v49 = vpack.c.bf16 %v11129_v60, %v11127_v4 }
 0x2a6   : > { %v2554_v25 = vsub.f32 %v11129_v60, %v2553_v16  ;;  %v8481_v42 = vpack.c.bf16 %v2553_v16, %v2546_v12  ;;  %v9068_v16 = vld [vmem:[%s10573_s6] sm:$0xff] }
 0x2a7   : > { %8396 = vmatpush3.bf16.msk.msra.mxu1 %vm10801_vm2, %v9998_v32 }
 0x2a8   : > { %8397 = vmatprep.subr.bf16.mxu1 %v9995_v3  ;;  %8424 = vmatpush3.bf16.xpose.msk.msra.mxu0 %vm11038_vm4, %v10662_v31  ;;  %v2555_v51 = vand.u32 4294901760, %v2554_v25 }
 0x2a9   : > { %8425 = vmatprep.subr.bf16.mxu0 %v9995_v3 }
 0x2aa   : > { %7797 = vmatmul.mubr.f32.vlgmr.msra.gmra.mrb[2].mxu1 %v1951_v55  ;;  %v8441_v2 = vpack.c.bf16 %v2555_v51, %v2548_v43  ;;  %v2561_v55 = vsub.f32 %v11153_v35, %v2560_v44  ;;  %v9069_v43 = vld [vmem:[%s10573_s6 + $0x8] sm:$0xff]  ;;  %v9070_v44 = vld [vmem:[%s10573_s6 + $0x10] sm:$0xff] }
 0x2ab   : > { %8399 = vmatpush3.bf16.msra.mxu1 %v8326_v0  ;;  %7815 = vmatprep.mubr.msk.f32.mxu1 %vm9996_vm0, %v9997_v7 }
 0x2ac   : > { %8400 = vmatprep.subr.bf16.mxu1 %v9995_v3 }
 0x2af   : > { %8402 = vmatpush3.bf16.msra.mxu1 %v8329_v19  ;;  %v2562_v19 = vand.u32 4294901760, %v2561_v55 }
 0x2b0   : > { %8403 = vmatprep.subr.bf16.mxu1 %v9995_v3  ;;  %8428 = vmatpush3.bf16.xpose.msk.msra.mxu0 %vm11038_vm4, %v11052_v28 }
 0x2b1   : > { %8429 = vmatprep.subr.bf16.mxu0 %v9995_v3 }
 0x2b3   : > { %8405 = vmatpush3.bf16.msra.mxu1 %v8332_v27  ;;  %v2569_v27 = vand.u32 4294901760, %v2568_v56 }
 0x2b4   : > { %8406 = vmatprep.subr.bf16.mxu1 %v9995_v3 }
 0x2b7   : > { %8408 = vmatpush3.bf16.msra.mxu1 %v8335_v30  ;;  %v8444_v30 = vpack.c.bf16 %v2569_v27, %v2562_v19 }
 0x2b8   : > { %8409 = vmatprep.subr.bf16.mxu1 %v9995_v3  ;;  %8432 = vmatpush3.bf16.xpose.msk.msra.mxu0 %vm11038_vm4, %v11069_v36 }
 0x2b9   : > { %8433 = vmatprep.subr.bf16.mxu0 %v9995_v3 }
 0x2ba   : > { %7816 = vmatmul.mubr.f32.vlgmr.msra.gmra.mrb[2].mxu1 %v10900_v1 }
 0x2bb   : > { %8411 = vmatpush3.bf16.msk.msra.mxu1 %vm10647_vm14, %v9998_v32  ;;  %7834 = vmatprep.mubr.msk.f32.mxu1 %vm9996_vm0, %v9997_v7 }
 0x2bc   : > { %8412 = vmatprep.subr.bf16.mxu1 %v9995_v3 }
 0x2bf   : > { %8414 = vmatpush3.bf16.msk.msra.mxu1 %vm10692_vm7, %v9998_v32 }
 0x2c0   : > { %8415 = vmatprep.subr.bf16.mxu1 %v9995_v3 }
 0x2c3   : > { %8417 = vmatpush3.bf16.msk.msra.mxu1 %vm10739_vm10, %v9998_v32 }
 0x2c4   : > { %8418 = vmatprep.subr.bf16.mxu1 %v9995_v3 }
 0x2c7   : > { %8420 = vmatpush3.bf16.msk.msra.mxu1 %vm10801_vm2, %v9998_v32  ;;  %v11083_v32 = vpack.c.bf16 %v10785_v10, %v10776_v62  ;;  %v2574_v62 = vand.u32 4294901760, %v11173_v58 }
 0x2c8   : > { %8505 = vmatprep.subr.bf16.mxu1 %v9995_v3 }
 0x2c9   : > { %8436 = vmatpush3.bf16.xpose.msk.msra.mxu0 %vm11038_vm4, %v11083_v32  ;;  %v2575_v38 = vsub.f32 %v11173_v58, %v2574_v62 }
 0x2ca   : > { %7835 = vmatmul.mubr.f32.vlgmr.msra.gmra.mrb[2].mxu1 %v10900_v1  ;;  %8437 = vmatprep.subr.bf16.mxu0 %v9995_v3  ;;  %v2444_v1 = vsel %vm2418_vm3, %v10785_v10, 0 }
 0x2cb   : > { %7967 = vmatprep.mubr.msk.f32.mxu1 %vm9996_vm0, %v9997_v7  ;;  %v11175_v0 = vsub.f32 %v2444_v1, %v2444_v1  ;;  %v2576_v53 = vand.u32 4294901760, %v2575_v38 }
 0x2cd   : > { %v2581_v10 = vand.u32 4294901760, %v11175_v0 }
 0x2cf   : > { %v2582_v39 = vsub.f32 %v11175_v0, %v2581_v10 }
 0x2d0   : > { %8508 = vmatpush3.bf16.xpose.msk.msra.mxu1 %vm11038_vm4, %v10662_v31 }
 0x2d1   : > { %8509 = vmatprep.subr.bf16.mxu1 %v9995_v3  ;;  %v2583_v57 = vand.u32 4294901760, %v2582_v39 }
 0x2d3   : > { %v8447_v23 = vpack.c.bf16 %v2583_v57, %v2576_v53 }
 0x2d8   : > { %8512 = vmatpush3.bf16.xpose.msk.msra.mxu1 %vm11038_vm4, %v11052_v28 }
 0x2d9   : > { %8513 = vmatprep.subr.bf16.mxu1 %v9995_v3 }
 0x2e0   : > { %8516 = vmatpush3.bf16.xpose.msk.msra.mxu1 %vm11038_vm4, %v11069_v36 }
 0x2e1   : > { %8517 = vmatprep.subr.bf16.mxu1 %v9995_v3 }
 0x2e8   : > { %8520 = vmatpush3.bf16.xpose.msk.msra.mxu1 %vm11038_vm4, %v11083_v32 }
 0x2e9   : > { %8521 = vmatprep.subr.bf16.mxu1 %v9995_v3 }
 0x33d   : > { %v1414_v13 = vpop.f32.mrb[0].mxu1 }
 0x33e   : > { %v7627_v14 = vpop.f32.mrb[1].mxu1 }
 0x375   : > { %v1868_v15 = vpop.f32.mrb[0].mxu0 }
 0x376   : > { %v8589_v21 = vadd.f32 %v1868_v15, %v1414_v13  ;;  %v7722_v22 = vpop.f32.mrb[1].mxu0 }
 0x378   : > { %v1872_v59 = vmul.f32 0.0078125, %v8589_v21 }
 0x37a   : > { %v2420_v63 = vsel %vm2418_vm3, %v1872_v59, 0  ;;  %v2414_v13 = vmul.f32 %v1872_v59, %v1872_v59 }
 0x37b   : > { %v11132_v6 = vand.u32 4294901760, %v2420_v63 }
 0x37d   : > { %v11135_v8 = vsub.f32 %v2420_v63, %v11132_v6 }
 0x37f   : > { %v2521_v34 = vand.u32 4294901760, %v11135_v8 }
 0x381   : > { %v2522_v18 = vsub.f32 %v11135_v8, %v2521_v34 }
 0x383   : > { %v2523_v47 = vand.u32 4294901760, %v2522_v18 }
 0x385   : > { %7854 = vmatmul.mubr.f32.vlgmr.msra.gmra.mrb[2].mxu0 %v2523_v47  ;;  %v8459_v47 = vpack.c.bf16 %v11175_v0, %v11173_v58 }
 0x386   : > { %8439 = vmatpush3.bf16.xpose.msra.mxu0 %v11117_v9  ;;  %7872 = vmatprep.mubr.msk.f32.mxu0 %vm9996_vm0, %v9997_v7 }
 0x387   : > { %8440 = vmatprep.subr.bf16.mxu0 %v9995_v3 }
 0x38e   : > { %8442 = vmatpush3.bf16.xpose.msra.mxu0 %v8441_v2 }
 0x38f   : > { %8443 = vmatprep.subr.bf16.mxu0 %v9995_v3 }
 0x396   : > { %8445 = vmatpush3.bf16.xpose.msra.mxu0 %v8444_v30 }
 0x397   : > { %8446 = vmatprep.subr.bf16.mxu0 %v9995_v3 }
 0x39d   : > { %v2409_v61 = vpop.f32.mrb[2].mxu1 }
 0x39e   : > { %v2413_v14 = vmul.f32 0.0078125, %v2409_v61  ;;  %v7836_v15 = vpop.f32.mrb[3].mxu1  ;;  %8448 = vmatpush3.bf16.xpose.msra.mxu0 %v8447_v23 }
 0x39f   : > { %8449 = vmatprep.subr.bf16.mxu0 %v9995_v3 }
 0x3a0   : > { %v2415_v21 = vsub.f32 %v2413_v14, %v2414_v13 }
 0x3a2   : > { %v2416_v22 = vadd.f32 1e-06, %v2415_v21 }
 0x3a4   : > { %9050 = vrsqrt.f32 %v2416_v22 }
 0x3a5   : > { %7873 = vmatmul.mubr.f32.vlgmr.msra.gmra.mrb[2].mxu0 %v11132_v6 }
 0x3a6   : > { %8451 = vmatpush3.bf16.xpose.msra.mxu0 %v11121_v26  ;;  %7891 = vmatprep.mubr.msk.f32.mxu0 %vm9996_vm0, %v9997_v7 }
 0x3a7   : > { %8452 = vmatprep.subr.bf16.mxu0 %v9995_v3 }
 0x3ae   : > { %v9051_v11 = vpop.eup %9050  ;;  %8454 = vmatpush3.bf16.xpose.msra.mxu0 %v8453_v49 }
 0x3af   : > { %8455 = vmatprep.subr.bf16.mxu0 %v9995_v3  ;;  %v2984_v59 = vsel %vm2418_vm3, %v9051_v11, 0 }
 0x3b0   : > { %v11197_v63 = vand.u32 4294901760, %v2984_v59 }
 0x3b2   : > { %v11200_v37 = vsub.f32 %v2984_v59, %v11197_v63 }
 0x3b4   : > { %v3061_v18 = vand.u32 4294901760, %v11200_v37 }
 0x3b6   : > { %v3062_v20 = vsub.f32 %v11200_v37, %v3061_v18  ;;  %8457 = vmatpush3.bf16.xpose.msra.mxu0 %v8456_v17 }
 0x3b7   : > { %8458 = vmatprep.subr.bf16.mxu0 %v9995_v3 }
 0x3b8   : > { %v3063_v25 = vand.u32 4294901760, %v3062_v20 }
 0x3ba   : > { %7968 = vmatmul.mubr.f32.vlgmr.msra.gmra.mrb[4].mxu1 %v3063_v25  ;;  %v7091_v25 = vld [vmem:[#allocation12] ss:$0 sm:$0xff] }
 0x3bb   : > { %8523 = vmatpush3.bf16.xpose.msra.mxu1 %v11117_v9  ;;  %7986 = vmatprep.mubr.msk.f32.mxu1 %vm9996_vm0, %v9997_v7  ;;  %v8478_v9 = vpack.c.bf16 %v2539_v52, %v2532_v50  ;;  %v8487_v50 = vpack.c.bf16 %v2581_v10, %v2574_v62  ;;  %v9031_v52 = vld [vmem:[%s12100_s4 + $0x8] sm:$0xff]   ;;  %v7090_v10 = vld [vmem:[#allocation10] ss:$0 sm:$0xff] }
 0x3bc   : > { %8524 = vmatprep.subr.bf16.mxu1 %v9995_v3 }
 0x3be   : > { %8460 = vmatpush3.bf16.xpose.msra.mxu0 %v8459_v47 }
 0x3bf   : > { %8461 = vmatprep.subr.bf16.mxu0 %v9995_v3 }
 0x3c3   : > { %8526 = vmatpush3.bf16.xpose.msra.mxu1 %v8441_v2  ;;  %v7089_v2 = vld [vmem:[#allocation7] ss:$0 sm:$0xff] }
 0x3c4   : > { %8527 = vmatprep.subr.bf16.mxu1 %v9995_v3 }
 0x3c5   : > { %7892 = vmatmul.mubr.f32.vlgmr.msra.gmra.mrb[2].mxu0 %v11135_v8 }
 0x3c6   : > { %8464 = vmatpush3.bf16.xpose.msk.msra.mxu0 %vm11038_vm4, %v10662_v31  ;;  %7910 = vmatprep.mubr.msk.f32.mxu0 %vm9996_vm0, %v9997_v7 }
 0x3c7   : > { %8465 = vmatprep.subr.bf16.mxu0 %v9995_v3 }
 0x3cb   : > { %8529 = vmatpush3.bf16.xpose.msra.mxu1 %v8444_v30 }
 0x3cc   : > { %8530 = vmatprep.subr.bf16.mxu1 %v9995_v3 }
 0x3ce   : > { %8468 = vmatpush3.bf16.xpose.msk.msra.mxu0 %vm11038_vm4, %v11052_v28 }
 0x3cf   : > { %8469 = vmatprep.subr.bf16.mxu0 %v9995_v3 }
 0x3d3   : > { %8532 = vmatpush3.bf16.xpose.msra.mxu1 %v8447_v23 }
 0x3d4   : > { %8533 = vmatprep.subr.bf16.mxu1 %v9995_v3 }
 0x3d6   : > { %8472 = vmatpush3.bf16.xpose.msk.msra.mxu0 %vm11038_vm4, %v11069_v36 }
 0x3d7   : > { %8473 = vmatprep.subr.bf16.mxu0 %v9995_v3 }
 0x3da   : > { %7987 = vmatmul.mubr.f32.vlgmr.msra.gmra.mrb[4].mxu1 %v11197_v63 }
 0x3db   : > { %8535 = vmatpush3.bf16.xpose.msra.mxu1 %v11121_v26  ;;  %8005 = vmatprep.mubr.msk.f32.mxu1 %vm9996_vm0, %v9997_v7  ;;  %v9032_v26 = vld [vmem:[%s12100_s4 + $0x10] sm:$0xff]  }
 0x3dc   : > { %8536 = vmatprep.subr.bf16.mxu1 %v9995_v3 }
 0x3de   : > { %8476 = vmatpush3.bf16.xpose.msk.msra.mxu0 %vm11038_vm4, %v11083_v32 }
 0x3df   : > { %8477 = vmatprep.subr.bf16.mxu0 %v9995_v3 }
 0x3e3   : > { %8538 = vmatpush3.bf16.xpose.msra.mxu1 %v8453_v49 }
 0x3e4   : > { %8539 = vmatprep.subr.bf16.mxu1 %v9995_v3 }
 0x3e5   : > { %7911 = vmatmul.mubr.f32.vlgmr.msra.gmra.mrb[2].mxu0 %v2521_v34 }
 0x3e6   : > { %8479 = vmatpush3.bf16.xpose.msra.mxu0 %v8478_v9  ;;  %7929 = vmatprep.mubr.msk.f32.mxu0 %vm9996_vm0, %v9997_v7 }
 0x3e7   : > { %8480 = vmatprep.subr.bf16.mxu0 %v9995_v3 }
 0x3eb   : > { %8541 = vmatpush3.bf16.xpose.msra.mxu1 %v8456_v17 }
 0x3ec   : > { %8542 = vmatprep.subr.bf16.mxu1 %v9995_v3 }
 0x3ee   : > { %8482 = vmatpush3.bf16.xpose.msra.mxu0 %v8481_v42 }
 0x3ef   : > { %8483 = vmatprep.subr.bf16.mxu0 %v9995_v3 }
 0x3f3   : > { %8544 = vmatpush3.bf16.xpose.msra.mxu1 %v8459_v47 }
 0x3f4   : > { %8545 = vmatprep.subr.bf16.mxu1 %v9995_v3 }
 0x3f6   : > { %8485 = vmatpush3.bf16.xpose.msra.mxu0 %v8484_v46 }
 0x3f7   : > { %8486 = vmatprep.subr.bf16.mxu0 %v9995_v3 }
 0x3fa   : > { %8006 = vmatmul.mubr.f32.vlgmr.msra.gmra.mrb[4].mxu1 %v11200_v37 }
 0x3fb   : > { %8548 = vmatpush3.bf16.xpose.msk.msra.mxu1 %vm11038_vm4, %v10662_v31  ;;  %8024 = vmatprep.mubr.msk.f32.mxu1 %vm9996_vm0, %v9997_v7 }
 0x3fc   : > { %8549 = vmatprep.subr.bf16.mxu1 %v9995_v3 }
 0x3fe   : > { %8488 = vmatpush3.bf16.xpose.msra.mxu0 %v8487_v50 }
 0x3ff   : > { %8489 = vmatprep.subr.bf16.mxu0 %v9995_v3 }
 0x403   : > { %8552 = vmatpush3.bf16.xpose.msk.msra.mxu1 %vm11038_vm4, %v11052_v28 }
 0x404   : > { %8553 = vmatprep.subr.bf16.mxu1 %v9995_v3 }
 0x405   : > { %7930 = vmatmul.mubr.f32.vlgmr.msra.gmra.mrb[2].mxu0 %v11132_v6 }
 0x406   : > { %8492 = vmatpush3.bf16.xpose.msk.msra.mxu0 %vm11038_vm4, %v10662_v31  ;;  %7948 = vmatprep.mubr.msk.f32.mxu0 %vm9996_vm0, %v9997_v7 }
 0x407   : > { %8493 = vmatprep.subr.bf16.mxu0 %v9995_v3 }
 0x40b   : > { %8556 = vmatpush3.bf16.xpose.msk.msra.mxu1 %vm11038_vm4, %v11069_v36 }
 0x40c   : > { %8557 = vmatprep.subr.bf16.mxu1 %v9995_v3 }
 0x40e   : > { %8496 = vmatpush3.bf16.xpose.msk.msra.mxu0 %vm11038_vm4, %v11052_v28 }
 0x40f   : > { %8497 = vmatprep.subr.bf16.mxu0 %v9995_v3 }
 0x413   : > { %8560 = vmatpush3.bf16.xpose.msk.msra.mxu1 %vm11038_vm4, %v11083_v32 }
 0x414   : > { %8561 = vmatprep.subr.bf16.mxu1 %v9995_v3 }
 0x416   : > { %8500 = vmatpush3.bf16.xpose.msk.msra.mxu0 %vm11038_vm4, %v11069_v36 }
 0x417   : > { %8501 = vmatprep.subr.bf16.mxu0 %v9995_v3 }
 0x41a   : > { %8025 = vmatmul.mubr.f32.vlgmr.msra.gmra.mrb[4].mxu1 %v3061_v18 }
 0x41b   : > { %8563 = vmatpush3.bf16.xpose.msra.mxu1 %v8478_v9  ;;  %8043 = vmatprep.mubr.msk.f32.mxu1 %vm9996_vm0, %v9997_v7 }
 0x41c   : > { %8564 = vmatprep.subr.bf16.mxu1 %v9995_v3 }
 0x41e   : > { %8504 = vmatpush3.bf16.xpose.msk.msra.mxu0 %vm11038_vm4, %v11083_v32 }
 0x423   : > { %8566 = vmatpush3.bf16.xpose.msra.mxu1 %v8481_v42 }
 0x424   : > { %8567 = vmatprep.subr.bf16.mxu1 %v9995_v3 }
 0x425   : > { %7949 = vmatmul.mubr.f32.vlgmr.msra.gmra.mrb[2].mxu0 %v11132_v6  ;;  %v3525_v6 = vsub.s32 0, %v10592_v5 }
 0x42b   : > { %8569 = vmatpush3.bf16.xpose.msra.mxu1 %v8484_v46 }
 0x42c   : > { %8570 = vmatprep.subr.bf16.mxu1 %v9995_v3 }
 0x433   : > { %8572 = vmatpush3.bf16.xpose.msra.mxu1 %v8487_v50 }
 0x434   : > { %8573 = vmatprep.subr.bf16.mxu1 %v9995_v3 }
 0x43a   : > { %8044 = vmatmul.mubr.f32.vlgmr.msra.gmra.mrb[4].mxu1 %v11197_v63 }
 0x43b   : > { %8576 = vmatpush3.bf16.xpose.msk.msra.mxu1 %vm11038_vm4, %v10662_v31  ;;  %8062 = vmatprep.mubr.msk.f32.mxu1 %vm9996_vm0, %v9997_v7  ;;  %v9030_v31 = vld [vmem:[%s12099_s26] sm:$0xff]  }
 0x43c   : > { %8577 = vmatprep.subr.bf16.mxu1 %v9995_v3  ;;  %8628 = vmatprep.subr.msk.bf16.mxu0 %vm1281_vm1, %v9030_v31 }
 0x443   : > { %8580 = vmatpush3.bf16.xpose.msk.msra.mxu1 %vm11038_vm4, %v11052_v28  ;;  %v3629_v28 = vsel %vm1281_vm1, %v9030_v31, 0 }
 0x444   : > { %8581 = vmatprep.subr.bf16.mxu1 %v9995_v3  ;;  %8066 = vmatpush3.bf16.xpose.msra.mxu0 %v3629_v28 }
 0x445   : > { %8629 = vmatprep.subr.msk.bf16.mxu0 %vm1281_vm1, %v9031_v52 }
 0x44b   : > { %8584 = vmatpush3.bf16.xpose.msk.msra.mxu1 %vm11038_vm4, %v11069_v36  ;;  %v3632_v36 = vsel %vm1281_vm1, %v9031_v52, 0 }
 0x44c   : > { %8585 = vmatprep.subr.bf16.mxu1 %v9995_v3  ;;  %8068 = vmatpush3.bf16.xpose.msra.mxu0 %v3632_v36  ;;  %v3635_v3 = vsel %vm1281_vm1, %v9032_v26, 0 }
 0x44d   : > { %8630 = vmatprep.subr.msk.bf16.mxu0 %vm1281_vm1, %v9032_v26 }
 0x453   : > { %8588 = vmatpush3.bf16.xpose.msk.msra.mxu1 %vm11038_vm4, %v11083_v32  ;;  %v3638_v32 = vsel %vm1281_vm1, %v9033_v33, 0 }
 0x454   : > { %8070 = vmatpush3.bf16.xpose.msra.mxu0 %v3635_v3 }
 0x455   : > { %8631 = vmatprep.subr.msk.bf16.mxu0 %vm1281_vm1, %v9033_v33 }
 0x45a   : > { %8063 = vmatmul.mubr.f32.vlgmr.msra.gmra.mrb[4].mxu1 %v11197_v63 }
 0x45c   : > { %8072 = vmatpush3.bf16.xpose.msra.mxu0 %v3638_v32 }
 0x4f8   : > { %v2979_v4 = vpop.f32.mrb[2].mxu0 }
 0x4f9   : > { %v7950_v60 = vpop.f32.mrb[3].mxu0  ;;  %v3526_v8 = vrot.slane %v2979_v4, %v3525_v6 }
 0x4fb   : > { %v3527_v34 = vsub.f32 %v9068_v16, %v3526_v8  ;;  %v3528_v51 = vsub.f32 %v9069_v43, %v3526_v8  ;;  %v3529_v45 = vsub.f32 %v9070_v44, %v3526_v8  ;;  %v3530_v1 = vsub.f32 %v9071_v48, %v3526_v8  ;;  %v9034_v44 = vld [vmem:[%s12101_s23] sm:$0xff]  }
 0x4fc   : > { %v3531_v55 = vsub.f32 %v10638_v24, %v3526_v8  ;;  %v3532_v56 = vsub.f32 %v10654_v29, %v3526_v8  ;;  %v3533_v58 = vsub.f32 %v10699_v40, %v3526_v8  ;;  %v3534_v5 = vsub.f32 %v10744_v54, %v3526_v8  ;;  %8632 = vmatprep.subr.msk.bf16.mxu1 %vm1281_vm1, %v9034_v44 }
 0x4fd   : > { %v3893_v48 = vsel %vm1281_vm1, %v9034_v44, 0 }
 0x4fe   : > { %8082 = vmatpush3.bf16.xpose.msra.mxu1 %v3893_v48 }
 0x52d   : > { %v3519_v12 = vpop.f32.mrb[4].mxu1 }
 0x52e   : > { %v3538_v35 = vrot.slane %v3519_v12, %v3525_v6  ;;  %v8064_v41 = vpop.f32.mrb[5].mxu1 }
 0x530   : > { %v3539_v0 = vmul.f32 %v3538_v35, %v3527_v34  ;;  %v3540_v19 = vmul.f32 %v3538_v35, %v3528_v51  ;;  %v3541_v27 = vmul.f32 %v3538_v35, %v3529_v45  ;;  %v3542_v62 = vmul.f32 %v3538_v35, %v3530_v1  ;;  %v9035_v45 = vld [vmem:[#allocation16] sm:$0xff]  }
 0x531   : > { %v3543_v30 = vmul.f32 %v3538_v35, %v3531_v55  ;;  %v3544_v38 = vmul.f32 %v3538_v35, %v3532_v56  ;;  %v3545_v39 = vmul.f32 %v3538_v35, %v3533_v58  ;;  %v3546_v53 = vmul.f32 %v3538_v35, %v3534_v5  ;;  %8636 = vmatprep.subr.msk.bf16.mxu0 %vm1281_vm1, %v9035_v45 }
 0x532   : > { %v3554_v57 = vmul.f32 %v7089_v2, %v3539_v0  ;;  %v3555_v23 = vmul.f32 %v7089_v2, %v3540_v19  ;;  %v3556_v61 = vmul.f32 %v7089_v2, %v3541_v27  ;;  %v3557_v13 = vmul.f32 %v7089_v2, %v3542_v62 }
 0x533   : > { %v3558_v24 = vmul.f32 %v7089_v2, %v3543_v30  ;;  %v3559_v14 = vmul.f32 %v7089_v2, %v3544_v38  ;;  %v3560_v29 = vmul.f32 %v7089_v2, %v3545_v39  ;;  %v3561_v15 = vmul.f32 %v7089_v2, %v3546_v53 }
 0x534   : > { %v3569_v40 = vadd.f32 %v7090_v10, %v3554_v57  ;;  %v3570_v21 = vadd.f32 %v7090_v10, %v3555_v23  ;;  %v3571_v54 = vadd.f32 %v7090_v10, %v3556_v61  ;;  %v3572_v22 = vadd.f32 %v7090_v10, %v3557_v13 }
 0x535   : > { %v3573_v49 = vadd.f32 %v7090_v10, %v3558_v24  ;;  %v3574_v11 = vadd.f32 %v7090_v10, %v3559_v14  ;;  %v3575_v59 = vadd.f32 %v7090_v10, %v3560_v29  ;;  %v3576_v63 = vadd.f32 %v7090_v10, %v3561_v15 }
 0x536   : > { %v3586_v37 = vpack.c.bf16 %v3570_v21, %v3569_v40  ;;  %v3587_v17 = vpack.c.bf16 %v3572_v22, %v3571_v54  ;;  %v4046_v1 = vsel %vm1281_vm1, %v9035_v45, 0 }
 0x537   : > { %v3588_v18 = vpack.c.bf16 %v3574_v11, %v3573_v49  ;;  %v3589_v20 = vpack.c.bf16 %v3576_v63, %v3575_v59 }
 0x538   : > { %8073 = vmatprep.mubr.msk.bf16.mxu0 %vm1281_vm1, %v3586_v37 }
 0x539   : > { %8074 = vmatmul.mubr.msk.bf16.vlgmr.msra.gmra.mrb[4].mxu0 %vm1281_vm1, %v3587_v17 }
 0x53a   : > { %8077 = vmatprep.mubr.msk.bf16.mxu0 %vm1281_vm1, %v3588_v18  ;;  %8098 = vmatpush3.bf16.xpose.msra.mxu0 %v4046_v1 }
 0x541   : > { %8078 = vmatmul.mubr.msk.bf16.gmra.mrb[8].mxu0 %vm1281_vm1, %v3589_v20 }
 0x60c   : > { %v8075_v47 = vpop.f32.mrb[4].mxu0 }
 0x60d   : > { %v3683_v9 = vadd.f32 %v8075_v47, %v7091_v25  ;;  %v3674_v42 = vpop.f32.mrb[5].mxu0 }
 0x60e   : > { %v3675_v46 = vadd.f32 %v7091_v25, %v3674_v42  ;;  %v8076_v50 = vpop.f32.mrb[6].mxu0 }
 0x60f   : > { %3707 = vst.msk [vmem:[#allocation2 + $0x10] sm:$0xff] %vm1281_vm1, %v3683_v9  ;;  %v3686_v31 = vadd.f32 %v8076_v50, %v7091_v25  ;;  %v3677_v52 = vpop.f32.mrb[7].mxu0  ;;  %v3721_v28 = vsel %vm1281_vm1, %v3683_v9, 0.0 }
 0x610   : > { %3705 = vst.msk [vmem:[#allocation2] sm:$0xff] %vm1281_vm1, %v3675_v46  ;;  %v3678_v36 = vadd.f32 %v7091_v25, %v3677_v52  ;;  %3722 = vadd.xlane.f32.xlu1 %v3721_v28  ;;  %v3715_v26 = vsel %vm1281_vm1, %v3675_v46, 0.0  ;;  %v9037_v52 = vld [vmem:[#allocation16 + $0x8] sm:$0xff]  }
 0x611   : > { %3708 = vst.msk [vmem:[#allocation2 + $0x18] sm:$0xff] %vm1281_vm1, %v3686_v31  ;;  %3716 = vadd.xlane.f32.xlu0 %v3715_v26  ;;  %v3724_v3 = vsel %vm1281_vm1, %v3686_v31, 0.0  ;;  %8637 = vmatprep.subr.msk.bf16.mxu0 %vm1281_vm1, %v9037_v52  ;;  %v9038_v26 = vld [vmem:[%s12102_s1 + $0x10] sm:$0xff]  }
 0x612   : > { %3706 = vst.msk [vmem:[#allocation2 + $0x8] sm:$0xff] %vm1281_vm1, %v3678_v36  ;;  %v3718_v32 = vsel %vm1281_vm1, %v3678_v36, 0.0 }
 0x614   : > { %3725 = vadd.xlane.f32.xlu1 %v3724_v3  ;;  %v8079_v33 = vpop.f32.mrb[8].mxu0  ;;  %v9039_v3 = vld [vmem:[#allocation16 + $0x10] sm:$0xff]  }
 0x615   : > { %v3699_v4 = vadd.f32 %v8079_v33, %v7091_v25  ;;  %v3690_v60 = vpop.f32.mrb[9].mxu0  ;;  %3719 = vadd.xlane.f32.xlu0 %v3718_v32  ;;  %v3899_v33 = vsel %vm1281_vm1, %v9038_v26, 0  ;;  %v4052_v32 = vsel %vm1281_vm1, %v9039_v3, 0 }
 0x616   : > { %v3691_v6 = vadd.f32 %v7091_v25, %v3690_v60  ;;  %v8080_v8 = vpop.f32.mrb[10].mxu0  ;;  %v9041_v60 = vld [vmem:[#allocation16 + $0x18] sm:$0xff]  }
 0x617   : > { %3711 = vst.msk [vmem:[#allocation2 + $0x30] sm:$0xff] %vm1281_vm1, %v3699_v4  ;;  %v3702_v12 = vadd.f32 %v8080_v8, %v7091_v25  ;;  %v3693_v16 = vpop.f32.mrb[11].mxu0  ;;  %v3733_v43 = vsel %vm1281_vm1, %v3699_v4, 0.0  ;;  %v4055_v8 = vsel %vm1281_vm1, %v9041_v60, 0 }
 0x618   : > { %3709 = vst.msk [vmem:[#allocation2 + $0x20] sm:$0xff] %vm1281_vm1, %v3691_v6  ;;  %v3694_v34 = vadd.f32 %v7091_v25, %v3693_v16  ;;  %v3727_v35 = vsel %vm1281_vm1, %v3691_v6, 0.0 }
 0x619   : > { %3712 = vst.msk [vmem:[#allocation2 + $0x38] sm:$0xff] %vm1281_vm1, %v3702_v12  ;;  %3728 = vadd.xlane.f32.xlu0 %v3727_v35  ;;  %v3736_v51 = vsel %vm1281_vm1, %v3702_v12, 0.0 }
 0x61a   : > { %3710 = vst.msk [vmem:[#allocation2 + $0x28] sm:$0xff] %vm1281_vm1, %v3694_v34  ;;  %v3730_v41 = vsel %vm1281_vm1, %v3694_v34, 0.0 }
 0x61b   : > { %3731 = vadd.xlane.f32.xlu1 %v3730_v41 }
 0x61d   : > { %3734 = vadd.xlane.f32.xlu0 %v3733_v43 }
 0x61f   : > { %3737 = vadd.xlane.f32.xlu1 %v3736_v51 }
 0x69d   : > { %v3723_v2 = vpop.xlane.xlu1 %3722 }
 0x69e   : > { %v3742_v55 = vmul.f32 0.015625, %v3723_v2  ;;  %v3717_v56 = vpop.xlane.xlu0 %3716 }
 0x69f   : > { %v3740_v58 = vmul.f32 0.015625, %v3717_v56 }
 0x6a0   : > { %v11381_v5 = vsub.f32 %v3683_v9, %v3742_v55 }
 0x6a1   : > { %v11383_v0 = vsub.f32 %v3675_v46, %v3740_v58  ;;  %v3726_v19 = vpop.xlane.xlu1 %3725 }
 0x6a2   : > { %v3743_v27 = vmul.f32 0.015625, %v3726_v19  ;;  %v3720_v62 = vpop.xlane.xlu0 %3719  ;;  %v3758_v57 = vmul.f32 %v11381_v5, %v11381_v5 }
 0x6a3   : > { %v3741_v10 = vmul.f32 0.015625, %v3720_v62  ;;  %v3756_v30 = vmul.f32 %v11383_v0, %v11383_v0 }
 0x6a4   : > { %v11387_v38 = vsub.f32 %v3686_v31, %v3743_v27  ;;  %v3770_v40 = vsel %vm1281_vm1, %v3758_v57, 0.0  ;;  %v9036_v31 = vld [vmem:[%s12102_s1 + $0x8] sm:$0xff]  }
 0x6a5   : > { %v11389_v39 = vsub.f32 %v3678_v36, %v3741_v10  ;;  %v3764_v53 = vsel %vm1281_vm1, %v3756_v30, 0.0  ;;  %8633 = vmatprep.subr.msk.bf16.mxu1 %vm1281_vm1, %v9036_v31  ;;  %v3896_v28 = vsel %vm1281_vm1, %v9036_v31, 0  ;;  %v4049_v36 = vsel %vm1281_vm1, %v9037_v52, 0  ;;  %v9043_v31 = vld [vmem:[#allocation27] sm:$0xff]  }
 0x6a6   : > { %3765 = vadd.xlane.f32.xlu0 %v3764_v53  ;;  %v3729_v23 = vpop.xlane.xlu0 %3728  ;;  %v3759_v14 = vmul.f32 %v11387_v38, %v11387_v38  ;;  %8084 = vmatpush3.bf16.xpose.msra.mxu1 %v3896_v28 }
 0x6a7   : > { %v3744_v61 = vmul.f32 0.015625, %v3729_v23  ;;  %v3757_v13 = vmul.f32 %v11389_v39, %v11389_v39  ;;  %8100 = vmatpush3.bf16.xpose.msra.mxu0 %v4049_v36  ;;  %8634 = vmatprep.subr.msk.bf16.mxu1 %vm1281_vm1, %v9038_v26 }
 0x6a8   : > { %v3732_v24 = vpop.xlane.xlu1 %3731  ;;  %v3773_v63 = vsel %vm1281_vm1, %v3759_v14, 0.0  ;;  %8638 = vmatprep.subr.msk.bf16.mxu0 %vm1281_vm1, %v9039_v3 }
 0x6a9   : > { %v11398_v29 = vsub.f32 %v3691_v6, %v3744_v61  ;;  %v3745_v15 = vmul.f32 0.015625, %v3732_v24  ;;  %v3767_v21 = vsel %vm1281_vm1, %v3757_v13, 0.0  ;;  %v7100_v13 = vld [vmem:[#allocation13] ss:$0 sm:$0xff] }
 0x6aa   : > { %3771 = vadd.xlane.f32.xlu0 %v3770_v40  ;;  %3768 = vadd.xlane.f32.xlu1 %v3767_v21  ;;  %v3735_v54 = vpop.xlane.xlu0 %3734 }
 0x6ab   : > { %v11402_v22 = vsub.f32 %v3694_v34, %v3745_v15  ;;  %v3746_v49 = vmul.f32 0.015625, %v3735_v54  ;;  %v3760_v11 = vmul.f32 %v11398_v29, %v11398_v29 }
 0x6ac   : > { %v3738_v59 = vpop.xlane.xlu1 %3737 }
 0x6ad   : > { %v11407_v37 = vsub.f32 %v3699_v4, %v3746_v49  ;;  %v3747_v17 = vmul.f32 0.015625, %v3738_v59  ;;  %v3776_v18 = vsel %vm1281_vm1, %v3760_v11, 0.0  ;;  %v3761_v20 = vmul.f32 %v11402_v22, %v11402_v22  ;;  %v9040_v4 = vld [vmem:[%s12102_s1 + $0x18] sm:$0xff]   ;;  %v7101_v11 = vld [vmem:[#allocation15] ss:$0 sm:$0xff] }
 0x6ae   : > { %3774 = vadd.xlane.f32.xlu1 %v3773_v63  ;;  %3777 = vadd.xlane.f32.xlu0 %v3776_v18  ;;  %v3902_v6 = vsel %vm1281_vm1, %v9040_v4, 0 }
 0x6af   : > { %v11412_v25 = vsub.f32 %v3702_v12, %v3747_v17  ;;  %v3762_v47 = vmul.f32 %v11407_v37, %v11407_v37  ;;  %v3779_v9 = vsel %vm1281_vm1, %v3761_v20, 0.0  ;;  %8086 = vmatpush3.bf16.xpose.msra.mxu1 %v3899_v33  ;;  %8102 = vmatpush3.bf16.xpose.msra.mxu0 %v4052_v32  ;;  %v4298_v33 = vsel %vm1281_vm1, %v9043_v31, 0 }
 0x6b0   : > { %8635 = vmatprep.subr.msk.bf16.mxu1 %vm1281_vm1, %v9040_v4  ;;  %8639 = vmatprep.subr.msk.bf16.mxu0 %vm1281_vm1, %v9041_v60 }
 0x6b1   : > { %v3782_v42 = vsel %vm1281_vm1, %v3762_v47, 0.0  ;;  %v3763_v46 = vmul.f32 %v11412_v25, %v11412_v25 }
 0x6b2   : > { %3780 = vadd.xlane.f32.xlu1 %v3779_v9  ;;  %3783 = vadd.xlane.f32.xlu0 %v3782_v42 }
 0x6b3   : > { %v3785_v50 = vsel %vm1281_vm1, %v3763_v46, 0.0 }
 0x6b6   : > { %3786 = vadd.xlane.f32.xlu1 %v3785_v50  ;;  %v9042_v50 = vld [vmem:[#allocation25] sm:$0xff]  }
 0x6b7   : > { %8088 = vmatpush3.bf16.xpose.msra.mxu1 %v3902_v6  ;;  %8104 = vmatpush3.bf16.xpose.msra.mxu0 %v4055_v8 }
 0x6b8   : > { %8113 = vmatprep.subr.bf16.mxu1 %v9997_v7  ;;  %8125 = vmatprep.subr.bf16.mxu0 %v9997_v7 }
 0x733   : > { %v3766_v12 = vpop.xlane.xlu0 %3765 }
 0x734   : > { %v3788_v16 = vmul.f32 0.015625, %v3766_v12 }
 0x736   : > { %v3796_v34 = vadd.f32 1e-05, %v3788_v16  ;;  %v9044_v16 = vld [vmem:[#allocation25 + $0x8] sm:$0xff]  }
 0x737   : > { %v3769_v35 = vpop.xlane.xlu1 %3768  ;;  %v3772_v41 = vpop.xlane.xlu0 %3771 }
 0x738   : > { %9052 = vrsqrt.f32 %v3796_v34  ;;  %v3789_v43 = vmul.f32 0.015625, %v3769_v35  ;;  %v3790_v51 = vmul.f32 0.015625, %v3772_v41  ;;  %v9045_v34 = vld [vmem:[#allocation27 + $0x8] sm:$0xff]  }
 0x73a   : > { %v3797_v44 = vadd.f32 1e-05, %v3789_v43  ;;  %v3798_v45 = vadd.f32 1e-05, %v3790_v51  ;;  %v4208_v43 = vsel %vm1281_vm1, %v9044_v16, 0  ;;  %v4301_v51 = vsel %vm1281_vm1, %v9045_v34, 0 }
 0x73b   : > { %v3775_v48 = vpop.xlane.xlu1 %3774  ;;  %v3778_v1 = vpop.xlane.xlu0 %3777 }
 0x73c   : > { %9054 = vrsqrt.f32 %v3797_v44  ;;  %v3791_v2 = vmul.f32 0.015625, %v3775_v48  ;;  %v3792_v55 = vmul.f32 0.015625, %v3778_v1  ;;  %v9046_v44 = vld [vmem:[#allocation25 + $0x10] sm:$0xff]  }
 0x73d   : > { %9056 = vrsqrt.f32 %v3798_v45  ;;  %v9047_v45 = vld [vmem:[#allocation27 + $0x10] sm:$0xff]   ;;  %v4211_v48 = vsel %vm1281_vm1, %v9046_v44, 0 }
 0x73e   : > { %v3799_v56 = vadd.f32 1e-05, %v3791_v2  ;;  %v3800_v58 = vadd.f32 1e-05, %v3792_v55  ;;  %v4304_v1 = vsel %vm1281_vm1, %v9047_v45, 0  ;;  %v9048_v2 = vld [vmem:[#allocation25 + $0x18] sm:$0xff]  }
 0x73f   : > { %v3781_v19 = vpop.xlane.xlu1 %3780  ;;  %v3784_v27 = vpop.xlane.xlu0 %3783  ;;  %v9049_v55 = vld [vmem:[#allocation27 + $0x18] sm:$0xff]  }
 0x740   : > { %9058 = vrsqrt.f32 %v3799_v56  ;;  %v3793_v62 = vmul.f32 0.015625, %v3781_v19  ;;  %v3794_v10 = vmul.f32 0.015625, %v3784_v27  ;;  %v4214_v56 = vsel %vm1281_vm1, %v9048_v2, 0  ;;  %v4170_v19 = vld [vmem:[%s10576_s0] sm:$0xff]  ;;  %v4171_v27 = vld [vmem:[%s10576_s0 + $0x8] sm:$0xff] }
 0x741   : > { %9060 = vrsqrt.f32 %v3800_v58  ;;  %v4307_v58 = vsel %vm1281_vm1, %v9049_v55, 0 }
 0x742   : > { %v9053_v30 = vpop.eup %9052  ;;  %v3801_v53 = vadd.f32 1e-05, %v3793_v62  ;;  %v3802_v57 = vadd.f32 1e-05, %v3794_v10  ;;  %v4180_v62 = vpack.c.bf16 %v4171_v27, %v4170_v19 }
 0x743   : > { %v3812_v23 = vmul.f32 %v9053_v30, %v11383_v0  ;;  %v3787_v61 = vpop.xlane.xlu1 %3786 }
 0x744   : > { %9062 = vrsqrt.f32 %v3801_v53  ;;  %v3795_v24 = vmul.f32 0.015625, %v3787_v61 }
 0x745   : > { %9064 = vrsqrt.f32 %v3802_v57  ;;  %v3826_v54 = vmul.f32 %v7100_v13, %v3812_v23 }
 0x746   : > { %v9055_v14 = vpop.eup %9054  ;;  %v3803_v15 = vadd.f32 1e-05, %v3795_v24 }
 0x747   : > { %v9057_v40 = vpop.eup %9056  ;;  %v3813_v21 = vmul.f32 %v9055_v14, %v11389_v39  ;;  %v3840_v20 = vadd.f32 %v7101_v11, %v3826_v54 }
 0x748   : > { %v3814_v49 = vmul.f32 %v9057_v40, %v11381_v5  ;;  %9066 = vrsqrt.f32 %v3803_v15 }
 0x749   : > { %v3827_v59 = vmul.f32 %v7100_v13, %v3813_v21 }
 0x74a   : > { %v9059_v63 = vpop.eup %9058  ;;  %v3828_v18 = vmul.f32 %v7100_v13, %v3814_v49 }
 0x74b   : > { %v9061_v17 = vpop.eup %9060  ;;  %v3815_v0 = vmul.f32 %v9059_v63, %v11387_v38  ;;  %v3841_v47 = vadd.f32 %v7101_v11, %v3827_v59 }
 0x74c   : > { %v3816_v9 = vmul.f32 %v9061_v17, %v11398_v29  ;;  %v3842_v36 = vadd.f32 %v7101_v11, %v3828_v18  ;;  %v4205_v29 = vsel %vm1281_vm1, %v9042_v50, 0 }
 0x74d   : > { %v3829_v42 = vmul.f32 %v7100_v13, %v3815_v0  ;;  %v3856_v46 = vpack.c.bf16 %v3841_v47, %v3840_v20 }
 0x74e   : > { %v9063_v39 = vpop.eup %9062  ;;  %v3830_v52 = vmul.f32 %v7100_v13, %v3816_v9 }
 0x74f   : > { %v9065_v28 = vpop.eup %9064  ;;  %v3817_v5 = vmul.f32 %v9063_v39, %v11402_v22  ;;  %8089 = vmatprep.mubr.msk.bf16.mxu1 %vm1281_vm1, %v3856_v46  ;;  %8105 = vmatprep.mubr.msk.bf16.mxu0 %vm1281_vm1, %v3856_v46  ;;  %v3843_v26 = vadd.f32 %v7101_v11, %v3829_v42 }
 0x750   : > { %v3818_v38 = vmul.f32 %v9065_v28, %v11407_v37  ;;  %v3844_v60 = vadd.f32 %v7101_v11, %v3830_v52 }
 0x751   : > { %v3857_v3 = vpack.c.bf16 %v3843_v26, %v3842_v36  ;;  %v3831_v32 = vmul.f32 %v7100_v13, %v3817_v5 }
 0x752   : > { %v9067_v4 = vpop.eup %9066  ;;  %v3832_v8 = vmul.f32 %v7100_v13, %v3818_v38 }
 0x753   : > { %v3819_v6 = vmul.f32 %v9067_v4, %v11412_v25  ;;  %8090 = vmatmul.mubr.msk.bf16.vlgmr.msra.gmra.mrb[8].mxu1 %vm1281_vm1, %v3857_v3  ;;  %8106 = vmatmul.mubr.msk.bf16.vlgmr.msra.gmra.mrb[12].mxu0 %vm1281_vm1, %v3857_v3  ;;  %v3845_v22 = vadd.f32 %v7101_v11, %v3831_v32 }
 0x754   : > { %8114 = vmatpush3.bf16.xpose.msra.mxu1 %v4205_v29  ;;  %8126 = vmatpush3.bf16.xpose.msra.mxu0 %v4298_v33  ;;  %v3846_v25 = vadd.f32 %v7101_v11, %v3832_v8 }
 0x755   : > { %v3858_v12 = vpack.c.bf16 %v3845_v22, %v3844_v60  ;;  %8115 = vmatprep.subr.bf16.mxu1 %v9997_v7  ;;  %8127 = vmatprep.subr.bf16.mxu0 %v9997_v7  ;;  %v3833_v37 = vmul.f32 %v7100_v13, %v3819_v6 }
 0x757   : > { %8093 = vmatprep.mubr.msk.bf16.mxu1 %vm1281_vm1, %v3858_v12  ;;  %8109 = vmatprep.mubr.msk.bf16.mxu0 %vm1281_vm1, %v3858_v12  ;;  %v3847_v35 = vadd.f32 %v7101_v11, %v3833_v37 }
 0x759   : > { %v3859_v41 = vpack.c.bf16 %v3847_v35, %v3846_v25 }
 0x75b   : > { %8094 = vmatmul.mubr.msk.bf16.gmra.mrb[12].mxu1 %vm1281_vm1, %v3859_v41  ;;  %8110 = vmatmul.mubr.msk.bf16.gmra.mrb[16].mxu0 %vm1281_vm1, %v3859_v41 }
 0x75c   : > { %8116 = vmatpush3.bf16.xpose.msra.mxu1 %v4208_v43  ;;  %8128 = vmatpush3.bf16.xpose.msra.mxu0 %v4301_v51 }
 0x75d   : > { %8117 = vmatprep.subr.bf16.mxu1 %v9997_v7  ;;  %8129 = vmatprep.subr.bf16.mxu0 %v9997_v7 }
 0x75e   : > { %8121 = vmatprep.mubr.msk.bf16.mxu1 %vm9996_vm0, %v9997_v7  ;;  %8133 = vmatprep.mubr.msk.bf16.mxu0 %vm9996_vm0, %v9997_v7 }
 0x764   : > { %8118 = vmatpush3.bf16.xpose.msra.mxu1 %v4211_v48  ;;  %8130 = vmatpush3.bf16.xpose.msra.mxu0 %v4304_v1 }
 0x765   : > { %8119 = vmatprep.subr.bf16.mxu1 %v9997_v7  ;;  %8131 = vmatprep.subr.bf16.mxu0 %v9997_v7 }
 0x76c   : > { %8120 = vmatpush3.bf16.xpose.msra.mxu1 %v4214_v56  ;;  %8132 = vmatpush3.bf16.xpose.msra.mxu0 %v4307_v58 }
 0x773   : > { %8122 = vmatmul.mubr.msk.bf16.vlgmr.msra.gmra.mrb[16].mxu1 %vm1281_vm1, %v4180_v62  ;;  %8134 = vmatmul.mubr.msk.bf16.vlgmr.msra.gmra.mrb[20].mxu0 %vm1281_vm1, %v4180_v62 }
 0x826   : > { %v8091_v10 = vpop.f32.mrb[8].mxu1  ;;  %v8107_v30 = vpop.f32.mrb[12].mxu0 }
 0x827   : > { %v3938_v53 = vpop.f32.mrb[9].mxu1  ;;  %v4091_v57 = vpop.f32.mrb[13].mxu0 }
 0x828   : > { %v8092_v7 = vpop.f32.mrb[10].mxu1  ;;  %v8108_v23 = vpop.f32.mrb[14].mxu0 }
 0x829   : > { %v8980_v61 = vpack.i.bf16 %v8092_v7, %v8091_v10  ;;  %v4002_v13 = vpack.c.bf16 %v8092_v7, %v8091_v10  ;;  %v8985_v24 = vpack.i.bf16 %v8108_v23, %v8107_v30  ;;  %v4155_v14 = vpack.c.bf16 %v8108_v23, %v8107_v30  ;;  %v3941_v15 = vpop.f32.mrb[11].mxu1  ;;  %v4094_v40 = vpop.f32.mrb[15].mxu0 }
 0x82a   : > { %v8990_v21 = vpack.i.bf16 %v3941_v15, %v3938_v53  ;;  %v4001_v54 = vpack.c.bf16 %v3941_v15, %v3938_v53  ;;  %v8995_v49 = vpack.i.bf16 %v4094_v40, %v4091_v57  ;;  %v4154_v11 = vpack.c.bf16 %v4094_v40, %v4091_v57 }
 0x82b   : > { %4010 = vst.msk [vmem:[#allocation3 + $0x8] sm:$0xff] %vm2418_vm3, %v4002_v13  ;;  %4163 = vst.msk [vmem:[#allocation4 + $0x8] sm:$0xff] %vm2418_vm3, %v4155_v14  ;;  %8981 = vrot.lane.b32.xlu1 %v8980_v61, %s9999_s15 }
 0x82c   : > { %4009 = vst.msk [vmem:[#allocation3] sm:$0xff] %vm2418_vm3, %v4001_v54  ;;  %4162 = vst.msk [vmem:[#allocation4] sm:$0xff] %vm2418_vm3, %v4154_v11  ;;  %8991 = vrot.lane.b32.xlu0 %v8990_v21, %s9999_s15 }
 0x82e   : > { %v8095_v59 = vpop.f32.mrb[12].mxu1  ;;  %v8111_v63 = vpop.f32.mrb[16].mxu0 }
 0x82f   : > { %v4107_v17 = vpop.f32.mrb[17].mxu0  ;;  %8986 = vrot.lane.b32.xlu1 %v8985_v24, %s9999_s15  ;;  %v3954_v18 = vpop.f32.mrb[13].mxu1 }
 0x830   : > { %v8112_v0 = vpop.f32.mrb[18].mxu0  ;;  %8996 = vrot.lane.b32.xlu0 %v8995_v49, %s9999_s15  ;;  %v8096_v20 = vpop.f32.mrb[14].mxu1 }
 0x831   : > { %v9005_v47 = vpack.i.bf16 %v8112_v0, %v8111_v63  ;;  %v4157_v9 = vpack.c.bf16 %v8112_v0, %v8111_v63  ;;  %v9000_v42 = vpack.i.bf16 %v8096_v20, %v8095_v59  ;;  %v4004_v46 = vpack.c.bf16 %v8096_v20, %v8095_v59  ;;  %v3957_v50 = vpop.f32.mrb[15].mxu1  ;;  %v4110_v31 = vpop.f32.mrb[19].mxu0 }
 0x832   : > { %v9010_v39 = vpack.i.bf16 %v3957_v50, %v3954_v18  ;;  %v4003_v52 = vpack.c.bf16 %v3957_v50, %v3954_v18  ;;  %v9015_v28 = vpack.i.bf16 %v4110_v31, %v4107_v17  ;;  %v4156_v5 = vpack.c.bf16 %v4110_v31, %v4107_v17 }
 0x833   : > { %4165 = vst.msk [vmem:[#allocation4 + $0x18] sm:$0xff] %vm2418_vm3, %v4157_v9  ;;  %4012 = vst.msk [vmem:[#allocation3 + $0x18] sm:$0xff] %vm2418_vm3, %v4004_v46  ;;  %9001 = vrot.lane.b32.xlu1 %v9000_v42, %s9999_s15 }
 0x834   : > { %4011 = vst.msk [vmem:[#allocation3 + $0x10] sm:$0xff] %vm2418_vm3, %v4003_v52  ;;  %4164 = vst.msk [vmem:[#allocation4 + $0x10] sm:$0xff] %vm2418_vm3, %v4156_v5  ;;  %9016 = vrot.lane.b32.xlu0 %v9015_v28, %s9999_s15 }
 0x837   : > { %9006 = vrot.lane.b32.xlu1 %v9005_v47, %s9999_s15 }
 0x83b   : > { %9011 = vrot.lane.b32.xlu1 %v9010_v39, %s9999_s15 }
 0x846   : > { %v4250_v36 = vpop.f32.mrb[16].mxu1  ;;  %v4343_v26 = vpop.f32.mrb[20].mxu0 }
 0x847   : > { %v8123_v38 = vpop.f32.mrb[17].mxu1  ;;  %v8135_v3 = vpop.f32.mrb[21].mxu0 }
 0x848   : > { %v4253_v29 = vpop.f32.mrb[18].mxu1  ;;  %v4346_v33 = vpop.f32.mrb[22].mxu0 }
 0x849   : > { %v9020_v32 = vpack.i.bf16 %v4253_v29, %v4250_v36  ;;  %v4265_v4 = vpack.c.bf16 %v4253_v29, %v4250_v36  ;;  %v9025_v60 = vpack.i.bf16 %v4346_v33, %v4343_v26  ;;  %v4358_v6 = vpack.c.bf16 %v4346_v33, %v4343_v26  ;;  %v8124_v22 = vpop.f32.mrb[19].mxu1  ;;  %v8136_v8 = vpop.f32.mrb[23].mxu0 }
 0x84b   : > { %4267 = vst.msk [vmem:[#allocation5] sm:$0xff] %vm2418_vm3, %v4265_v4  ;;  %4360 = vst.msk [vmem:[#allocation6] sm:$0xff] %vm2418_vm3, %v4358_v6  ;;  %9026 = vrot.lane.b32.xlu1 %v9025_v60, %s9999_s15  ;;  %9021 = vrot.lane.b32.xlu0 %v9020_v32, %s9999_s15 }
 0x89d   : > { %v8982_v12 = vpop.permute.xlu1 %8981 }
 0x89e   : > { %v8984_v37 = vunpack.i.h.bf16 %v8982_v12  ;;  %v8983_v16 = vunpack.i.l.bf16 %v8982_v12  ;;  %v8992_v34 = vpop.permute.xlu0 %8991 }
 0x89f   : > { %v8994_v25 = vunpack.i.h.bf16 %v8992_v34  ;;  %v8993_v35 = vunpack.i.l.bf16 %v8992_v34 }
 0x8a0   : > { %v4006_v41 = vpack.c.bf16 %v8984_v37, %v8983_v16 }
 0x8a1   : > { %v4005_v43 = vpack.c.bf16 %v8994_v25, %v8993_v35  ;;  %v8987_v51 = vpop.permute.xlu1 %8986 }
 0x8a2   : > { %4014 = vst.msk [vmem:[#allocation3 + $0x28] sm:$0xff] %vm2418_vm3, %v4006_v41  ;;  %v8989_v44 = vunpack.i.h.bf16 %v8987_v51  ;;  %v8988_v45 = vunpack.i.l.bf16 %v8987_v51  ;;  %v8997_v48 = vpop.permute.xlu0 %8996 }
 0x8a3   : > { %4013 = vst.msk [vmem:[#allocation3 + $0x20] sm:$0xff] %vm2418_vm3, %v4005_v43  ;;  %v8999_v1 = vunpack.i.h.bf16 %v8997_v48  ;;  %v8998_v2 = vunpack.i.l.bf16 %v8997_v48 }
 0x8a4   : > { %v4159_v55 = vpack.c.bf16 %v8989_v44, %v8988_v45 }
 0x8a5   : > { %v4158_v56 = vpack.c.bf16 %v8999_v1, %v8998_v2  ;;  %v9002_v58 = vpop.permute.xlu1 %9001 }
 0x8a6   : > { %4167 = vst.msk [vmem:[#allocation4 + $0x28] sm:$0xff] %vm2418_vm3, %v4159_v55  ;;  %v9004_v19 = vunpack.i.h.bf16 %v9002_v58  ;;  %v9003_v27 = vunpack.i.l.bf16 %v9002_v58  ;;  %v9017_v62 = vpop.permute.xlu0 %9016 }
 0x8a7   : > { %4166 = vst.msk [vmem:[#allocation4 + $0x20] sm:$0xff] %vm2418_vm3, %v4158_v56  ;;  %v9019_v10 = vunpack.i.h.bf16 %v9017_v62  ;;  %v9018_v30 = vunpack.i.l.bf16 %v9017_v62 }
 0x8a8   : > { %v4008_v53 = vpack.c.bf16 %v9004_v19, %v9003_v27 }
 0x8a9   : > { %v4160_v57 = vpack.c.bf16 %v9019_v10, %v9018_v30  ;;  %v9007_v7 = vpop.permute.xlu1 %9006 }
 0x8aa   : > { %4016 = vst.msk [vmem:[#allocation3 + $0x38] sm:$0xff] %vm2418_vm3, %v4008_v53  ;;  %v9009_v23 = vunpack.i.h.bf16 %v9007_v7  ;;  %v9008_v61 = vunpack.i.l.bf16 %v9007_v7 }
 0x8ab   : > { %4168 = vst.msk [vmem:[#allocation4 + $0x30] sm:$0xff] %vm2418_vm3, %v4160_v57 }
 0x8ac   : > { %v4161_v13 = vpack.c.bf16 %v9009_v23, %v9008_v61 }
 0x8ad   : > { %v9012_v24 = vpop.permute.xlu1 %9011 }
 0x8ae   : > { %4169 = vst.msk [vmem:[#allocation4 + $0x38] sm:$0xff] %vm2418_vm3, %v4161_v13  ;;  %v9014_v14 = vunpack.i.h.bf16 %v9012_v24  ;;  %v9013_v15 = vunpack.i.l.bf16 %v9012_v24 }
 0x8b0   : > { %v4007_v40 = vpack.c.bf16 %v9014_v14, %v9013_v15 }
 0x8b2   : > { %4015 = vst.msk [vmem:[#allocation3 + $0x30] sm:$0xff] %vm2418_vm3, %v4007_v40 }
 0x8bd   : > { %v9027_v21 = vpop.permute.xlu1 %9026  ;;  %v9022_v54 = vpop.permute.xlu0 %9021 }
 0x8be   : > { %v9029_v49 = vunpack.i.h.bf16 %v9027_v21  ;;  %v9028_v11 = vunpack.i.l.bf16 %v9027_v21  ;;  %v9024_v59 = vunpack.i.h.bf16 %v9022_v54  ;;  %v9023_v63 = vunpack.i.l.bf16 %v9022_v54 }
 0x8c0   : > { %v4359_v17 = vpack.c.bf16 %v9029_v49, %v9028_v11  ;;  %v4266_v18 = vpack.c.bf16 %v9024_v59, %v9023_v63 }
 0x8c2   : > { %4361 = vst.msk [vmem:[#allocation6 + $0x8] sm:$0xff] %vm2418_vm3, %v4359_v17  ;;  %4268 = vst.msk [vmem:[#allocation5 + $0x8] sm:$0xff] %vm2418_vm3, %v4266_v18 }
 0x8c3 PF: > { %s12103_s17 = sld [smem:[#allocation71_spill]]  ;;  %s12104_s8 = sld [smem:[#allocation55_spill]]  ;;  %vm4375_vm0 = vcmask 523264   ;;  %v4449_v1 = vld [vmem:[#allocation3] sm:$0xff]  ;;  %vm4591_vm1 = vcmask 261120   ;;  %v4450_v2 = vld [vmem:[#allocation3 + $0x8] sm:$0xff] }
 0x8c4   : > { %8644 = vmatprep.subr.msk.bf16.mxu1 %vm4591_vm1, %v4449_v1  ;;  %v4599_v55 = vsel %vm4591_vm1, %v4449_v1, 0  ;;  %v4602_v56 = vsel %vm4591_vm1, %v4450_v2, 0  ;;  %v4451_v58 = vld [vmem:[#allocation3 + $0x10] sm:$0xff]  ;;  %v4452_v27 = vld [vmem:[#allocation3 + $0x18] sm:$0xff]  ;;  %v7129_v54 = vld [vmem:[#allocation13] ss:$0 sm:$0xff] }
 0x8c5   : > { %8150 = vmatpush3.bf16.xpose.msra.mxu1 %v4599_v55  ;;  %v4605_v19 = vsel %vm4591_vm1, %v4451_v58, 0  ;;  %v7130_v18 = vld [vmem:[#allocation15] ss:$0 sm:$0xff]  ;;  %s10000_s26 = smov 96   ;;  %vm5428_vm14 = vcmask 130048   ;;  %s12105_s23 = sld [smem:[#allocation63_spill]] }
 0x8c6   : > { %8645 = vmatprep.subr.msk.bf16.mxu1 %vm4591_vm1, %v4450_v2  ;;  %s12107_s15 = sld [smem:[#allocation65_spill]]  ;;  %s12116_s3 = sld [smem:[#allocation69_spill]] }
 0x8c7   : > { %p12118_p6 = scmp.ne.s32.totalorder %s12068_s20, 0 }
 0x8c9   : > { %s12027_s0 = sshll.u32 %s12103_s17, 5  ;;  %v9092_v39 = vld [vmem:[%s12104_s8] sm:$0xff]   ;;  %v9093_v41 = vld [vmem:[%s12104_s8 + $0x8] sm:$0xff]   ;;  %v9094_v51 = vld [vmem:[%s12104_s8 + $0x10] sm:$0xff]  }
 0x8ca   : > { %s4368_s2 = scalar_lea.vmem [#allocation2], %s12027_s0  ;;  %8640 = vmatprep.subr.msk.bf16.mxu0 %vm4375_vm0, %v9092_v39  ;;  %v4511_v35 = vsel %vm4375_vm0, %v9092_v39, 0  ;;  %v4514_v43 = vsel %vm4375_vm0, %v9093_v41, 0  ;;  %v4517_v44 = vsel %vm4375_vm0, %v9094_v51, 0  ;;  %v9095_v45 = vld [vmem:[%s12104_s8 + $0x18] sm:$0xff]  }
 0x8cb   : > { %v11509_v0 = vld [vmem:[%s4368_s2] sm:$0xff]  ;;  %v11511_v20 = vld [vmem:[%s4368_s2 + $0x10] sm:$0xff]  ;;  %v11513_v47 = vld [vmem:[%s4368_s2 + $0x8] sm:$0xff]  ;;  %8138 = vmatpush3.bf16.xpose.msra.mxu0 %v4511_v35  ;;  %v4520_v48 = vsel %vm4375_vm0, %v9095_v45, 0 }
 0x8cc   : > { %v4376_v9 = vsel %vm4375_vm0, %v11509_v0, 0.0  ;;  %v4382_v42 = vsel %vm4375_vm0, %v11511_v20, 0.0  ;;  %v4379_v46 = vsel %vm4375_vm0, %v11513_v47, 0.0  ;;  %v11521_v50 = vld [vmem:[%s4368_s2 + $0x18] sm:$0xff]  ;;  %8641 = vmatprep.subr.msk.bf16.mxu0 %vm4375_vm0, %v9093_v41  ;;  %s12106_s2 = smov %s12105_s23  ;;  %s12108_s10 = smov %s12107_s15 }
 0x8cd   : > { %4377 = vadd.xlane.f32.xlu0 %v4376_v9  ;;  %4383 = vadd.xlane.f32.xlu1 %v4382_v42  ;;  %v4385_v31 = vsel %vm4375_vm0, %v11521_v50, 0.0 }
 0x8ce   : > { %8152 = vmatpush3.bf16.xpose.msra.mxu1 %v4602_v56 }
 0x8cf   : > { %8646 = vmatprep.subr.msk.bf16.mxu1 %vm4591_vm1, %v4451_v58 }
 0x8d1   : > { %4380 = vadd.xlane.f32.xlu0 %v4379_v46  ;;  %4386 = vadd.xlane.f32.xlu1 %v4385_v31 }
 0x8d3   : > { %8140 = vmatpush3.bf16.xpose.msra.mxu0 %v4514_v43 }
 0x8d4   : > { %8642 = vmatprep.subr.msk.bf16.mxu0 %vm4375_vm0, %v9094_v51 }
 0x8d6   : > { %8154 = vmatpush3.bf16.xpose.msra.mxu1 %v4605_v19 }
 0x8d7   : > { %8647 = vmatprep.subr.msk.bf16.mxu1 %vm4591_vm1, %v4452_v27 }
 0x8db   : > { %8142 = vmatpush3.bf16.xpose.msra.mxu0 %v4517_v44 }
 0x8dc   : > { %8643 = vmatprep.subr.msk.bf16.mxu0 %vm4375_vm0, %v9095_v45 }
 0x8e3   : > { %8144 = vmatpush3.bf16.xpose.msra.mxu0 %v4520_v48 }
 0x95a   : > { %v4378_v52 = vpop.xlane.xlu0 %4377  ;;  %v4384_v28 = vpop.xlane.xlu1 %4383 }
 0x95b   : > { %v4389_v5 = vmul.f32 0.015625, %v4378_v52  ;;  %v4391_v36 = vmul.f32 0.015625, %v4384_v28 }
 0x95d   : > { %v11528_v26 = vsub.f32 %v11509_v0, %v4389_v5  ;;  %v11531_v38 = vsub.f32 %v11511_v20, %v4391_v36 }
 0x95e   : > { %v4381_v3 = vpop.xlane.xlu0 %4380  ;;  %v4387_v29 = vpop.xlane.xlu1 %4386 }
 0x95f   : > { %v4390_v33 = vmul.f32 0.015625, %v4381_v3  ;;  %v4392_v32 = vmul.f32 0.015625, %v4387_v29  ;;  %v4397_v4 = vmul.f32 %v11528_v26, %v11528_v26  ;;  %v4399_v60 = vmul.f32 %v11531_v38, %v11531_v38 }
 0x960   : > { %v4608_v29 = vsel %vm4591_vm1, %v4452_v27, 0 }
 0x961   : > { %v4394_v6 = vsub.f32 %v11513_v47, %v4390_v33  ;;  %v11539_v22 = vsub.f32 %v11521_v50, %v4392_v32  ;;  %v4401_v8 = vsel %vm4375_vm0, %v4397_v4, 0.0  ;;  %v4407_v12 = vsel %vm4375_vm0, %v4399_v60, 0.0  ;;  %8156 = vmatpush3.bf16.xpose.msra.mxu1 %v4608_v29  ;;  %v4454_v33 = vld [vmem:[#allocation3 + $0x28] sm:$0xff]  ;;  %v4455_v60 = vld [vmem:[#allocation3 + $0x30] sm:$0xff] }
 0x962   : > { %4402 = vadd.xlane.f32.xlu0 %v4401_v8  ;;  %v4669_v4 = vsel %vm4591_vm1, %v4454_v33, 0 }
 0x963   : > { %v4398_v37 = vmul.f32 %v4394_v6, %v4394_v6  ;;  %v4400_v16 = vmul.f32 %v11539_v22, %v11539_v22 }
 0x965   : > { %v4404_v34 = vsel %vm4375_vm0, %v4398_v37, 0.0  ;;  %v4410_v25 = vsel %vm4375_vm0, %v4400_v16, 0.0 }
 0x966   : > { %4408 = vadd.xlane.f32.xlu0 %v4407_v12  ;;  %4405 = vadd.xlane.f32.xlu1 %v4404_v34 }
 0x96a   : > { %4411 = vadd.xlane.f32.xlu1 %v4410_v25 }
 0x9ef   : > { %v4403_v62 = vpop.xlane.xlu0 %4402 }
 0x9f0   : > { %v4413_v10 = vmul.f32 0.015625, %v4403_v62 }
 0x9f2   : > { %v4417_v30 = vadd.f32 1e-05, %v4413_v10 }
 0x9f3   : > { %v4406_v53 = vpop.xlane.xlu1 %4405  ;;  %v4409_v57 = vpop.xlane.xlu0 %4408 }
 0x9f4   : > { %9156 = vrsqrt.f32 %v4417_v30  ;;  %v4414_v7 = vmul.f32 0.015625, %v4406_v53  ;;  %v4415_v23 = vmul.f32 0.015625, %v4409_v57 }
 0x9f6   : > { %v4418_v61 = vadd.f32 1e-05, %v4414_v7  ;;  %v4419_v13 = vadd.f32 1e-05, %v4415_v23 }
 0x9f7   : > { %v4412_v24 = vpop.xlane.xlu1 %4411 }
 0x9f8   : > { %9158 = vrsqrt.f32 %v4418_v61  ;;  %v4416_v14 = vmul.f32 0.015625, %v4412_v24  ;;  %v4457_v24 = vld [vmem:[#allocation4] sm:$0xff] }
 0x9f9   : > { %9160 = vrsqrt.f32 %v4419_v13  ;;  %8173 = vmatprep.subr.bf16.mxu1 %v4457_v24 }
 0x9fa   : > { %v4420_v15 = vadd.f32 1e-05, %v4416_v14  ;;  %v4458_v14 = vld [vmem:[#allocation4 + $0x8] sm:$0xff] }
 0x9fc   : > { %9162 = vrsqrt.f32 %v4420_v15  ;;  %v4459_v15 = vld [vmem:[#allocation4 + $0x10] sm:$0xff] }
 0x9fe   : > { %v9157_v40 = vpop.eup %9156 }
 0x9ff   : > { %v4425_v21 = vmul.f32 %v9157_v40, %v11528_v26  ;;  %v4460_v40 = vld [vmem:[#allocation4 + $0x18] sm:$0xff] }
 0xa01   : > { %v4435_v63 = vmul.f32 %v7129_v54, %v4425_v21 }
 0xa02   : > { %v9159_v49 = vpop.eup %9158 }
 0xa03   : > { %v9161_v11 = vpop.eup %9160  ;;  %v4426_v59 = vmul.f32 %v9159_v49, %v4394_v6  ;;  %v4445_v31 = vadd.f32 %v7130_v18, %v4435_v63  ;;  %v4672_v6 = vsel %vm4591_vm1, %v4455_v60, 0 }
 0xa04   : > { %v4427_v17 = vmul.f32 %v9161_v11, %v11531_v38  ;;  %v4453_v38 = vld [vmem:[#allocation3 + $0x20] sm:$0xff] }
 0xa05   : > { %v4436_v9 = vmul.f32 %v7129_v54, %v4426_v59  ;;  %8648 = vmatprep.subr.msk.bf16.mxu0 %vm4591_vm1, %v4453_v38  ;;  %v4666_v32 = vsel %vm4591_vm1, %v4453_v38, 0 }
 0xa06   : > { %v9163_v42 = vpop.eup %9162  ;;  %v4437_v52 = vmul.f32 %v7129_v54, %v4427_v17 }
 0xa07   : > { %v4428_v46 = vmul.f32 %v9163_v42, %v11539_v22  ;;  %v4446_v39 = vadd.f32 %v7130_v18, %v4436_v9  ;;  %v4456_v22 = vld [vmem:[#allocation3 + $0x38] sm:$0xff] }
 0xa08   : > { %v4447_v36 = vadd.f32 %v7130_v18, %v4437_v52  ;;  %v4675_v8 = vsel %vm4591_vm1, %v4456_v22, 0 }
 0xa09   : > { %v4482_v28 = vpack.c.bf16 %v4446_v39, %v4445_v31  ;;  %v4438_v5 = vmul.f32 %v7129_v54, %v4428_v46  ;;  %v4461_v39 = vld [vmem:[#allocation4 + $0x20] sm:$0xff] }
 0xa0b   : > { %8145 = vmatprep.mubr.msk.bf16.mxu0 %vm4375_vm0, %v4482_v28  ;;  %v4448_v26 = vadd.f32 %v7130_v18, %v4438_v5 }
 0xa0d   : > { %v4483_v3 = vpack.c.bf16 %v4448_v26, %v4447_v36 }
 0xa0f   : > { %8146 = vmatmul.mubr.msk.bf16.vlgmr.msra.gmra.mrb[0].mxu0 %vm4375_vm0, %v4483_v3 }
 0xa10   : > { %8162 = vmatpush3.bf16.xpose.msra.mxu0 %v4666_v32 }
 0xa11   : > { %8649 = vmatprep.subr.msk.bf16.mxu0 %vm4591_vm1, %v4454_v33 }
 0xa18   : > { %8164 = vmatpush3.bf16.xpose.msra.mxu0 %v4669_v4 }
 0xa19   : > { %8650 = vmatprep.subr.msk.bf16.mxu0 %vm4591_vm1, %v4455_v60 }
 0xa20   : > { %8166 = vmatpush3.bf16.xpose.msra.mxu0 %v4672_v6 }
 0xa21   : > { %8651 = vmatprep.subr.msk.bf16.mxu0 %vm4591_vm1, %v4456_v22 }
 0xa28   : > { %8168 = vmatpush3.bf16.xpose.msra.mxu0 %v4675_v8 }
 0xae2   : > { %v8147_v12 = vpop.f32.mrb[0].mxu0 }
 0xae3   : > { %v4556_v37 = vpop.f32.mrb[1].mxu0 }
 0xae4   : > { %v8148_v16 = vpop.f32.mrb[2].mxu0 }
 0xae5   : > { %v9077_v34 = vpack.i.bf16 %v8148_v16, %v8147_v12  ;;  %v4588_v25 = vpack.c.bf16 %v8148_v16, %v8147_v12  ;;  %v4559_v35 = vpop.f32.mrb[3].mxu0 }
 0xae6   : > { %v9072_v41 = vpack.i.bf16 %v4559_v35, %v4556_v37  ;;  %v4587_v43 = vpack.c.bf16 %v4559_v35, %v4556_v37  ;;  %v4462_v35 = vld [vmem:[#allocation4 + $0x28] sm:$0xff] }
 0xae7   : > { %9078 = vrot.lane.b32.xlu1 %v9077_v34, %s10000_s26 }
 0xae8   : > { %9073 = vrot.lane.b32.xlu0 %v9072_v41, %s10000_s26  ;;  %8157 = vmatprep.mubr.msk.bf16.mxu1 %vm4591_vm1, %v4587_v43 }
 0xae9   : > { %8158 = vmatmul.mubr.msk.bf16.vlgmr.msra.gmra.mrb[0].mxu1 %vm4591_vm1, %v4588_v25 }
 0xaea   : > { %8174 = vmatpush3.bf16.msra.mxu1 %v4457_v24 }
 0xaeb   : > { %8175 = vmatprep.subr.bf16.mxu1 %v4458_v14 }
 0xaee   : > { %8176 = vmatpush3.bf16.msra.mxu1 %v4458_v14 }
 0xaef   : > { %8177 = vmatprep.subr.bf16.mxu1 %v4459_v15 }
 0xaf2   : > { %8178 = vmatpush3.bf16.msra.mxu1 %v4459_v15 }
 0xaf3   : > { %8179 = vmatprep.subr.bf16.mxu1 %v4460_v40 }
 0xaf6   : > { %8180 = vmatpush3.bf16.msra.mxu1 %v4460_v40 }
 0xaf7   : > { %8185 = vmatprep.subr.bf16.mxu1 %v4461_v39 }
 0xb59   : > { %v9079_v51 = vpop.permute.xlu1 %9078 }
 0xb5a   : > { %v9081_v44 = vunpack.i.h.bf16 %v9079_v51  ;;  %v9080_v45 = vunpack.i.l.bf16 %v9079_v51  ;;  %v9074_v48 = vpop.permute.xlu0 %9073  ;;  %v4463_v51 = vld [vmem:[#allocation4 + $0x30] sm:$0xff] }
 0xb5b   : > { %v9076_v1 = vunpack.i.h.bf16 %v9074_v48  ;;  %v9075_v2 = vunpack.i.l.bf16 %v9074_v48  ;;  %v9097_v48 = vld [vmem:[#allocation18 + $0x8] sm:$0xff]  }
 0xb5c   : > { %v4590_v56 = vpack.c.bf16 %v9081_v44, %v9080_v45  ;;  %v4464_v44 = vld [vmem:[#allocation4 + $0x38] sm:$0xff]  ;;  %v9096_v45 = vld [vmem:[#allocation18] sm:$0xff]  }
 0xb5d   : > { %v4589_v55 = vpack.c.bf16 %v9076_v1, %v9075_v2  ;;  %8197 = vmatprep.subr.bf16.mxu0 %v9096_v45 }
 0xb5f   : > { %8169 = vmatprep.mubr.msk.bf16.mxu0 %vm4591_vm1, %v4589_v55 }
 0xb60   : > { %8170 = vmatmul.mubr.msk.bf16.vlgmr.msra.gmra.mrb[4].mxu0 %vm4591_vm1, %v4590_v56 }
 0xb61   : > { %8198 = vmatpush3.bf16.msra.mxu0 %v9096_v45 }
 0xb62   : > { %8199 = vmatprep.subr.bf16.mxu0 %v9097_v48 }
 0xb65   : > { %8200 = vmatpush3.bf16.msra.mxu0 %v9097_v48 }
 0xbbc   : > { %v8159_v58 = vpop.f32.mrb[0].mxu1 }
 0xbbd   : > { %v4644_v19 = vpop.f32.mrb[1].mxu1  ;;  %v4728_v7 = vmul.f32 0.17677669, %v8159_v58 }
 0xbbe   : > { %v4726_v27 = vmul.f32 0.17677669, %v4644_v19  ;;  %v8160_v62 = vpop.f32.mrb[2].mxu1 }
 0xbbf   : > { %v4647_v10 = vpop.f32.mrb[3].mxu1  ;;  %v4729_v30 = vmul.f32 0.17677669, %v8160_v62  ;;  %v4740_v13 = vsel %vm4375_vm0, %v4728_v7, -inf }
 0xbc0   : > { %v4727_v53 = vmul.f32 0.17677669, %v4647_v10  ;;  %v4734_v57 = vsel %vm4375_vm0, %v4726_v27, -inf }
 0xbc1   : > { %4735 = vmax.xlane.f32.xlu1 %v4734_v57  ;;  %v4743_v61 = vsel %vm4375_vm0, %v4729_v30, -inf }
 0xbc2   : > { %v4737_v23 = vsel %vm4375_vm0, %v4727_v53, -inf }
 0xbc3   : > { %4738 = vmax.xlane.f32.xlu0 %v4737_v23 }
 0xbc5   : > { %4744 = vmax.xlane.f32.xlu1 %v4743_v61 }
 0xbc7   : > { %4741 = vmax.xlane.f32.xlu0 %v4740_v13 }
 0xc33   : > { %v8171_v21 = vpop.f32.mrb[4].mxu0 }
 0xc34   : > { %v4711_v54 = vpop.f32.mrb[5].mxu0  ;;  %v11590_v63 = vmul.f32 0.17677669, %v8171_v21 }
 0xc35   : > { %v11588_v49 = vmul.f32 0.17677669, %v4711_v54  ;;  %v8172_v11 = vpop.f32.mrb[6].mxu0 }
 0xc36   : > { %v4714_v59 = vpop.f32.mrb[7].mxu0  ;;  %v11596_v9 = vmul.f32 0.17677669, %v8172_v11  ;;  %v4752_v46 = vsel %vm4375_vm0, %v11590_v63, -inf }
 0xc37   : > { %v11592_v17 = vmul.f32 0.17677669, %v4714_v59  ;;  %v4746_v18 = vsel %vm4375_vm0, %v11588_v49, -inf }
 0xc38   : > { %4747 = vmax.xlane.f32.xlu0 %v4746_v18  ;;  %v4755_v31 = vsel %vm4375_vm0, %v11596_v9, -inf  ;;  %v9099_v18 = vld [vmem:[#allocation18 + $0x18] sm:$0xff]  }
 0xc39   : > { %v4749_v42 = vsel %vm4375_vm0, %v11592_v17, -inf }
 0xc3a   : > { %4750 = vmax.xlane.f32.xlu1 %v4749_v42 }
 0xc3c   : > { %4753 = vmax.xlane.f32.xlu0 %v4752_v46 }
 0xc3e   : > { %4756 = vmax.xlane.f32.xlu1 %v4755_v31 }
 0xc4e   : > { %v4736_v52 = vpop.xlane.xlu1 %4735 }
 0xc4f   : > { %v4758_v28 = vsub.f32 %v4726_v27, %v4736_v52 }
 0xc50   : > { %v4739_v5 = vpop.xlane.xlu0 %4738 }
 0xc51   : > { %v4766_v36 = vmul.f32 1.442695, %v4758_v28  ;;  %v4759_v26 = vsub.f32 %v4727_v53, %v4739_v5 }
 0xc52   : > { %v4745_v3 = vpop.xlane.xlu1 %4744 }
 0xc53   : > { %v4768_v29 = vmul.f32 1.442695, %v4759_v26  ;;  %v4761_v38 = vsub.f32 %v4729_v30, %v4745_v3  ;;  %9164 = vpow2.f32 %v4766_v36 }
 0xc54   : > { %v4742_v33 = vpop.xlane.xlu0 %4741 }
 0xc55   : > { %9166 = vpow2.f32 %v4768_v29  ;;  %v4772_v32 = vmul.f32 1.442695, %v4761_v38  ;;  %v4760_v4 = vsub.f32 %v4728_v7, %v4742_v33 }
 0xc57   : > { %9168 = vpow2.f32 %v4772_v32  ;;  %v4770_v60 = vmul.f32 1.442695, %v4760_v4 }
 0xc59   : > { %9170 = vpow2.f32 %v4770_v60 }
 0xc5d   : > { %v9165_v6 = vpop.eup %9164 }
 0xc5e   : > { %v4782_v43 = vsel %vm4375_vm0, %v9165_v6, 0.0 }
 0xc5f   : > { %v9167_v22 = vpop.eup %9166 }
 0xc60   : > { %v4806_v8 = vpack.c.bf16 %v9167_v22, %v9165_v6  ;;  %v4785_v41 = vsel %vm4375_vm0, %v9167_v22, 0.0 }
 0xc61   : > { %v9169_v12 = vpop.eup %9168 }
 0xc62   : > { %8181 = vmatprep.mubr.msk.bf16.mxu1 %vm4375_vm0, %v4806_v8  ;;  %v4791_v37 = vsel %vm4375_vm0, %v9169_v12, 0.0 }
 0xc63   : > { %v9171_v16 = vpop.eup %9170  ;;  %4792 = vadd.xlane.f32.xlu1 %v4791_v37 }
 0xc64   : > { %v4788_v34 = vsel %vm4375_vm0, %v9171_v16, 0.0  ;;  %v4807_v25 = vpack.c.bf16 %v9169_v12, %v9171_v16 }
 0xc65   : > { %4789 = vadd.xlane.f32.xlu0 %v4788_v34 }
 0xc66   : > { %8182 = vmatmul.mubr.msk.bf16.vlgmr.msra.gmra.mrb[4].mxu1 %vm4375_vm0, %v4807_v25 }
 0xc67   : > { %4786 = vadd.xlane.f32.xlu1 %v4785_v41  ;;  %8186 = vmatpush3.bf16.msra.mxu1 %v4461_v39 }
 0xc68   : > { %8187 = vmatprep.subr.bf16.mxu1 %v4462_v35 }
 0xc69   : > { %4783 = vadd.xlane.f32.xlu0 %v4782_v43 }
 0xc6b   : > { %8188 = vmatpush3.bf16.msra.mxu1 %v4462_v35 }
 0xc6c   : > { %8189 = vmatprep.subr.bf16.mxu1 %v4463_v51 }
 0xc6f   : > { %8190 = vmatpush3.bf16.msra.mxu1 %v4463_v51 }
 0xc70   : > { %8191 = vmatprep.subr.bf16.mxu1 %v4464_v44 }
 0xc73   : > { %8192 = vmatpush3.bf16.msra.mxu1 %v4464_v44 }
 0xcc5   : > { %v4748_v1 = vpop.xlane.xlu0 %4747 }
 0xcc6   : > { %v4762_v2 = vsub.f32 %v11588_v49, %v4748_v1 }
 0xcc7   : > { %v4751_v55 = vpop.xlane.xlu1 %4750 }
 0xcc8   : > { %v4774_v56 = vmul.f32 1.442695, %v4762_v2  ;;  %v4763_v58 = vsub.f32 %v11592_v17, %v4751_v55  ;;  %v9098_v17 = vld [vmem:[#allocation18 + $0x10] sm:$0xff]  }
 0xcc9   : > { %v4754_v19 = vpop.xlane.xlu0 %4753  ;;  %8205 = vmatprep.subr.bf16.mxu1 %v9098_v17 }
 0xcca   : > { %9172 = vpow2.f32 %v4774_v56  ;;  %v4776_v27 = vmul.f32 1.442695, %v4763_v58  ;;  %v4764_v62 = vsub.f32 %v11590_v63, %v4754_v19 }
 0xccb   : > { %v4757_v10 = vpop.xlane.xlu1 %4756 }
 0xccc   : > { %9174 = vpow2.f32 %v4776_v27  ;;  %v4778_v30 = vmul.f32 1.442695, %v4764_v62  ;;  %v4765_v53 = vsub.f32 %v11596_v9, %v4757_v10 }
 0xcce   : > { %9176 = vpow2.f32 %v4778_v30  ;;  %v4780_v57 = vmul.f32 1.442695, %v4765_v53  ;;  %v7153_v30 = vld [vmem:[#allocation19] ss:$0 sm:$0xff] }
 0xcd0   : > { %9178 = vpow2.f32 %v4780_v57 }
 0xcd4   : > { %v9173_v7 = vpop.eup %9172 }
 0xcd5   : > { %v4794_v23 = vsel %vm4375_vm0, %v9173_v7, 0.0 }
 0xcd6   : > { %v9175_v61 = vpop.eup %9174  ;;  %4795 = vadd.xlane.f32.xlu0 %v4794_v23 }
 0xcd7   : > { %v4797_v13 = vsel %vm4375_vm0, %v9175_v61, 0.0  ;;  %v4808_v24 = vpack.c.bf16 %v9175_v61, %v9173_v7 }
 0xcd8   : > { %v9177_v14 = vpop.eup %9176  ;;  %4798 = vadd.xlane.f32.xlu1 %v4797_v13 }
 0xcd9   : > { %8193 = vmatprep.mubr.msk.bf16.mxu1 %vm4375_vm0, %v4808_v24  ;;  %v4800_v15 = vsel %vm4375_vm0, %v9177_v14, 0.0 }
 0xcda   : > { %v9179_v40 = vpop.eup %9178  ;;  %4801 = vadd.xlane.f32.xlu0 %v4800_v15 }
 0xcdb   : > { %v4803_v21 = vsel %vm4375_vm0, %v9179_v40, 0.0  ;;  %v4809_v54 = vpack.c.bf16 %v9179_v40, %v9177_v14 }
 0xcdc   : > { %4804 = vadd.xlane.f32.xlu1 %v4803_v21 }
 0xcdd   : > { %8194 = vmatmul.mubr.msk.bf16.vlgmr.msra.gmra.mrb[8].mxu1 %vm4375_vm0, %v4809_v54 }
 0xcde   : > { %8206 = vmatpush3.bf16.msra.mxu1 %v9098_v17 }
 0xcdf   : > { %8207 = vmatprep.subr.bf16.mxu1 %v9099_v18 }
 0xce2   : > { %8208 = vmatpush3.bf16.msra.mxu1 %v9099_v18 }
 0xcf0   : > { %v4793_v49 = vpop.xlane.xlu1 %4792 }
 0xcf1   : > { %9180 = vrcp.f32 %v4793_v49 }
 0xcf2   : > { %v4790_v11 = vpop.xlane.xlu0 %4789 }
 0xcf3   : > { %9182 = vrcp.f32 %v4790_v11 }
 0xcf4   : > { %v4787_v59 = vpop.xlane.xlu1 %4786 }
 0xcf5   : > { %9184 = vrcp.f32 %v4787_v59 }
 0xcf6   : > { %v4784_v63 = vpop.xlane.xlu0 %4783 }
 0xcf7   : > { %9186 = vrcp.f32 %v4784_v63 }
 0xcfb   : > { %v9181_v9 = vpop.eup %9180 }
 0xcfd   : > { %v9183_v46 = vpop.eup %9182 }
 0xcff   : > { %v9185_v39 = vpop.eup %9184 }
 0xd01   : > { %v9187_v28 = vpop.eup %9186 }
 0xd39   : > { %v8183_v42 = vpop.f32.mrb[4].mxu1 }
 0xd3a   : > { %v4850_v31 = vpop.f32.mrb[5].mxu1  ;;  %v4930_v5 = vmul.f32 %v9183_v46, %v8183_v42 }
 0xd3b   : > { %v8184_v52 = vpop.f32.mrb[6].mxu1  ;;  %v4928_v3 = vmul.f32 %v9187_v28, %v4850_v31 }
 0xd3c   : > { %v4931_v36 = vmul.f32 %v9181_v9, %v8184_v52  ;;  %v4853_v26 = vpop.f32.mrb[7].mxu1 }
 0xd3d   : > { %v4929_v29 = vmul.f32 %v9185_v39, %v4853_v26 }
 0xd3e   : > { %v4937_v38 = vpack.c.bf16 %v4931_v36, %v4930_v5 }
 0xd3f   : > { %v4936_v33 = vpack.c.bf16 %v4929_v29, %v4928_v3 }
 0xd41   : > { %8201 = vmatprep.mubr.msk.bf16.mxu0 %vm4591_vm1, %v4936_v33 }
 0xd42   : > { %8202 = vmatmul.mubr.msk.bf16.vlgmr.msra.gmra.mrb[8].mxu0 %vm4591_vm1, %v4937_v38 }
 0xd63   : > { %v4796_v32 = vpop.xlane.xlu0 %4795 }
 0xd64   : > { %9188 = vrcp.f32 %v4796_v32 }
 0xd65   : > { %v4799_v4 = vpop.xlane.xlu1 %4798 }
 0xd67   : > { %v4802_v60 = vpop.xlane.xlu0 %4801 }
 0xd68   : > { %9190 = vrcp.f32 %v4802_v60 }
 0xd69   : > { %v4805_v6 = vpop.xlane.xlu1 %4804 }
 0xd6a   : > { %9192 = vrcp.f32 %v4805_v6 }
 0xd6b   : > { %9194 = vrcp.f32 %v4799_v4 }
 0xd6e   : > { %v9189_v22 = vpop.eup %9188 }
 0xd72   : > { %v9191_v12 = vpop.eup %9190 }
 0xd74   : > { %v9193_v16 = vpop.eup %9192 }
 0xd75   : > { %v9195_v25 = vpop.eup %9194 }
 0xdb0   : > { %v8195_v8 = vpop.f32.mrb[8].mxu1 }
 0xdb1   : > { %v4905_v37 = vpop.f32.mrb[9].mxu1  ;;  %v4934_v35 = vmul.f32 %v9191_v12, %v8195_v8 }
 0xdb2   : > { %v8196_v34 = vpop.f32.mrb[10].mxu1  ;;  %v4932_v51 = vmul.f32 %v9189_v22, %v4905_v37 }
 0xdb3   : > { %v4935_v41 = vmul.f32 %v9193_v16, %v8196_v34  ;;  %v4908_v43 = vpop.f32.mrb[11].mxu1  ;;  %v9101_v34 = vld [vmem:[#allocation24 + $0x8] sm:$0xff]  }
 0xdb4   : > { %v4933_v44 = vmul.f32 %v9195_v25, %v4908_v43  ;;  %v5227_v25 = vsel %vm4375_vm0, %v9101_v34, 0  ;;  %v9103_v43 = vld [vmem:[#allocation24 + $0x18] sm:$0xff]  }
 0xdb5   : > { %v4939_v45 = vpack.c.bf16 %v4935_v41, %v4934_v35  ;;  %v9102_v35 = vld [vmem:[#allocation24 + $0x10] sm:$0xff]  }
 0xdb6   : > { %v4938_v48 = vpack.c.bf16 %v4933_v44, %v4932_v51  ;;  %v5230_v41 = vsel %vm4375_vm0, %v9102_v35, 0  ;;  %v5233_v51 = vsel %vm4375_vm0, %v9103_v43, 0  ;;  %v5174_v44 = vld [vmem:[#allocation5] sm:$0xff] }
 0xdb7   : > { %8656 = vmatprep.subr.msk.bf16.mxu1 %vm4591_vm1, %v5174_v44 }
 0xdb8   : > { %8209 = vmatprep.mubr.msk.bf16.mxu1 %vm4591_vm1, %v4938_v48 }
 0xdb9   : > { %8210 = vmatmul.mubr.msk.bf16.vlgmr.msra.gmra.mrb[12].mxu1 %vm4591_vm1, %v4939_v45 }
 0xe15   : > { %v8203_v1 = vpop.f32.mrb[8].mxu0 }
 0xe16   : > { %v4992_v2 = vpop.f32.mrb[9].mxu0  ;;  %v5080_v19 = vsel %vm4375_vm0, %v8203_v1, 0.0 }
 0xe17   : > { %v8204_v55 = vpop.f32.mrb[10].mxu0  ;;  %v5074_v10 = vsel %vm4375_vm0, %v4992_v2, 0.0 }
 0xe18   : > { %v4995_v56 = vpop.f32.mrb[11].mxu0  ;;  %v5083_v23 = vsel %vm4375_vm0, %v8204_v55, 0.0 }
 0xe19   : > { %v5077_v14 = vsel %vm4375_vm0, %v4995_v56, 0.0 }
 0xe8c   : > { %v8211_v58 = vpop.f32.mrb[12].mxu1 }
 0xe8d   : > { %v5081_v27 = vsel %vm4375_vm0, %v8211_v58, 0.0  ;;  %v5059_v62 = vpop.f32.mrb[13].mxu1 }
 0xe8e   : > { %v5082_v53 = vadd.f32 %v5081_v27, %v5080_v19  ;;  %v5075_v57 = vsel %vm4375_vm0, %v5059_v62, 0.0  ;;  %v8212_v7 = vpop.f32.mrb[14].mxu1 }
 0xe8f   : > { %v5076_v61 = vadd.f32 %v5075_v57, %v5074_v10  ;;  %v5084_v13 = vsel %vm4375_vm0, %v8212_v7, 0.0  ;;  %v5062_v24 = vpop.f32.mrb[15].mxu1  ;;  %v7154_v57 = vld [vmem:[#allocation21] ss:$0 sm:$0xff] }
 0xe90   : > { %v5085_v15 = vadd.f32 %v5084_v13, %v5083_v23  ;;  %v5078_v40 = vsel %vm4375_vm0, %v5062_v24, 0.0  ;;  %v5094_v21 = vadd.f32 %v7153_v30, %v5082_v53 }
 0xe91   : > { %v5092_v54 = vadd.f32 %v7153_v30, %v5076_v61  ;;  %v5079_v49 = vadd.f32 %v5078_v40, %v5077_v14  ;;  %v7155_v14 = vld [vmem:[#allocation22] ss:$0 sm:$0xff] }
 0xe92   : > { %v5095_v11 = vadd.f32 %v7153_v30, %v5085_v15  ;;  %v11641_v9 = vadd.f32 %v5094_v21, %v11511_v20 }
 0xe93   : > { %v5093_v59 = vadd.f32 %v7153_v30, %v5079_v49  ;;  %v11633_v63 = vadd.f32 %v5092_v54, %v11509_v0 }
 0xe94   : > { %v11646_v46 = vadd.f32 %v5095_v11, %v11521_v50  ;;  %v5108_v0 = vsel %vm4375_vm0, %v11641_v9, 0.0 }
 0xe95   : > { %v5102_v17 = vsel %vm4375_vm0, %v11633_v63, 0.0  ;;  %v11638_v18 = vadd.f32 %v5093_v59, %v11513_v47  ;;  %v9100_v47 = vld [vmem:[#allocation24] sm:$0xff]  }
 0xe96   : > { %5103 = vadd.xlane.f32.xlu0 %v5102_v17  ;;  %v5111_v31 = vsel %vm4375_vm0, %v11646_v46, 0.0  ;;  %8652 = vmatprep.subr.msk.bf16.mxu0 %vm4375_vm0, %v9100_v47  ;;  %v5224_v20 = vsel %vm4375_vm0, %v9100_v47, 0 }
 0xe97   : > { %v5105_v42 = vsel %vm4375_vm0, %v11638_v18, 0.0  ;;  %8214 = vmatpush3.bf16.xpose.msra.mxu0 %v5224_v20  ;;  %v5311_v20 = vsel %vm4591_vm1, %v5174_v44, 0 }
 0xe98   : > { %5106 = vadd.xlane.f32.xlu1 %v5105_v42  ;;  %8653 = vmatprep.subr.msk.bf16.mxu0 %vm4375_vm0, %v9101_v34 }
 0xe99   : > { %8226 = vmatpush3.bf16.xpose.msra.mxu1 %v5311_v20 }
 0xe9a   : > { %5109 = vadd.xlane.f32.xlu0 %v5108_v0 }
 0xe9c   : > { %5112 = vadd.xlane.f32.xlu1 %v5111_v31 }
 0xe9f   : > { %8216 = vmatpush3.bf16.xpose.msra.mxu0 %v5227_v25 }
 0xea0   : > { %8654 = vmatprep.subr.msk.bf16.mxu0 %vm4375_vm0, %v9102_v35 }
 0xea7   : > { %8218 = vmatpush3.bf16.xpose.msra.mxu0 %v5230_v41 }
 0xea8   : > { %8655 = vmatprep.subr.msk.bf16.mxu0 %vm4375_vm0, %v9103_v43 }
 0xeaf   : > { %8220 = vmatpush3.bf16.xpose.msra.mxu0 %v5233_v51 }
 0xf23   : > { %v5104_v39 = vpop.xlane.xlu0 %5103 }
 0xf24   : > { %v5114_v52 = vmul.f32 0.015625, %v5104_v39  ;;  %v5175_v39 = vld [vmem:[#allocation5 + $0x8] sm:$0xff] }
 0xf25   : > { %v5107_v28 = vpop.xlane.xlu1 %5106  ;;  %8657 = vmatprep.subr.msk.bf16.mxu1 %vm4591_vm1, %v5175_v39 }
 0xf26   : > { %v5118_v50 = vsub.f32 %v11633_v63, %v5114_v52  ;;  %v5115_v5 = vmul.f32 0.015625, %v5107_v28 }
 0xf27   : > { %v5110_v36 = vpop.xlane.xlu0 %5109 }
 0xf28   : > { %v5119_v26 = vsub.f32 %v11638_v18, %v5115_v5  ;;  %v5116_v3 = vmul.f32 0.015625, %v5110_v36  ;;  %v5122_v29 = vmul.f32 %v5118_v50, %v5118_v50 }
 0xf29   : > { %v5113_v38 = vpop.xlane.xlu1 %5112 }
 0xf2a   : > { %v5120_v33 = vsub.f32 %v11641_v9, %v5116_v3  ;;  %v5117_v32 = vmul.f32 0.015625, %v5113_v38  ;;  %v5126_v4 = vsel %vm4375_vm0, %v5122_v29, 0.0  ;;  %v5123_v60 = vmul.f32 %v5119_v26, %v5119_v26 }
 0xf2b   : > { %5127 = vadd.xlane.f32.xlu0 %v5126_v4  ;;  %v5369_v38 = vsel %vm4591_vm1, %v5175_v39, 0 }
 0xf2c   : > { %v5121_v6 = vsub.f32 %v11646_v46, %v5117_v32  ;;  %v5129_v22 = vsel %vm4375_vm0, %v5123_v60, 0.0  ;;  %v5124_v8 = vmul.f32 %v5120_v33, %v5120_v33 }
 0xf2d   : > { %5130 = vadd.xlane.f32.xlu1 %v5129_v22 }
 0xf2e   : > { %v5132_v12 = vsel %vm4375_vm0, %v5124_v8, 0.0  ;;  %v5125_v37 = vmul.f32 %v5121_v6, %v5121_v6 }
 0xf2f   : > { %5133 = vadd.xlane.f32.xlu0 %v5132_v12 }
 0xf30   : > { %v5135_v16 = vsel %vm4375_vm0, %v5125_v37, 0.0 }
 0xf31   : > { %5136 = vadd.xlane.f32.xlu1 %v5135_v16 }
 0xfb8   : > { %v5128_v45 = vpop.xlane.xlu0 %5127 }
 0xfb9   : > { %v5138_v48 = vmul.f32 0.015625, %v5128_v45 }
 0xfba   : > { %v5131_v1 = vpop.xlane.xlu1 %5130 }
 0xfbb   : > { %v5142_v2 = vadd.f32 1e-05, %v5138_v48  ;;  %v5139_v55 = vmul.f32 0.015625, %v5131_v1 }
 0xfbc   : > { %v5134_v56 = vpop.xlane.xlu0 %5133 }
 0xfbd   : > { %9196 = vrsqrt.f32 %v5142_v2  ;;  %v5143_v58 = vadd.f32 1e-05, %v5139_v55  ;;  %v5140_v19 = vmul.f32 0.015625, %v5134_v56  ;;  %v5176_v2 = vld [vmem:[#allocation6] sm:$0xff] }
 0xfbe   : > { %v5137_v27 = vpop.xlane.xlu1 %5136 }
 0xfbf   : > { %9198 = vrsqrt.f32 %v5143_v58  ;;  %v5144_v62 = vadd.f32 1e-05, %v5140_v19  ;;  %v5141_v10 = vmul.f32 0.015625, %v5137_v27 }
 0xfc1   : > { %9200 = vrsqrt.f32 %v5144_v62  ;;  %v5145_v30 = vadd.f32 1e-05, %v5141_v10 }
 0xfc3   : > { %9202 = vrsqrt.f32 %v5145_v30 }
 0xfc7   : > { %v9197_v53 = vpop.eup %9196 }
 0xfc8   : > { %v5150_v7 = vmul.f32 %v9197_v53, %v5118_v50 }
 0xfc9   : > { %v9199_v23 = vpop.eup %9198 }
 0xfca   : > { %v5151_v61 = vmul.f32 %v9199_v23, %v5119_v26  ;;  %v5160_v13 = vmul.f32 %v7154_v57, %v5150_v7 }
 0xfcb   : > { %v9201_v24 = vpop.eup %9200 }
 0xfcc   : > { %v5152_v15 = vmul.f32 %v9201_v24, %v5120_v33  ;;  %v5161_v40 = vmul.f32 %v7154_v57, %v5151_v61  ;;  %v5170_v11 = vadd.f32 %v7155_v14, %v5160_v13 }
 0xfcd   : > { %v9203_v21 = vpop.eup %9202 }
 0xfce   : > { %v5162_v54 = vmul.f32 %v7154_v57, %v5152_v15  ;;  %v5153_v49 = vmul.f32 %v9203_v21, %v5121_v6  ;;  %v5171_v59 = vadd.f32 %v7155_v14, %v5161_v40 }
 0xfd0   : > { %v5163_v17 = vmul.f32 %v7154_v57, %v5153_v49  ;;  %v5195_v42 = vpack.c.bf16 %v5171_v59, %v5170_v11  ;;  %v5172_v0 = vadd.f32 %v7155_v14, %v5162_v54 }
 0xfd2   : > { %8221 = vmatprep.mubr.msk.bf16.mxu0 %vm4375_vm0, %v5195_v42  ;;  %v5173_v31 = vadd.f32 %v7155_v14, %v5163_v17  ;;  %v5177_v14 = vld [vmem:[#allocation6 + $0x8] sm:$0xff] }
 0xfd4   : > { %v5196_v47 = vpack.c.bf16 %v5173_v31, %v5172_v0 }
 0xfd6   : > { %8222 = vmatmul.mubr.msk.bf16.vlgmr.msra.gmra.mrb[12].mxu0 %vm4375_vm0, %v5196_v47 }
0x10a9   : > { %v8223_v52 = vpop.f32.mrb[12].mxu0 }
0x10aa   : > { %v5269_v28 = vpop.f32.mrb[13].mxu0 }
0x10ab   : > { %v8224_v50 = vpop.f32.mrb[14].mxu0 }
0x10ac   : > { %v9087_v5 = vpack.i.bf16 %v8224_v50, %v8223_v52  ;;  %v5301_v36 = vpack.c.bf16 %v8224_v50, %v8223_v52  ;;  %v5272_v26 = vpop.f32.mrb[15].mxu0 }
0x10ad   : > { %v9082_v3 = vpack.i.bf16 %v5272_v26, %v5269_v28  ;;  %v5300_v29 = vpack.c.bf16 %v5272_v26, %v5269_v28  ;;  %v9104_v26 = vld [vmem:[#allocation28] sm:$0xff]  }
0x10ae   : > { %9088 = vrot.lane.b32.xlu1 %v9087_v5, %s10000_s26  ;;  %8249 = vmatprep.subr.bf16.mxu0 %v9104_v26 }
0x10af   : > { %9083 = vrot.lane.b32.xlu0 %v9082_v3, %s10000_s26  ;;  %8227 = vmatprep.mubr.msk.bf16.mxu1 %vm4591_vm1, %v5300_v29  ;;  %v9105_v3 = vld [vmem:[#allocation28 + $0x8] sm:$0xff]   ;;  %s12109_s26 = sld [smem:[#allocation66_spill]] }
0x10b0   : > { %8228 = vmatmul.mubr.msk.bf16.vlgmr.msra.gmra.mrb[16].mxu1 %vm4591_vm1, %v5301_v36  ;;  %8250 = vmatpush3.bf16.msra.mxu0 %v9104_v26 }
0x10b1   : > { %8232 = vmatpush3.bf16.xpose.msra.mxu1 %v5369_v38  ;;  %8251 = vmatprep.subr.bf16.mxu0 %v9105_v3 }
0x10b2   : > { %8237 = vmatprep.subr.bf16.mxu1 %v5176_v2 }
0x10b4   : > { %8252 = vmatpush3.bf16.msra.mxu0 %v9105_v3 }
0x10b5   : > { %s12110_s0 = smov %s12109_s26 }
0x1120   : > { %v9089_v33 = vpop.permute.xlu1 %9088 }
0x1121   : > { %v9091_v32 = vunpack.i.h.bf16 %v9089_v33  ;;  %v9090_v4 = vunpack.i.l.bf16 %v9089_v33  ;;  %v9084_v60 = vpop.permute.xlu0 %9083 }
0x1122   : > { %v9086_v6 = vunpack.i.h.bf16 %v9084_v60  ;;  %v9085_v22 = vunpack.i.l.bf16 %v9084_v60 }
0x1123   : > { %v5303_v12 = vpack.c.bf16 %v9091_v32, %v9090_v4 }
0x1124   : > { %v5302_v8 = vpack.c.bf16 %v9086_v6, %v9085_v22 }
0x1126   : > { %8233 = vmatprep.mubr.msk.bf16.mxu1 %vm4591_vm1, %v5302_v8 }
0x1127   : > { %8234 = vmatmul.mubr.msk.bf16.vlgmr.msra.gmra.mrb[20].mxu1 %vm4591_vm1, %v5303_v12 }
0x1128   : > { %8238 = vmatpush3.bf16.msra.mxu1 %v5176_v2 }
0x1129   : > { %8243 = vmatprep.subr.bf16.mxu1 %v5177_v14 }
0x1183   : > { %v8229_v37 = vpop.f32.mrb[16].mxu1 }
0x1184   : > { %v5347_v16 = vpop.f32.mrb[17].mxu1  ;;  %v5422_v44 = vmul.f32 0.17677669, %v8229_v37 }
0x1185   : > { %v5420_v34 = vmul.f32 0.17677669, %v5347_v16  ;;  %v8230_v25 = vpop.f32.mrb[18].mxu1 }
0x1186   : > { %v5350_v35 = vpop.f32.mrb[19].mxu1  ;;  %v5423_v41 = vmul.f32 0.17677669, %v8230_v25  ;;  %v5435_v1 = vsel %vm5428_vm14, %v5422_v44, -inf }
0x1187   : > { %v5421_v43 = vmul.f32 0.17677669, %v5350_v35  ;;  %v5429_v51 = vsel %vm5428_vm14, %v5420_v34, -inf }
0x1188   : > { %5430 = vmax.xlane.f32.xlu1 %v5429_v51  ;;  %v5438_v48 = vsel %vm5428_vm14, %v5423_v41, -inf }
0x1189   : > { %v5432_v45 = vsel %vm5428_vm14, %v5421_v43, -inf }
0x118a   : > { %5433 = vmax.xlane.f32.xlu0 %v5432_v45 }
0x118c   : > { %5439 = vmax.xlane.f32.xlu1 %v5438_v48 }
0x118e   : > { %5436 = vmax.xlane.f32.xlu0 %v5435_v1 }
0x11fa   : > { %v8235_v55 = vpop.f32.mrb[20].mxu1 }
0x11fb   : > { %v5405_v56 = vpop.f32.mrb[21].mxu1  ;;  %v11684_v62 = vmul.f32 0.17677669, %v8235_v55 }
0x11fc   : > { %v5424_v58 = vmul.f32 0.17677669, %v5405_v56  ;;  %v8236_v19 = vpop.f32.mrb[22].mxu1 }
0x11fd   : > { %v5408_v27 = vpop.f32.mrb[23].mxu1  ;;  %v5427_v53 = vmul.f32 0.17677669, %v8236_v19  ;;  %v5447_v7 = vsel %vm5428_vm14, %v11684_v62, -inf  ;;  %v9106_v19 = vld [vmem:[#allocation28 + $0x10] sm:$0xff]  }
0x11fe   : > { %v5425_v10 = vmul.f32 0.17677669, %v5408_v27  ;;  %v5441_v30 = vsel %vm5428_vm14, %v5424_v58, -inf  ;;  %v9107_v27 = vld [vmem:[#allocation28 + $0x18] sm:$0xff]  }
0x11ff   : > { %5442 = vmax.xlane.f32.xlu0 %v5441_v30  ;;  %v5450_v23 = vsel %vm5428_vm14, %v5427_v53, -inf }
0x1200   : > { %v5444_v57 = vsel %vm5428_vm14, %v5425_v10, -inf }
0x1201   : > { %5445 = vmax.xlane.f32.xlu1 %v5444_v57 }
0x1203   : > { %5448 = vmax.xlane.f32.xlu0 %v5447_v7 }
0x1205   : > { %5451 = vmax.xlane.f32.xlu1 %v5450_v23 }
0x1215   : > { %v5431_v61 = vpop.xlane.xlu1 %5430 }
0x1216   : > { %v5453_v13 = vsub.f32 %v5420_v34, %v5431_v61 }
0x1217   : > { %v5434_v24 = vpop.xlane.xlu0 %5433 }
0x1218   : > { %v5461_v15 = vmul.f32 1.442695, %v5453_v13  ;;  %v5454_v40 = vsub.f32 %v5421_v43, %v5434_v24 }
0x1219   : > { %v5440_v21 = vpop.xlane.xlu1 %5439 }
0x121a   : > { %v5463_v54 = vmul.f32 1.442695, %v5454_v40  ;;  %v5456_v49 = vsub.f32 %v5423_v41, %v5440_v21  ;;  %9204 = vpow2.f32 %v5461_v15 }
0x121b   : > { %v5437_v11 = vpop.xlane.xlu0 %5436 }
0x121c   : > { %9206 = vpow2.f32 %v5463_v54  ;;  %v5467_v59 = vmul.f32 1.442695, %v5456_v49  ;;  %v5455_v17 = vsub.f32 %v5422_v44, %v5437_v11 }
0x121e   : > { %9208 = vpow2.f32 %v5467_v59  ;;  %v5465_v42 = vmul.f32 1.442695, %v5455_v17 }
0x1220   : > { %9210 = vpow2.f32 %v5465_v42 }
0x1224   : > { %v9205_v0 = vpop.eup %9204 }
0x1225   : > { %v5477_v36 = vsel %vm5428_vm14, %v9205_v0, 0.0 }
0x1226   : > { %v9207_v31 = vpop.eup %9206 }
0x1227   : > { %v5501_v47 = vpack.c.bf16 %v9207_v31, %v9205_v0  ;;  %v5480_v5 = vsel %vm5428_vm14, %v9207_v31, 0.0 }
0x1228   : > { %v9209_v20 = vpop.eup %9208 }
0x1229   : > { %8239 = vmatprep.mubr.msk.bf16.mxu1 %vm5428_vm14, %v5501_v47  ;;  %v5486_v39 = vsel %vm5428_vm14, %v9209_v20, 0.0 }
0x122a   : > { %v9211_v52 = vpop.eup %9210  ;;  %5487 = vadd.xlane.f32.xlu1 %v5486_v39 }
0x122b   : > { %v5483_v28 = vsel %vm5428_vm14, %v9211_v52, 0.0  ;;  %v5502_v50 = vpack.c.bf16 %v9209_v20, %v9211_v52 }
0x122c   : > { %5484 = vadd.xlane.f32.xlu0 %v5483_v28 }
0x122d   : > { %8240 = vmatmul.mubr.msk.bf16.vlgmr.msra.gmra.mrb[24].mxu1 %vm5428_vm14, %v5502_v50 }
0x122e   : > { %5481 = vadd.xlane.f32.xlu1 %v5480_v5  ;;  %8244 = vmatpush3.bf16.msra.mxu1 %v5177_v14 }
0x122f   : > { %8257 = vmatprep.subr.bf16.mxu1 %v9106_v19 }
0x1230   : > { %5478 = vadd.xlane.f32.xlu0 %v5477_v36 }
0x128c   : > { %v5443_v29 = vpop.xlane.xlu0 %5442 }
0x128d   : > { %v5457_v38 = vsub.f32 %v5424_v58, %v5443_v29 }
0x128e   : > { %v5446_v33 = vpop.xlane.xlu1 %5445 }
0x128f   : > { %v5469_v32 = vmul.f32 1.442695, %v5457_v38  ;;  %v5458_v4 = vsub.f32 %v5425_v10, %v5446_v33 }
0x1290   : > { %v5449_v60 = vpop.xlane.xlu0 %5448 }
0x1291   : > { %9212 = vpow2.f32 %v5469_v32  ;;  %v5471_v6 = vmul.f32 1.442695, %v5458_v4  ;;  %v5459_v22 = vsub.f32 %v11684_v62, %v5449_v60 }
0x1292   : > { %v5452_v8 = vpop.xlane.xlu1 %5451 }
0x1293   : > { %9214 = vpow2.f32 %v5471_v6  ;;  %v5473_v12 = vmul.f32 1.442695, %v5459_v22  ;;  %v5460_v37 = vsub.f32 %v5427_v53, %v5452_v8 }
0x1295   : > { %9216 = vpow2.f32 %v5473_v12  ;;  %v5475_v16 = vmul.f32 1.442695, %v5460_v37  ;;  %v7178_v12 = vld [vmem:[#allocation30] ss:$0 sm:$0xff] }
0x1297   : > { %9218 = vpow2.f32 %v5475_v16 }
0x129b   : > { %v9213_v34 = vpop.eup %9212 }
0x129c   : > { %v5489_v25 = vsel %vm5428_vm14, %v9213_v34, 0.0 }
0x129d   : > { %v9215_v35 = vpop.eup %9214  ;;  %5490 = vadd.xlane.f32.xlu0 %v5489_v25 }
0x129e   : > { %v5492_v41 = vsel %vm5428_vm14, %v9215_v35, 0.0  ;;  %v5503_v43 = vpack.c.bf16 %v9215_v35, %v9213_v34 }
0x129f   : > { %v9217_v51 = vpop.eup %9216  ;;  %5493 = vadd.xlane.f32.xlu1 %v5492_v41 }
0x12a0   : > { %8245 = vmatprep.mubr.msk.bf16.mxu1 %vm5428_vm14, %v5503_v43  ;;  %v5495_v44 = vsel %vm5428_vm14, %v9217_v51, 0.0 }
0x12a1   : > { %v9219_v45 = vpop.eup %9218  ;;  %5496 = vadd.xlane.f32.xlu0 %v5495_v44 }
0x12a2   : > { %v5498_v48 = vsel %vm5428_vm14, %v9219_v45, 0.0  ;;  %v5504_v1 = vpack.c.bf16 %v9219_v45, %v9217_v51 }
0x12a3   : > { %5499 = vadd.xlane.f32.xlu1 %v5498_v48 }
0x12a4   : > { %8246 = vmatmul.mubr.msk.bf16.vlgmr.msra.gmra.mrb[28].mxu1 %vm5428_vm14, %v5504_v1 }
0x12a5   : > { %8258 = vmatpush3.bf16.msra.mxu1 %v9106_v19 }
0x12a6   : > { %8259 = vmatprep.subr.bf16.mxu1 %v9107_v27 }
0x12a9   : > { %8260 = vmatpush3.bf16.msra.mxu1 %v9107_v27 }
0x12b7   : > { %v5488_v2 = vpop.xlane.xlu1 %5487 }
0x12b8   : > { %9220 = vrcp.f32 %v5488_v2 }
0x12b9   : > { %v5485_v55 = vpop.xlane.xlu0 %5484 }
0x12ba   : > { %9222 = vrcp.f32 %v5485_v55 }
0x12bb   : > { %v5482_v56 = vpop.xlane.xlu1 %5481 }
0x12bc   : > { %9224 = vrcp.f32 %v5482_v56 }
0x12bd   : > { %v5479_v58 = vpop.xlane.xlu0 %5478 }
0x12be   : > { %9226 = vrcp.f32 %v5479_v58 }
0x12c2   : > { %v9221_v62 = vpop.eup %9220 }
0x12c4   : > { %v9223_v30 = vpop.eup %9222 }
0x12c6   : > { %v9225_v57 = vpop.eup %9224 }
0x12c8   : > { %v9227_v23 = vpop.eup %9226 }
0x1300   : > { %v8241_v10 = vpop.f32.mrb[24].mxu1 }
0x1301   : > { %v5545_v53 = vpop.f32.mrb[25].mxu1  ;;  %v5625_v61 = vmul.f32 %v9223_v30, %v8241_v10 }
0x1302   : > { %v8242_v7 = vpop.f32.mrb[26].mxu1  ;;  %v5623_v14 = vmul.f32 %v9227_v23, %v5545_v53  ;;  %v9109_v53 = vld [vmem:[%s12107_s15 + $0x40] sm:$0xff]   ;;  %v9112_v23 = vld [vmem:[%s12106_s2 + $0x48] sm:$0xff]   ;;  %s12113_s15 = sld [smem:[#allocation64_spill]] }
0x1303   : > { %v5626_v13 = vmul.f32 %v9221_v62, %v8242_v7  ;;  %v5548_v24 = vpop.f32.mrb[27].mxu1  ;;  %v9111_v7 = vld [vmem:[%s12108_s10] sm:$0xff]   ;;  %8666 = vmatprep.subr.msk.bf16.mxu1 %vm4375_vm0, %v9109_v53 }
0x1304   : > { %v5624_v15 = vmul.f32 %v9225_v57, %v5548_v24  ;;  %v9110_v57 = vld [vmem:[%s12106_s2] sm:$0xff]   ;;  %v9114_v24 = vld [vmem:[%s12106_s2 + $0x8] sm:$0xff]  }
0x1305   : > { %v5632_v40 = vpack.c.bf16 %v5626_v13, %v5625_v61  ;;  %v6002_v61 = vsel %vm4375_vm0, %v9110_v57, 0  ;;  %v6227_v13 = vsel %vm4375_vm0, %v9111_v7, 0  ;;  %v9136_v57 = vld [vmem:[%s12106_s2 + $0x78] sm:$0xff]  }
0x1306   : > { %v5631_v21 = vpack.c.bf16 %v5624_v15, %v5623_v14  ;;  %v9115_v14 = vld [vmem:[%s12108_s10 + $0x8] sm:$0xff]   ;;  %v6005_v15 = vsel %vm4375_vm0, %v9114_v24, 0  ;;  %v9137_v7 = vld [vmem:[%s12108_s10 + $0x78] sm:$0xff]  }
0x1308   : > { %8253 = vmatprep.mubr.msk.bf16.mxu0 %vm4591_vm1, %v5631_v21  ;;  %v6230_v21 = vsel %vm4375_vm0, %v9115_v14, 0 }
0x1309   : > { %8254 = vmatmul.mubr.msk.bf16.vlgmr.msra.gmra.mrb[16].mxu0 %vm4591_vm1, %v5632_v40  ;;  %v9116_v40 = vld [vmem:[%s12106_s2 + $0x50] sm:$0xff]  }
0x132a   : > { %v5491_v54 = vpop.xlane.xlu0 %5490 }
0x132b   : > { %9228 = vrcp.f32 %v5491_v54  ;;  %v9117_v54 = vld [vmem:[%s12108_s10 + $0x50] sm:$0xff]  }
0x132c   : > { %v5494_v49 = vpop.xlane.xlu1 %5493 }
0x132e   : > { %v5497_v11 = vpop.xlane.xlu0 %5496 }
0x132f   : > { %9230 = vrcp.f32 %v5497_v11  ;;  %v9119_v11 = vld [vmem:[%s12108_s10 + $0x10] sm:$0xff]  }
0x1330   : > { %v5500_v59 = vpop.xlane.xlu1 %5499 }
0x1331   : > { %9232 = vrcp.f32 %v5500_v59 }
0x1332   : > { %9234 = vrcp.f32 %v5494_v49  ;;  %v9118_v49 = vld [vmem:[%s12106_s2 + $0x10] sm:$0xff]  }
0x1333   : > { %v6008_v59 = vsel %vm4375_vm0, %v9118_v49, 0 }
0x1335   : > { %v9229_v17 = vpop.eup %9228 }
0x1339   : > { %v9231_v0 = vpop.eup %9230 }
0x133b   : > { %v9233_v47 = vpop.eup %9232 }
0x133c   : > { %v9235_v39 = vpop.eup %9234 }
0x1377   : > { %v8247_v42 = vpop.f32.mrb[28].mxu1 }
0x1378   : > { %v5600_v31 = vpop.f32.mrb[29].mxu1  ;;  %v5629_v52 = vmul.f32 %v9231_v0, %v8247_v42  ;;  %v6233_v42 = vsel %vm4375_vm0, %v9119_v11, 0  ;;  %v9121_v0 = vld [vmem:[%s12108_s10 + $0x58] sm:$0xff]  }
0x1379   : > { %v8248_v20 = vpop.f32.mrb[30].mxu1  ;;  %v5627_v5 = vmul.f32 %v9229_v17, %v5600_v31  ;;  %v9120_v17 = vld [vmem:[%s12106_s2 + $0x58] sm:$0xff]  }
0x137a   : > { %v5630_v28 = vmul.f32 %v9233_v47, %v8248_v20  ;;  %v5603_v50 = vpop.f32.mrb[31].mxu1  ;;  %v9122_v31 = vld [vmem:[%s12106_s2 + $0x18] sm:$0xff]  }
0x137b   : > { %v5628_v36 = vmul.f32 %v9235_v39, %v5603_v50  ;;  %v9123_v47 = vld [vmem:[%s12108_s10 + $0x18] sm:$0xff]   ;;  %v6011_v20 = vsel %vm4375_vm0, %v9122_v31, 0  ;;  %v9124_v39 = vld [vmem:[%s12106_s2 + $0x60] sm:$0xff]  }
0x137c   : > { %v5634_v26 = vpack.c.bf16 %v5630_v28, %v5629_v52  ;;  %v6236_v52 = vsel %vm4375_vm0, %v9123_v47, 0  ;;  %v9125_v28 = vld [vmem:[%s12108_s10 + $0x60] sm:$0xff]   ;;  %v7179_v47 = vld [vmem:[#allocation31] ss:$0 sm:$0xff] }
0x137d   : > { %v5633_v3 = vpack.c.bf16 %v5628_v36, %v5627_v5  ;;  %v9126_v50 = vld [vmem:[%s12106_s2 + $0x20] sm:$0xff]  }
0x137e   : > { %v9127_v5 = vld [vmem:[%s12108_s10 + $0x20] sm:$0xff]   ;;  %v6014_v36 = vsel %vm4375_vm0, %v9126_v50, 0 }
0x137f   : > { %8261 = vmatprep.mubr.msk.bf16.mxu1 %vm4591_vm1, %v5633_v3 }
0x1380   : > { %8262 = vmatmul.mubr.msk.bf16.vlgmr.msra.gmra.mrb[32].mxu1 %vm4591_vm1, %v5634_v26  ;;  %v6239_v26 = vsel %vm4375_vm0, %v9127_v5, 0  ;;  %v7180_v5 = vld [vmem:[#allocation33] ss:$0 sm:$0xff] }
0x1381   : > { %7584 = vmatpush3.bf16.xpose.msra.mxu1 %v6227_v13 }
0x13dc   : > { %v8255_v29 = vpop.f32.mrb[16].mxu0 }
0x13dd   : > { %v5687_v38 = vpop.f32.mrb[17].mxu0  ;;  %v5775_v60 = vsel %vm4375_vm0, %v8255_v29, 0.0 }
0x13de   : > { %v8256_v33 = vpop.f32.mrb[18].mxu0  ;;  %v5769_v8 = vsel %vm4375_vm0, %v5687_v38, 0.0 }
0x13df   : > { %v5690_v32 = vpop.f32.mrb[19].mxu0  ;;  %v5778_v25 = vsel %vm4375_vm0, %v8256_v33, 0.0 }
0x13e0   : > { %v5772_v51 = vsel %vm4375_vm0, %v5690_v32, 0.0 }
0x1453   : > { %v8263_v4 = vpop.f32.mrb[32].mxu1 }
0x1454   : > { %v5776_v6 = vsel %vm4375_vm0, %v8263_v4, 0.0  ;;  %v5754_v22 = vpop.f32.mrb[33].mxu1 }
0x1455   : > { %v5777_v37 = vadd.f32 %v5776_v6, %v5775_v60  ;;  %v5770_v16 = vsel %vm4375_vm0, %v5754_v22, 0.0  ;;  %v8264_v34 = vpop.f32.mrb[34].mxu1 }
0x1456   : > { %v5771_v35 = vadd.f32 %v5770_v16, %v5769_v8  ;;  %v5779_v41 = vsel %vm4375_vm0, %v8264_v34, 0.0  ;;  %v5757_v43 = vpop.f32.mrb[35].mxu1 }
0x1457   : > { %v5780_v44 = vadd.f32 %v5779_v41, %v5778_v25  ;;  %v5773_v45 = vsel %vm4375_vm0, %v5757_v43, 0.0  ;;  %v5789_v48 = vadd.f32 %v7178_v12, %v5777_v37 }
0x1458   : > { %v5787_v1 = vadd.f32 %v7178_v12, %v5771_v35  ;;  %v5774_v2 = vadd.f32 %v5773_v45, %v5772_v51  ;;  %v9128_v45 = vld [vmem:[%s12106_s2 + $0x68] sm:$0xff]  }
0x1459   : > { %v5790_v55 = vadd.f32 %v7178_v12, %v5780_v44  ;;  %v11725_v62 = vadd.f32 %v5789_v48, %v11641_v9  ;;  %v9108_v9 = vld [vmem:[%s12105_s23 + $0x40] sm:$0xff]   ;;  %v9129_v48 = vld [vmem:[%s12108_s10 + $0x68] sm:$0xff]   ;;  %s12111_s23 = sld [smem:[#allocation67_spill]] }
0x145a   : > { %v5788_v56 = vadd.f32 %v7178_v12, %v5774_v2  ;;  %v11717_v58 = vadd.f32 %v5787_v1, %v11633_v63  ;;  %8658 = vmatprep.subr.msk.bf16.mxu0 %vm4375_vm0, %v9108_v9  ;;  %v9130_v1 = vld [vmem:[%s12106_s2 + $0x28] sm:$0xff]  }
0x145b   : > { %v11730_v30 = vadd.f32 %v5790_v55, %v11646_v46  ;;  %v5803_v63 = vsel %vm4375_vm0, %v11725_v62, 0.0  ;;  %v9113_v46 = vld [vmem:[%s12108_s10 + $0x48] sm:$0xff]   ;;  %7564 = vmatpush3.bf16.xpose.msra.mxu0 %v6002_v61  ;;  %v6017_v55 = vsel %vm4375_vm0, %v9130_v1, 0  ;;  %v5905_v1 = vlaneseq }
0x145c   : > { %v5797_v19 = vsel %vm4375_vm0, %v11717_v58, 0.0  ;;  %v11722_v27 = vadd.f32 %v5788_v56, %v11638_v18  ;;  %8659 = vmatprep.subr.msk.bf16.mxu0 %vm4375_vm0, %v9112_v23  ;;  %8667 = vmatprep.subr.msk.bf16.mxu1 %vm4375_vm0, %v9113_v46  ;;  %v9131_v2 = vld [vmem:[%s12108_s10 + $0x28] sm:$0xff]   ;;  %v9138_v23 = vld [vmem:[%s12106_s2 + $0x38] sm:$0xff]  }
0x145d   : > { %5798 = vadd.xlane.f32.xlu0 %v5797_v19  ;;  %v5806_v18 = vsel %vm4375_vm0, %v11730_v30, 0.0  ;;  %7586 = vmatpush3.bf16.xpose.msra.mxu1 %v6230_v21  ;;  %v6242_v56 = vsel %vm4375_vm0, %v9131_v2, 0  ;;  %v9132_v19 = vld [vmem:[%s12106_s2 + $0x70] sm:$0xff]   ;;  %v9139_v46 = vld [vmem:[%s12108_s10 + $0x38] sm:$0xff]   ;;  %v6023_v61 = vsel %vm4375_vm0, %v9138_v23, 0  ;;  %v11850_v2 = vshrl.u32 %v5905_v1, 7 }
0x145e   : > { %v5800_v10 = vsel %vm4375_vm0, %v11722_v27, 0.0  ;;  %8668 = vmatprep.subr.msk.bf16.mxu1 %vm4375_vm0, %v9117_v54  ;;  %v6248_v13 = vsel %vm4375_vm0, %v9139_v46, 0 }
0x145f   : > { %5801 = vadd.xlane.f32.xlu1 %v5800_v10  ;;  %v9133_v10 = vld [vmem:[%s12108_s10 + $0x70] sm:$0xff]   ;;  %s12112_s1 = smov %s12111_s23 }
0x1461   : > { %5804 = vadd.xlane.f32.xlu0 %v5803_v63  ;;  %v9134_v63 = vld [vmem:[%s12106_s2 + $0x30] sm:$0xff]  }
0x1462   : > { %v6020_v9 = vsel %vm4375_vm0, %v9134_v63, 0 }
0x1463   : > { %5807 = vadd.xlane.f32.xlu1 %v5806_v18  ;;  %7566 = vmatpush3.bf16.xpose.msra.mxu0 %v6005_v15  ;;  %v9135_v18 = vld [vmem:[%s12108_s10 + $0x30] sm:$0xff]  }
0x1464   : > { %8660 = vmatprep.subr.msk.bf16.mxu0 %vm4375_vm0, %v9116_v40  ;;  %v6245_v53 = vsel %vm4375_vm0, %v9135_v18, 0 }
0x1465   : > { %7588 = vmatpush3.bf16.xpose.msra.mxu1 %v6233_v42 }
0x1466   : > { %8669 = vmatprep.subr.msk.bf16.mxu1 %vm4375_vm0, %v9121_v0 }
0x146b   : > { %7568 = vmatpush3.bf16.xpose.msra.mxu0 %v6008_v59 }
0x146c   : > { %8661 = vmatprep.subr.msk.bf16.mxu0 %vm4375_vm0, %v9120_v17 }
0x146d   : > { %7590 = vmatpush3.bf16.xpose.msra.mxu1 %v6236_v52 }
0x146e   : > { %8670 = vmatprep.subr.msk.bf16.mxu1 %vm4375_vm0, %v9125_v28 }
0x1473   : > { %7570 = vmatpush3.bf16.xpose.msra.mxu0 %v6011_v20 }
0x1474   : > { %8662 = vmatprep.subr.msk.bf16.mxu0 %vm4375_vm0, %v9124_v39 }
0x1475   : > { %7592 = vmatpush3.bf16.xpose.msra.mxu1 %v6239_v26 }
0x1476   : > { %8671 = vmatprep.subr.msk.bf16.mxu1 %vm4375_vm0, %v9129_v48 }
0x147b   : > { %7572 = vmatpush3.bf16.xpose.msra.mxu0 %v6014_v36 }
0x147c   : > { %8663 = vmatprep.subr.msk.bf16.mxu0 %vm4375_vm0, %v9128_v45 }
0x147d   : > { %7594 = vmatpush3.bf16.xpose.msra.mxu1 %v6242_v56  ;;  %v6134_v56 = vld [vmem:[#allocation34] sm:$0x3] }
0x147e   : > { %8672 = vmatprep.subr.msk.bf16.mxu1 %vm4375_vm0, %v9133_v10 }
0x1483   : > { %7574 = vmatpush3.bf16.xpose.msra.mxu0 %v6017_v55  ;;  %v5907_v55 = vsub.s32 0, %v11850_v2 }
0x1484   : > { %8664 = vmatprep.subr.msk.bf16.mxu0 %vm4375_vm0, %v9132_v19  ;;  %v5911_v19 = vsub.s32 1, %v11850_v2 }
0x1485   : > { %7596 = vmatpush3.bf16.xpose.msra.mxu1 %v6245_v53  ;;  %v6139_v10 = vrot.slane %v6134_v56, %v5907_v55 }
0x1486   : > { %8673 = vmatprep.subr.msk.bf16.mxu1 %vm4375_vm0, %v9137_v7  ;;  %v6143_v63 = vrot.slane %v6134_v56, %v5911_v19 }
0x148b   : > { %7576 = vmatpush3.bf16.xpose.msra.mxu0 %v6020_v9 }
0x148c   : > { %8665 = vmatprep.subr.msk.bf16.mxu0 %vm4375_vm0, %v9136_v57 }
0x148d   : > { %7598 = vmatpush3.bf16.xpose.msra.mxu1 %v6248_v13 }
0x1493   : > { %7578 = vmatpush3.bf16.xpose.msra.mxu0 %v6023_v61 }
0x14ea   : > { %v5799_v3 = vpop.xlane.xlu0 %5798 }
0x14eb   : > { %v5809_v29 = vmul.f32 0.015625, %v5799_v3 }
0x14ec   : > { %v5802_v38 = vpop.xlane.xlu1 %5801 }
0x14ed   : > { %v11777_v33 = vsub.f32 %v11717_v58, %v5809_v29  ;;  %v5810_v32 = vmul.f32 0.015625, %v5802_v38 }
0x14ee   : > { %v5805_v4 = vpop.xlane.xlu0 %5804 }
0x14ef   : > { %v11780_v60 = vsub.f32 %v11722_v27, %v5810_v32  ;;  %v5811_v6 = vmul.f32 0.015625, %v5805_v4  ;;  %v5817_v22 = vmul.f32 %v11777_v33, %v11777_v33 }
0x14f0   : > { %v5808_v8 = vpop.xlane.xlu1 %5807 }
0x14f1   : > { %v11785_v12 = vsub.f32 %v11725_v62, %v5811_v6  ;;  %v5812_v37 = vmul.f32 0.015625, %v5808_v8  ;;  %v5821_v16 = vsel %vm4375_vm0, %v5817_v22, 0.0  ;;  %v5818_v34 = vmul.f32 %v11780_v60, %v11780_v60 }
0x14f2   : > { %5822 = vadd.xlane.f32.xlu0 %v5821_v16  ;;  %v9145_v16 = vld [vmem:[%s12110_s0 + $0x14] ss:$8 sps:$4 sm:$0xff]  }
0x14f3   : > { %v11791_v25 = vsub.f32 %v11730_v30, %v5812_v37  ;;  %v5824_v35 = vsel %vm4375_vm0, %v5818_v34, 0.0  ;;  %v5819_v41 = vmul.f32 %v11785_v12, %v11785_v12  ;;  %v9140_v37 = vld [vmem:[%s12110_s0] ss:$8 sps:$4 sm:$0xff]   ;;  %v9143_v34 = vld [vmem:[%s12110_s0 + $0x10] ss:$8 sps:$4 sm:$0xff]  }
0x14f4   : > { %5825 = vadd.xlane.f32.xlu1 %v5824_v35  ;;  %v9146_v35 = vld [vmem:[%s12110_s0 + $0x20] ss:$8 sps:$4 sm:$0xff]  }
0x14f5   : > { %v5827_v43 = vsel %vm4375_vm0, %v5819_v41, 0.0  ;;  %v5820_v51 = vmul.f32 %v11791_v25, %v11791_v25  ;;  %v9151_v41 = vld [vmem:[%s12110_s0 + $0x34] ss:$8 sps:$4 sm:$0xff]  }
0x14f6   : > { %5828 = vadd.xlane.f32.xlu0 %v5827_v43  ;;  %v9149_v43 = vld [vmem:[%s12110_s0 + $0x30] ss:$8 sps:$4 sm:$0xff]  }
0x14f7   : > { %v5830_v44 = vsel %vm4375_vm0, %v5820_v51, 0.0  ;;  %v9152_v51 = vld [vmem:[%s12111_s23] sm:$0xff]   ;;  %s7242_s23 = sshll.u32 %s12103_s17, 2 }
0x14f8   : > { %5831 = vadd.xlane.f32.xlu1 %v5830_v44  ;;  %v9153_v44 = vld [vmem:[%s12112_s1 + $0x8] sm:$0xff]   ;;  %8674 = vmatprep.subr.msk.bf16.mxu1 %vm4375_vm0, %v9152_v51  ;;  %v6547_v45 = vsel %vm4375_vm0, %v9152_v51, 0 }
0x14f9   : > { %v6550_v48 = vsel %vm4375_vm0, %v9153_v44, 0 }
0x157f   : > { %v5823_v24 = vpop.xlane.xlu0 %5822 }
0x1580   : > { %v5833_v14 = vmul.f32 0.015625, %v5823_v24 }
0x1581   : > { %v5826_v15 = vpop.xlane.xlu1 %5825 }
0x1582   : > { %v5837_v40 = vadd.f32 1e-05, %v5833_v14  ;;  %v5834_v21 = vmul.f32 0.015625, %v5826_v15 }
0x1583   : > { %v5829_v54 = vpop.xlane.xlu0 %5828 }
0x1584   : > { %9236 = vrsqrt.f32 %v5837_v40  ;;  %v5838_v49 = vadd.f32 1e-05, %v5834_v21  ;;  %v5835_v11 = vmul.f32 0.015625, %v5829_v54 }
0x1585   : > { %v5832_v59 = vpop.xlane.xlu1 %5831 }
0x1586   : > { %9238 = vrsqrt.f32 %v5838_v49  ;;  %v5839_v17 = vadd.f32 1e-05, %v5835_v11  ;;  %v5836_v42 = vmul.f32 0.015625, %v5832_v59 }
0x1588   : > { %9240 = vrsqrt.f32 %v5839_v17  ;;  %v5840_v0 = vadd.f32 1e-05, %v5836_v42 }
0x158a   : > { %9242 = vrsqrt.f32 %v5840_v0 }
0x158e   : > { %v9237_v31 = vpop.eup %9236 }
0x158f   : > { %v5845_v20 = vmul.f32 %v9237_v31, %v11777_v33 }
0x1590   : > { %v9239_v39 = vpop.eup %9238 }
0x1591   : > { %v5846_v52 = vmul.f32 %v9239_v39, %v11780_v60  ;;  %v5855_v28 = vmul.f32 %v7179_v47, %v5845_v20 }
0x1592   : > { %v9241_v50 = vpop.eup %9240 }
0x1593   : > { %v5847_v36 = vmul.f32 %v9241_v50, %v11785_v12  ;;  %v5856_v26 = vmul.f32 %v7179_v47, %v5846_v52  ;;  %v5865_v38 = vadd.f32 %v7180_v5, %v5855_v28  ;;  %v9142_v12 = vld [vmem:[%s12109_s26 + $0x4] ss:$8 sps:$4 sm:$0xff]   ;;  %s12114_s26 = sld [smem:[#allocation68_spill]] }
0x1594   : > { %v9243_v3 = vpop.eup %9242  ;;  %6450 = vmatprep.subr.bf16.mxu0 %v9142_v12 }
0x1595   : > { %v5848_v29 = vmul.f32 %v9243_v3, %v11791_v25  ;;  %v5866_v32 = vadd.f32 %v7180_v5, %v5856_v26  ;;  %v5857_v4 = vmul.f32 %v7179_v47, %v5847_v36  ;;  %v9148_v25 = vld [vmem:[%s12110_s0 + $0x24] ss:$8 sps:$4 sm:$0xff]   ;;  %s12115_s0 = sshll.u32 %s12103_s17, 5 }
0x1597   : > { %v5902_v6 = vpack.c.bf16 %v5866_v32, %v5865_v38  ;;  %v5858_v22 = vmul.f32 %v7179_v47, %v5848_v29  ;;  %v5867_v33 = vadd.f32 %v7180_v5, %v5857_v4 }
0x1599   : > { %7579 = vmatprep.mubr.msk.bf16.mxu0 %vm4375_vm0, %v5902_v6  ;;  %7599 = vmatprep.mubr.msk.bf16.mxu1 %vm4375_vm0, %v5902_v6  ;;  %v5868_v60 = vadd.f32 %v7180_v5, %v5858_v22 }
0x159a   : > { %7580 = vmatmul.mubr.msk.bf16.vlgmr.msra.gmra.mrb[20].mxu0 %vm4375_vm0, %v5902_v6  ;;  %7600 = vmatmul.mubr.msk.bf16.vlgmr.msra.gmra.mrb[36].mxu1 %vm4375_vm0, %v5902_v6 }
0x159b   : > { %v5903_v8 = vpack.c.bf16 %v5868_v60, %v5867_v33  ;;  %6451 = vmatpush1.bf16.xpose.msra.mxu0 %v9140_v37  ;;  %8266 = vmatpush3.bf16.xpose.msra.mxu1 %v6547_v45 }
0x159c   : > { %6452 = vmatprep.subr.bf16.mxu0 %v9145_v16  ;;  %8675 = vmatprep.subr.msk.bf16.mxu1 %vm4375_vm0, %v9153_v44 }
0x159d   : > { %7581 = vmatprep.mubr.msk.bf16.mxu0 %vm4375_vm0, %v5903_v8  ;;  %7601 = vmatprep.mubr.msk.bf16.mxu1 %vm4375_vm0, %v5903_v8 }
0x15a2   : > { %7582 = vmatmul.mubr.msk.bf16.gmra.mrb[24].mxu0 %vm4375_vm0, %v5903_v8  ;;  %7602 = vmatmul.mubr.msk.bf16.gmra.mrb[40].mxu1 %vm4375_vm0, %v5903_v8  ;;  %v5901_v8 = vld [vmem:[%s12113_s15] sm:$0x3]  ;;  %s7243_s15 = sshll.u32 %s9930_s22, 3  ;;  %s6631_s22 = sshll.u32 %s10578_s11, 4  ;;  %s11939_s22 = int_to_ptr.vmem [resolvable:$true] %s6631_s22 }
0x15a3   : > { %6453 = vmatpush1.bf16.xpose.msra.mxu0 %v9143_v34  ;;  %8268 = vmatpush3.bf16.xpose.msra.mxu1 %v6550_v48  ;;  %s6628_s2 = sadd.s32 %s7243_s15, %s7242_s23 }
0x15a4   : > { %6454 = vmatprep.subr.bf16.mxu0 %v9148_v25  ;;  %v5908_v25 = vrot.slane %v5901_v8, %v5907_v55  ;;  %s7244_s4 = sshll.u32 %s6628_s2, 7 }
0x15ab   : > { %6455 = vmatpush1.bf16.xpose.msra.mxu0 %v9146_v35 }
0x15ac   : > { %6456 = vmatprep.subr.bf16.mxu0 %v9151_v41 }
0x15b3   : > { %6457 = vmatpush1.bf16.xpose.msra.mxu0 %v9149_v43  ;;  %v5912_v43 = vrot.slane %v5901_v8, %v5911_v19 }
0x166d   : > { %v11856_v18 = vpop.f32.mrb[20].mxu0  ;;  %v6308_v9 = vpop.f32.mrb[36].mxu1 }
0x166e   : > { %v11858_v53 = vadd.f32 %v6308_v9, %v6139_v10  ;;  %v11860_v57 = vpop.f32.mrb[21].mxu0  ;;  %v6310_v7 = vpop.f32.mrb[37].mxu1  ;;  %v6084_v1 = vadd.f32 %v11856_v18, %v5908_v25 }
0x166f   : > { %v11862_v23 = vadd.f32 %v6310_v7, %v6143_v63  ;;  %v11864_v46 = vpop.f32.mrb[22].mxu0  ;;  %v6312_v61 = vpop.f32.mrb[38].mxu1  ;;  %v6086_v55 = vadd.f32 %v11860_v57, %v5912_v43 }
0x1670   : > { %v7217_v13 = vmul.f32 -1.442695, %v11858_v53  ;;  %v11867_v24 = vadd.f32 %v6312_v61, %v6139_v10  ;;  %v11869_v14 = vpop.f32.mrb[23].mxu0  ;;  %v6314_v15 = vpop.f32.mrb[39].mxu1  ;;  %v6088_v19 = vadd.f32 %v11864_v46, %v5908_v25 }
0x1671   : > { %v7218_v40 = vmul.f32 -1.442695, %v11862_v23  ;;  %v11872_v21 = vadd.f32 %v6314_v15, %v6143_v63 }
0x1672   : > { %9244 = vpow2.f32 %v7217_v13  ;;  %v7219_v54 = vmul.f32 -1.442695, %v11867_v24  ;;  %v6090_v13 = vadd.f32 %v11869_v14, %v5912_v43 }
0x1673   : > { %9246 = vpow2.f32 %v7218_v40  ;;  %v7220_v49 = vmul.f32 -1.442695, %v11872_v21 }
0x1674   : > { %9248 = vpow2.f32 %v7219_v54 }
0x1675   : > { %9250 = vpow2.f32 %v7220_v49  ;;  %v11876_v11 = vpop.f32.mrb[24].mxu0  ;;  %v6318_v59 = vpop.f32.mrb[40].mxu1 }
0x1676   : > { %v11878_v17 = vadd.f32 %v6318_v59, %v6139_v10  ;;  %v11880_v42 = vpop.f32.mrb[25].mxu0  ;;  %v6320_v0 = vpop.f32.mrb[41].mxu1  ;;  %v6094_v57 = vadd.f32 %v11876_v11, %v5908_v25 }
0x1677   : > { %v11882_v31 = vadd.f32 %v6320_v0, %v6143_v63  ;;  %v11884_v47 = vpop.f32.mrb[26].mxu0  ;;  %v6322_v20 = vpop.f32.mrb[42].mxu1  ;;  %v6096_v46 = vadd.f32 %v11880_v42, %v5912_v43 }
0x1678   : > { %v7221_v39 = vmul.f32 -1.442695, %v11878_v17  ;;  %v11887_v52 = vadd.f32 %v6322_v20, %v6139_v10  ;;  %v11889_v28 = vpop.f32.mrb[27].mxu0  ;;  %v6324_v50 = vpop.f32.mrb[43].mxu1 }
0x1679   : > { %v7222_v5 = vmul.f32 -1.442695, %v11882_v31  ;;  %v11892_v36 = vadd.f32 %v6324_v50, %v6143_v63  ;;  %v6100_v11 = vadd.f32 %v11889_v28, %v5912_v43  ;;  %v7225_v28 = vld [vmem:[#allocation36] ss:$0 sm:$0xff] }
0x167a   : > { %9252 = vpow2.f32 %v7221_v39  ;;  %v7223_v26 = vmul.f32 -1.442695, %v11887_v52 }
0x167b   : > { %9254 = vpow2.f32 %v7222_v5  ;;  %v7224_v3 = vmul.f32 -1.442695, %v11892_v36 }
0x167c   : > { %v9245_v29 = vpop.eup %9244  ;;  %9256 = vpow2.f32 %v7223_v26 }
0x167d   : > { %v9247_v38 = vpop.eup %9246  ;;  %v6351_v32 = vadd.f32 1.0, %v9245_v29  ;;  %9258 = vpow2.f32 %v7224_v3  ;;  %v9155_v29 = vld [vmem:[%s12112_s1 + $0x18] sm:$0xff]  }
0x167e   : > { %v9249_v4 = vpop.eup %9248  ;;  %v6352_v6 = vadd.f32 1.0, %v9247_v38 }
0x167f   : > { %v9251_v22 = vpop.eup %9250  ;;  %9260 = vrcp.f32 %v6351_v32  ;;  %v6353_v33 = vadd.f32 1.0, %v9249_v4 }
0x1680   : > { %9262 = vrcp.f32 %v6352_v6  ;;  %v6354_v60 = vadd.f32 1.0, %v9251_v22 }
0x1681   : > { %9264 = vrcp.f32 %v6353_v33 }
0x1682   : > { %9266 = vrcp.f32 %v6354_v60 }
0x1684   : > { %v9253_v12 = vpop.eup %9252 }
0x1685   : > { %v9255_v37 = vpop.eup %9254  ;;  %v6355_v16 = vadd.f32 1.0, %v9253_v12 }
0x1686   : > { %v9257_v34 = vpop.eup %9256  ;;  %v6356_v35 = vadd.f32 1.0, %v9255_v37 }
0x1687   : > { %v9259_v41 = vpop.eup %9258  ;;  %9268 = vrcp.f32 %v6355_v16  ;;  %v6357_v51 = vadd.f32 1.0, %v9257_v34 }
0x1688   : > { %9270 = vrcp.f32 %v6356_v35  ;;  %v6358_v44 = vadd.f32 1.0, %v9259_v41 }
0x1689   : > { %v9261_v45 = vpop.eup %9260  ;;  %9272 = vrcp.f32 %v6357_v51 }
0x168a   : > { %v9263_v48 = vpop.eup %9262  ;;  %v6375_v56 = vmul.f32 %v9261_v45, %v11858_v53  ;;  %9274 = vrcp.f32 %v6358_v44 }
0x168b   : > { %v9265_v10 = vpop.eup %9264  ;;  %v6376_v63 = vmul.f32 %v9263_v48, %v11862_v23 }
0x168c   : > { %v9267_v9 = vpop.eup %9266  ;;  %v6383_v2 = vmul.f32 %v6375_v56, %v6084_v1  ;;  %v6377_v7 = vmul.f32 %v9265_v10, %v11867_v24 }
0x168d   : > { %v6384_v61 = vmul.f32 %v6376_v63, %v6086_v55  ;;  %v6378_v15 = vmul.f32 %v9267_v9, %v11872_v21  ;;  %v6098_v21 = vadd.f32 %v11884_v47, %v5908_v25 }
0x168e   : > { %v6385_v18 = vmul.f32 %v6377_v7, %v6088_v19 }
0x168f   : > { %v6386_v40 = vmul.f32 %v6378_v15, %v6090_v13 }
0x1690   : > { %v6400_v53 = vpack.c.bf16 %v6385_v18, %v6383_v2 }
0x1691   : > { %v9269_v54 = vpop.eup %9268  ;;  %v6401_v49 = vpack.c.bf16 %v6386_v40, %v6384_v61 }
0x1692   : > { %v9271_v59 = vpop.eup %9270  ;;  %v6379_v23 = vmul.f32 %v9269_v54, %v11878_v17 }
0x1693   : > { %v9273_v0 = vpop.eup %9272  ;;  %v6380_v24 = vmul.f32 %v9271_v59, %v11882_v31  ;;  %6482 = vmatprep.mubr.bf16.mxu0 %v6401_v49  ;;  %v9154_v31 = vld [vmem:[%s12112_s1 + $0x10] sm:$0xff]   ;;  %s4363_s1 = scalar_lea.vmem %s10573_s6, %s12115_s0  ;;  %s11937_s6 = scalar_lea.hbm %s12116_s3, %s7244_s4 }
0x1694   : > { %v9275_v14 = vpop.eup %9274  ;;  %v6387_v20 = vmul.f32 %v6379_v23, %v6094_v57  ;;  %v6381_v39 = vmul.f32 %v9273_v0, %v11887_v52  ;;  %6483 = vmatmul.mubr.bf16.vlgmr.msra.gmra.mrb[28].mxu0 %v6400_v53  ;;  %8676 = vmatprep.subr.msk.bf16.mxu1 %vm4375_vm0, %v9154_v31  ;;  %v6553_v47 = vsel %vm4375_vm0, %v9154_v31, 0  ;;  %v6556_v52 = vsel %vm4375_vm0, %v9155_v29, 0  ;;  %v4364_v48 = vld [vmem:[%s4363_s1] sm:$0xff]  ;;  %v4365_v63 = vld [vmem:[%s4363_s1 + $0x8] sm:$0xff]  ;;  %s9808_s0 = scalar_lea.vmem %s11939_s22, 512  ;;  %s10001_s4 = smov [#allocation37]  }
0x1695   : > { %v6388_v50 = vmul.f32 %v6380_v24, %v6096_v46  ;;  %v6382_v17 = vmul.f32 %v9275_v14, %v11892_v36  ;;  %8270 = vmatpush3.bf16.xpose.msra.mxu1 %v6553_v47  ;;  %p9809_p5 = scmp.ne.s32.totalorder %s11939_s22, %s9808_s0  ;;  %s9812_s2 = sshll.u32 %s10001_s4, 4  ;;  %s9813_s2 = int_to_ptr.vmem [resolvable:$false] %s9812_s2 }
0x1696   : > { %v6389_v5 = vmul.f32 %v6381_v39, %v6098_v21  ;;  %8677 = vmatprep.subr.msk.bf16.mxu1 %vm4375_vm0, %v9155_v29  ;;  %p9815_p8 = scmp.lt.s32.totalorder %s11939_s22, %s9813_s2 }
0x1697   : > { %v6390_v26 = vmul.f32 %v6382_v17, %v6100_v11  ;;  %p9810_p7 = pnand %p9809_p5, %p12118_p6 }
0x1698   : > { %v6402_v42 = vpack.c.bf16 %v6389_v5, %v6387_v20 }
0x1699   : > { %v6403_v3 = vpack.c.bf16 %v6390_v26, %v6388_v50  ;;  %p9811_p3 = pneg %p9810_p7 }
0x169b   : > { %6490 = vmatprep.mubr.bf16.mxu0 %v6403_v3 }
0x169c   : > { %6491 = vmatmul.mubr.bf16.gmra.mrb[32].mxu0 %v6402_v42 }
0x169d   : > { %8272 = vmatpush3.bf16.xpose.msra.mxu1 %v6556_v52 }
0x1767   : > { %v6484_v36 = vpop.f32.mrb[28].mxu0 }
0x1768   : > { %v6485_v38 = vadd.f32 %v7225_v28, %v6484_v36  ;;  %v6486_v32 = vpop.f32.mrb[29].mxu0 }
0x1769   : > { %v6487_v4 = vpop.f32.mrb[30].mxu0 }
0x176a   : > { %v6488_v6 = vadd.f32 %v7225_v28, %v6487_v4  ;;  %v6489_v22 = vpop.f32.mrb[31].mxu0  ;;  %v6499_v33 = vadd.f32 %v6485_v38, %v11717_v58  ;;  %v7234_v58 = vld [vmem:[%s12114_s26] ss:$0 sm:$0xff]  ;;  %s9814_s26 = scalar_lea.vmem %s9813_s2, 1024 }
0x176b   : > { %p9816_p10 = scmp.lt.s32.totalorder %s9814_s26, %s9808_s0 }
0x176c   : > { %v6500_v60 = vadd.f32 %v6488_v6, %v11722_v27  ;;  %v4366_v27 = vld [vmem:[%s4363_s1 + $0x10] sm:$0xff] }
0x176d   : > { %p9817_p12 = por %p9816_p10, %p9815_p8 }
0x176e   : > { %v6512_v8 = vpack.c.bf16 %v6500_v60, %v6499_v33 }
0x176f   : > { %v6492_v12 = vpop.f32.mrb[32].mxu0  ;;  %p9818_p9 = pnand %p9817_p12, %p9811_p3 }
0x1770   : > { %v6493_v37 = vadd.f32 %v7225_v28, %v6492_v12  ;;  %v6494_v16 = vpop.f32.mrb[33].mxu0  ;;  %8273 = vmatprep.mubr.msk.bf16.mxu1 %vm4375_vm0, %v6512_v8 }
0x1771   : > { %v6495_v34 = vpop.f32.mrb[34].mxu0 }
0x1772   : > { %v6496_v25 = vadd.f32 %v7225_v28, %v6495_v34  ;;  %v6497_v35 = vpop.f32.mrb[35].mxu0  ;;  %v6501_v41 = vadd.f32 %v6493_v37, %v11725_v62 }
0x1774   : > { %v6502_v43 = vadd.f32 %v6496_v25, %v11730_v30  ;;  %v4367_v30 = vld [vmem:[%s4363_s1 + $0x18] sm:$0xff]  ;;  %s12117_s1 = sand.u32 1, %s9918_s16  }
0x1775   : > { %s11949_s17 = scalar_lea.sflag [#allocation9], %s12117_s1 }
0x1776   : > { %v6513_v51 = vpack.c.bf16 %v6502_v43, %v6501_v41 }
0x1778   : > { %8274 = vmatmul.mubr.msk.bf16.vlgmr.msra.gmra.mrb[44].mxu1 %vm4375_vm0, %v6513_v51 }
0x184b   : > { %v8275_v44 = vpop.f32.mrb[44].mxu1 }
0x184c   : > { %v6601_v45 = vadd.f32 %v8275_v44, %v7234_v58  ;;  %v6592_v1 = vpop.f32.mrb[45].mxu1 }
0x184d   : > { %v6593_v62 = vadd.f32 %v7234_v58, %v6592_v1  ;;  %v8276_v56 = vpop.f32.mrb[46].mxu1 }
0x184e   : > { %v6609_v10 = vadd.f32 %v6601_v45, %v4366_v27  ;;  %v6604_v55 = vadd.f32 %v8276_v56, %v7234_v58  ;;  %v6595_v9 = vpop.f32.mrb[47].mxu1 }
0x184f   : > { %v6607_v2 = vadd.f32 %v6593_v62, %v4364_v48  ;;  %v6596_v19 = vadd.f32 %v7234_v58, %v6595_v9 }
0x1850   : > { %6613 = vst.msk [vmem:[%s10578_s11 + $0x10] sm:$0xff] %vm4375_vm0, %v6609_v10  ;;  %v6610_v7 = vadd.f32 %v6604_v55, %v4367_v30 }
0x1851   : > { %6611 = vst.msk [vmem:[%s10578_s11] sm:$0xff] %vm4375_vm0, %v6607_v2  ;;  %v6608_v61 = vadd.f32 %v6596_v19, %v4365_v63 }
0x1852   : > { %6614 = vst.msk [vmem:[%s10578_s11 + $0x18] sm:$0xff] %vm4375_vm0, %v6610_v7 }
0x1853   : > { %6612 = vst.msk [vmem:[%s10578_s11 + $0x8] sm:$0xff] %vm4375_vm0, %v6608_v61 }
0x1854   : > { %9821 = shalt.err (!%p9818_p9)
}
0x1855   : > { %s9822_s11 = scalar_lea.hbm %s11937_s6, 512  ;;  %s9826_s23 = scalar_lea.hbm %s12116_s3, 2048 }
0x1856   : > { %p9823_p11 = scmp.ne.s32.totalorder %s11937_s6, %s9822_s11  ;;  %p9827_p4 = scmp.lt.u32.totalorder %s11937_s6, %s12116_s3 }
0x1857   : > { %p9828_p0 = scmp.lt.u32.totalorder %s9826_s23, %s9822_s11  ;;  %p9830_p5 = scmp.lt.u32.totalorder %s9822_s11, %s11937_s6 }
0x1858   : > { %p9824_p13 = pnand %p9823_p11, %p12118_p6 }
0x1859   : > { %p9829_p2 = por %p9828_p0, %p9827_p4 }
0x185a   : > { %p9825_p1 = pneg %p9824_p13 }
0x185b   : > { %p9831_p7 = por %p9830_p5, %p9829_p2 }
0x185d   : > { %p9832_p3 = pnand %p9831_p7, %p9825_p1 }
0x185f   : > { %9835 = shalt.err (!%p9832_p3)
}
0x1860   : > { %s10002_s15 = smov 128   ;;  %s10003_s1 = smov 8  }
0x1861   : > { %8754 = dma.vmem_to_hbm [thread:$0]  (%p12118_p6), %s11939_s22, 512, %s11937_s6, %s11949_s17, %s10002_s15, %s10002_s15, %s10003_s1  }
0x1862 PF: > { %s12119_s0 = sld [smem:[#allocation70_spill]]  ;;  %s12120_s4 = sld [smem:[#allocation76_spill]] }
0x1863   : > { %p8856_p8 = scmp.ge.s32.totalorder %s9942_s28, 2 }
0x1868   : > { %s6646_s2 = sand.u32 1, %s12119_s0   ;;  %p12121_p10 = scmp.ne.s32.totalorder %s12120_s4, 0 }
0x1869   : > { %s6647_s26 = scalar_lea.sflag [#allocation9], %s6646_s2 }
0x186a   : > { %p8815_p12 = pnand %p8856_p8, %p12121_p10 }
0x186c   : > { %9909 = dma.done.wait (!%p8815_p12), %s6647_s26, 512  }
0x186d   : > { %9911 = vsyncadd (!%p8815_p12), %s6647_s26, 4294966784  ;;  %s84_s28 = sadd.s32 1, %s9942_s28   ;;  %s12122_s11 = sld [smem:[#allocation77_spill]] }
0x186e   : > { %p81_p9 = scmp.ge.s32.totalorder %s84_s28, 6   ;;  %s12123_s0 = sld [smem:[#allocation72_spill]] }
0x186f   : > { %s12124_s22 = sld [smem:[#allocation73_spill]]  ;;  %s12125_s23 = sld [smem:[#allocation74_spill]] }
0x1870   : > { %s12126_s26 = sld [smem:[#allocation75_spill]]  ;;  %s12127_s15 = smov %s9918_s16 }
0x1871   : > { %s12128_s16 = smov %s9922_s18  ;;  %83 = sbr.rel (!%p81_p9) target bundleno = 75 (0x4b), region = 291 }
0x1873   : > { %s12129_s18 = smov %s12122_s11 }
0x1874   : > { %12130 = sst [smem:[#allocation70_spill]] %s12123_s0 }
0x1878   :  { %6652 = vsyncpa [#allocation8], 1 }
0x1879   :  { %6654 = vsyncpa [#allocation8 + $0x1], 1 }
0x187a   :  { %6655 = vsyncpa [#allocation11], 1 }
0x187b   :  { %6656 = vsyncpa [#allocation14], 1 }
0x187c   :  { %6657 = vsyncpa [#allocation17], 1 }
0x187d   :  { %6658 = vsyncpa [#allocation20], 1 }
0x187e   :  { %6659 = vsyncpa [#allocation23], 1 }
0x187f   :  { %6660 = vsyncpa [#allocation26], 1 }
0x1880   :  { %6661 = vsyncpa [#allocation29], 1 }
0x1881   :  { %6662 = vsyncpa [#allocation32], 1 }
0x1882   :  { %6663 = vsyncpa [#allocation35], 1 }
0x1883   :  { %6664 = vsyncpa [#allocation9], 1 }
0x1884   :  { %6666 = vsyncpa [#allocation9 + $0x1], 1 }

// kernel: tpu_custom_call.1
= control target key start
LH: loop header
LB: loop body
LE: loop exit
PB: predicated region body
PF: predicated region fallthrough
CT: control target
= control target key end

     0   :  { %s9944_s6 = smov 1   ;;  %s9945_s10 = smov 2   ;;  %s11997_s0 = inlined_call_operand.smem [shape: u32[31], index: -1, kind: input, shape index: {}] }
   0x1   :  { %s10012_s5 = sld [smem:[%s11997_s0]]   ;;  %s9946_s14 = smov 3  }
   0x2   :  { %s10017_s9 = sld [smem:[%s11997_s0 + %s9944_s6]]   ;;  %s9947_s18 = smov 4  }
   0x3   :  { %s10022_s13 = sld [smem:[%s11997_s0 + %s9945_s10]]   ;;  %s9948_s22 = smov 5  }
   0x4   :  { %s10027_s17 = sld [smem:[%s11997_s0 + %s9946_s14]]   ;;  %s9949_s26 = smov 6  }
   0x5   :  { %s10032_s21 = sld [smem:[%s11997_s0 + %s9947_s18]]   ;;  %s9950_s30 = smov 7  }
   0x6   :  { %s10037_s25 = sld [smem:[%s11997_s0 + %s9948_s22]]   ;;  %s9951_s4 = smov 8  }
   0x7   :  { %12034 = sst [smem:[#allocation49_spill]] %s10012_s5  ;;  %s9952_s10 = smov 9  }
   0x8   :  { %12035 = sst [smem:[#allocation50_spill]] %s10017_s9  ;;  %s9953_s15 = smov 10  }
   0x9   :  { %s10042_s29 = sld [smem:[%s11997_s0 + %s9949_s26]]   ;;  %s9954_s20 = smov 11  }
   0xa   :  { %12036 = sst [smem:[#allocation51_spill]] %s10027_s17  ;;  %s9955_s26 = smov 12  }
   0xb   :  { %12037 = sst [smem:[#allocation52_spill]] %s10032_s21  ;;  %s9956_s1 = smov 13  }
   0xc   :  { %s10047_s3 = sld [smem:[%s11997_s0 + %s9950_s30]]   ;;  %s9957_s7 = smov 14  }
   0xd   :  { %s10052_s8 = sld [smem:[%s11997_s0 + %s9951_s4]]   ;;  %s9959_s22 = smov 16  }
   0xe   :  { %s10057_s14 = sld [smem:[%s11997_s0 + %s9952_s10]]   ;;  %s9960_s28 = smov 17  }
   0xf   :  { %12038 = sst [smem:[#allocation53_spill]] %s10042_s29 }
  0x10   :  { %s10062_s19 = sld [smem:[%s11997_s0 + %s9953_s15]]   ;;  %s9958_s15 = smov 15  }
  0x11   :  { %s10067_s24 = sld [smem:[%s11997_s0 + %s9954_s20]]  }
  0x12   :  { %12039 = sst [smem:[#allocation54_spill]] %s10047_s3 }
  0x13   :  { %12040 = sst [smem:[#allocation55_spill]] %s10052_s8 }
  0x14   :  { %12041 = sst [smem:[#allocation56_spill]] %s10057_s14 }
  0x15   :  { %s10072_s30 = sld [smem:[%s11997_s0 + %s9955_s26]]  }
  0x16   :  { %s10077_s6 = sld [smem:[%s11997_s0 + %s9956_s1]]  }
  0x17   :  { %s10082_s12 = sld [smem:[%s11997_s0 + %s9957_s7]]   ;;  %s9961_s7 = smov 18  }
  0x18   :  { %s10087_s20 = sld [smem:[%s11997_s0 + %s9958_s15]]   ;;  %s9962_s15 = smov 19  }
  0x19   :  { %s10092_s27 = sld [smem:[%s11997_s0 + %s9959_s22]]   ;;  %s9963_s22 = smov 20  }
  0x1a   :  { %s10097_s4 = sld [smem:[%s11997_s0 + %s9960_s28]]   ;;  %s9964_s28 = smov 21  }
  0x1b   :  { %s10102_s8 = sld [smem:[%s11997_s0 + %s9961_s7]]   ;;  %s9965_s7 = smov 22  }
  0x1c   :  { %12042 = sst [smem:[#allocation57_spill]] %s10077_s6 }
  0x1d   :  { %s10107_s14 = sld [smem:[%s11997_s0 + %s9962_s15]]   ;;  %s9966_s15 = smov 23  }
  0x1e   :  { %12043 = sst [smem:[#allocation58_spill]] %s10087_s20 }
  0x1f   :  { %s10112_s21 = sld [smem:[%s11997_s0 + %s9963_s22]]   ;;  %s9967_s22 = smov 24  }
  0x20   :  { %12044 = sst [smem:[#allocation59_spill]] %s10097_s4 }
  0x21   :  { %12045 = sst [smem:[#allocation60_spill]] %s10102_s8 }
  0x22   :  { %s10117_s9 = sld [smem:[%s11997_s0 + %s9964_s28]]   ;;  %s9968_s28 = smov 25  }
  0x23   :  { %12046 = sst [smem:[#allocation61_spill]] %s10107_s14 }
  0x24   :  { %s10122_s5 = sld [smem:[%s11997_s0 + %s9965_s7]]   ;;  %s9969_s7 = smov 26  }
  0x25   :  { %s10127_s14 = sld [smem:[%s11997_s0 + %s9966_s15]]   ;;  %s9970_s15 = smov 27  }
  0x26   :  { %s10132_s4 = sld [smem:[%s11997_s0 + %s9967_s22]]   ;;  %s9971_s22 = smov 28  }
  0x28   :  { %12047 = sst [smem:[#allocation62_spill]] %s10117_s9 }
  0x29   :  { %s10137_s9 = sld [smem:[%s11997_s0 + %s9968_s28]]   ;;  %s9972_s28 = smov 29  }
  0x2a   :  { %12048 = sst [smem:[#allocation63_spill]] %s10122_s5 }
  0x2b   :  { %12049 = sst [smem:[#allocation64_spill]] %s10127_s14 }
  0x2c   :  { %12050 = sst [smem:[#allocation65_spill]] %s10132_s4 }
  0x2d   :  { %s10142_s5 = sld [smem:[%s11997_s0 + %s9969_s7]]   ;;  %s9973_s7 = smov 30  }
  0x2e   :  { %s10147_s14 = sld [smem:[%s11997_s0 + %s9970_s15]]  }
  0x2f   :  { %s10152_s4 = sld [smem:[%s11997_s0 + %s9971_s22]]  }
  0x30   :  { %s10157_s20 = sld [smem:[%s11997_s0 + %s9972_s28]]  }
  0x33   :  { %12051 = sst [smem:[#allocation66_spill]] %s10142_s5 }
  0x34   :  { %s10162_s5 = sld [smem:[%s11997_s0 + %s9973_s7]]  }
  0x35   :  { %12052 = sst [smem:[#allocation67_spill]] %s10152_s4 }
  0x36   :  { %12053 = sst [smem:[#allocation68_spill]] %s10157_s20 }
  0x3a   :  { %12054 = sst [smem:[#allocation69_spill]] %s10162_s5 }
  0x3b   :  { %66 = vsyncpa [#allocation8], 0 }
  0x3c   :  { %67 = vsyncpa [#allocation11], 0 }
  0x3d   :  { %68 = vsyncpa [#allocation14], 0 }
  0x3e   :  { %69 = vsyncpa [#allocation17], 0 }
  0x3f   :  { %70 = vsyncpa [#allocation20], 0 }
  0x40   :  { %71 = vsyncpa [#allocation23], 0 }
  0x41   :  { %72 = vsyncpa [#allocation26], 0 }
  0x42   :  { %73 = vsyncpa [#allocation29], 0 }
  0x43   :  { %74 = vsyncpa [#allocation32], 0 }
  0x44   :  { %75 = vsyncpa [#allocation35], 0 }
  0x45   :  { %76 = vsyncpa [#allocation9], 0 }
  0x46   :  { %78 = vsyncpa [#allocation9 + $0x1], 0  ;;  %s10164_s15 = smov 0   ;;  %s10166_s16 = smov 0  }
  0x47   :  { %s10168_s18 = smov 0   ;;  %s10170_s0 = smov 0  }
  0x48   :  { %12055 = sst [smem:[#allocation70_spill]] %s10170_s0  ;;  %s10172_s22 = smov 0  }
  0x49   :  { %s10174_s23 = smov 0   ;;  %s10176_s26 = smov 0  }
  0x4a   :  { %s10178_s28 = smov 0  }
  0x4b LB: > { %s12057_s8 = sld [smem:[#allocation60_spill]]  ;;  %s12058_s6 = sld [smem:[#allocation57_spill]]  ;;  %s9930_s22 = sphi %s10172_s22, %s12124_s22   ;;  %s9922_s18 = sphi %s10168_s18, %s12129_s18   ;;  %s9918_s16 = sphi %s10166_s16, %s12128_s16   ;;  %s9914_s15 = sphi %s10164_s15, %s12127_s15   ;;  %s9942_s28 = sphi %s10178_s28, %s84_s28   ;;  %s9938_s26 = sphi %s10176_s26, %s12126_s26   ;;  %s9934_s23 = sphi %s10174_s23, %s12125_s23  }
  0x4c   : > { %s12059_s3 = sld [smem:[#allocation54_spill]]  ;;  %s12060_s29 = sld [smem:[#allocation53_spill]] }
  0x4d   : > { %s12061_s17 = sld [smem:[#allocation51_spill]]  ;;  %s12062_s0 = sld [smem:[#allocation70_spill]] }
  0x4e   : > { %12063 = sst [smem:[#allocation70_spill]] %s9914_s15  ;;  %s6936_s1 = sadd.s32 4294967295, %s9942_s28  }
  0x4f   : > { %12065 = sst [smem:[#allocation72_spill]] %s9934_s23  ;;  %s6937_s2 = sadd.s32 4294967294, %s9942_s28  }
  0x50   : > { %12066 = sst [smem:[#allocation73_spill]] %s9938_s26  ;;  %s93_s7 = sadd.s32 1, %s9934_s23 }
  0x51   : > { %s96_s10 = sadd.s32 1, %s9938_s26  ;;  %p94_p0 = scmp.ge.s32.totalorder %s93_s7, 2 }
  0x52   : > { %s745_s11 = sadd.s32 1, %s9922_s18  ;;  %p755_p1 = scmp.ne.s32.totalorder %s9922_s18, %s9918_s16 }
  0x53   : > { %12064 = sst [smem:[#allocation71_spill]] %s12062_s0  ;;  %p756_p2 = scmp.eq.s32.totalorder %s6936_s1, 3 }
  0x54   : > { %s12132_s7 = smov (%p94_p0, %s93_s7), 0  ;;  %s12134_s10 = smov (!%p94_p0, %s96_s10), %s9938_s26 }
  0x55   : > { %12067 = sst [smem:[#allocation74_spill]] %s12132_s7  ;;  %s741_s5 = ssub.s32 %s9934_s23, %s12132_s7 }
  0x56   : > { %p10216_p3 = por %p756_p2, %p755_p1  ;;  %p98_p4 = scmp.ge.s32.totalorder %s12134_s10, 2 }
  0x57   : > { %p761_p5 = scmp.ne.s32.totalorder %s9918_s16, %s9914_s15  ;;  %p762_p6 = scmp.eq.s32.totalorder %s6937_s2, 3 }
  0x58   : > { %s12068_s20 = scalar_select %p10216_p3, 1, 0 }
  0x59   : > { %p6938_p7 = scmp.ge.s32.totalorder %s9942_s28, 1  ;;  %s12136_s10 = smov (%p98_p4, %s12134_s10), 0 }
  0x5a   : > { %12069 = sst [smem:[#allocation75_spill]] %s12136_s10  ;;  %p10225_p8 = por %p762_p6, %p761_p5 }
  0x5b   : > { %p769_p9 = scmp.lt.s32.totalorder %s9942_s28, 5  ;;  %s740_s0 = ssub.s32 %s9938_s26, %s12136_s10 }
  0x5c   : > { %s12070_s4 = scalar_select %p10225_p8, 1, 0 }
  0x5d   : > { %s742_s7 = sor.u32 %s741_s5, %s740_s0  ;;  %p10232_p10 = pnand %p6938_p7, %p769_p9 }
  0x5e   : > { %12071 = sst [smem:[#allocation76_spill]] %s12070_s4  ;;  %p743_p11 = scmp.eq.s32.totalorder %s742_s7, 0 }
  0x5f   : > { %s12072_s23 = scalar_select %p10232_p10, 1, 0 }
  0x60   : > { %p10236_p12 = scmp.eq.s32.totalorder %s6936_s1, 0  ;;  %p8756_p13 = pneg %p10232_p10 }
  0x61   : > { %s10243_s15 = scalar_select %p743_p11, %s9922_s18, %s745_s11  }
  0x62   : > { %s12073_s2 = scalar_select %p10236_p12, 1, 0 }
  0x63   : > { %12074 = sst [smem:[#allocation77_spill]] %s10243_s15  ;;  %p10247_p0 = pnand %p10236_p12, %p8756_p13 }
  0x64   : > { %s9974_s5 = smov [#allocation10]   ;;  %s9975_s26 = smov [#allocation13]  }
  0x65   : > { %s793_s0 = sshll.u32 %s9974_s5, 4  ;;  %s818_s7 = sshll.u32 %s9975_s26, 4  ;;  %s794_s0 = int_to_ptr.vmem [resolvable:$true] %s793_s0  ;;  %s819_s7 = int_to_ptr.vmem [resolvable:$true] %s818_s7 }
  0x66   : > { %s9276_s1 = scalar_lea.hbm %s12061_s17, 16  ;;  %p10255_p2 = pneg %p10247_p0 }
  0x67   : > { %p9277_p1 = scmp.ne.s32.totalorder %s12061_s17, %s9276_s1  ;;  %p9283_p6 = scmp.lt.u32.totalorder %s9276_s1, %s12061_s17 }
  0x69   : > { %p9279_p4 = pnand %p10255_p2, %p9277_p1 }
  0x6b   : > { %p9280_p5 = pneg %p9279_p4 }
  0x6d   : > { %p9285_p7 = pnand %p9283_p6, %p9280_p5 }
  0x6f   : > { %9288 = shalt.err (!%p9285_p7)
}
  0x70   : > { %s9289_s11 = scalar_lea.vmem %s794_s0, 16  ;;  %s9296_s26 = scalar_lea.vmem %s794_s0, 32 }
  0x71   : > { %p9290_p9 = scmp.ne.s32.totalorder %s794_s0, %s9289_s11  ;;  %p9297_p8 = scmp.lt.s32.totalorder %s794_s0, %s794_s0 }
  0x72   : > { %p9298_p3 = scmp.lt.s32.totalorder %s9296_s26, %s9289_s11 }
  0x73   : > { %p9292_p11 = pnand %p9290_p9, %p10255_p2 }
  0x74   : > { %p9299_p12 = por %p9298_p3, %p9297_p8 }
  0x75   : > { %p9293_p13 = pneg %p9292_p11 }
  0x77   : > { %p9300_p10 = pnand %p9299_p12, %p9293_p13 }
  0x79   : > { %9303 = shalt.err (!%p9300_p10)
}
  0x7a   : > { %8762 = dma.hbm_to_vmem [thread:$0]  (!%p10247_p0), %s12061_s17, 16, %s794_s0, [#allocation11]  }
  0x7b   : > { %s9304_s5 = scalar_lea.hbm %s12060_s29, 16 }
  0x7c   : > { %p9305_p1 = scmp.ne.s32.totalorder %s12060_s29, %s9304_s5  ;;  %p9311_p6 = scmp.lt.u32.totalorder %s9304_s5, %s12060_s29 }
  0x7e   : > { %p9307_p4 = pnand %p9305_p1, %p10255_p2 }
  0x80   : > { %p9308_p5 = pneg %p9307_p4 }
  0x82   : > { %p9313_p7 = pnand %p9311_p6, %p9308_p5 }
  0x84   : > { %9316 = shalt.err (!%p9313_p7)
}
  0x85   : > { %s9317_s1 = scalar_lea.vmem %s819_s7, 16  ;;  %s9324_s11 = scalar_lea.vmem %s819_s7, 32 }
  0x86   : > { %p9318_p3 = scmp.ne.s32.totalorder %s819_s7, %s9317_s1  ;;  %p9325_p12 = scmp.lt.s32.totalorder %s819_s7, %s819_s7 }
  0x87   : > { %p9326_p9 = scmp.lt.s32.totalorder %s9324_s11, %s9317_s1 }
  0x88   : > { %p9320_p8 = pnand %p9318_p3, %p10255_p2 }
  0x89   : > { %p9327_p11 = por %p9326_p9, %p9325_p12 }
  0x8a   : > { %p9321_p10 = pneg %p9320_p8 }
  0x8c   : > { %p9328_p13 = pnand %p9327_p11, %p9321_p10 }
  0x8e   : > { %9331 = shalt.err (!%p9328_p13)
}
  0x8f   : > { %8768 = dma.hbm_to_vmem [thread:$0]  (!%p10247_p0), %s12060_s29, 16, %s819_s7, [#allocation14]  }
  0x90   : > { %s9976_s0 = smov [#allocation16]   ;;  %s9332_s5 = scalar_lea.hbm %s10062_s19, 512 }
  0x91   : > { %s845_s26 = sshll.u32 %s9976_s0, 4  ;;  %p9333_p1 = scmp.ne.s32.totalorder %s10062_s19, %s9332_s5  ;;  %s846_s26 = int_to_ptr.vmem [resolvable:$true] %s845_s26 }
  0x92   : > { %p9339_p6 = scmp.lt.u32.totalorder %s9332_s5, %s10062_s19 }
  0x93   : > { %p9335_p4 = pnand %p9333_p1, %p10255_p2 }
  0x95   : > { %p9336_p5 = pneg %p9335_p4 }
  0x97   : > { %p9341_p7 = pnand %p9339_p6, %p9336_p5 }
  0x99   : > { %9344 = shalt.err (!%p9341_p7)
}
  0x9a   : > { %s9345_s1 = scalar_lea.vmem %s846_s26, 512  ;;  %p9353_p12 = scmp.lt.s32.totalorder %s846_s26, %s846_s26 }
  0x9b   : > { %p9346_p3 = scmp.ne.s32.totalorder %s846_s26, %s9345_s1  ;;  %p9354_p9 = scmp.lt.s32.totalorder %s9345_s1, %s9345_s1 }
  0x9d   : > { %p9348_p8 = pnand %p9346_p3, %p10255_p2  ;;  %p9355_p11 = por %p9354_p9, %p9353_p12 }
  0x9f   : > { %p9349_p10 = pneg %p9348_p8 }
  0xa1   : > { %p9356_p13 = pnand %p9355_p11, %p9349_p10 }
  0xa3   : > { %9359 = shalt.err (!%p9356_p13)
}
  0xa4   : > { %s9977_s7 = smov 64   ;;  %s9978_s11 = smov 4  }
  0xa5   : > { %8774 = dma.hbm_to_vmem [thread:$0]  (!%p10247_p0), %s10062_s19, 512, %s846_s26, [#allocation17], %s9977_s7, %s9977_s7, %s9978_s11  }
  0xa6   : > { %s9979_s0 = smov [#allocation19]   ;;  %s9980_s17 = smov [#allocation22]  }
  0xa7   : > { %s872_s5 = sshll.u32 %s9979_s0, 4  ;;  %s894_s1 = sshll.u32 %s9980_s17, 4  ;;  %s873_s5 = int_to_ptr.vmem [resolvable:$true] %s872_s5  ;;  %s10290_s1 = int_to_ptr.vmem [resolvable:$true] %s894_s1 }
  0xa8   : > { %s9360_s29 = scalar_lea.hbm %s10072_s30, 16 }
  0xa9   : > { %p9361_p1 = scmp.ne.s32.totalorder %s10072_s30, %s9360_s29  ;;  %p9367_p6 = scmp.lt.u32.totalorder %s9360_s29, %s10072_s30 }
  0xab   : > { %p9363_p4 = pnand %p9361_p1, %p10255_p2 }
  0xad   : > { %p9364_p5 = pneg %p9363_p4 }
  0xaf   : > { %p9369_p7 = pnand %p9367_p6, %p9364_p5 }
  0xb1   : > { %9372 = shalt.err (!%p9369_p7)
}
  0xb2   : > { %s9373_s15 = scalar_lea.vmem %s873_s5, 16  ;;  %s9380_s26 = scalar_lea.vmem %s873_s5, 32 }
  0xb3   : > { %p9374_p3 = scmp.ne.s32.totalorder %s873_s5, %s9373_s15  ;;  %p9381_p12 = scmp.lt.s32.totalorder %s873_s5, %s873_s5 }
  0xb4   : > { %p9382_p9 = scmp.lt.s32.totalorder %s9380_s26, %s9373_s15 }
  0xb5   : > { %p9376_p8 = pnand %p9374_p3, %p10255_p2 }
  0xb6   : > { %p9383_p11 = por %p9382_p9, %p9381_p12 }
  0xb7   : > { %p9377_p10 = pneg %p9376_p8 }
  0xb9   : > { %p9384_p13 = pnand %p9383_p11, %p9377_p10 }
  0xbb   : > { %9387 = shalt.err (!%p9384_p13)
}
  0xbc   : > { %8780 = dma.hbm_to_vmem [thread:$0]  (!%p10247_p0), %s10072_s30, 16, %s873_s5, [#allocation20]  }
  0xbd   : > { %s9388_s17 = scalar_lea.hbm %s10082_s12, 16 }
  0xbe   : > { %p9389_p1 = scmp.ne.s32.totalorder %s10082_s12, %s9388_s17  ;;  %p9395_p6 = scmp.lt.u32.totalorder %s9388_s17, %s10082_s12 }
  0xc0   : > { %p9391_p4 = pnand %p9389_p1, %p10255_p2 }
  0xc2   : > { %p9392_p5 = pneg %p9391_p4 }
  0xc4   : > { %p9397_p7 = pnand %p9395_p6, %p9392_p5 }
  0xc6   : > { %9400 = shalt.err (!%p9397_p7)
}
  0xc7   : > { %s9401_s29 = scalar_lea.vmem %s10290_s1, 16  ;;  %s9408_s15 = scalar_lea.vmem %s10290_s1, 32 }
  0xc8   : > { %p9402_p3 = scmp.ne.s32.totalorder %s10290_s1, %s9401_s29  ;;  %p9409_p12 = scmp.lt.s32.totalorder %s10290_s1, %s10290_s1 }
  0xc9   : > { %p9410_p9 = scmp.lt.s32.totalorder %s9408_s15, %s9401_s29 }
  0xca   : > { %p9404_p8 = pnand %p9402_p3, %p10255_p2 }
  0xcb   : > { %p9411_p11 = por %p9410_p9, %p9409_p12 }
  0xcc   : > { %p9405_p10 = pneg %p9404_p8 }
  0xce   : > { %p9412_p13 = pnand %p9411_p11, %p9405_p10 }
  0xd0   : > { %9415 = shalt.err (!%p9412_p13)
}
  0xd1   : > { %8786 = dma.hbm_to_vmem [thread:$0]  (!%p10247_p0), %s10082_s12, 16, %s10290_s1, [#allocation23]  }
  0xd2   : > { %s9981_s0 = smov [#allocation25]   ;;  %s9982_s26 = smov [#allocation28]  }
  0xd3   : > { %s917_s5 = sshll.u32 %s9981_s0, 4  ;;  %s943_s17 = sshll.u32 %s9982_s26, 4  ;;  %s918_s5 = int_to_ptr.vmem [resolvable:$true] %s917_s5  ;;  %s10318_s17 = int_to_ptr.vmem [resolvable:$true] %s943_s17 }
  0xd4   : > { %s9416_s29 = scalar_lea.hbm %s10092_s27, 512 }
  0xd5   : > { %p9417_p1 = scmp.ne.s32.totalorder %s10092_s27, %s9416_s29  ;;  %p9423_p6 = scmp.lt.u32.totalorder %s9416_s29, %s10092_s27 }
  0xd7   : > { %p9419_p4 = pnand %p9417_p1, %p10255_p2 }
  0xd9   : > { %p9420_p5 = pneg %p9419_p4 }
  0xdb   : > { %p9425_p7 = pnand %p9423_p6, %p9420_p5 }
  0xdd   : > { %9428 = shalt.err (!%p9425_p7)
}
  0xde   : > { %s9429_s15 = scalar_lea.vmem %s918_s5, 512  ;;  %p9437_p12 = scmp.lt.s32.totalorder %s918_s5, %s918_s5 }
  0xdf   : > { %p9430_p3 = scmp.ne.s32.totalorder %s918_s5, %s9429_s15  ;;  %p9438_p9 = scmp.lt.s32.totalorder %s9429_s15, %s9429_s15 }
  0xe1   : > { %p9432_p8 = pnand %p9430_p3, %p10255_p2  ;;  %p9439_p11 = por %p9438_p9, %p9437_p12 }
  0xe3   : > { %p9433_p10 = pneg %p9432_p8 }
  0xe5   : > { %p9440_p13 = pnand %p9439_p11, %p9433_p10 }
  0xe7   : > { %9443 = shalt.err (!%p9440_p13)
}
  0xe8   : > { %8792 = dma.hbm_to_vmem [thread:$0]  (!%p10247_p0), %s10092_s27, 512, %s918_s5, [#allocation26], %s9977_s7, %s9977_s7, %s9978_s11  }
  0xe9   : > { %s9444_s1 = scalar_lea.hbm %s12057_s8, 512 }
  0xea   : > { %p9445_p1 = scmp.ne.s32.totalorder %s12057_s8, %s9444_s1  ;;  %p9451_p6 = scmp.lt.u32.totalorder %s9444_s1, %s12057_s8 }
  0xec   : > { %p9447_p4 = pnand %p9445_p1, %p10255_p2 }
  0xee   : > { %p9448_p5 = pneg %p9447_p4 }
  0xf0   : > { %p9453_p7 = pnand %p9451_p6, %p9448_p5 }
  0xf2   : > { %9456 = shalt.err (!%p9453_p7)
}
  0xf3   : > { %s9457_s0 = scalar_lea.vmem %s10318_s17, 512  ;;  %p9465_p12 = scmp.lt.s32.totalorder %s10318_s17, %s10318_s17 }
  0xf4   : > { %p9458_p3 = scmp.ne.s32.totalorder %s10318_s17, %s9457_s0  ;;  %p9466_p9 = scmp.lt.s32.totalorder %s9457_s0, %s9457_s0 }
  0xf6   : > { %p9460_p8 = pnand %p9458_p3, %p10255_p2  ;;  %p9467_p11 = por %p9466_p9, %p9465_p12 }
  0xf8   : > { %p9461_p10 = pneg %p9460_p8 }
  0xfa   : > { %p9468_p13 = pnand %p9467_p11, %p9461_p10 }
  0xfc   : > { %9471 = shalt.err (!%p9468_p13)
}
  0xfd   : > { %8798 = dma.hbm_to_vmem [thread:$0]  (!%p10247_p0), %s12057_s8, 512, %s10318_s17, [#allocation29], %s9977_s7, %s9977_s7, %s9978_s11  }
  0xfe   : > { %s9983_s5 = smov [#allocation31]   ;;  %s9984_s29 = smov [#allocation34]  }
  0xff   : > { %s968_s26 = sshll.u32 %s9983_s5, 4  ;;  %s999_s15 = sshll.u32 %s9984_s29, 4  ;;  %s969_s26 = int_to_ptr.vmem [resolvable:$true] %s968_s26  ;;  %s10351_s15 = int_to_ptr.vmem [resolvable:$true] %s999_s15 }
 0x100   : > { %s9472_s1 = scalar_lea.hbm %s10112_s21, 16 }
 0x101   : > { %p9473_p1 = scmp.ne.s32.totalorder %s10112_s21, %s9472_s1  ;;  %p9479_p6 = scmp.lt.u32.totalorder %s9472_s1, %s10112_s21 }
 0x103   : > { %p9475_p4 = pnand %p9473_p1, %p10255_p2 }
 0x105   : > { %p9476_p5 = pneg %p9475_p4 }
 0x107   : > { %p9481_p7 = pnand %p9479_p6, %p9476_p5 }
 0x109   : > { %9484 = shalt.err (!%p9481_p7)
}
 0x10a   : > { %s9485_s0 = scalar_lea.vmem %s969_s26, 16  ;;  %s9492_s17 = scalar_lea.vmem %s969_s26, 32 }
 0x10b   : > { %p9486_p3 = scmp.ne.s32.totalorder %s969_s26, %s9485_s0  ;;  %p9493_p12 = scmp.lt.s32.totalorder %s969_s26, %s969_s26 }
 0x10c   : > { %p9494_p9 = scmp.lt.s32.totalorder %s9492_s17, %s9485_s0 }
 0x10d   : > { %p9488_p8 = pnand %p9486_p3, %p10255_p2 }
 0x10e   : > { %p9495_p11 = por %p9494_p9, %p9493_p12 }
 0x10f   : > { %p9489_p10 = pneg %p9488_p8 }
 0x111   : > { %p9496_p13 = pnand %p9495_p11, %p9489_p10 }
 0x113   : > { %9499 = shalt.err (!%p9496_p13)
}
 0x114   : > { %8804 = dma.hbm_to_vmem [thread:$0]  (!%p10247_p0), %s10112_s21, 16, %s969_s26, [#allocation32]  }
 0x115   : > { %s9500_s5 = scalar_lea.hbm %s10137_s9, 32 }
 0x116   : > { %p9501_p1 = scmp.ne.s32.totalorder %s10137_s9, %s9500_s5  ;;  %p9507_p6 = scmp.lt.u32.totalorder %s9500_s5, %s10137_s9 }
 0x118   : > { %p9503_p4 = pnand %p9501_p1, %p10255_p2 }
 0x11a   : > { %p9504_p5 = pneg %p9503_p4 }
 0x11c   : > { %p9509_p7 = pnand %p9507_p6, %p9504_p5 }
 0x11e   : > { %9512 = shalt.err (!%p9509_p7)
}
 0x11f   : > { %s9513_s29 = scalar_lea.vmem %s10351_s15, 32  ;;  %p9521_p12 = scmp.lt.s32.totalorder %s10351_s15, %s10351_s15 }
 0x120   : > { %p9514_p3 = scmp.ne.s32.totalorder %s10351_s15, %s9513_s29  ;;  %p9522_p9 = scmp.lt.s32.totalorder %s9513_s29, %s9513_s29 }
 0x122   : > { %p9516_p8 = pnand %p9514_p3, %p10255_p2  ;;  %p9523_p11 = por %p9522_p9, %p9521_p12 }
 0x124   : > { %p9517_p10 = pneg %p9516_p8 }
 0x126   : > { %p9524_p13 = pnand %p9523_p11, %p9517_p10 }
 0x128   : > { %9527 = shalt.err (!%p9524_p13)
}
 0x129   : > { %8810 = dma.hbm_to_vmem [thread:$0]  (!%p10247_p0), %s10137_s9, 32, %s10351_s15, [#allocation35]  }
 0x12a   : > { %s9985_s26 = smov [#allocation7]   ;;  %s9986_s0 = smov [#allocation12]  }
 0x12b   : > { %s782_s1 = sshll.u32 %s9985_s26, 4  ;;  %s807_s17 = sshll.u32 %s9986_s0, 4  ;;  %s783_s1 = int_to_ptr.vmem [resolvable:$true] %s782_s1  ;;  %s10378_s17 = int_to_ptr.vmem [resolvable:$true] %s807_s17 }
 0x12c   : > { %s9528_s5 = scalar_lea.hbm %s10022_s13, 16 }
 0x12d   : > { %p9529_p1 = scmp.ne.s32.totalorder %s10022_s13, %s9528_s5  ;;  %p9535_p6 = scmp.lt.u32.totalorder %s9528_s5, %s10022_s13 }
 0x12f   : > { %p9531_p4 = pnand %p9529_p1, %p10255_p2 }
 0x131   : > { %p9532_p5 = pneg %p9531_p4 }
 0x133   : > { %p9537_p7 = pnand %p9535_p6, %p9532_p5 }
 0x135   : > { %9540 = shalt.err (!%p9537_p7)
}
 0x136   : > { %s9541_s29 = scalar_lea.vmem %s783_s1, 16  ;;  %s9548_s15 = scalar_lea.vmem %s783_s1, 32 }
 0x137   : > { %p9542_p3 = scmp.ne.s32.totalorder %s783_s1, %s9541_s29  ;;  %p9549_p12 = scmp.lt.s32.totalorder %s783_s1, %s783_s1 }
 0x138   : > { %p9550_p9 = scmp.lt.s32.totalorder %s9548_s15, %s9541_s29 }
 0x139   : > { %p9544_p8 = pnand %p9542_p3, %p10255_p2 }
 0x13a   : > { %p9551_p11 = por %p9550_p9, %p9549_p12 }
 0x13b   : > { %p9545_p10 = pneg %p9544_p8 }
 0x13d   : > { %p9552_p13 = pnand %p9551_p11, %p9545_p10 }
 0x13f   : > { %9555 = shalt.err (!%p9552_p13)
}
 0x140   : > { %8759 = dma.hbm_to_vmem [thread:$0]  (!%p10247_p0), %s10022_s13, 16, %s783_s1, [#allocation8]  }
 0x141   : > { %s9556_s26 = scalar_lea.hbm %s10037_s25, 16 }
 0x142   : > { %p9557_p1 = scmp.ne.s32.totalorder %s10037_s25, %s9556_s26  ;;  %p9563_p6 = scmp.lt.u32.totalorder %s9556_s26, %s10037_s25 }
 0x144   : > { %p9559_p4 = pnand %p9557_p1, %p10255_p2 }
 0x146   : > { %p9560_p5 = pneg %p9559_p4 }
 0x148   : > { %p9565_p7 = pnand %p9563_p6, %p9560_p5 }
 0x14a   : > { %9568 = shalt.err (!%p9565_p7)
}
 0x14b   : > { %s9569_s0 = scalar_lea.vmem %s10378_s17, 16  ;;  %s9576_s5 = scalar_lea.vmem %s10378_s17, 32 }
 0x14c   : > { %p9570_p3 = scmp.ne.s32.totalorder %s10378_s17, %s9569_s0  ;;  %p9577_p12 = scmp.lt.s32.totalorder %s10378_s17, %s10378_s17 }
 0x14d   : > { %p9578_p9 = scmp.lt.s32.totalorder %s9576_s5, %s9569_s0 }
 0x14e   : > { %p9572_p8 = pnand %p9570_p3, %p10255_p2 }
 0x14f   : > { %p9579_p11 = por %p9578_p9, %p9577_p12 }
 0x150   : > { %p9573_p10 = pneg %p9572_p8 }
 0x152   : > { %p9580_p13 = pnand %p9579_p11, %p9573_p10 }
 0x154   : > { %9583 = shalt.err (!%p9580_p13)
}
 0x155   : > { %8765 = dma.hbm_to_vmem [thread:$0]  (!%p10247_p0), %s10037_s25, 16, %s10378_s17, [#allocation11]  }
 0x156   : > { %s9987_s1 = smov [#allocation15]   ;;  %s9988_s15 = smov [#allocation18]  }
 0x157   : > { %s829_s29 = sshll.u32 %s9987_s1, 4  ;;  %s858_s26 = sshll.u32 %s9988_s15, 4  ;;  %s830_s29 = int_to_ptr.vmem [resolvable:$true] %s829_s29  ;;  %s10406_s26 = int_to_ptr.vmem [resolvable:$true] %s858_s26 }
 0x158   : > { %s9584_s0 = scalar_lea.hbm %s12059_s3, 16 }
 0x159   : > { %p9585_p1 = scmp.ne.s32.totalorder %s12059_s3, %s9584_s0  ;;  %p9591_p6 = scmp.lt.u32.totalorder %s9584_s0, %s12059_s3 }
 0x15b   : > { %p9587_p4 = pnand %p9585_p1, %p10255_p2 }
 0x15d   : > { %p9588_p5 = pneg %p9587_p4 }
 0x15f   : > { %p9593_p7 = pnand %p9591_p6, %p9588_p5 }
 0x161   : > { %9596 = shalt.err (!%p9593_p7)
}
 0x162   : > { %s9597_s5 = scalar_lea.vmem %s830_s29, 16  ;;  %s9604_s17 = scalar_lea.vmem %s830_s29, 32 }
 0x163   : > { %p9598_p3 = scmp.ne.s32.totalorder %s830_s29, %s9597_s5  ;;  %p9605_p12 = scmp.lt.s32.totalorder %s830_s29, %s830_s29 }
 0x164   : > { %p9606_p9 = scmp.lt.s32.totalorder %s9604_s17, %s9597_s5 }
 0x165   : > { %p9600_p8 = pnand %p9598_p3, %p10255_p2 }
 0x166   : > { %p9607_p11 = por %p9606_p9, %p9605_p12 }
 0x167   : > { %p9601_p10 = pneg %p9600_p8 }
 0x169   : > { %p9608_p13 = pnand %p9607_p11, %p9601_p10 }
 0x16b   : > { %9611 = shalt.err (!%p9608_p13)
}
 0x16c   : > { %8771 = dma.hbm_to_vmem [thread:$0]  (!%p10247_p0), %s12059_s3, 16, %s830_s29, [#allocation14]  }
 0x16d   : > { %s9612_s1 = scalar_lea.hbm %s10067_s24, 512 }
 0x16e   : > { %p9613_p1 = scmp.ne.s32.totalorder %s10067_s24, %s9612_s1  ;;  %p9619_p6 = scmp.lt.u32.totalorder %s9612_s1, %s10067_s24 }
 0x170   : > { %p9615_p4 = pnand %p9613_p1, %p10255_p2 }
 0x172   : > { %p9616_p5 = pneg %p9615_p4 }
 0x174   : > { %p9621_p7 = pnand %p9619_p6, %p9616_p5 }
 0x176   : > { %9624 = shalt.err (!%p9621_p7)
}
 0x177   : > { %s9625_s15 = scalar_lea.vmem %s10406_s26, 512  ;;  %p9633_p12 = scmp.lt.s32.totalorder %s10406_s26, %s10406_s26 }
 0x178   : > { %p9626_p3 = scmp.ne.s32.totalorder %s10406_s26, %s9625_s15  ;;  %p9634_p9 = scmp.lt.s32.totalorder %s9625_s15, %s9625_s15 }
 0x17a   : > { %p9628_p8 = pnand %p9626_p3, %p10255_p2  ;;  %p9635_p11 = por %p9634_p9, %p9633_p12 }
 0x17c   : > { %p9629_p10 = pneg %p9628_p8 }
 0x17e   : > { %p9636_p13 = pnand %p9635_p11, %p9629_p10 }
 0x180   : > { %9639 = shalt.err (!%p9636_p13)
}
 0x181   : > { %8777 = dma.hbm_to_vmem [thread:$0]  (!%p10247_p0), %s10067_s24, 512, %s10406_s26, [#allocation17], %s9977_s7, %s9977_s7, %s9978_s11  }
 0x182   : > { %s9989_s29 = smov [#allocation21]   ;;  %s9990_s5 = smov [#allocation24]  }
 0x183   : > { %s883_s0 = sshll.u32 %s9989_s29, 4  ;;  %s904_s17 = sshll.u32 %s9990_s5, 4  ;;  %s884_s0 = int_to_ptr.vmem [resolvable:$true] %s883_s0  ;;  %s10436_s17 = int_to_ptr.vmem [resolvable:$true] %s904_s17 }
 0x184   : > { %s9640_s1 = scalar_lea.hbm %s12058_s6, 16 }
 0x185   : > { %p9641_p1 = scmp.ne.s32.totalorder %s12058_s6, %s9640_s1  ;;  %p9647_p6 = scmp.lt.u32.totalorder %s9640_s1, %s12058_s6 }
 0x187   : > { %p9643_p4 = pnand %p9641_p1, %p10255_p2 }
 0x189   : > { %p9644_p5 = pneg %p9643_p4 }
 0x18b   : > { %p9649_p7 = pnand %p9647_p6, %p9644_p5 }
 0x18d   : > { %9652 = shalt.err (!%p9649_p7)
}
 0x18e   : > { %s9653_s15 = scalar_lea.vmem %s884_s0, 16  ;;  %s9660_s26 = scalar_lea.vmem %s884_s0, 32 }
 0x18f   : > { %p9654_p3 = scmp.ne.s32.totalorder %s884_s0, %s9653_s15  ;;  %p9661_p12 = scmp.lt.s32.totalorder %s884_s0, %s884_s0 }
 0x190   : > { %p9662_p9 = scmp.lt.s32.totalorder %s9660_s26, %s9653_s15 }
 0x191   : > { %p9656_p8 = pnand %p9654_p3, %p10255_p2 }
 0x192   : > { %p9663_p11 = por %p9662_p9, %p9661_p12 }
 0x193   : > { %p9657_p10 = pneg %p9656_p8 }
 0x195   : > { %p9664_p13 = pnand %p9663_p11, %p9657_p10 }
 0x197   : > { %9667 = shalt.err (!%p9664_p13)
}
 0x198   : > { %s12077_s29 = sld [smem:[#allocation58_spill]] }
 0x199   : > { %8783 = dma.hbm_to_vmem [thread:$0]  (!%p10247_p0), %s12058_s6, 16, %s884_s0, [#allocation20]  }
 0x19e   : > { %s9668_s5 = scalar_lea.hbm %s12077_s29, 512 }
 0x19f   : > { %p9669_p1 = scmp.ne.s32.totalorder %s12077_s29, %s9668_s5  ;;  %p9675_p6 = scmp.lt.u32.totalorder %s9668_s5, %s12077_s29 }
 0x1a1   : > { %p9671_p4 = pnand %p9669_p1, %p10255_p2 }
 0x1a3   : > { %p9672_p5 = pneg %p9671_p4 }
 0x1a5   : > { %p9677_p7 = pnand %p9675_p6, %p9672_p5 }
 0x1a7   : > { %9680 = shalt.err (!%p9677_p7)
}
 0x1a8   : > { %s9681_s1 = scalar_lea.vmem %s10436_s17, 512  ;;  %p9689_p12 = scmp.lt.s32.totalorder %s10436_s17, %s10436_s17 }
 0x1a9   : > { %p9682_p3 = scmp.ne.s32.totalorder %s10436_s17, %s9681_s1  ;;  %p9690_p9 = scmp.lt.s32.totalorder %s9681_s1, %s9681_s1 }
 0x1ab   : > { %p9684_p8 = pnand %p9682_p3, %p10255_p2  ;;  %p9691_p11 = por %p9690_p9, %p9689_p12 }
 0x1ad   : > { %p9685_p10 = pneg %p9684_p8 }
 0x1af   : > { %p9692_p13 = pnand %p9691_p11, %p9685_p10 }
 0x1b1   : > { %9695 = shalt.err (!%p9692_p13)
}
 0x1b2   : > { %s12078_s0 = sld [smem:[#allocation59_spill]]  ;;  %s9991_s15 = smov [#allocation27]  }
 0x1b3   : > { %8789 = dma.hbm_to_vmem [thread:$0]  (!%p10247_p0), %s12077_s29, 512, %s10436_s17, [#allocation23], %s9977_s7, %s9977_s7, %s9978_s11  }
 0x1b4   : > { %s930_s26 = sshll.u32 %s9991_s15, 4  ;;  %s9992_s3 = smov [#allocation30]   ;;  %s931_s26 = int_to_ptr.vmem [resolvable:$true] %s930_s26 }
 0x1b5   : > { %s957_s6 = sshll.u32 %s9992_s3, 4  ;;  %s10466_s6 = int_to_ptr.vmem [resolvable:$true] %s957_s6 }
 0x1b8   : > { %s12079_s5 = smov %s12078_s0  ;;  %s9696_s1 = scalar_lea.hbm %s12078_s0, 512 }
 0x1b9   : > { %p9697_p1 = scmp.ne.s32.totalorder %s12079_s5, %s9696_s1  ;;  %p9703_p6 = scmp.lt.u32.totalorder %s9696_s1, %s12079_s5 }
 0x1bb   : > { %p9699_p4 = pnand %p9697_p1, %p10255_p2 }
 0x1bd   : > { %p9700_p5 = pneg %p9699_p4 }
 0x1bf   : > { %p9705_p7 = pnand %p9703_p6, %p9700_p5 }
 0x1c1   : > { %9708 = shalt.err (!%p9705_p7)
}
 0x1c2   : > { %s9709_s8 = scalar_lea.vmem %s931_s26, 512  ;;  %p9717_p12 = scmp.lt.s32.totalorder %s931_s26, %s931_s26 }
 0x1c3   : > { %p9710_p3 = scmp.ne.s32.totalorder %s931_s26, %s9709_s8  ;;  %p9718_p9 = scmp.lt.s32.totalorder %s9709_s8, %s9709_s8 }
 0x1c5   : > { %p9712_p8 = pnand %p9710_p3, %p10255_p2  ;;  %p9719_p11 = por %p9718_p9, %p9717_p12 }
 0x1c7   : > { %p9713_p10 = pneg %p9712_p8 }
 0x1c9   : > { %p9720_p13 = pnand %p9719_p11, %p9713_p10 }
 0x1cb   : > { %9723 = shalt.err (!%p9720_p13)
}
 0x1cc   : > { %s12080_s3 = sld [smem:[#allocation61_spill]] }
 0x1cd   : > { %8795 = dma.hbm_to_vmem [thread:$0]  (!%p10247_p0), %s12079_s5, 512, %s931_s26, [#allocation26], %s9977_s7, %s9977_s7, %s9978_s11  }
 0x1d2   : > { %s9724_s17 = scalar_lea.hbm %s12080_s3, 16 }
 0x1d3   : > { %p9725_p1 = scmp.ne.s32.totalorder %s12080_s3, %s9724_s17  ;;  %p9731_p6 = scmp.lt.u32.totalorder %s9724_s17, %s12080_s3 }
 0x1d5   : > { %p9727_p4 = pnand %p9725_p1, %p10255_p2 }
 0x1d7   : > { %p9728_p5 = pneg %p9727_p4 }
 0x1d9   : > { %p9733_p7 = pnand %p9731_p6, %p9728_p5 }
 0x1db   : > { %9736 = shalt.err (!%p9733_p7)
}
 0x1dc   : > { %s9737_s8 = scalar_lea.vmem %s10466_s6, 16  ;;  %s9744_s0 = scalar_lea.vmem %s10466_s6, 32 }
 0x1dd   : > { %p9738_p3 = scmp.ne.s32.totalorder %s10466_s6, %s9737_s8  ;;  %p9745_p12 = scmp.lt.s32.totalorder %s10466_s6, %s10466_s6 }
 0x1de   : > { %p9746_p9 = scmp.lt.s32.totalorder %s9744_s0, %s9737_s8 }
 0x1df   : > { %p9740_p8 = pnand %p9738_p3, %p10255_p2 }
 0x1e0   : > { %p9747_p11 = por %p9746_p9, %p9745_p12 }
 0x1e1   : > { %p9741_p10 = pneg %p9740_p8 }
 0x1e3   : > { %p9748_p13 = pnand %p9747_p11, %p9741_p10 }
 0x1e5   : > { %9751 = shalt.err (!%p9748_p13)
}
 0x1e6   : > { %s12081_s7 = sld [smem:[#allocation62_spill]]  ;;  %s9993_s11 = smov [#allocation33]  }
 0x1e7   : > { %8801 = dma.hbm_to_vmem [thread:$0]  (!%p10247_p0), %s12080_s3, 16, %s10466_s6, [#allocation29]  }
 0x1e8   : > { %s979_s15 = sshll.u32 %s9993_s11, 4  ;;  %s9994_s26 = smov [#allocation36]   ;;  %s980_s15 = int_to_ptr.vmem [resolvable:$true] %s979_s15 }
 0x1e9   : > { %s1013_s1 = sshll.u32 %s9994_s26, 4  ;;  %s10497_s1 = int_to_ptr.vmem [resolvable:$true] %s1013_s1 }
 0x1ec   : > { %s9752_s17 = scalar_lea.hbm %s12081_s7, 16 }
 0x1ed   : > { %p9753_p1 = scmp.ne.s32.totalorder %s12081_s7, %s9752_s17  ;;  %p9759_p6 = scmp.lt.u32.totalorder %s9752_s17, %s12081_s7 }
 0x1ef   : > { %p9755_p4 = pnand %p9753_p1, %p10255_p2 }
 0x1f1   : > { %p9756_p5 = pneg %p9755_p4 }
 0x1f3   : > { %p9761_p7 = pnand %p9759_p6, %p9756_p5 }
 0x1f5   : > { %9764 = shalt.err (!%p9761_p7)
}
 0x1f6   : > { %s9765_s8 = scalar_lea.vmem %s980_s15, 16  ;;  %s9772_s6 = scalar_lea.vmem %s980_s15, 32 }
 0x1f7   : > { %p9766_p3 = scmp.ne.s32.totalorder %s980_s15, %s9765_s8  ;;  %p9773_p12 = scmp.lt.s32.totalorder %s980_s15, %s980_s15 }
 0x1f8   : > { %p9774_p9 = scmp.lt.s32.totalorder %s9772_s6, %s9765_s8 }
 0x1f9   : > { %p9768_p8 = pnand %p9766_p3, %p10255_p2 }
 0x1fa   : > { %p9775_p11 = por %p9774_p9, %p9773_p12 }
 0x1fb   : > { %p9769_p10 = pneg %p9768_p8 }
 0x1fd   : > { %p9776_p13 = pnand %p9775_p11, %p9769_p10 }
 0x1ff   : > { %9779 = shalt.err (!%p9776_p13)
}
 0x200   : > { %8807 = dma.hbm_to_vmem [thread:$0]  (!%p10247_p0), %s12081_s7, 16, %s980_s15, [#allocation32]  }
 0x201   : > { %s9780_s0 = scalar_lea.hbm %s10147_s14, 16 }
 0x202   : > { %p9781_p1 = scmp.ne.s32.totalorder %s10147_s14, %s9780_s0  ;;  %p9787_p6 = scmp.lt.u32.totalorder %s9780_s0, %s10147_s14 }
 0x204   : > { %p9783_p4 = pnand %p9781_p1, %p10255_p2 }
 0x206   : > { %p9784_p5 = pneg %p9783_p4 }
 0x208   : > { %p9789_p7 = pnand %p9787_p6, %p9784_p5 }
 0x20a   : > { %9792 = shalt.err (!%p9789_p7)
}
 0x20b   : > { %s9793_s11 = scalar_lea.vmem %s10497_s1, 16  ;;  %s9800_s26 = scalar_lea.vmem %s10497_s1, 32 }
 0x20c   : > { %p9794_p3 = scmp.ne.s32.totalorder %s10497_s1, %s9793_s11  ;;  %p9801_p12 = scmp.lt.s32.totalorder %s10497_s1, %s10497_s1 }
 0x20d   : > { %p9802_p9 = scmp.lt.s32.totalorder %s9800_s26, %s9793_s11 }
 0x20e   : > { %p9796_p8 = pnand %p9794_p3, %p10255_p2 }
 0x20f   : > { %p9803_p11 = por %p9802_p9, %p9801_p12 }
 0x210   : > { %p9797_p10 = pneg %p9796_p8 }
 0x212   : > { %p9804_p13 = pnand %p9803_p11, %p9797_p10 }
 0x214   : > { %9807 = shalt.err (!%p9804_p13)
}
 0x215   : > { %8813 = dma.hbm_to_vmem [thread:$0]  (!%p10247_p0), %s10147_s14, 16, %s10497_s1, [#allocation35]  }
 0x216   : > { %p12082_p1 = scmp.ne.s32.totalorder %s12072_s23, 0 }
 0x217   : > { %p12083_p4 = scmp.ne.s32.totalorder (!%p12082_p1), %s12073_s2, 0 }
 0x218   : > { %1048 = sbr.rel (%p12082_p1) target bundleno = 6242 (0x1862), region = 140 }
 0x21f   : > { %9869 = dma.done.wait (%p12083_p4), [#allocation8], 16  }
 0x220   : > { %9871 = vsyncadd (%p12083_p4), [#allocation8], 4294967280 }
 0x221   : > { %9873 = dma.done.wait (%p12083_p4), [#allocation11], 32  }
 0x222   : > { %9875 = vsyncadd (%p12083_p4), [#allocation11], 4294967264 }
 0x223   : > { %9877 = dma.done.wait (%p12083_p4), [#allocation14], 32  }
 0x224   : > { %9879 = vsyncadd (%p12083_p4), [#allocation14], 4294967264 }
 0x225   : > { %9881 = dma.done.wait (%p12083_p4), [#allocation17], 1024  }
 0x226   : > { %9883 = vsyncadd (%p12083_p4), [#allocation17], 4294966272 }
 0x227   : > { %9885 = dma.done.wait (%p12083_p4), [#allocation20], 32  }
 0x228   : > { %9887 = vsyncadd (%p12083_p4), [#allocation20], 4294967264 }
 0x229   : > { %9889 = dma.done.wait (%p12083_p4), [#allocation23], 528  }
 0x22a   : > { %9891 = vsyncadd (%p12083_p4), [#allocation23], 4294966768 }
 0x22b   : > { %9893 = dma.done.wait (%p12083_p4), [#allocation26], 1024  }
 0x22c   : > { %9895 = vsyncadd (%p12083_p4), [#allocation26], 4294966272 }
 0x22d   : > { %9897 = dma.done.wait (%p12083_p4), [#allocation29], 528  }
 0x22e   : > { %9899 = vsyncadd (%p12083_p4), [#allocation29], 4294966768 }
 0x22f   : > { %9901 = dma.done.wait (%p12083_p4), [#allocation32], 32  }
 0x230   : > { %9903 = vsyncadd (%p12083_p4), [#allocation32], 4294967264 }
 0x231   : > { %9905 = dma.done.wait (%p12083_p4), [#allocation35], 48  }
 0x232   : > { %9907 = vsyncadd (%p12083_p4), [#allocation35], 4294967248  ;;  %s12084_s4 = sld [smem:[#allocation49_spill]]  ;;  %s12085_s23 = sld [smem:[#allocation50_spill]] }
 0x233   : > { %s12026_s10 = sand.u32 1, %s9918_s16   ;;  %p1203_p0 = scmp.lt.s32.totalorder %s9930_s22, 1 }
 0x234   : > { %s6979_s15 = sshll.u32 %s12026_s10, 5  ;;  %s12086_s2 = sld [smem:[#allocation71_spill]] }
 0x235   : > { %s1204_s1 = scalar_select %p1203_p0, %s9930_s22, 1 }
 0x236   : > { %s10578_s11 = scalar_lea.vmem [#allocation37], %s6979_s15 }
 0x237   : > { %s7247_s17 = sshll.u32 %s1204_s1, 6  ;;  %s7248_s8 = sshll.u32 %s1204_s1, 4 }
 0x238   : > { %s10573_s6 = scalar_lea.vmem %s12084_s4, %s7247_s17  ;;  %s10576_s0 = scalar_lea.vmem %s12085_s23, %s7248_s8 }
 0x23a   : > { %p6984_p2 = scmp.ne.s32.totalorder %s12086_s2, 0 }
 0x23b   : > { %v1227_v0 = vlaneseq (!%p6984_p2)  ;;  %v10582_v1 = vld [vmem:[%s10573_s6] sm:$0xff] (!%p6984_p2)  ;;  %v10585_v2 = vld [vmem:[%s10573_s6 + $0x8] sm:$0xff] (!%p6984_p2)  ;;  %v9995_v3 = vmov (!%p6984_p2), 0.0|0.0   ;;  %v10590_v4 = vld [vmem:[%s10573_s6 + $0x10] sm:$0xff] (!%p6984_p2)  ;;  %vm9996_vm0 = vmmov (!%p6984_p2), 0   ;;  %v9997_v7 = vmov (!%p6984_p2), 0.0  }
 0x23c   : > { %1218 = sbr.rel (%p6984_p2) target bundleno = 2243 (0x8c3), region = 220  ;;  %8289 = vmatprep.subr.bf16.mxu0 (!%p6984_p2), %v9995_v3  ;;  %8277 = vmatprep.subr.bf16.mxu1 (!%p6984_p2), %v9995_v3  ;;  %v10597_v8 = vld [vmem:[%s10573_s6 + $0x18] sm:$0xff] (!%p6984_p2)  ;;  %vm1281_vm1 = vcmask (!%p6984_p2), 523264   ;;  %v10638_v24 = vld [vmem:[%s10573_s6 + $0x20] sm:$0xff] (!%p6984_p2)  ;;  %v10654_v29 = vld [vmem:[%s10573_s6 + $0x28] sm:$0xff] (!%p6984_p2)  ;;  %s12099_s26 = sld [smem:[#allocation52_spill]] (!%p6984_p2) }
 0x23d   : > { %v10592_v5 = vshrl.u32 (!%p6984_p2), %v1227_v0, 7  ;;  %v1237_v6 = vand.u32 (!%p6984_p2), 127, %v1227_v0  ;;  %7644 = vmatprep.mubr.msk.f32.mxu0 (!%p6984_p2), %vm9996_vm0, %v9997_v7  ;;  %7625 = vmatprep.mubr.msk.f32.mxu1 (!%p6984_p2), %vm9996_vm0, %v9997_v7  ;;  %v1282_v9 = vsel (!%p6984_p2), %vm1281_vm1, %v10582_v1, 0.0  ;;  %v1283_v10 = vsel (!%p6984_p2), %vm1281_vm1, %v10585_v2, 0.0  ;;  %v10699_v40 = vld [vmem:[%s10573_s6 + $0x30] sm:$0xff] (!%p6984_p2)  ;;  %v10744_v54 = vld [vmem:[%s10573_s6 + $0x38] sm:$0xff] (!%p6984_p2) }
 0x23e   : > { %v1285_v14 = vsel (!%p6984_p2), %vm1281_vm1, %v10590_v4, 0.0  ;;  %v1287_v18 = vsel (!%p6984_p2), %vm1281_vm1, %v10597_v8, 0.0  ;;  %v1284_v25 = vadd.f32 (!%p6984_p2), %v1283_v10, %v1282_v9  ;;  %v9998_v32 = vmov (!%p6984_p2), 1.0|1.0   ;;  %s12101_s23 = sld [smem:[#allocation56_spill]] (!%p6984_p2)  ;;  %s9999_s15 = smov (!%p6984_p2), 96  }
 0x23f   : > { %v1229_v11 = vadd.s32 (!%p6984_p2), 8, %v10592_v5  ;;  %v10606_v12 = vmul.u32 (!%p6984_p2), 2, %v1237_v6  ;;  %v1247_v13 = vadd.s32 (!%p6984_p2), 1, %v1237_v6  ;;  %v1230_v15 = vadd.s32 (!%p6984_p2), 16, %v10592_v5 }
 0x240   : > { %v1231_v16 = vadd.s32 (!%p6984_p2), 24, %v10592_v5  ;;  %v1232_v17 = vadd.s32 (!%p6984_p2), 32, %v10592_v5  ;;  %v1233_v20 = vadd.s32 (!%p6984_p2), 40, %v10592_v5  ;;  %v1234_v21 = vadd.s32 (!%p6984_p2), 48, %v10592_v5 }
 0x241   : > { %vm1239_vm2 = vcmp.ge.s32.totalorder (!%p6984_p2), %v10592_v5, %v10606_v12  ;;  %v10617_v19 = vmul.u32 (!%p6984_p2), 2, %v1247_v13  ;;  %vm1240_vm3 = vcmp.ge.s32.totalorder (!%p6984_p2), %v1229_v11, %v10606_v12  ;;  %v10623_v22 = vadd.s32 (!%p6984_p2), 56, %v10592_v5 }
 0x242   : > { %vm1241_vm7 = vcmp.ge.s32.totalorder (!%p6984_p2), %v1230_v15, %v10606_v12  ;;  %vm1242_vm8 = vcmp.ge.s32.totalorder (!%p6984_p2), %v1231_v16, %v10606_v12  ;;  %vm1243_vm10 = vcmp.ge.s32.totalorder (!%p6984_p2), %v1232_v17, %v10606_v12  ;;  %vm1244_vm13 = vcmp.ge.s32.totalorder (!%p6984_p2), %v1233_v20, %v10606_v12  ;;  %s12100_s4 = smov (!%p6984_p2), %s12099_s26 }
 0x243   : > { %vm1249_vm4 = vcmp.lt.s32.totalorder %v10592_v5, %v10617_v19  ;;  %vm1250_vm5 = vcmp.lt.s32.totalorder %v1229_v11, %v10617_v19  ;;  %vm1251_vm9 = vcmp.lt.s32.totalorder %v1230_v15, %v10617_v19  ;;  %vm1252_vm12 = vcmp.lt.s32.totalorder %v1231_v16, %v10617_v19 }
 0x244   : > { %vm1257_vm6 = vmand %vm1239_vm2, %vm1249_vm4  ;;  %vm1253_vm15 = vcmp.lt.s32.totalorder %v1232_v17, %v10617_v19  ;;  %vm1254_vm2 = vcmp.lt.s32.totalorder %v1233_v20, %v10617_v19  ;;  %vm1245_vm4 = vcmp.ge.s32.totalorder %v1234_v21, %v10606_v12  ;;  %v1286_v35 = vadd.f32 %v1285_v14, %v1284_v25  ;;  %s12102_s1 = smov %s12101_s23 }
 0x245   : > { %vm1258_vm11 = vmand %vm1240_vm3, %vm1250_vm5  ;;  %v10633_v23 = vsel %vm1257_vm6, 1.0, %v9997_v7  ;;  %vm1246_vm5 = vcmp.ge.s32.totalorder %v10623_v22, %v10606_v12  ;;  %v1289_v44 = vsel %vm1281_vm1, %v10638_v24, 0.0  ;;  %v1291_v48 = vsel %vm1281_vm1, %v10654_v29, 0.0 }
 0x246   : > { %v10641_v26 = vsel %vm1258_vm11, 1.0, %v9997_v7  ;;  %v10645_v27 = vsub.f32 %v10633_v23, %v10633_v23  ;;  %vm10647_vm14 = vmpackc.low %vm1258_vm11, %vm1257_vm6  ;;  %vm1255_vm11 = vcmp.lt.s32.totalorder %v1234_v21, %v10617_v19  ;;  %v1288_v43 = vadd.f32 %v1287_v18, %v1286_v35 }
 0x247   : > { %v10658_v30 = vsub.f32 %v10641_v26, %v10641_v26  ;;  %v10662_v31 = vpack.c.bf16 %v10641_v26, %v10633_v23  ;;  %8279 = vmatpush3.bf16.msk.msra.mxu1 %vm10647_vm14, %v9998_v32  ;;  %vm1259_vm3 = vmand %vm1241_vm7, %vm1251_vm9  ;;  %v1293_v59 = vsel %vm1281_vm1, %v10699_v40, 0.0  ;;  %v1295_v18 = vsel %vm1281_vm1, %v10744_v54, 0.0 }
 0x248   : > { %v1421_v33 = vand.u32 4294901760, %v10645_v27  ;;  %vm1260_vm6 = vmand %vm1242_vm8, %vm1252_vm12  ;;  %v10680_v34 = vsel %vm1259_vm3, 1.0, %v9997_v7  ;;  %8280 = vmatprep.subr.bf16.mxu1 %v9995_v3  ;;  %vm1256_vm8 = vcmp.lt.s32.totalorder %v10623_v22, %v10617_v19  ;;  %v1290_v63 = vadd.f32 %v1289_v44, %v1288_v43 }
 0x249   : > { %v1428_v36 = vand.u32 4294901760, %v10658_v30  ;;  %v10686_v37 = vsel %vm1260_vm6, 1.0, %v9997_v7  ;;  %v10690_v38 = vsub.f32 %v10680_v34, %v10680_v34  ;;  %vm10692_vm7 = vmpackc.low %vm1260_vm6, %vm1259_vm3  ;;  %v1304_v43 = vmul.f32 %v10585_v2, %v10585_v2 }
 0x24a   : > { %v1422_v41 = vsub.f32 %v10645_v27, %v1421_v33  ;;  %v10706_v42 = vsub.f32 %v10686_v37, %v10686_v37  ;;  %vm1261_vm9 = vmand %vm1243_vm10, %vm1253_vm15  ;;  %v1292_v17 = vadd.f32 %v1291_v48, %v1290_v63  ;;  %v1305_v48 = vmul.f32 %v10590_v4, %v10590_v4 }
 0x24b   : > { %v1429_v45 = vsub.f32 %v10658_v30, %v1428_v36  ;;  %v1435_v46 = vand.u32 4294901760, %v10690_v38  ;;  %8282 = vmatpush3.bf16.msk.msra.mxu1 %vm10692_vm7, %v9998_v32  ;;  %vm1262_vm12 = vmand %vm1244_vm13, %vm1254_vm2  ;;  %v10726_v47 = vsel %vm1261_vm9, 1.0, %v9997_v7  ;;  %v1306_v2 = vmul.f32 %v10597_v8, %v10597_v8 }
 0x24c   : > { %v1423_v49 = vand.u32 4294901760, %v1422_v41  ;;  %v1442_v50 = vand.u32 4294901760, %v10706_v42  ;;  %v10732_v51 = vsel %vm1262_vm12, 1.0, %v9997_v7  ;;  %v10736_v52 = vsub.f32 %v10726_v47, %v10726_v47  ;;  %8283 = vmatprep.subr.bf16.mxu1 %v9995_v3  ;;  %vm10739_vm10 = vmpackc.low %vm1262_vm12, %vm1261_vm9 }
 0x24d   : > { %v1430_v55 = vand.u32 4294901760, %v1429_v45  ;;  %v1436_v56 = vsub.f32 %v10690_v38, %v1435_v46  ;;  %v10751_v57 = vsub.f32 %v10732_v51, %v10732_v51  ;;  %vm10757_vm13 = vmand %vm1245_vm4, %vm1255_vm11  ;;  %v1294_v35 = vadd.f32 %v1293_v59, %v1292_v17 }
 0x24e   : > { %v1443_v60 = vsub.f32 %v10706_v42, %v1442_v50  ;;  %v1449_v61 = vand.u32 4294901760, %v10736_v52  ;;  %vm1264_vm15 = vmand %vm1246_vm5, %vm1256_vm8  ;;  %v10776_v62 = vsel %vm10757_vm13, 1.0, %v9997_v7  ;;  %v1303_v41 = vmul.f32 %v10582_v1, %v10582_v1 }
 0x24f   : > { %v10778_v0 = vpack.c.bf16 %v1430_v55, %v1423_v49  ;;  %v1437_v6 = vand.u32 4294901760, %v1436_v56  ;;  %v1456_v9 = vand.u32 4294901760, %v10751_v57  ;;  %8285 = vmatpush3.bf16.msk.msra.mxu1 %vm10739_vm10, %v9998_v32  ;;  %v10785_v10 = vsel %vm1264_vm15, 1.0, %v9997_v7  ;;  %vm10801_vm2 = vmpackc.low %vm1264_vm15, %vm10757_vm13 }
 0x250   : > { %v1444_v11 = vand.u32 4294901760, %v1443_v60  ;;  %v1450_v12 = vsub.f32 %v10736_v52, %v1449_v61  ;;  %v10792_v13 = vsub.f32 %v10776_v62, %v10776_v62  ;;  %v10796_v14 = vsub.f32 %v10785_v10, %v10785_v10  ;;  %8286 = vmatprep.subr.bf16.mxu1 %v9995_v3 }
 0x251   : > { %8291 = vmatpush3.bf16.msra.mxu0 %v10778_v0  ;;  %v1457_v16 = vsub.f32 %v10751_v57, %v1456_v9  ;;  %v1296_v1 = vadd.f32 %v1295_v18, %v1294_v35  ;;  %v1307_v59 = vmul.f32 %v10638_v24, %v10638_v24  ;;  %v1311_v4 = vsel %vm1281_vm1, %v1303_v41, 0.0 }
 0x252   : > { %8292 = vmatprep.subr.bf16.mxu0 %v9995_v3  ;;  %v10812_v19 = vpack.c.bf16 %v1444_v11, %v1437_v6  ;;  %v1451_v20 = vand.u32 4294901760, %v1450_v12  ;;  %v1463_v21 = vand.u32 4294901760, %v10792_v13  ;;  %v1470_v22 = vand.u32 4294901760, %v10796_v14 }
 0x253   : > { %v1458_v25 = vand.u32 4294901760, %v1457_v16  ;;  %8288 = vmatpush3.bf16.msk.msra.mxu1 %vm10801_vm2, %v9998_v32  ;;  %v1297_v58 = vrot.slane %v1296_v1, 4  ;;  %v1312_v60 = vsel %vm1281_vm1, %v1304_v43, 0.0  ;;  %v1314_v6 = vsel %vm1281_vm1, %v1305_v48, 0.0 }
 0x254   : > { %v1464_v44 = vsub.f32 %v10792_v13, %v1463_v21  ;;  %v1471_v45 = vsub.f32 %v10796_v14, %v1470_v22  ;;  %8349 = vmatprep.subr.bf16.mxu1 %v9995_v3  ;;  %v1313_v63 = vadd.f32 %v1312_v60, %v1311_v4  ;;  %v1308_v12 = vmul.f32 %v10654_v29, %v10654_v29 }
 0x255   : > { %8294 = vmatpush3.bf16.msra.mxu0 %v10812_v19  ;;  %v10833_v49 = vpack.c.bf16 %v1458_v25, %v1451_v20  ;;  %v1298_v8 = vadd.f32 %v1297_v58, %v1296_v1  ;;  %v1316_v16 = vsel %vm1281_vm1, %v1306_v2, 0.0  ;;  %v1309_v20 = vmul.f32 %v10699_v40, %v10699_v40 }
 0x256   : > { %8295 = vmatprep.subr.bf16.mxu0 %v9995_v3  ;;  %v1465_v55 = vand.u32 4294901760, %v1464_v44  ;;  %v1472_v56 = vand.u32 4294901760, %v1471_v45  ;;  %v1315_v17 = vadd.f32 %v1314_v6, %v1313_v63  ;;  %v1318_v25 = vsel %vm1281_vm1, %v1307_v59, 0.0 }
 0x257   : > { %v1299_v18 = vrot.slane %v1298_v8, 2  ;;  %v1310_v43 = vmul.f32 %v10744_v54, %v10744_v54  ;;  %v1320_v44 = vsel %vm1281_vm1, %v1308_v12, 0.0  ;;  %v1322_v1 = vsel %vm1281_vm1, %v1309_v20, 0.0 }
 0x258   : > { %v10844_v11 = vpack.c.bf16 %v1472_v56, %v1465_v55  ;;  %v1317_v35 = vadd.f32 %v1316_v16, %v1315_v17  ;;  %v10863_v4 = vpack.c.bf16 %v10658_v30, %v10645_v27  ;;  %v10872_v12 = vpack.c.bf16 %v10706_v42, %v10690_v38 }
 0x259   : > { %8297 = vmatpush3.bf16.msra.mxu0 %v10833_v49  ;;  %v1300_v41 = vadd.f32 %v1299_v18, %v1298_v8  ;;  %v1324_v56 = vsel %vm1281_vm1, %v1310_v43, 0.0  ;;  %v8332_v27 = vpack.c.bf16 %v1456_v9, %v1449_v61  ;;  %v8335_v30 = vpack.c.bf16 %v1470_v22, %v1463_v21 }
 0x25a   : > { %8298 = vmatprep.subr.bf16.mxu0 %v9995_v3  ;;  %v1319_v45 = vadd.f32 %v1318_v25, %v1317_v35  ;;  %v10880_v25 = vpack.c.bf16 %v10751_v57, %v10736_v52  ;;  %vm2418_vm3 = vcmask 261120   ;;  %v11052_v28 = vpack.c.bf16 %v10686_v37, %v10680_v34 }
 0x25b   : > { %v1301_v48 = vrot.slane %v1300_v41, 1  ;;  %vm11038_vm4 = vmpackc.low %vm2418_vm3, %vm2418_vm3  ;;  %v2423_v38 = vsel %vm2418_vm3, %v10633_v23, 0  ;;  %v2426_v39 = vsel %vm2418_vm3, %v10641_v26, 0 }
 0x25c   : > { %v1321_v2 = vadd.f32 %v1320_v44, %v1319_v45  ;;  %v10889_v44 = vpack.c.bf16 %v10796_v14, %v10792_v13  ;;  %v11105_v42 = vsub.f32 %v2423_v38, %v2423_v38 }
 0x25d   : > { %8300 = vmatpush3.bf16.msra.mxu0 %v10844_v11  ;;  %v1302_v55 = vadd.f32 %v1301_v48, %v1300_v41 }
 0x25e   : > { %8301 = vmatprep.subr.bf16.mxu0 %v9995_v3  ;;  %v1323_v58 = vadd.f32 %v1322_v1, %v1321_v2 }
 0x25f   : > { %v1333_v59 = vsel %vm1281_vm1, %v1302_v55, 0 }
 0x260   : > { %v10865_v60 = vand.u32 4294901760, %v1333_v59  ;;  %v1325_v63 = vadd.f32 %v1324_v56, %v1323_v58 }
 0x262   : > { %7645 = vmatmul.mubr.f32.vlgmr.msra.gmra.mrb[0].mxu0 %v10865_v60  ;;  %v1409_v6 = vsub.f32 %v1333_v59, %v10865_v60  ;;  %v1326_v8 = vrot.slane %v1325_v63, 4 }
 0x263   : > { %8303 = vmatpush3.bf16.msra.mxu0 %v10863_v4  ;;  %7663 = vmatprep.mubr.msk.f32.mxu0 %vm9996_vm0, %v9997_v7 }
 0x264   : > { %v1410_v16 = vand.u32 4294901760, %v1409_v6  ;;  %8304 = vmatprep.subr.bf16.mxu0 %v9995_v3  ;;  %v1327_v17 = vadd.f32 %v1326_v8, %v1325_v63 }
 0x266   : > { %v1411_v18 = vsub.f32 %v1409_v6, %v1410_v16  ;;  %v1328_v20 = vrot.slane %v1327_v17, 2 }
 0x267   : > { %8306 = vmatpush3.bf16.msra.mxu0 %v10872_v12 }
 0x268   : > { %v1412_v35 = vand.u32 4294901760, %v1411_v18  ;;  %8307 = vmatprep.subr.bf16.mxu0 %v9995_v3  ;;  %v1329_v41 = vadd.f32 %v1328_v20, %v1327_v17  ;;  %v2438_v17 = vsel %vm2418_vm3, %v10732_v51, 0 }
 0x26a   : > { %7626 = vmatmul.mubr.f32.vlgmr.msra.gmra.mrb[0].mxu1 %v1412_v35  ;;  %v1330_v43 = vrot.slane %v1329_v41, 1 }
 0x26b   : > { %8351 = vmatpush3.bf16.msk.msra.mxu1 %vm10647_vm14, %v9998_v32  ;;  %8309 = vmatpush3.bf16.msra.mxu0 %v10880_v25 }
 0x26c   : > { %8352 = vmatprep.subr.bf16.mxu1 %v9995_v3  ;;  %8310 = vmatprep.subr.bf16.mxu0 %v9995_v3  ;;  %v1331_v45 = vadd.f32 %v1330_v43, %v1329_v41  ;;  %v11155_v41 = vsub.f32 %v2438_v17, %v2438_v17 }
 0x26d   : > { %7739 = vmatprep.mubr.msk.f32.mxu1 %vm9996_vm0, %v9997_v7 }
 0x26e   : > { %v1874_v48 = vsel %vm1281_vm1, %v1331_v45, 0  ;;  %v2567_v45 = vand.u32 4294901760, %v11155_v41 }
 0x26f   : > { %8354 = vmatpush3.bf16.msk.msra.mxu1 %vm10692_vm7, %v9998_v32  ;;  %8312 = vmatpush3.bf16.msra.mxu0 %v10889_v44  ;;  %v10900_v1 = vand.u32 4294901760, %v1874_v48 }
 0x270   : > { %8355 = vmatprep.subr.bf16.mxu1 %v9995_v3  ;;  %8313 = vmatprep.subr.bf16.mxu0 %v9995_v3 }
 0x271   : > { %v10905_v2 = vsub.f32 %v1874_v48, %v10900_v1  ;;  %v2441_v48 = vsel %vm2418_vm3, %v10776_v62, 0 }
 0x272   : > { %7664 = vmatmul.mubr.f32.vlgmr.msra.gmra.mrb[0].mxu0 %v1409_v6 }
 0x273   : > { %8357 = vmatpush3.bf16.msk.msra.mxu1 %vm10739_vm10, %v9998_v32  ;;  %8315 = vmatpush3.bf16.msk.msra.mxu0 %vm10647_vm14, %v9998_v32  ;;  %v1951_v55 = vand.u32 4294901760, %v10905_v2 }
 0x274   : > { %8358 = vmatprep.subr.bf16.mxu1 %v9995_v3  ;;  %8316 = vmatprep.subr.bf16.mxu0 %v9995_v3 }
 0x275   : > { %v1952_v56 = vsub.f32 %v10905_v2, %v1951_v55  ;;  %7682 = vmatprep.mubr.msk.f32.mxu0 %vm9996_vm0, %v9997_v7 }
 0x277   : > { %8360 = vmatpush3.bf16.msk.msra.mxu1 %vm10801_vm2, %v9998_v32  ;;  %v1953_v58 = vand.u32 4294901760, %v1952_v56  ;;  %8318 = vmatpush3.bf16.msk.msra.mxu0 %vm10692_vm7, %v9998_v32  ;;  %v2568_v56 = vsub.f32 %v11155_v41, %v2567_v45 }
 0x278   : > { %8361 = vmatprep.subr.bf16.mxu1 %v9995_v3  ;;  %8319 = vmatprep.subr.bf16.mxu0 %v9995_v3 }
 0x27a   : > { %7740 = vmatmul.mubr.f32.vlgmr.msra.gmra.mrb[2].mxu1 %v1953_v58  ;;  %v11173_v58 = vsub.f32 %v2441_v48, %v2441_v48  ;;  %v9071_v48 = vld [vmem:[%s10573_s6 + $0x18] sm:$0xff] }
 0x27b   : > { %8363 = vmatpush3.bf16.msra.mxu1 %v10778_v0  ;;  %8321 = vmatpush3.bf16.msk.msra.mxu0 %vm10739_vm10, %v9998_v32  ;;  %v8326_v0 = vpack.c.bf16 %v1428_v36, %v1421_v33  ;;  %v11069_v36 = vpack.c.bf16 %v10732_v51, %v10726_v47  ;;  %v9033_v33 = vld [vmem:[%s12100_s4 + $0x18] sm:$0xff]  }
 0x27c   : > { %8364 = vmatprep.subr.bf16.mxu1 %v9995_v3  ;;  %8322 = vmatprep.subr.bf16.mxu0 %v9995_v3 }
 0x27d   : > { %7758 = vmatprep.mubr.msk.f32.mxu1 %vm9996_vm0, %v9997_v7 }
 0x27f   : > { %8366 = vmatpush3.bf16.msra.mxu1 %v10812_v19  ;;  %8324 = vmatpush3.bf16.msk.msra.mxu0 %vm10801_vm2, %v9998_v32  ;;  %v8329_v19 = vpack.c.bf16 %v1442_v50, %v1435_v46  ;;  %v11107_v46 = vsub.f32 %v2426_v39, %v2426_v39  ;;  %v2532_v50 = vand.u32 4294901760, %v11105_v42 }
 0x280   : > { %8367 = vmatprep.subr.bf16.mxu1 %v9995_v3  ;;  %8325 = vmatprep.subr.bf16.mxu0 %v9995_v3 }
 0x281   : > { %v2539_v52 = vand.u32 4294901760, %v11107_v46  ;;  %v2533_v53 = vsub.f32 %v11105_v42, %v2532_v50  ;;  %v11121_v26 = vpack.c.bf16 %v11107_v46, %v11105_v42 }
 0x282   : > { %7683 = vmatmul.mubr.f32.vlgmr.msra.gmra.mrb[0].mxu0 %v1410_v16 }
 0x283   : > { %8369 = vmatpush3.bf16.msra.mxu1 %v10833_v49  ;;  %8327 = vmatpush3.bf16.msra.mxu0 %v8326_v0  ;;  %v2540_v57 = vsub.f32 %v11107_v46, %v2539_v52  ;;  %v2534_v23 = vand.u32 4294901760, %v2533_v53  ;;  %v2429_v49 = vsel %vm2418_vm3, %v10680_v34, 0 }
 0x284   : > { %8370 = vmatprep.subr.bf16.mxu1 %v9995_v3  ;;  %8328 = vmatprep.subr.bf16.mxu0 %v9995_v3 }
 0x285   : > { %7701 = vmatprep.mubr.msk.f32.mxu0 %vm9996_vm0, %v9997_v7  ;;  %v2541_v61 = vand.u32 4294901760, %v2540_v57 }
 0x287   : > { %8372 = vmatpush3.bf16.msra.mxu1 %v10844_v11  ;;  %8330 = vmatpush3.bf16.msra.mxu0 %v8329_v19  ;;  %v11117_v9 = vpack.c.bf16 %v2541_v61, %v2534_v23  ;;  %v2432_v11 = vsel %vm2418_vm3, %v10686_v37, 0  ;;  %v2435_v37 = vsel %vm2418_vm3, %v10726_v47, 0 }
 0x288   : > { %8373 = vmatprep.subr.bf16.mxu1 %v9995_v3  ;;  %8331 = vmatprep.subr.bf16.mxu0 %v9995_v3  ;;  %v11153_v35 = vsub.f32 %v2435_v37, %v2435_v37 }
 0x28a   : > { %7759 = vmatmul.mubr.f32.vlgmr.msra.gmra.mrb[2].mxu1 %v10900_v1  ;;  %v8456_v17 = vpack.c.bf16 %v11155_v41, %v11153_v35 }
 0x28b   : > { %8375 = vmatpush3.bf16.msra.mxu1 %v10863_v4  ;;  %8333 = vmatpush3.bf16.msra.mxu0 %v8332_v27  ;;  %v11127_v4 = vsub.f32 %v2429_v49, %v2429_v49 }
 0x28c   : > { %8376 = vmatprep.subr.bf16.mxu1 %v9995_v3  ;;  %8334 = vmatprep.subr.bf16.mxu0 %v9995_v3 }
 0x28d   : > { %7777 = vmatprep.mubr.msk.f32.mxu1 %vm9996_vm0, %v9997_v7 }
 0x28f   : > { %8378 = vmatpush3.bf16.msra.mxu1 %v10872_v12  ;;  %8336 = vmatpush3.bf16.msra.mxu0 %v8335_v30  ;;  %v2546_v12 = vand.u32 4294901760, %v11127_v4 }
 0x290   : > { %8379 = vmatprep.subr.bf16.mxu1 %v9995_v3  ;;  %8337 = vmatprep.subr.bf16.mxu0 %v9995_v3 }
 0x291   : > { %v2547_v20 = vsub.f32 %v11127_v4, %v2546_v12 }
 0x292   : > { %7702 = vmatmul.mubr.f32.vlgmr.msra.gmra.mrb[0].mxu0 %v10865_v60 }
 0x293   : > { %8381 = vmatpush3.bf16.msra.mxu1 %v10880_v25  ;;  %8339 = vmatpush3.bf16.msk.msra.mxu0 %vm10647_vm14, %v9998_v32  ;;  %v2548_v43 = vand.u32 4294901760, %v2547_v20 }
 0x294   : > { %8382 = vmatprep.subr.bf16.mxu1 %v9995_v3  ;;  %8340 = vmatprep.subr.bf16.mxu0 %v9995_v3 }
 0x295   : > { %7720 = vmatprep.mubr.msk.f32.mxu0 %vm9996_vm0, %v9997_v7 }
 0x297   : > { %8384 = vmatpush3.bf16.msra.mxu1 %v10889_v44  ;;  %8342 = vmatpush3.bf16.msk.msra.mxu0 %vm10692_vm7, %v9998_v32  ;;  %v2560_v44 = vand.u32 4294901760, %v11153_v35 }
 0x298   : > { %8385 = vmatprep.subr.bf16.mxu1 %v9995_v3  ;;  %8343 = vmatprep.subr.bf16.mxu0 %v9995_v3 }
 0x299   : > { %v8484_v46 = vpack.c.bf16 %v2567_v45, %v2560_v44 }
 0x29a   : > { %7778 = vmatmul.mubr.f32.vlgmr.msra.gmra.mrb[2].mxu1 %v10905_v2 }
 0x29b   : > { %8387 = vmatpush3.bf16.msk.msra.mxu1 %vm10647_vm14, %v9998_v32  ;;  %8345 = vmatpush3.bf16.msk.msra.mxu0 %vm10739_vm10, %v9998_v32 }
 0x29c   : > { %8388 = vmatprep.subr.bf16.mxu1 %v9995_v3  ;;  %8346 = vmatprep.subr.bf16.mxu0 %v9995_v3 }
 0x29d   : > { %7796 = vmatprep.mubr.msk.f32.mxu1 %vm9996_vm0, %v9997_v7 }
 0x29f   : > { %8390 = vmatpush3.bf16.msk.msra.mxu1 %vm10692_vm7, %v9998_v32  ;;  %8348 = vmatpush3.bf16.msk.msra.mxu0 %vm10801_vm2, %v9998_v32 }
 0x2a0   : > { %8391 = vmatprep.subr.bf16.mxu1 %v9995_v3  ;;  %8421 = vmatprep.subr.bf16.mxu0 %v9995_v3 }
 0x2a2   : > { %7721 = vmatmul.mubr.f32.vlgmr.msra.gmra.mrb[0].mxu0 %v10865_v60  ;;  %v11129_v60 = vsub.f32 %v2432_v11, %v2432_v11 }
 0x2a3   : > { %8393 = vmatpush3.bf16.msk.msra.mxu1 %vm10739_vm10, %v9998_v32  ;;  %7853 = vmatprep.mubr.msk.f32.mxu0 %vm9996_vm0, %v9997_v7 }
 0x2a4   : > { %8394 = vmatprep.subr.bf16.mxu1 %v9995_v3  ;;  %v2553_v16 = vand.u32 4294901760, %v11129_v60  ;;  %v8453_v49 = vpack.c.bf16 %v11129_v60, %v11127_v4 }
 0x2a6   : > { %v2554_v25 = vsub.f32 %v11129_v60, %v2553_v16  ;;  %v8481_v42 = vpack.c.bf16 %v2553_v16, %v2546_v12  ;;  %v9068_v16 = vld [vmem:[%s10573_s6] sm:$0xff] }
 0x2a7   : > { %8396 = vmatpush3.bf16.msk.msra.mxu1 %vm10801_vm2, %v9998_v32 }
 0x2a8   : > { %8397 = vmatprep.subr.bf16.mxu1 %v9995_v3  ;;  %8424 = vmatpush3.bf16.xpose.msk.msra.mxu0 %vm11038_vm4, %v10662_v31  ;;  %v2555_v51 = vand.u32 4294901760, %v2554_v25 }
 0x2a9   : > { %8425 = vmatprep.subr.bf16.mxu0 %v9995_v3 }
 0x2aa   : > { %7797 = vmatmul.mubr.f32.vlgmr.msra.gmra.mrb[2].mxu1 %v1951_v55  ;;  %v8441_v2 = vpack.c.bf16 %v2555_v51, %v2548_v43  ;;  %v2561_v55 = vsub.f32 %v11153_v35, %v2560_v44  ;;  %v9069_v43 = vld [vmem:[%s10573_s6 + $0x8] sm:$0xff]  ;;  %v9070_v44 = vld [vmem:[%s10573_s6 + $0x10] sm:$0xff] }
 0x2ab   : > { %8399 = vmatpush3.bf16.msra.mxu1 %v8326_v0  ;;  %7815 = vmatprep.mubr.msk.f32.mxu1 %vm9996_vm0, %v9997_v7 }
 0x2ac   : > { %8400 = vmatprep.subr.bf16.mxu1 %v9995_v3 }
 0x2af   : > { %8402 = vmatpush3.bf16.msra.mxu1 %v8329_v19  ;;  %v2562_v19 = vand.u32 4294901760, %v2561_v55 }
 0x2b0   : > { %8403 = vmatprep.subr.bf16.mxu1 %v9995_v3  ;;  %8428 = vmatpush3.bf16.xpose.msk.msra.mxu0 %vm11038_vm4, %v11052_v28 }
 0x2b1   : > { %8429 = vmatprep.subr.bf16.mxu0 %v9995_v3 }
 0x2b3   : > { %8405 = vmatpush3.bf16.msra.mxu1 %v8332_v27  ;;  %v2569_v27 = vand.u32 4294901760, %v2568_v56 }
 0x2b4   : > { %8406 = vmatprep.subr.bf16.mxu1 %v9995_v3 }
 0x2b7   : > { %8408 = vmatpush3.bf16.msra.mxu1 %v8335_v30  ;;  %v8444_v30 = vpack.c.bf16 %v2569_v27, %v2562_v19 }
 0x2b8   : > { %8409 = vmatprep.subr.bf16.mxu1 %v9995_v3  ;;  %8432 = vmatpush3.bf16.xpose.msk.msra.mxu0 %vm11038_vm4, %v11069_v36 }
 0x2b9   : > { %8433 = vmatprep.subr.bf16.mxu0 %v9995_v3 }
 0x2ba   : > { %7816 = vmatmul.mubr.f32.vlgmr.msra.gmra.mrb[2].mxu1 %v10900_v1 }
 0x2bb   : > { %8411 = vmatpush3.bf16.msk.msra.mxu1 %vm10647_vm14, %v9998_v32  ;;  %7834 = vmatprep.mubr.msk.f32.mxu1 %vm9996_vm0, %v9997_v7 }
 0x2bc   : > { %8412 = vmatprep.subr.bf16.mxu1 %v9995_v3 }
 0x2bf   : > { %8414 = vmatpush3.bf16.msk.msra.mxu1 %vm10692_vm7, %v9998_v32 }
 0x2c0   : > { %8415 = vmatprep.subr.bf16.mxu1 %v9995_v3 }
 0x2c3   : > { %8417 = vmatpush3.bf16.msk.msra.mxu1 %vm10739_vm10, %v9998_v32 }
 0x2c4   : > { %8418 = vmatprep.subr.bf16.mxu1 %v9995_v3 }
 0x2c7   : > { %8420 = vmatpush3.bf16.msk.msra.mxu1 %vm10801_vm2, %v9998_v32  ;;  %v11083_v32 = vpack.c.bf16 %v10785_v10, %v10776_v62  ;;  %v2574_v62 = vand.u32 4294901760, %v11173_v58 }
 0x2c8   : > { %8505 = vmatprep.subr.bf16.mxu1 %v9995_v3 }
 0x2c9   : > { %8436 = vmatpush3.bf16.xpose.msk.msra.mxu0 %vm11038_vm4, %v11083_v32  ;;  %v2575_v38 = vsub.f32 %v11173_v58, %v2574_v62 }
 0x2ca   : > { %7835 = vmatmul.mubr.f32.vlgmr.msra.gmra.mrb[2].mxu1 %v10900_v1  ;;  %8437 = vmatprep.subr.bf16.mxu0 %v9995_v3  ;;  %v2444_v1 = vsel %vm2418_vm3, %v10785_v10, 0 }
 0x2cb   : > { %7967 = vmatprep.mubr.msk.f32.mxu1 %vm9996_vm0, %v9997_v7  ;;  %v11175_v0 = vsub.f32 %v2444_v1, %v2444_v1  ;;  %v2576_v53 = vand.u32 4294901760, %v2575_v38 }
 0x2cd   : > { %v2581_v10 = vand.u32 4294901760, %v11175_v0 }
 0x2cf   : > { %v2582_v39 = vsub.f32 %v11175_v0, %v2581_v10 }
 0x2d0   : > { %8508 = vmatpush3.bf16.xpose.msk.msra.mxu1 %vm11038_vm4, %v10662_v31 }
 0x2d1   : > { %8509 = vmatprep.subr.bf16.mxu1 %v9995_v3  ;;  %v2583_v57 = vand.u32 4294901760, %v2582_v39 }
 0x2d3   : > { %v8447_v23 = vpack.c.bf16 %v2583_v57, %v2576_v53 }
 0x2d8   : > { %8512 = vmatpush3.bf16.xpose.msk.msra.mxu1 %vm11038_vm4, %v11052_v28 }
 0x2d9   : > { %8513 = vmatprep.subr.bf16.mxu1 %v9995_v3 }
 0x2e0   : > { %8516 = vmatpush3.bf16.xpose.msk.msra.mxu1 %vm11038_vm4, %v11069_v36 }
 0x2e1   : > { %8517 = vmatprep.subr.bf16.mxu1 %v9995_v3 }
 0x2e8   : > { %8520 = vmatpush3.bf16.xpose.msk.msra.mxu1 %vm11038_vm4, %v11083_v32 }
 0x2e9   : > { %8521 = vmatprep.subr.bf16.mxu1 %v9995_v3 }
 0x33d   : > { %v1414_v13 = vpop.f32.mrb[0].mxu1 }
 0x33e   : > { %v7627_v14 = vpop.f32.mrb[1].mxu1 }
 0x375   : > { %v1868_v15 = vpop.f32.mrb[0].mxu0 }
 0x376   : > { %v8589_v21 = vadd.f32 %v1868_v15, %v1414_v13  ;;  %v7722_v22 = vpop.f32.mrb[1].mxu0 }
 0x378   : > { %v1872_v59 = vmul.f32 0.0078125, %v8589_v21 }
 0x37a   : > { %v2420_v63 = vsel %vm2418_vm3, %v1872_v59, 0  ;;  %v2414_v13 = vmul.f32 %v1872_v59, %v1872_v59 }
 0x37b   : > { %v11132_v6 = vand.u32 4294901760, %v2420_v63 }
 0x37d   : > { %v11135_v8 = vsub.f32 %v2420_v63, %v11132_v6 }
 0x37f   : > { %v2521_v34 = vand.u32 4294901760, %v11135_v8 }
 0x381   : > { %v2522_v18 = vsub.f32 %v11135_v8, %v2521_v34 }
 0x383   : > { %v2523_v47 = vand.u32 4294901760, %v2522_v18 }
 0x385   : > { %7854 = vmatmul.mubr.f32.vlgmr.msra.gmra.mrb[2].mxu0 %v2523_v47  ;;  %v8459_v47 = vpack.c.bf16 %v11175_v0, %v11173_v58 }
 0x386   : > { %8439 = vmatpush3.bf16.xpose.msra.mxu0 %v11117_v9  ;;  %7872 = vmatprep.mubr.msk.f32.mxu0 %vm9996_vm0, %v9997_v7 }
 0x387   : > { %8440 = vmatprep.subr.bf16.mxu0 %v9995_v3 }
 0x38e   : > { %8442 = vmatpush3.bf16.xpose.msra.mxu0 %v8441_v2 }
 0x38f   : > { %8443 = vmatprep.subr.bf16.mxu0 %v9995_v3 }
 0x396   : > { %8445 = vmatpush3.bf16.xpose.msra.mxu0 %v8444_v30 }
 0x397   : > { %8446 = vmatprep.subr.bf16.mxu0 %v9995_v3 }
 0x39d   : > { %v2409_v61 = vpop.f32.mrb[2].mxu1 }
 0x39e   : > { %v2413_v14 = vmul.f32 0.0078125, %v2409_v61  ;;  %v7836_v15 = vpop.f32.mrb[3].mxu1  ;;  %8448 = vmatpush3.bf16.xpose.msra.mxu0 %v8447_v23 }
 0x39f   : > { %8449 = vmatprep.subr.bf16.mxu0 %v9995_v3 }
 0x3a0   : > { %v2415_v21 = vsub.f32 %v2413_v14, %v2414_v13 }
 0x3a2   : > { %v2416_v22 = vadd.f32 1e-06, %v2415_v21 }
 0x3a4   : > { %9050 = vrsqrt.f32 %v2416_v22 }
 0x3a5   : > { %7873 = vmatmul.mubr.f32.vlgmr.msra.gmra.mrb[2].mxu0 %v11132_v6 }
 0x3a6   : > { %8451 = vmatpush3.bf16.xpose.msra.mxu0 %v11121_v26  ;;  %7891 = vmatprep.mubr.msk.f32.mxu0 %vm9996_vm0, %v9997_v7 }
 0x3a7   : > { %8452 = vmatprep.subr.bf16.mxu0 %v9995_v3 }
 0x3ae   : > { %v9051_v11 = vpop.eup %9050  ;;  %8454 = vmatpush3.bf16.xpose.msra.mxu0 %v8453_v49 }
 0x3af   : > { %8455 = vmatprep.subr.bf16.mxu0 %v9995_v3  ;;  %v2984_v59 = vsel %vm2418_vm3, %v9051_v11, 0 }
 0x3b0   : > { %v11197_v63 = vand.u32 4294901760, %v2984_v59 }
 0x3b2   : > { %v11200_v37 = vsub.f32 %v2984_v59, %v11197_v63 }
 0x3b4   : > { %v3061_v18 = vand.u32 4294901760, %v11200_v37 }
 0x3b6   : > { %v3062_v20 = vsub.f32 %v11200_v37, %v3061_v18  ;;  %8457 = vmatpush3.bf16.xpose.msra.mxu0 %v8456_v17 }
 0x3b7   : > { %8458 = vmatprep.subr.bf16.mxu0 %v9995_v3 }
 0x3b8   : > { %v3063_v25 = vand.u32 4294901760, %v3062_v20 }
 0x3ba   : > { %7968 = vmatmul.mubr.f32.vlgmr.msra.gmra.mrb[4].mxu1 %v3063_v25  ;;  %v7091_v25 = vld [vmem:[#allocation12] ss:$0 sm:$0xff] }
 0x3bb   : > { %8523 = vmatpush3.bf16.xpose.msra.mxu1 %v11117_v9  ;;  %7986 = vmatprep.mubr.msk.f32.mxu1 %vm9996_vm0, %v9997_v7  ;;  %v8478_v9 = vpack.c.bf16 %v2539_v52, %v2532_v50  ;;  %v8487_v50 = vpack.c.bf16 %v2581_v10, %v2574_v62  ;;  %v9031_v52 = vld [vmem:[%s12100_s4 + $0x8] sm:$0xff]   ;;  %v7090_v10 = vld [vmem:[#allocation10] ss:$0 sm:$0xff] }
 0x3bc   : > { %8524 = vmatprep.subr.bf16.mxu1 %v9995_v3 }
 0x3be   : > { %8460 = vmatpush3.bf16.xpose.msra.mxu0 %v8459_v47 }
 0x3bf   : > { %8461 = vmatprep.subr.bf16.mxu0 %v9995_v3 }
 0x3c3   : > { %8526 = vmatpush3.bf16.xpose.msra.mxu1 %v8441_v2  ;;  %v7089_v2 = vld [vmem:[#allocation7] ss:$0 sm:$0xff] }
 0x3c4   : > { %8527 = vmatprep.subr.bf16.mxu1 %v9995_v3 }
 0x3c5   : > { %7892 = vmatmul.mubr.f32.vlgmr.msra.gmra.mrb[2].mxu0 %v11135_v8 }
 0x3c6   : > { %8464 = vmatpush3.bf16.xpose.msk.msra.mxu0 %vm11038_vm4, %v10662_v31  ;;  %7910 = vmatprep.mubr.msk.f32.mxu0 %vm9996_vm0, %v9997_v7 }
 0x3c7   : > { %8465 = vmatprep.subr.bf16.mxu0 %v9995_v3 }
 0x3cb   : > { %8529 = vmatpush3.bf16.xpose.msra.mxu1 %v8444_v30 }
 0x3cc   : > { %8530 = vmatprep.subr.bf16.mxu1 %v9995_v3 }
 0x3ce   : > { %8468 = vmatpush3.bf16.xpose.msk.msra.mxu0 %vm11038_vm4, %v11052_v28 }
 0x3cf   : > { %8469 = vmatprep.subr.bf16.mxu0 %v9995_v3 }
 0x3d3   : > { %8532 = vmatpush3.bf16.xpose.msra.mxu1 %v8447_v23 }
 0x3d4   : > { %8533 = vmatprep.subr.bf16.mxu1 %v9995_v3 }
 0x3d6   : > { %8472 = vmatpush3.bf16.xpose.msk.msra.mxu0 %vm11038_vm4, %v11069_v36 }
 0x3d7   : > { %8473 = vmatprep.subr.bf16.mxu0 %v9995_v3 }
 0x3da   : > { %7987 = vmatmul.mubr.f32.vlgmr.msra.gmra.mrb[4].mxu1 %v11197_v63 }
 0x3db   : > { %8535 = vmatpush3.bf16.xpose.msra.mxu1 %v11121_v26  ;;  %8005 = vmatprep.mubr.msk.f32.mxu1 %vm9996_vm0, %v9997_v7  ;;  %v9032_v26 = vld [vmem:[%s12100_s4 + $0x10] sm:$0xff]  }
 0x3dc   : > { %8536 = vmatprep.subr.bf16.mxu1 %v9995_v3 }
 0x3de   : > { %8476 = vmatpush3.bf16.xpose.msk.msra.mxu0 %vm11038_vm4, %v11083_v32 }
 0x3df   : > { %8477 = vmatprep.subr.bf16.mxu0 %v9995_v3 }
 0x3e3   : > { %8538 = vmatpush3.bf16.xpose.msra.mxu1 %v8453_v49 }
 0x3e4   : > { %8539 = vmatprep.subr.bf16.mxu1 %v9995_v3 }
 0x3e5   : > { %7911 = vmatmul.mubr.f32.vlgmr.msra.gmra.mrb[2].mxu0 %v2521_v34 }
 0x3e6   : > { %8479 = vmatpush3.bf16.xpose.msra.mxu0 %v8478_v9  ;;  %7929 = vmatprep.mubr.msk.f32.mxu0 %vm9996_vm0, %v9997_v7 }
 0x3e7   : > { %8480 = vmatprep.subr.bf16.mxu0 %v9995_v3 }
 0x3eb   : > { %8541 = vmatpush3.bf16.xpose.msra.mxu1 %v8456_v17 }
 0x3ec   : > { %8542 = vmatprep.subr.bf16.mxu1 %v9995_v3 }
 0x3ee   : > { %8482 = vmatpush3.bf16.xpose.msra.mxu0 %v8481_v42 }
 0x3ef   : > { %8483 = vmatprep.subr.bf16.mxu0 %v9995_v3 }
 0x3f3   : > { %8544 = vmatpush3.bf16.xpose.msra.mxu1 %v8459_v47 }
 0x3f4   : > { %8545 = vmatprep.subr.bf16.mxu1 %v9995_v3 }
 0x3f6   : > { %8485 = vmatpush3.bf16.xpose.msra.mxu0 %v8484_v46 }
 0x3f7   : > { %8486 = vmatprep.subr.bf16.mxu0 %v9995_v3 }
 0x3fa   : > { %8006 = vmatmul.mubr.f32.vlgmr.msra.gmra.mrb[4].mxu1 %v11200_v37 }
 0x3fb   : > { %8548 = vmatpush3.bf16.xpose.msk.msra.mxu1 %vm11038_vm4, %v10662_v31  ;;  %8024 = vmatprep.mubr.msk.f32.mxu1 %vm9996_vm0, %v9997_v7 }
 0x3fc   : > { %8549 = vmatprep.subr.bf16.mxu1 %v9995_v3 }
 0x3fe   : > { %8488 = vmatpush3.bf16.xpose.msra.mxu0 %v8487_v50 }
 0x3ff   : > { %8489 = vmatprep.subr.bf16.mxu0 %v9995_v3 }
 0x403   : > { %8552 = vmatpush3.bf16.xpose.msk.msra.mxu1 %vm11038_vm4, %v11052_v28 }
 0x404   : > { %8553 = vmatprep.subr.bf16.mxu1 %v9995_v3 }
 0x405   : > { %7930 = vmatmul.mubr.f32.vlgmr.msra.gmra.mrb[2].mxu0 %v11132_v6 }
 0x406   : > { %8492 = vmatpush3.bf16.xpose.msk.msra.mxu0 %vm11038_vm4, %v10662_v31  ;;  %7948 = vmatprep.mubr.msk.f32.mxu0 %vm9996_vm0, %v9997_v7 }
 0x407   : > { %8493 = vmatprep.subr.bf16.mxu0 %v9995_v3 }
 0x40b   : > { %8556 = vmatpush3.bf16.xpose.msk.msra.mxu1 %vm11038_vm4, %v11069_v36 }
 0x40c   : > { %8557 = vmatprep.subr.bf16.mxu1 %v9995_v3 }
 0x40e   : > { %8496 = vmatpush3.bf16.xpose.msk.msra.mxu0 %vm11038_vm4, %v11052_v28 }
 0x40f   : > { %8497 = vmatprep.subr.bf16.mxu0 %v9995_v3 }
 0x413   : > { %8560 = vmatpush3.bf16.xpose.msk.msra.mxu1 %vm11038_vm4, %v11083_v32 }
 0x414   : > { %8561 = vmatprep.subr.bf16.mxu1 %v9995_v3 }
 0x416   : > { %8500 = vmatpush3.bf16.xpose.msk.msra.mxu0 %vm11038_vm4, %v11069_v36 }
 0x417   : > { %8501 = vmatprep.subr.bf16.mxu0 %v9995_v3 }
 0x41a   : > { %8025 = vmatmul.mubr.f32.vlgmr.msra.gmra.mrb[4].mxu1 %v3061_v18 }
 0x41b   : > { %8563 = vmatpush3.bf16.xpose.msra.mxu1 %v8478_v9  ;;  %8043 = vmatprep.mubr.msk.f32.mxu1 %vm9996_vm0, %v9997_v7 }
 0x41c   : > { %8564 = vmatprep.subr.bf16.mxu1 %v9995_v3 }
 0x41e   : > { %8504 = vmatpush3.bf16.xpose.msk.msra.mxu0 %vm11038_vm4, %v11083_v32 }
 0x423   : > { %8566 = vmatpush3.bf16.xpose.msra.mxu1 %v8481_v42 }
 0x424   : > { %8567 = vmatprep.subr.bf16.mxu1 %v9995_v3 }
 0x425   : > { %7949 = vmatmul.mubr.f32.vlgmr.msra.gmra.mrb[2].mxu0 %v11132_v6  ;;  %v3525_v6 = vsub.s32 0, %v10592_v5 }
 0x42b   : > { %8569 = vmatpush3.bf16.xpose.msra.mxu1 %v8484_v46 }
 0x42c   : > { %8570 = vmatprep.subr.bf16.mxu1 %v9995_v3 }
 0x433   : > { %8572 = vmatpush3.bf16.xpose.msra.mxu1 %v8487_v50 }
 0x434   : > { %8573 = vmatprep.subr.bf16.mxu1 %v9995_v3 }
 0x43a   : > { %8044 = vmatmul.mubr.f32.vlgmr.msra.gmra.mrb[4].mxu1 %v11197_v63 }
 0x43b   : > { %8576 = vmatpush3.bf16.xpose.msk.msra.mxu1 %vm11038_vm4, %v10662_v31  ;;  %8062 = vmatprep.mubr.msk.f32.mxu1 %vm9996_vm0, %v9997_v7  ;;  %v9030_v31 = vld [vmem:[%s12099_s26] sm:$0xff]  }
 0x43c   : > { %8577 = vmatprep.subr.bf16.mxu1 %v9995_v3  ;;  %8628 = vmatprep.subr.msk.bf16.mxu0 %vm1281_vm1, %v9030_v31 }
 0x443   : > { %8580 = vmatpush3.bf16.xpose.msk.msra.mxu1 %vm11038_vm4, %v11052_v28  ;;  %v3629_v28 = vsel %vm1281_vm1, %v9030_v31, 0 }
 0x444   : > { %8581 = vmatprep.subr.bf16.mxu1 %v9995_v3  ;;  %8066 = vmatpush3.bf16.xpose.msra.mxu0 %v3629_v28 }
 0x445   : > { %8629 = vmatprep.subr.msk.bf16.mxu0 %vm1281_vm1, %v9031_v52 }
 0x44b   : > { %8584 = vmatpush3.bf16.xpose.msk.msra.mxu1 %vm11038_vm4, %v11069_v36  ;;  %v3632_v36 = vsel %vm1281_vm1, %v9031_v52, 0 }
 0x44c   : > { %8585 = vmatprep.subr.bf16.mxu1 %v9995_v3  ;;  %8068 = vmatpush3.bf16.xpose.msra.mxu0 %v3632_v36  ;;  %v3635_v3 = vsel %vm1281_vm1, %v9032_v26, 0 }
 0x44d   : > { %8630 = vmatprep.subr.msk.bf16.mxu0 %vm1281_vm1, %v9032_v26 }
 0x453   : > { %8588 = vmatpush3.bf16.xpose.msk.msra.mxu1 %vm11038_vm4, %v11083_v32  ;;  %v3638_v32 = vsel %vm1281_vm1, %v9033_v33, 0 }
 0x454   : > { %8070 = vmatpush3.bf16.xpose.msra.mxu0 %v3635_v3 }
 0x455   : > { %8631 = vmatprep.subr.msk.bf16.mxu0 %vm1281_vm1, %v9033_v33 }
 0x45a   : > { %8063 = vmatmul.mubr.f32.vlgmr.msra.gmra.mrb[4].mxu1 %v11197_v63 }
 0x45c   : > { %8072 = vmatpush3.bf16.xpose.msra.mxu0 %v3638_v32 }
 0x4f8   : > { %v2979_v4 = vpop.f32.mrb[2].mxu0 }
 0x4f9   : > { %v7950_v60 = vpop.f32.mrb[3].mxu0  ;;  %v3526_v8 = vrot.slane %v2979_v4, %v3525_v6 }
 0x4fb   : > { %v3527_v34 = vsub.f32 %v9068_v16, %v3526_v8  ;;  %v3528_v51 = vsub.f32 %v9069_v43, %v3526_v8  ;;  %v3529_v45 = vsub.f32 %v9070_v44, %v3526_v8  ;;  %v3530_v1 = vsub.f32 %v9071_v48, %v3526_v8  ;;  %v9034_v44 = vld [vmem:[%s12101_s23] sm:$0xff]  }
 0x4fc   : > { %v3531_v55 = vsub.f32 %v10638_v24, %v3526_v8  ;;  %v3532_v56 = vsub.f32 %v10654_v29, %v3526_v8  ;;  %v3533_v58 = vsub.f32 %v10699_v40, %v3526_v8  ;;  %v3534_v5 = vsub.f32 %v10744_v54, %v3526_v8  ;;  %8632 = vmatprep.subr.msk.bf16.mxu1 %vm1281_vm1, %v9034_v44 }
 0x4fd   : > { %v3893_v48 = vsel %vm1281_vm1, %v9034_v44, 0 }
 0x4fe   : > { %8082 = vmatpush3.bf16.xpose.msra.mxu1 %v3893_v48 }
 0x52d   : > { %v3519_v12 = vpop.f32.mrb[4].mxu1 }
 0x52e   : > { %v3538_v35 = vrot.slane %v3519_v12, %v3525_v6  ;;  %v8064_v41 = vpop.f32.mrb[5].mxu1 }
 0x530   : > { %v3539_v0 = vmul.f32 %v3538_v35, %v3527_v34  ;;  %v3540_v19 = vmul.f32 %v3538_v35, %v3528_v51  ;;  %v3541_v27 = vmul.f32 %v3538_v35, %v3529_v45  ;;  %v3542_v62 = vmul.f32 %v3538_v35, %v3530_v1  ;;  %v9035_v45 = vld [vmem:[#allocation16] sm:$0xff]  }
 0x531   : > { %v3543_v30 = vmul.f32 %v3538_v35, %v3531_v55  ;;  %v3544_v38 = vmul.f32 %v3538_v35, %v3532_v56  ;;  %v3545_v39 = vmul.f32 %v3538_v35, %v3533_v58  ;;  %v3546_v53 = vmul.f32 %v3538_v35, %v3534_v5  ;;  %8636 = vmatprep.subr.msk.bf16.mxu0 %vm1281_vm1, %v9035_v45 }
 0x532   : > { %v3554_v57 = vmul.f32 %v7089_v2, %v3539_v0  ;;  %v3555_v23 = vmul.f32 %v7089_v2, %v3540_v19  ;;  %v3556_v61 = vmul.f32 %v7089_v2, %v3541_v27  ;;  %v3557_v13 = vmul.f32 %v7089_v2, %v3542_v62 }
 0x533   : > { %v3558_v24 = vmul.f32 %v7089_v2, %v3543_v30  ;;  %v3559_v14 = vmul.f32 %v7089_v2, %v3544_v38  ;;  %v3560_v29 = vmul.f32 %v7089_v2, %v3545_v39  ;;  %v3561_v15 = vmul.f32 %v7089_v2, %v3546_v53 }
 0x534   : > { %v3569_v40 = vadd.f32 %v7090_v10, %v3554_v57  ;;  %v3570_v21 = vadd.f32 %v7090_v10, %v3555_v23  ;;  %v3571_v54 = vadd.f32 %v7090_v10, %v3556_v61  ;;  %v3572_v22 = vadd.f32 %v7090_v10, %v3557_v13 }
 0x535   : > { %v3573_v49 = vadd.f32 %v7090_v10, %v3558_v24  ;;  %v3574_v11 = vadd.f32 %v7090_v10, %v3559_v14  ;;  %v3575_v59 = vadd.f32 %v7090_v10, %v3560_v29  ;;  %v3576_v63 = vadd.f32 %v7090_v10, %v3561_v15 }
 0x536   : > { %v3586_v37 = vpack.c.bf16 %v3570_v21, %v3569_v40  ;;  %v3587_v17 = vpack.c.bf16 %v3572_v22, %v3571_v54  ;;  %v4046_v1 = vsel %vm1281_vm1, %v9035_v45, 0 }
 0x537   : > { %v3588_v18 = vpack.c.bf16 %v3574_v11, %v3573_v49  ;;  %v3589_v20 = vpack.c.bf16 %v3576_v63, %v3575_v59 }
 0x538   : > { %8073 = vmatprep.mubr.msk.bf16.mxu0 %vm1281_vm1, %v3586_v37 }
 0x539   : > { %8074 = vmatmul.mubr.msk.bf16.vlgmr.msra.gmra.mrb[4].mxu0 %vm1281_vm1, %v3587_v17 }
 0x53a   : > { %8077 = vmatprep.mubr.msk.bf16.mxu0 %vm1281_vm1, %v3588_v18  ;;  %8098 = vmatpush3.bf16.xpose.msra.mxu0 %v4046_v1 }
 0x541   : > { %8078 = vmatmul.mubr.msk.bf16.gmra.mrb[8].mxu0 %vm1281_vm1, %v3589_v20 }
 0x60c   : > { %v8075_v47 = vpop.f32.mrb[4].mxu0 }
 0x60d   : > { %v3683_v9 = vadd.f32 %v8075_v47, %v7091_v25  ;;  %v3674_v42 = vpop.f32.mrb[5].mxu0 }
 0x60e   : > { %v3675_v46 = vadd.f32 %v7091_v25, %v3674_v42  ;;  %v8076_v50 = vpop.f32.mrb[6].mxu0 }
 0x60f   : > { %3707 = vst.msk [vmem:[#allocation2 + $0x10] sm:$0xff] %vm1281_vm1, %v3683_v9  ;;  %v3686_v31 = vadd.f32 %v8076_v50, %v7091_v25  ;;  %v3677_v52 = vpop.f32.mrb[7].mxu0  ;;  %v3721_v28 = vsel %vm1281_vm1, %v3683_v9, 0.0 }
 0x610   : > { %3705 = vst.msk [vmem:[#allocation2] sm:$0xff] %vm1281_vm1, %v3675_v46  ;;  %v3678_v36 = vadd.f32 %v7091_v25, %v3677_v52  ;;  %3722 = vadd.xlane.f32.xlu1 %v3721_v28  ;;  %v3715_v26 = vsel %vm1281_vm1, %v3675_v46, 0.0  ;;  %v9037_v52 = vld [vmem:[#allocation16 + $0x8] sm:$0xff]  }
 0x611   : > { %3708 = vst.msk [vmem:[#allocation2 + $0x18] sm:$0xff] %vm1281_vm1, %v3686_v31  ;;  %3716 = vadd.xlane.f32.xlu0 %v3715_v26  ;;  %v3724_v3 = vsel %vm1281_vm1, %v3686_v31, 0.0  ;;  %8637 = vmatprep.subr.msk.bf16.mxu0 %vm1281_vm1, %v9037_v52  ;;  %v9038_v26 = vld [vmem:[%s12102_s1 + $0x10] sm:$0xff]  }
 0x612   : > { %3706 = vst.msk [vmem:[#allocation2 + $0x8] sm:$0xff] %vm1281_vm1, %v3678_v36  ;;  %v3718_v32 = vsel %vm1281_vm1, %v3678_v36, 0.0 }
 0x614   : > { %3725 = vadd.xlane.f32.xlu1 %v3724_v3  ;;  %v8079_v33 = vpop.f32.mrb[8].mxu0  ;;  %v9039_v3 = vld [vmem:[#allocation16 + $0x10] sm:$0xff]  }
 0x615   : > { %v3699_v4 = vadd.f32 %v8079_v33, %v7091_v25  ;;  %v3690_v60 = vpop.f32.mrb[9].mxu0  ;;  %3719 = vadd.xlane.f32.xlu0 %v3718_v32  ;;  %v3899_v33 = vsel %vm1281_vm1, %v9038_v26, 0  ;;  %v4052_v32 = vsel %vm1281_vm1, %v9039_v3, 0 }
 0x616   : > { %v3691_v6 = vadd.f32 %v7091_v25, %v3690_v60  ;;  %v8080_v8 = vpop.f32.mrb[10].mxu0  ;;  %v9041_v60 = vld [vmem:[#allocation16 + $0x18] sm:$0xff]  }
 0x617   : > { %3711 = vst.msk [vmem:[#allocation2 + $0x30] sm:$0xff] %vm1281_vm1, %v3699_v4  ;;  %v3702_v12 = vadd.f32 %v8080_v8, %v7091_v25  ;;  %v3693_v16 = vpop.f32.mrb[11].mxu0  ;;  %v3733_v43 = vsel %vm1281_vm1, %v3699_v4, 0.0  ;;  %v4055_v8 = vsel %vm1281_vm1, %v9041_v60, 0 }
 0x618   : > { %3709 = vst.msk [vmem:[#allocation2 + $0x20] sm:$0xff] %vm1281_vm1, %v3691_v6  ;;  %v3694_v34 = vadd.f32 %v7091_v25, %v3693_v16  ;;  %v3727_v35 = vsel %vm1281_vm1, %v3691_v6, 0.0 }
 0x619   : > { %3712 = vst.msk [vmem:[#allocation2 + $0x38] sm:$0xff] %vm1281_vm1, %v3702_v12  ;;  %3728 = vadd.xlane.f32.xlu0 %v3727_v35  ;;  %v3736_v51 = vsel %vm1281_vm1, %v3702_v12, 0.0 }
 0x61a   : > { %3710 = vst.msk [vmem:[#allocation2 + $0x28] sm:$0xff] %vm1281_vm1, %v3694_v34  ;;  %v3730_v41 = vsel %vm1281_vm1, %v3694_v34, 0.0 }
 0x61b   : > { %3731 = vadd.xlane.f32.xlu1 %v3730_v41 }
 0x61d   : > { %3734 = vadd.xlane.f32.xlu0 %v3733_v43 }
 0x61f   : > { %3737 = vadd.xlane.f32.xlu1 %v3736_v51 }
 0x69d   : > { %v3723_v2 = vpop.xlane.xlu1 %3722 }
 0x69e   : > { %v3742_v55 = vmul.f32 0.015625, %v3723_v2  ;;  %v3717_v56 = vpop.xlane.xlu0 %3716 }
 0x69f   : > { %v3740_v58 = vmul.f32 0.015625, %v3717_v56 }
 0x6a0   : > { %v11381_v5 = vsub.f32 %v3683_v9, %v3742_v55 }
 0x6a1   : > { %v11383_v0 = vsub.f32 %v3675_v46, %v3740_v58  ;;  %v3726_v19 = vpop.xlane.xlu1 %3725 }
 0x6a2   : > { %v3743_v27 = vmul.f32 0.015625, %v3726_v19  ;;  %v3720_v62 = vpop.xlane.xlu0 %3719  ;;  %v3758_v57 = vmul.f32 %v11381_v5, %v11381_v5 }
 0x6a3   : > { %v3741_v10 = vmul.f32 0.015625, %v3720_v62  ;;  %v3756_v30 = vmul.f32 %v11383_v0, %v11383_v0 }
 0x6a4   : > { %v11387_v38 = vsub.f32 %v3686_v31, %v3743_v27  ;;  %v3770_v40 = vsel %vm1281_vm1, %v3758_v57, 0.0  ;;  %v9036_v31 = vld [vmem:[%s12102_s1 + $0x8] sm:$0xff]  }
 0x6a5   : > { %v11389_v39 = vsub.f32 %v3678_v36, %v3741_v10  ;;  %v3764_v53 = vsel %vm1281_vm1, %v3756_v30, 0.0  ;;  %8633 = vmatprep.subr.msk.bf16.mxu1 %vm1281_vm1, %v9036_v31  ;;  %v3896_v28 = vsel %vm1281_vm1, %v9036_v31, 0  ;;  %v4049_v36 = vsel %vm1281_vm1, %v9037_v52, 0  ;;  %v9043_v31 = vld [vmem:[#allocation27] sm:$0xff]  }
 0x6a6   : > { %3765 = vadd.xlane.f32.xlu0 %v3764_v53  ;;  %v3729_v23 = vpop.xlane.xlu0 %3728  ;;  %v3759_v14 = vmul.f32 %v11387_v38, %v11387_v38  ;;  %8084 = vmatpush3.bf16.xpose.msra.mxu1 %v3896_v28 }
 0x6a7   : > { %v3744_v61 = vmul.f32 0.015625, %v3729_v23  ;;  %v3757_v13 = vmul.f32 %v11389_v39, %v11389_v39  ;;  %8100 = vmatpush3.bf16.xpose.msra.mxu0 %v4049_v36  ;;  %8634 = vmatprep.subr.msk.bf16.mxu1 %vm1281_vm1, %v9038_v26 }
 0x6a8   : > { %v3732_v24 = vpop.xlane.xlu1 %3731  ;;  %v3773_v63 = vsel %vm1281_vm1, %v3759_v14, 0.0  ;;  %8638 = vmatprep.subr.msk.bf16.mxu0 %vm1281_vm1, %v9039_v3 }
 0x6a9   : > { %v11398_v29 = vsub.f32 %v3691_v6, %v3744_v61  ;;  %v3745_v15 = vmul.f32 0.015625, %v3732_v24  ;;  %v3767_v21 = vsel %vm1281_vm1, %v3757_v13, 0.0  ;;  %v7100_v13 = vld [vmem:[#allocation13] ss:$0 sm:$0xff] }
 0x6aa   : > { %3771 = vadd.xlane.f32.xlu0 %v3770_v40  ;;  %3768 = vadd.xlane.f32.xlu1 %v3767_v21  ;;  %v3735_v54 = vpop.xlane.xlu0 %3734 }
 0x6ab   : > { %v11402_v22 = vsub.f32 %v3694_v34, %v3745_v15  ;;  %v3746_v49 = vmul.f32 0.015625, %v3735_v54  ;;  %v3760_v11 = vmul.f32 %v11398_v29, %v11398_v29 }
 0x6ac   : > { %v3738_v59 = vpop.xlane.xlu1 %3737 }
 0x6ad   : > { %v11407_v37 = vsub.f32 %v3699_v4, %v3746_v49  ;;  %v3747_v17 = vmul.f32 0.015625, %v3738_v59  ;;  %v3776_v18 = vsel %vm1281_vm1, %v3760_v11, 0.0  ;;  %v3761_v20 = vmul.f32 %v11402_v22, %v11402_v22  ;;  %v9040_v4 = vld [vmem:[%s12102_s1 + $0x18] sm:$0xff]   ;;  %v7101_v11 = vld [vmem:[#allocation15] ss:$0 sm:$0xff] }
 0x6ae   : > { %3774 = vadd.xlane.f32.xlu1 %v3773_v63  ;;  %3777 = vadd.xlane.f32.xlu0 %v3776_v18  ;;  %v3902_v6 = vsel %vm1281_vm1, %v9040_v4, 0 }
 0x6af   : > { %v11412_v25 = vsub.f32 %v3702_v12, %v3747_v17  ;;  %v3762_v47 = vmul.f32 %v11407_v37, %v11407_v37  ;;  %v3779_v9 = vsel %vm1281_vm1, %v3761_v20, 0.0  ;;  %8086 = vmatpush3.bf16.xpose.msra.mxu1 %v3899_v33  ;;  %8102 = vmatpush3.bf16.xpose.msra.mxu0 %v4052_v32  ;;  %v4298_v33 = vsel %vm1281_vm1, %v9043_v31, 0 }
 0x6b0   : > { %8635 = vmatprep.subr.msk.bf16.mxu1 %vm1281_vm1, %v9040_v4  ;;  %8639 = vmatprep.subr.msk.bf16.mxu0 %vm1281_vm1, %v9041_v60 }
 0x6b1   : > { %v3782_v42 = vsel %vm1281_vm1, %v3762_v47, 0.0  ;;  %v3763_v46 = vmul.f32 %v11412_v25, %v11412_v25 }
 0x6b2   : > { %3780 = vadd.xlane.f32.xlu1 %v3779_v9  ;;  %3783 = vadd.xlane.f32.xlu0 %v3782_v42 }
 0x6b3   : > { %v3785_v50 = vsel %vm1281_vm1, %v3763_v46, 0.0 }
 0x6b6   : > { %3786 = vadd.xlane.f32.xlu1 %v3785_v50  ;;  %v9042_v50 = vld [vmem:[#allocation25] sm:$0xff]  }
 0x6b7   : > { %8088 = vmatpush3.bf16.xpose.msra.mxu1 %v3902_v6  ;;  %8104 = vmatpush3.bf16.xpose.msra.mxu0 %v4055_v8 }
 0x6b8   : > { %8113 = vmatprep.subr.bf16.mxu1 %v9997_v7  ;;  %8125 = vmatprep.subr.bf16.mxu0 %v9997_v7 }
 0x733   : > { %v3766_v12 = vpop.xlane.xlu0 %3765 }
 0x734   : > { %v3788_v16 = vmul.f32 0.015625, %v3766_v12 }
 0x736   : > { %v3796_v34 = vadd.f32 1e-05, %v3788_v16  ;;  %v9044_v16 = vld [vmem:[#allocation25 + $0x8] sm:$0xff]  }
 0x737   : > { %v3769_v35 = vpop.xlane.xlu1 %3768  ;;  %v3772_v41 = vpop.xlane.xlu0 %3771 }
 0x738   : > { %9052 = vrsqrt.f32 %v3796_v34  ;;  %v3789_v43 = vmul.f32 0.015625, %v3769_v35  ;;  %v3790_v51 = vmul.f32 0.015625, %v3772_v41  ;;  %v9045_v34 = vld [vmem:[#allocation27 + $0x8] sm:$0xff]  }
 0x73a   : > { %v3797_v44 = vadd.f32 1e-05, %v3789_v43  ;;  %v3798_v45 = vadd.f32 1e-05, %v3790_v51  ;;  %v4208_v43 = vsel %vm1281_vm1, %v9044_v16, 0  ;;  %v4301_v51 = vsel %vm1281_vm1, %v9045_v34, 0 }
 0x73b   : > { %v3775_v48 = vpop.xlane.xlu1 %3774  ;;  %v3778_v1 = vpop.xlane.xlu0 %3777 }
 0x73c   : > { %9054 = vrsqrt.f32 %v3797_v44  ;;  %v3791_v2 = vmul.f32 0.015625, %v3775_v48  ;;  %v3792_v55 = vmul.f32 0.015625, %v3778_v1  ;;  %v9046_v44 = vld [vmem:[#allocation25 + $0x10] sm:$0xff]  }
 0x73d   : > { %9056 = vrsqrt.f32 %v3798_v45  ;;  %v9047_v45 = vld [vmem:[#allocation27 + $0x10] sm:$0xff]   ;;  %v4211_v48 = vsel %vm1281_vm1, %v9046_v44, 0 }
 0x73e   : > { %v3799_v56 = vadd.f32 1e-05, %v3791_v2  ;;  %v3800_v58 = vadd.f32 1e-05, %v3792_v55  ;;  %v4304_v1 = vsel %vm1281_vm1, %v9047_v45, 0  ;;  %v9048_v2 = vld [vmem:[#allocation25 + $0x18] sm:$0xff]  }
 0x73f   : > { %v3781_v19 = vpop.xlane.xlu1 %3780  ;;  %v3784_v27 = vpop.xlane.xlu0 %3783  ;;  %v9049_v55 = vld [vmem:[#allocation27 + $0x18] sm:$0xff]  }
 0x740   : > { %9058 = vrsqrt.f32 %v3799_v56  ;;  %v3793_v62 = vmul.f32 0.015625, %v3781_v19  ;;  %v3794_v10 = vmul.f32 0.015625, %v3784_v27  ;;  %v4214_v56 = vsel %vm1281_vm1, %v9048_v2, 0  ;;  %v4170_v19 = vld [vmem:[%s10576_s0] sm:$0xff]  ;;  %v4171_v27 = vld [vmem:[%s10576_s0 + $0x8] sm:$0xff] }
 0x741   : > { %9060 = vrsqrt.f32 %v3800_v58  ;;  %v4307_v58 = vsel %vm1281_vm1, %v9049_v55, 0 }
 0x742   : > { %v9053_v30 = vpop.eup %9052  ;;  %v3801_v53 = vadd.f32 1e-05, %v3793_v62  ;;  %v3802_v57 = vadd.f32 1e-05, %v3794_v10  ;;  %v4180_v62 = vpack.c.bf16 %v4171_v27, %v4170_v19 }
 0x743   : > { %v3812_v23 = vmul.f32 %v9053_v30, %v11383_v0  ;;  %v3787_v61 = vpop.xlane.xlu1 %3786 }
 0x744   : > { %9062 = vrsqrt.f32 %v3801_v53  ;;  %v3795_v24 = vmul.f32 0.015625, %v3787_v61 }
 0x745   : > { %9064 = vrsqrt.f32 %v3802_v57  ;;  %v3826_v54 = vmul.f32 %v7100_v13, %v3812_v23 }
 0x746   : > { %v9055_v14 = vpop.eup %9054  ;;  %v3803_v15 = vadd.f32 1e-05, %v3795_v24 }
 0x747   : > { %v9057_v40 = vpop.eup %9056  ;;  %v3813_v21 = vmul.f32 %v9055_v14, %v11389_v39  ;;  %v3840_v20 = vadd.f32 %v7101_v11, %v3826_v54 }
 0x748   : > { %v3814_v49 = vmul.f32 %v9057_v40, %v11381_v5  ;;  %9066 = vrsqrt.f32 %v3803_v15 }
 0x749   : > { %v3827_v59 = vmul.f32 %v7100_v13, %v3813_v21 }
 0x74a   : > { %v9059_v63 = vpop.eup %9058  ;;  %v3828_v18 = vmul.f32 %v7100_v13, %v3814_v49 }
 0x74b   : > { %v9061_v17 = vpop.eup %9060  ;;  %v3815_v0 = vmul.f32 %v9059_v63, %v11387_v38  ;;  %v3841_v47 = vadd.f32 %v7101_v11, %v3827_v59 }
 0x74c   : > { %v3816_v9 = vmul.f32 %v9061_v17, %v11398_v29  ;;  %v3842_v36 = vadd.f32 %v7101_v11, %v3828_v18  ;;  %v4205_v29 = vsel %vm1281_vm1, %v9042_v50, 0 }
 0x74d   : > { %v3829_v42 = vmul.f32 %v7100_v13, %v3815_v0  ;;  %v3856_v46 = vpack.c.bf16 %v3841_v47, %v3840_v20 }
 0x74e   : > { %v9063_v39 = vpop.eup %9062  ;;  %v3830_v52 = vmul.f32 %v7100_v13, %v3816_v9 }
 0x74f   : > { %v9065_v28 = vpop.eup %9064  ;;  %v3817_v5 = vmul.f32 %v9063_v39, %v11402_v22  ;;  %8089 = vmatprep.mubr.msk.bf16.mxu1 %vm1281_vm1, %v3856_v46  ;;  %8105 = vmatprep.mubr.msk.bf16.mxu0 %vm1281_vm1, %v3856_v46  ;;  %v3843_v26 = vadd.f32 %v7101_v11, %v3829_v42 }
 0x750   : > { %v3818_v38 = vmul.f32 %v9065_v28, %v11407_v37  ;;  %v3844_v60 = vadd.f32 %v7101_v11, %v3830_v52 }
 0x751   : > { %v3857_v3 = vpack.c.bf16 %v3843_v26, %v3842_v36  ;;  %v3831_v32 = vmul.f32 %v7100_v13, %v3817_v5 }
 0x752   : > { %v9067_v4 = vpop.eup %9066  ;;  %v3832_v8 = vmul.f32 %v7100_v13, %v3818_v38 }
 0x753   : > { %v3819_v6 = vmul.f32 %v9067_v4, %v11412_v25  ;;  %8090 = vmatmul.mubr.msk.bf16.vlgmr.msra.gmra.mrb[8].mxu1 %vm1281_vm1, %v3857_v3  ;;  %8106 = vmatmul.mubr.msk.bf16.vlgmr.msra.gmra.mrb[12].mxu0 %vm1281_vm1, %v3857_v3  ;;  %v3845_v22 = vadd.f32 %v7101_v11, %v3831_v32 }
 0x754   : > { %8114 = vmatpush3.bf16.xpose.msra.mxu1 %v4205_v29  ;;  %8126 = vmatpush3.bf16.xpose.msra.mxu0 %v4298_v33  ;;  %v3846_v25 = vadd.f32 %v7101_v11, %v3832_v8 }
 0x755   : > { %v3858_v12 = vpack.c.bf16 %v3845_v22, %v3844_v60  ;;  %8115 = vmatprep.subr.bf16.mxu1 %v9997_v7  ;;  %8127 = vmatprep.subr.bf16.mxu0 %v9997_v7  ;;  %v3833_v37 = vmul.f32 %v7100_v13, %v3819_v6 }
 0x757   : > { %8093 = vmatprep.mubr.msk.bf16.mxu1 %vm1281_vm1, %v3858_v12  ;;  %8109 = vmatprep.mubr.msk.bf16.mxu0 %vm1281_vm1, %v3858_v12  ;;  %v3847_v35 = vadd.f32 %v7101_v11, %v3833_v37 }
 0x759   : > { %v3859_v41 = vpack.c.bf16 %v3847_v35, %v3846_v25 }
 0x75b   : > { %8094 = vmatmul.mubr.msk.bf16.gmra.mrb[12].mxu1 %vm1281_vm1, %v3859_v41  ;;  %8110 = vmatmul.mubr.msk.bf16.gmra.mrb[16].mxu0 %vm1281_vm1, %v3859_v41 }
 0x75c   : > { %8116 = vmatpush3.bf16.xpose.msra.mxu1 %v4208_v43  ;;  %8128 = vmatpush3.bf16.xpose.msra.mxu0 %v4301_v51 }
 0x75d   : > { %8117 = vmatprep.subr.bf16.mxu1 %v9997_v7  ;;  %8129 = vmatprep.subr.bf16.mxu0 %v9997_v7 }
 0x75e   : > { %8121 = vmatprep.mubr.msk.bf16.mxu1 %vm9996_vm0, %v9997_v7  ;;  %8133 = vmatprep.mubr.msk.bf16.mxu0 %vm9996_vm0, %v9997_v7 }
 0x764   : > { %8118 = vmatpush3.bf16.xpose.msra.mxu1 %v4211_v48  ;;  %8130 = vmatpush3.bf16.xpose.msra.mxu0 %v4304_v1 }
 0x765   : > { %8119 = vmatprep.subr.bf16.mxu1 %v9997_v7  ;;  %8131 = vmatprep.subr.bf16.mxu0 %v9997_v7 }
 0x76c   : > { %8120 = vmatpush3.bf16.xpose.msra.mxu1 %v4214_v56  ;;  %8132 = vmatpush3.bf16.xpose.msra.mxu0 %v4307_v58 }
 0x773   : > { %8122 = vmatmul.mubr.msk.bf16.vlgmr.msra.gmra.mrb[16].mxu1 %vm1281_vm1, %v4180_v62  ;;  %8134 = vmatmul.mubr.msk.bf16.vlgmr.msra.gmra.mrb[20].mxu0 %vm1281_vm1, %v4180_v62 }
 0x826   : > { %v8091_v10 = vpop.f32.mrb[8].mxu1  ;;  %v8107_v30 = vpop.f32.mrb[12].mxu0 }
 0x827   : > { %v3938_v53 = vpop.f32.mrb[9].mxu1  ;;  %v4091_v57 = vpop.f32.mrb[13].mxu0 }
 0x828   : > { %v8092_v7 = vpop.f32.mrb[10].mxu1  ;;  %v8108_v23 = vpop.f32.mrb[14].mxu0 }
 0x829   : > { %v8980_v61 = vpack.i.bf16 %v8092_v7, %v8091_v10  ;;  %v4002_v13 = vpack.c.bf16 %v8092_v7, %v8091_v10  ;;  %v8985_v24 = vpack.i.bf16 %v8108_v23, %v8107_v30  ;;  %v4155_v14 = vpack.c.bf16 %v8108_v23, %v8107_v30  ;;  %v3941_v15 = vpop.f32.mrb[11].mxu1  ;;  %v4094_v40 = vpop.f32.mrb[15].mxu0 }
 0x82a   : > { %v8990_v21 = vpack.i.bf16 %v3941_v15, %v3938_v53  ;;  %v4001_v54 = vpack.c.bf16 %v3941_v15, %v3938_v53  ;;  %v8995_v49 = vpack.i.bf16 %v4094_v40, %v4091_v57  ;;  %v4154_v11 = vpack.c.bf16 %v4094_v40, %v4091_v57 }
 0x82b   : > { %4010 = vst.msk [vmem:[#allocation3 + $0x8] sm:$0xff] %vm2418_vm3, %v4002_v13  ;;  %4163 = vst.msk [vmem:[#allocation4 + $0x8] sm:$0xff] %vm2418_vm3, %v4155_v14  ;;  %8981 = vrot.lane.b32.xlu1 %v8980_v61, %s9999_s15 }
 0x82c   : > { %4009 = vst.msk [vmem:[#allocation3] sm:$0xff] %vm2418_vm3, %v4001_v54  ;;  %4162 = vst.msk [vmem:[#allocation4] sm:$0xff] %vm2418_vm3, %v4154_v11  ;;  %8991 = vrot.lane.b32.xlu0 %v8990_v21, %s9999_s15 }
 0x82e   : > { %v8095_v59 = vpop.f32.mrb[12].mxu1  ;;  %v8111_v63 = vpop.f32.mrb[16].mxu0 }
 0x82f   : > { %v4107_v17 = vpop.f32.mrb[17].mxu0  ;;  %8986 = vrot.lane.b32.xlu1 %v8985_v24, %s9999_s15  ;;  %v3954_v18 = vpop.f32.mrb[13].mxu1 }
 0x830   : > { %v8112_v0 = vpop.f32.mrb[18].mxu0  ;;  %8996 = vrot.lane.b32.xlu0 %v8995_v49, %s9999_s15  ;;  %v8096_v20 = vpop.f32.mrb[14].mxu1 }
 0x831   : > { %v9005_v47 = vpack.i.bf16 %v8112_v0, %v8111_v63  ;;  %v4157_v9 = vpack.c.bf16 %v8112_v0, %v8111_v63  ;;  %v9000_v42 = vpack.i.bf16 %v8096_v20, %v8095_v59  ;;  %v4004_v46 = vpack.c.bf16 %v8096_v20, %v8095_v59  ;;  %v3957_v50 = vpop.f32.mrb[15].mxu1  ;;  %v4110_v31 = vpop.f32.mrb[19].mxu0 }
 0x832   : > { %v9010_v39 = vpack.i.bf16 %v3957_v50, %v3954_v18  ;;  %v4003_v52 = vpack.c.bf16 %v3957_v50, %v3954_v18  ;;  %v9015_v28 = vpack.i.bf16 %v4110_v31, %v4107_v17  ;;  %v4156_v5 = vpack.c.bf16 %v4110_v31, %v4107_v17 }
 0x833   : > { %4165 = vst.msk [vmem:[#allocation4 + $0x18] sm:$0xff] %vm2418_vm3, %v4157_v9  ;;  %4012 = vst.msk [vmem:[#allocation3 + $0x18] sm:$0xff] %vm2418_vm3, %v4004_v46  ;;  %9001 = vrot.lane.b32.xlu1 %v9000_v42, %s9999_s15 }
 0x834   : > { %4011 = vst.msk [vmem:[#allocation3 + $0x10] sm:$0xff] %vm2418_vm3, %v4003_v52  ;;  %4164 = vst.msk [vmem:[#allocation4 + $0x10] sm:$0xff] %vm2418_vm3, %v4156_v5  ;;  %9016 = vrot.lane.b32.xlu0 %v9015_v28, %s9999_s15 }
 0x837   : > { %9006 = vrot.lane.b32.xlu1 %v9005_v47, %s9999_s15 }
 0x83b   : > { %9011 = vrot.lane.b32.xlu1 %v9010_v39, %s9999_s15 }
 0x846   : > { %v4250_v36 = vpop.f32.mrb[16].mxu1  ;;  %v4343_v26 = vpop.f32.mrb[20].mxu0 }
 0x847   : > { %v8123_v38 = vpop.f32.mrb[17].mxu1  ;;  %v8135_v3 = vpop.f32.mrb[21].mxu0 }
 0x848   : > { %v4253_v29 = vpop.f32.mrb[18].mxu1  ;;  %v4346_v33 = vpop.f32.mrb[22].mxu0 }
 0x849   : > { %v9020_v32 = vpack.i.bf16 %v4253_v29, %v4250_v36  ;;  %v4265_v4 = vpack.c.bf16 %v4253_v29, %v4250_v36  ;;  %v9025_v60 = vpack.i.bf16 %v4346_v33, %v4343_v26  ;;  %v4358_v6 = vpack.c.bf16 %v4346_v33, %v4343_v26  ;;  %v8124_v22 = vpop.f32.mrb[19].mxu1  ;;  %v8136_v8 = vpop.f32.mrb[23].mxu0 }
 0x84b   : > { %4267 = vst.msk [vmem:[#allocation5] sm:$0xff] %vm2418_vm3, %v4265_v4  ;;  %4360 = vst.msk [vmem:[#allocation6] sm:$0xff] %vm2418_vm3, %v4358_v6  ;;  %9026 = vrot.lane.b32.xlu1 %v9025_v60, %s9999_s15  ;;  %9021 = vrot.lane.b32.xlu0 %v9020_v32, %s9999_s15 }
 0x89d   : > { %v8982_v12 = vpop.permute.xlu1 %8981 }
 0x89e   : > { %v8984_v37 = vunpack.i.h.bf16 %v8982_v12  ;;  %v8983_v16 = vunpack.i.l.bf16 %v8982_v12  ;;  %v8992_v34 = vpop.permute.xlu0 %8991 }
 0x89f   : > { %v8994_v25 = vunpack.i.h.bf16 %v8992_v34  ;;  %v8993_v35 = vunpack.i.l.bf16 %v8992_v34 }
 0x8a0   : > { %v4006_v41 = vpack.c.bf16 %v8984_v37, %v8983_v16 }
 0x8a1   : > { %v4005_v43 = vpack.c.bf16 %v8994_v25, %v8993_v35  ;;  %v8987_v51 = vpop.permute.xlu1 %8986 }
 0x8a2   : > { %4014 = vst.msk [vmem:[#allocation3 + $0x28] sm:$0xff] %vm2418_vm3, %v4006_v41  ;;  %v8989_v44 = vunpack.i.h.bf16 %v8987_v51  ;;  %v8988_v45 = vunpack.i.l.bf16 %v8987_v51  ;;  %v8997_v48 = vpop.permute.xlu0 %8996 }
 0x8a3   : > { %4013 = vst.msk [vmem:[#allocation3 + $0x20] sm:$0xff] %vm2418_vm3, %v4005_v43  ;;  %v8999_v1 = vunpack.i.h.bf16 %v8997_v48  ;;  %v8998_v2 = vunpack.i.l.bf16 %v8997_v48 }
 0x8a4   : > { %v4159_v55 = vpack.c.bf16 %v8989_v44, %v8988_v45 }
 0x8a5   : > { %v4158_v56 = vpack.c.bf16 %v8999_v1, %v8998_v2  ;;  %v9002_v58 = vpop.permute.xlu1 %9001 }
 0x8a6   : > { %4167 = vst.msk [vmem:[#allocation4 + $0x28] sm:$0xff] %vm2418_vm3, %v4159_v55  ;;  %v9004_v19 = vunpack.i.h.bf16 %v9002_v58  ;;  %v9003_v27 = vunpack.i.l.bf16 %v9002_v58  ;;  %v9017_v62 = vpop.permute.xlu0 %9016 }
 0x8a7   : > { %4166 = vst.msk [vmem:[#allocation4 + $0x20] sm:$0xff] %vm2418_vm3, %v4158_v56  ;;  %v9019_v10 = vunpack.i.h.bf16 %v9017_v62  ;;  %v9018_v30 = vunpack.i.l.bf16 %v9017_v62 }
 0x8a8   : > { %v4008_v53 = vpack.c.bf16 %v9004_v19, %v9003_v27 }
 0x8a9   : > { %v4160_v57 = vpack.c.bf16 %v9019_v10, %v9018_v30  ;;  %v9007_v7 = vpop.permute.xlu1 %9006 }
 0x8aa   : > { %4016 = vst.msk [vmem:[#allocation3 + $0x38] sm:$0xff] %vm2418_vm3, %v4008_v53  ;;  %v9009_v23 = vunpack.i.h.bf16 %v9007_v7  ;;  %v9008_v61 = vunpack.i.l.bf16 %v9007_v7 }
 0x8ab   : > { %4168 = vst.msk [vmem:[#allocation4 + $0x30] sm:$0xff] %vm2418_vm3, %v4160_v57 }
 0x8ac   : > { %v4161_v13 = vpack.c.bf16 %v9009_v23, %v9008_v61 }
 0x8ad   : > { %v9012_v24 = vpop.permute.xlu1 %9011 }
 0x8ae   : > { %4169 = vst.msk [vmem:[#allocation4 + $0x38] sm:$0xff] %vm2418_vm3, %v4161_v13  ;;  %v9014_v14 = vunpack.i.h.bf16 %v9012_v24  ;;  %v9013_v15 = vunpack.i.l.bf16 %v9012_v24 }
 0x8b0   : > { %v4007_v40 = vpack.c.bf16 %v9014_v14, %v9013_v15 }
 0x8b2   : > { %4015 = vst.msk [vmem:[#allocation3 + $0x30] sm:$0xff] %vm2418_vm3, %v4007_v40 }
 0x8bd   : > { %v9027_v21 = vpop.permute.xlu1 %9026  ;;  %v9022_v54 = vpop.permute.xlu0 %9021 }
 0x8be   : > { %v9029_v49 = vunpack.i.h.bf16 %v9027_v21  ;;  %v9028_v11 = vunpack.i.l.bf16 %v9027_v21  ;;  %v9024_v59 = vunpack.i.h.bf16 %v9022_v54  ;;  %v9023_v63 = vunpack.i.l.bf16 %v9022_v54 }
 0x8c0   : > { %v4359_v17 = vpack.c.bf16 %v9029_v49, %v9028_v11  ;;  %v4266_v18 = vpack.c.bf16 %v9024_v59, %v9023_v63 }
 0x8c2   : > { %4361 = vst.msk [vmem:[#allocation6 + $0x8] sm:$0xff] %vm2418_vm3, %v4359_v17  ;;  %4268 = vst.msk [vmem:[#allocation5 + $0x8] sm:$0xff] %vm2418_vm3, %v4266_v18 }
 0x8c3 PF: > { %s12103_s17 = sld [smem:[#allocation71_spill]]  ;;  %s12104_s8 = sld [smem:[#allocation55_spill]]  ;;  %vm4375_vm0 = vcmask 523264   ;;  %v4449_v1 = vld [vmem:[#allocation3] sm:$0xff]  ;;  %vm4591_vm1 = vcmask 261120   ;;  %v4450_v2 = vld [vmem:[#allocation3 + $0x8] sm:$0xff] }
 0x8c4   : > { %8644 = vmatprep.subr.msk.bf16.mxu1 %vm4591_vm1, %v4449_v1  ;;  %v4599_v55 = vsel %vm4591_vm1, %v4449_v1, 0  ;;  %v4602_v56 = vsel %vm4591_vm1, %v4450_v2, 0  ;;  %v4451_v58 = vld [vmem:[#allocation3 + $0x10] sm:$0xff]  ;;  %v4452_v27 = vld [vmem:[#allocation3 + $0x18] sm:$0xff]  ;;  %v7129_v54 = vld [vmem:[#allocation13] ss:$0 sm:$0xff] }
 0x8c5   : > { %8150 = vmatpush3.bf16.xpose.msra.mxu1 %v4599_v55  ;;  %v4605_v19 = vsel %vm4591_vm1, %v4451_v58, 0  ;;  %v7130_v18 = vld [vmem:[#allocation15] ss:$0 sm:$0xff]  ;;  %s10000_s26 = smov 96   ;;  %vm5428_vm14 = vcmask 130048   ;;  %s12105_s23 = sld [smem:[#allocation63_spill]] }
 0x8c6   : > { %8645 = vmatprep.subr.msk.bf16.mxu1 %vm4591_vm1, %v4450_v2  ;;  %s12107_s15 = sld [smem:[#allocation65_spill]]  ;;  %s12116_s3 = sld [smem:[#allocation69_spill]] }
 0x8c7   : > { %p12118_p6 = scmp.ne.s32.totalorder %s12068_s20, 0 }
 0x8c9   : > { %s12027_s0 = sshll.u32 %s12103_s17, 5  ;;  %v9092_v39 = vld [vmem:[%s12104_s8] sm:$0xff]   ;;  %v9093_v41 = vld [vmem:[%s12104_s8 + $0x8] sm:$0xff]   ;;  %v9094_v51 = vld [vmem:[%s12104_s8 + $0x10] sm:$0xff]  }
 0x8ca   : > { %s4368_s2 = scalar_lea.vmem [#allocation2], %s12027_s0  ;;  %8640 = vmatprep.subr.msk.bf16.mxu0 %vm4375_vm0, %v9092_v39  ;;  %v4511_v35 = vsel %vm4375_vm0, %v9092_v39, 0  ;;  %v4514_v43 = vsel %vm4375_vm0, %v9093_v41, 0  ;;  %v4517_v44 = vsel %vm4375_vm0, %v9094_v51, 0  ;;  %v9095_v45 = vld [vmem:[%s12104_s8 + $0x18] sm:$0xff]  }
 0x8cb   : > { %v11509_v0 = vld [vmem:[%s4368_s2] sm:$0xff]  ;;  %v11511_v20 = vld [vmem:[%s4368_s2 + $0x10] sm:$0xff]  ;;  %v11513_v47 = vld [vmem:[%s4368_s2 + $0x8] sm:$0xff]  ;;  %8138 = vmatpush3.bf16.xpose.msra.mxu0 %v4511_v35  ;;  %v4520_v48 = vsel %vm4375_vm0, %v9095_v45, 0 }
 0x8cc   : > { %v4376_v9 = vsel %vm4375_vm0, %v11509_v0, 0.0  ;;  %v4382_v42 = vsel %vm4375_vm0, %v11511_v20, 0.0  ;;  %v4379_v46 = vsel %vm4375_vm0, %v11513_v47, 0.0  ;;  %v11521_v50 = vld [vmem:[%s4368_s2 + $0x18] sm:$0xff]  ;;  %8641 = vmatprep.subr.msk.bf16.mxu0 %vm4375_vm0, %v9093_v41  ;;  %s12106_s2 = smov %s12105_s23  ;;  %s12108_s10 = smov %s12107_s15 }
 0x8cd   : > { %4377 = vadd.xlane.f32.xlu0 %v4376_v9  ;;  %4383 = vadd.xlane.f32.xlu1 %v4382_v42  ;;  %v4385_v31 = vsel %vm4375_vm0, %v11521_v50, 0.0 }
 0x8ce   : > { %8152 = vmatpush3.bf16.xpose.msra.mxu1 %v4602_v56 }
 0x8cf   : > { %8646 = vmatprep.subr.msk.bf16.mxu1 %vm4591_vm1, %v4451_v58 }
 0x8d1   : > { %4380 = vadd.xlane.f32.xlu0 %v4379_v46  ;;  %4386 = vadd.xlane.f32.xlu1 %v4385_v31 }
 0x8d3   : > { %8140 = vmatpush3.bf16.xpose.msra.mxu0 %v4514_v43 }
 0x8d4   : > { %8642 = vmatprep.subr.msk.bf16.mxu0 %vm4375_vm0, %v9094_v51 }
 0x8d6   : > { %8154 = vmatpush3.bf16.xpose.msra.mxu1 %v4605_v19 }
 0x8d7   : > { %8647 = vmatprep.subr.msk.bf16.mxu1 %vm4591_vm1, %v4452_v27 }
 0x8db   : > { %8142 = vmatpush3.bf16.xpose.msra.mxu0 %v4517_v44 }
 0x8dc   : > { %8643 = vmatprep.subr.msk.bf16.mxu0 %vm4375_vm0, %v9095_v45 }
 0x8e3   : > { %8144 = vmatpush3.bf16.xpose.msra.mxu0 %v4520_v48 }
 0x95a   : > { %v4378_v52 = vpop.xlane.xlu0 %4377  ;;  %v4384_v28 = vpop.xlane.xlu1 %4383 }
 0x95b   : > { %v4389_v5 = vmul.f32 0.015625, %v4378_v52  ;;  %v4391_v36 = vmul.f32 0.015625, %v4384_v28 }
 0x95d   : > { %v11528_v26 = vsub.f32 %v11509_v0, %v4389_v5  ;;  %v11531_v38 = vsub.f32 %v11511_v20, %v4391_v36 }
 0x95e   : > { %v4381_v3 = vpop.xlane.xlu0 %4380  ;;  %v4387_v29 = vpop.xlane.xlu1 %4386 }
 0x95f   : > { %v4390_v33 = vmul.f32 0.015625, %v4381_v3  ;;  %v4392_v32 = vmul.f32 0.015625, %v4387_v29  ;;  %v4397_v4 = vmul.f32 %v11528_v26, %v11528_v26  ;;  %v4399_v60 = vmul.f32 %v11531_v38, %v11531_v38 }
 0x960   : > { %v4608_v29 = vsel %vm4591_vm1, %v4452_v27, 0 }
 0x961   : > { %v4394_v6 = vsub.f32 %v11513_v47, %v4390_v33  ;;  %v11539_v22 = vsub.f32 %v11521_v50, %v4392_v32  ;;  %v4401_v8 = vsel %vm4375_vm0, %v4397_v4, 0.0  ;;  %v4407_v12 = vsel %vm4375_vm0, %v4399_v60, 0.0  ;;  %8156 = vmatpush3.bf16.xpose.msra.mxu1 %v4608_v29  ;;  %v4454_v33 = vld [vmem:[#allocation3 + $0x28] sm:$0xff]  ;;  %v4455_v60 = vld [vmem:[#allocation3 + $0x30] sm:$0xff] }
 0x962   : > { %4402 = vadd.xlane.f32.xlu0 %v4401_v8  ;;  %v4669_v4 = vsel %vm4591_vm1, %v4454_v33, 0 }
 0x963   : > { %v4398_v37 = vmul.f32 %v4394_v6, %v4394_v6  ;;  %v4400_v16 = vmul.f32 %v11539_v22, %v11539_v22 }
 0x965   : > { %v4404_v34 = vsel %vm4375_vm0, %v4398_v37, 0.0  ;;  %v4410_v25 = vsel %vm4375_vm0, %v4400_v16, 0.0 }
 0x966   : > { %4408 = vadd.xlane.f32.xlu0 %v4407_v12  ;;  %4405 = vadd.xlane.f32.xlu1 %v4404_v34 }
 0x96a   : > { %4411 = vadd.xlane.f32.xlu1 %v4410_v25 }
 0x9ef   : > { %v4403_v62 = vpop.xlane.xlu0 %4402 }
 0x9f0   : > { %v4413_v10 = vmul.f32 0.015625, %v4403_v62 }
 0x9f2   : > { %v4417_v30 = vadd.f32 1e-05, %v4413_v10 }
 0x9f3   : > { %v4406_v53 = vpop.xlane.xlu1 %4405  ;;  %v4409_v57 = vpop.xlane.xlu0 %4408 }
 0x9f4   : > { %9156 = vrsqrt.f32 %v4417_v30  ;;  %v4414_v7 = vmul.f32 0.015625, %v4406_v53  ;;  %v4415_v23 = vmul.f32 0.015625, %v4409_v57 }
 0x9f6   : > { %v4418_v61 = vadd.f32 1e-05, %v4414_v7  ;;  %v4419_v13 = vadd.f32 1e-05, %v4415_v23 }
 0x9f7   : > { %v4412_v24 = vpop.xlane.xlu1 %4411 }
 0x9f8   : > { %9158 = vrsqrt.f32 %v4418_v61  ;;  %v4416_v14 = vmul.f32 0.015625, %v4412_v24  ;;  %v4457_v24 = vld [vmem:[#allocation4] sm:$0xff] }
 0x9f9   : > { %9160 = vrsqrt.f32 %v4419_v13  ;;  %8173 = vmatprep.subr.bf16.mxu1 %v4457_v24 }
 0x9fa   : > { %v4420_v15 = vadd.f32 1e-05, %v4416_v14  ;;  %v4458_v14 = vld [vmem:[#allocation4 + $0x8] sm:$0xff] }
 0x9fc   : > { %9162 = vrsqrt.f32 %v4420_v15  ;;  %v4459_v15 = vld [vmem:[#allocation4 + $0x10] sm:$0xff] }
 0x9fe   : > { %v9157_v40 = vpop.eup %9156 }
 0x9ff   : > { %v4425_v21 = vmul.f32 %v9157_v40, %v11528_v26  ;;  %v4460_v40 = vld [vmem:[#allocation4 + $0x18] sm:$0xff] }
 0xa01   : > { %v4435_v63 = vmul.f32 %v7129_v54, %v4425_v21 }
 0xa02   : > { %v9159_v49 = vpop.eup %9158 }
 0xa03   : > { %v9161_v11 = vpop.eup %9160  ;;  %v4426_v59 = vmul.f32 %v9159_v49, %v4394_v6  ;;  %v4445_v31 = vadd.f32 %v7130_v18, %v4435_v63  ;;  %v4672_v6 = vsel %vm4591_vm1, %v4455_v60, 0 }
 0xa04   : > { %v4427_v17 = vmul.f32 %v9161_v11, %v11531_v38  ;;  %v4453_v38 = vld [vmem:[#allocation3 + $0x20] sm:$0xff] }
 0xa05   : > { %v4436_v9 = vmul.f32 %v7129_v54, %v4426_v59  ;;  %8648 = vmatprep.subr.msk.bf16.mxu0 %vm4591_vm1, %v4453_v38  ;;  %v4666_v32 = vsel %vm4591_vm1, %v4453_v38, 0 }
 0xa06   : > { %v9163_v42 = vpop.eup %9162  ;;  %v4437_v52 = vmul.f32 %v7129_v54, %v4427_v17 }
 0xa07   : > { %v4428_v46 = vmul.f32 %v9163_v42, %v11539_v22  ;;  %v4446_v39 = vadd.f32 %v7130_v18, %v4436_v9  ;;  %v4456_v22 = vld [vmem:[#allocation3 + $0x38] sm:$0xff] }
 0xa08   : > { %v4447_v36 = vadd.f32 %v7130_v18, %v4437_v52  ;;  %v4675_v8 = vsel %vm4591_vm1, %v4456_v22, 0 }
 0xa09   : > { %v4482_v28 = vpack.c.bf16 %v4446_v39, %v4445_v31  ;;  %v4438_v5 = vmul.f32 %v7129_v54, %v4428_v46  ;;  %v4461_v39 = vld [vmem:[#allocation4 + $0x20] sm:$0xff] }
 0xa0b   : > { %8145 = vmatprep.mubr.msk.bf16.mxu0 %vm4375_vm0, %v4482_v28  ;;  %v4448_v26 = vadd.f32 %v7130_v18, %v4438_v5 }
 0xa0d   : > { %v4483_v3 = vpack.c.bf16 %v4448_v26, %v4447_v36 }
 0xa0f   : > { %8146 = vmatmul.mubr.msk.bf16.vlgmr.msra.gmra.mrb[0].mxu0 %vm4375_vm0, %v4483_v3 }
 0xa10   : > { %8162 = vmatpush3.bf16.xpose.msra.mxu0 %v4666_v32 }
 0xa11   : > { %8649 = vmatprep.subr.msk.bf16.mxu0 %vm4591_vm1, %v4454_v33 }
 0xa18   : > { %8164 = vmatpush3.bf16.xpose.msra.mxu0 %v4669_v4 }
 0xa19   : > { %8650 = vmatprep.subr.msk.bf16.mxu0 %vm4591_vm1, %v4455_v60 }
 0xa20   : > { %8166 = vmatpush3.bf16.xpose.msra.mxu0 %v4672_v6 }
 0xa21   : > { %8651 = vmatprep.subr.msk.bf16.mxu0 %vm4591_vm1, %v4456_v22 }
 0xa28   : > { %8168 = vmatpush3.bf16.xpose.msra.mxu0 %v4675_v8 }
 0xae2   : > { %v8147_v12 = vpop.f32.mrb[0].mxu0 }
 0xae3   : > { %v4556_v37 = vpop.f32.mrb[1].mxu0 }
 0xae4   : > { %v8148_v16 = vpop.f32.mrb[2].mxu0 }
 0xae5   : > { %v9077_v34 = vpack.i.bf16 %v8148_v16, %v8147_v12  ;;  %v4588_v25 = vpack.c.bf16 %v8148_v16, %v8147_v12  ;;  %v4559_v35 = vpop.f32.mrb[3].mxu0 }
 0xae6   : > { %v9072_v41 = vpack.i.bf16 %v4559_v35, %v4556_v37  ;;  %v4587_v43 = vpack.c.bf16 %v4559_v35, %v4556_v37  ;;  %v4462_v35 = vld [vmem:[#allocation4 + $0x28] sm:$0xff] }
 0xae7   : > { %9078 = vrot.lane.b32.xlu1 %v9077_v34, %s10000_s26 }
 0xae8   : > { %9073 = vrot.lane.b32.xlu0 %v9072_v41, %s10000_s26  ;;  %8157 = vmatprep.mubr.msk.bf16.mxu1 %vm4591_vm1, %v4587_v43 }
 0xae9   : > { %8158 = vmatmul.mubr.msk.bf16.vlgmr.msra.gmra.mrb[0].mxu1 %vm4591_vm1, %v4588_v25 }
 0xaea   : > { %8174 = vmatpush3.bf16.msra.mxu1 %v4457_v24 }
 0xaeb   : > { %8175 = vmatprep.subr.bf16.mxu1 %v4458_v14 }
 0xaee   : > { %8176 = vmatpush3.bf16.msra.mxu1 %v4458_v14 }
 0xaef   : > { %8177 = vmatprep.subr.bf16.mxu1 %v4459_v15 }
 0xaf2   : > { %8178 = vmatpush3.bf16.msra.mxu1 %v4459_v15 }
 0xaf3   : > { %8179 = vmatprep.subr.bf16.mxu1 %v4460_v40 }
 0xaf6   : > { %8180 = vmatpush3.bf16.msra.mxu1 %v4460_v40 }
 0xaf7   : > { %8185 = vmatprep.subr.bf16.mxu1 %v4461_v39 }
 0xb59   : > { %v9079_v51 = vpop.permute.xlu1 %9078 }
 0xb5a   : > { %v9081_v44 = vunpack.i.h.bf16 %v9079_v51  ;;  %v9080_v45 = vunpack.i.l.bf16 %v9079_v51  ;;  %v9074_v48 = vpop.permute.xlu0 %9073  ;;  %v4463_v51 = vld [vmem:[#allocation4 + $0x30] sm:$0xff] }
 0xb5b   : > { %v9076_v1 = vunpack.i.h.bf16 %v9074_v48  ;;  %v9075_v2 = vunpack.i.l.bf16 %v9074_v48  ;;  %v9097_v48 = vld [vmem:[#allocation18 + $0x8] sm:$0xff]  }
 0xb5c   : > { %v4590_v56 = vpack.c.bf16 %v9081_v44, %v9080_v45  ;;  %v4464_v44 = vld [vmem:[#allocation4 + $0x38] sm:$0xff]  ;;  %v9096_v45 = vld [vmem:[#allocation18] sm:$0xff]  }
 0xb5d   : > { %v4589_v55 = vpack.c.bf16 %v9076_v1, %v9075_v2  ;;  %8197 = vmatprep.subr.bf16.mxu0 %v9096_v45 }
 0xb5f   : > { %8169 = vmatprep.mubr.msk.bf16.mxu0 %vm4591_vm1, %v4589_v55 }
 0xb60   : > { %8170 = vmatmul.mubr.msk.bf16.vlgmr.msra.gmra.mrb[4].mxu0 %vm4591_vm1, %v4590_v56 }
 0xb61   : > { %8198 = vmatpush3.bf16.msra.mxu0 %v9096_v45 }
 0xb62   : > { %8199 = vmatprep.subr.bf16.mxu0 %v9097_v48 }
 0xb65   : > { %8200 = vmatpush3.bf16.msra.mxu0 %v9097_v48 }
 0xbbc   : > { %v8159_v58 = vpop.f32.mrb[0].mxu1 }
 0xbbd   : > { %v4644_v19 = vpop.f32.mrb[1].mxu1  ;;  %v4728_v7 = vmul.f32 0.17677669, %v8159_v58 }
 0xbbe   : > { %v4726_v27 = vmul.f32 0.17677669, %v4644_v19  ;;  %v8160_v62 = vpop.f32.mrb[2].mxu1 }
 0xbbf   : > { %v4647_v10 = vpop.f32.mrb[3].mxu1  ;;  %v4729_v30 = vmul.f32 0.17677669, %v8160_v62  ;;  %v4740_v13 = vsel %vm4375_vm0, %v4728_v7, -inf }
 0xbc0   : > { %v4727_v53 = vmul.f32 0.17677669, %v4647_v10  ;;  %v4734_v57 = vsel %vm4375_vm0, %v4726_v27, -inf }
 0xbc1   : > { %4735 = vmax.xlane.f32.xlu1 %v4734_v57  ;;  %v4743_v61 = vsel %vm4375_vm0, %v4729_v30, -inf }
 0xbc2   : > { %v4737_v23 = vsel %vm4375_vm0, %v4727_v53, -inf }
 0xbc3   : > { %4738 = vmax.xlane.f32.xlu0 %v4737_v23 }
 0xbc5   : > { %4744 = vmax.xlane.f32.xlu1 %v4743_v61 }
 0xbc7   : > { %4741 = vmax.xlane.f32.xlu0 %v4740_v13 }
 0xc33   : > { %v8171_v21 = vpop.f32.mrb[4].mxu0 }
 0xc34   : > { %v4711_v54 = vpop.f32.mrb[5].mxu0  ;;  %v11590_v63 = vmul.f32 0.17677669, %v8171_v21 }
 0xc35   : > { %v11588_v49 = vmul.f32 0.17677669, %v4711_v54  ;;  %v8172_v11 = vpop.f32.mrb[6].mxu0 }
 0xc36   : > { %v4714_v59 = vpop.f32.mrb[7].mxu0  ;;  %v11596_v9 = vmul.f32 0.17677669, %v8172_v11  ;;  %v4752_v46 = vsel %vm4375_vm0, %v11590_v63, -inf }
 0xc37   : > { %v11592_v17 = vmul.f32 0.17677669, %v4714_v59  ;;  %v4746_v18 = vsel %vm4375_vm0, %v11588_v49, -inf }
 0xc38   : > { %4747 = vmax.xlane.f32.xlu0 %v4746_v18  ;;  %v4755_v31 = vsel %vm4375_vm0, %v11596_v9, -inf  ;;  %v9099_v18 = vld [vmem:[#allocation18 + $0x18] sm:$0xff]  }
 0xc39   : > { %v4749_v42 = vsel %vm4375_vm0, %v11592_v17, -inf }
 0xc3a   : > { %4750 = vmax.xlane.f32.xlu1 %v4749_v42 }
 0xc3c   : > { %4753 = vmax.xlane.f32.xlu0 %v4752_v46 }
 0xc3e   : > { %4756 = vmax.xlane.f32.xlu1 %v4755_v31 }
 0xc4e   : > { %v4736_v52 = vpop.xlane.xlu1 %4735 }
 0xc4f   : > { %v4758_v28 = vsub.f32 %v4726_v27, %v4736_v52 }
 0xc50   : > { %v4739_v5 = vpop.xlane.xlu0 %4738 }
 0xc51   : > { %v4766_v36 = vmul.f32 1.442695, %v4758_v28  ;;  %v4759_v26 = vsub.f32 %v4727_v53, %v4739_v5 }
 0xc52   : > { %v4745_v3 = vpop.xlane.xlu1 %4744 }
 0xc53   : > { %v4768_v29 = vmul.f32 1.442695, %v4759_v26  ;;  %v4761_v38 = vsub.f32 %v4729_v30, %v4745_v3  ;;  %9164 = vpow2.f32 %v4766_v36 }
 0xc54   : > { %v4742_v33 = vpop.xlane.xlu0 %4741 }
 0xc55   : > { %9166 = vpow2.f32 %v4768_v29  ;;  %v4772_v32 = vmul.f32 1.442695, %v4761_v38  ;;  %v4760_v4 = vsub.f32 %v4728_v7, %v4742_v33 }
 0xc57   : > { %9168 = vpow2.f32 %v4772_v32  ;;  %v4770_v60 = vmul.f32 1.442695, %v4760_v4 }
 0xc59   : > { %9170 = vpow2.f32 %v4770_v60 }
 0xc5d   : > { %v9165_v6 = vpop.eup %9164 }
 0xc5e   : > { %v4782_v43 = vsel %vm4375_vm0, %v9165_v6, 0.0 }
 0xc5f   : > { %v9167_v22 = vpop.eup %9166 }
 0xc60   : > { %v4806_v8 = vpack.c.bf16 %v9167_v22, %v9165_v6  ;;  %v4785_v41 = vsel %vm4375_vm0, %v9167_v22, 0.0 }
 0xc61   : > { %v9169_v12 = vpop.eup %9168 }
 0xc62   : > { %8181 = vmatprep.mubr.msk.bf16.mxu1 %vm4375_vm0, %v4806_v8  ;;  %v4791_v37 = vsel %vm4375_vm0, %v9169_v12, 0.0 }
 0xc63   : > { %v9171_v16 = vpop.eup %9170  ;;  %4792 = vadd.xlane.f32.xlu1 %v4791_v37 }
 0xc64   : > { %v4788_v34 = vsel %vm4375_vm0, %v9171_v16, 0.0  ;;  %v4807_v25 = vpack.c.bf16 %v9169_v12, %v9171_v16 }
 0xc65   : > { %4789 = vadd.xlane.f32.xlu0 %v4788_v34 }
 0xc66   : > { %8182 = vmatmul.mubr.msk.bf16.vlgmr.msra.gmra.mrb[4].mxu1 %vm4375_vm0, %v4807_v25 }
 0xc67   : > { %4786 = vadd.xlane.f32.xlu1 %v4785_v41  ;;  %8186 = vmatpush3.bf16.msra.mxu1 %v4461_v39 }
 0xc68   : > { %8187 = vmatprep.subr.bf16.mxu1 %v4462_v35 }
 0xc69   : > { %4783 = vadd.xlane.f32.xlu0 %v4782_v43 }
 0xc6b   : > { %8188 = vmatpush3.bf16.msra.mxu1 %v4462_v35 }
 0xc6c   : > { %8189 = vmatprep.subr.bf16.mxu1 %v4463_v51 }
 0xc6f   : > { %8190 = vmatpush3.bf16.msra.mxu1 %v4463_v51 }
 0xc70   : > { %8191 = vmatprep.subr.bf16.mxu1 %v4464_v44 }
 0xc73   : > { %8192 = vmatpush3.bf16.msra.mxu1 %v4464_v44 }
 0xcc5   : > { %v4748_v1 = vpop.xlane.xlu0 %4747 }
 0xcc6   : > { %v4762_v2 = vsub.f32 %v11588_v49, %v4748_v1 }
 0xcc7   : > { %v4751_v55 = vpop.xlane.xlu1 %4750 }
 0xcc8   : > { %v4774_v56 = vmul.f32 1.442695, %v4762_v2  ;;  %v4763_v58 = vsub.f32 %v11592_v17, %v4751_v55  ;;  %v9098_v17 = vld [vmem:[#allocation18 + $0x10] sm:$0xff]  }
 0xcc9   : > { %v4754_v19 = vpop.xlane.xlu0 %4753  ;;  %8205 = vmatprep.subr.bf16.mxu1 %v9098_v17 }
 0xcca   : > { %9172 = vpow2.f32 %v4774_v56  ;;  %v4776_v27 = vmul.f32 1.442695, %v4763_v58  ;;  %v4764_v62 = vsub.f32 %v11590_v63, %v4754_v19 }
 0xccb   : > { %v4757_v10 = vpop.xlane.xlu1 %4756 }
 0xccc   : > { %9174 = vpow2.f32 %v4776_v27  ;;  %v4778_v30 = vmul.f32 1.442695, %v4764_v62  ;;  %v4765_v53 = vsub.f32 %v11596_v9, %v4757_v10 }
 0xcce   : > { %9176 = vpow2.f32 %v4778_v30  ;;  %v4780_v57 = vmul.f32 1.442695, %v4765_v53  ;;  %v7153_v30 = vld [vmem:[#allocation19] ss:$0 sm:$0xff] }
 0xcd0   : > { %9178 = vpow2.f32 %v4780_v57 }
 0xcd4   : > { %v9173_v7 = vpop.eup %9172 }
 0xcd5   : > { %v4794_v23 = vsel %vm4375_vm0, %v9173_v7, 0.0 }
 0xcd6   : > { %v9175_v61 = vpop.eup %9174  ;;  %4795 = vadd.xlane.f32.xlu0 %v4794_v23 }
 0xcd7   : > { %v4797_v13 = vsel %vm4375_vm0, %v9175_v61, 0.0  ;;  %v4808_v24 = vpack.c.bf16 %v9175_v61, %v9173_v7 }
 0xcd8   : > { %v9177_v14 = vpop.eup %9176  ;;  %4798 = vadd.xlane.f32.xlu1 %v4797_v13 }
 0xcd9   : > { %8193 = vmatprep.mubr.msk.bf16.mxu1 %vm4375_vm0, %v4808_v24  ;;  %v4800_v15 = vsel %vm4375_vm0, %v9177_v14, 0.0 }
 0xcda   : > { %v9179_v40 = vpop.eup %9178  ;;  %4801 = vadd.xlane.f32.xlu0 %v4800_v15 }
 0xcdb   : > { %v4803_v21 = vsel %vm4375_vm0, %v9179_v40, 0.0  ;;  %v4809_v54 = vpack.c.bf16 %v9179_v40, %v9177_v14 }
 0xcdc   : > { %4804 = vadd.xlane.f32.xlu1 %v4803_v21 }
 0xcdd   : > { %8194 = vmatmul.mubr.msk.bf16.vlgmr.msra.gmra.mrb[8].mxu1 %vm4375_vm0, %v4809_v54 }
 0xcde   : > { %8206 = vmatpush3.bf16.msra.mxu1 %v9098_v17 }
 0xcdf   : > { %8207 = vmatprep.subr.bf16.mxu1 %v9099_v18 }
 0xce2   : > { %8208 = vmatpush3.bf16.msra.mxu1 %v9099_v18 }
 0xcf0   : > { %v4793_v49 = vpop.xlane.xlu1 %4792 }
 0xcf1   : > { %9180 = vrcp.f32 %v4793_v49 }
 0xcf2   : > { %v4790_v11 = vpop.xlane.xlu0 %4789 }
 0xcf3   : > { %9182 = vrcp.f32 %v4790_v11 }
 0xcf4   : > { %v4787_v59 = vpop.xlane.xlu1 %4786 }
 0xcf5   : > { %9184 = vrcp.f32 %v4787_v59 }
 0xcf6   : > { %v4784_v63 = vpop.xlane.xlu0 %4783 }
 0xcf7   : > { %9186 = vrcp.f32 %v4784_v63 }
 0xcfb   : > { %v9181_v9 = vpop.eup %9180 }
 0xcfd   : > { %v9183_v46 = vpop.eup %9182 }
 0xcff   : > { %v9185_v39 = vpop.eup %9184 }
 0xd01   : > { %v9187_v28 = vpop.eup %9186 }
 0xd39   : > { %v8183_v42 = vpop.f32.mrb[4].mxu1 }
 0xd3a   : > { %v4850_v31 = vpop.f32.mrb[5].mxu1  ;;  %v4930_v5 = vmul.f32 %v9183_v46, %v8183_v42 }
 0xd3b   : > { %v8184_v52 = vpop.f32.mrb[6].mxu1  ;;  %v4928_v3 = vmul.f32 %v9187_v28, %v4850_v31 }
 0xd3c   : > { %v4931_v36 = vmul.f32 %v9181_v9, %v8184_v52  ;;  %v4853_v26 = vpop.f32.mrb[7].mxu1 }
 0xd3d   : > { %v4929_v29 = vmul.f32 %v9185_v39, %v4853_v26 }
 0xd3e   : > { %v4937_v38 = vpack.c.bf16 %v4931_v36, %v4930_v5 }
 0xd3f   : > { %v4936_v33 = vpack.c.bf16 %v4929_v29, %v4928_v3 }
 0xd41   : > { %8201 = vmatprep.mubr.msk.bf16.mxu0 %vm4591_vm1, %v4936_v33 }
 0xd42   : > { %8202 = vmatmul.mubr.msk.bf16.vlgmr.msra.gmra.mrb[8].mxu0 %vm4591_vm1, %v4937_v38 }
 0xd63   : > { %v4796_v32 = vpop.xlane.xlu0 %4795 }
 0xd64   : > { %9188 = vrcp.f32 %v4796_v32 }
 0xd65   : > { %v4799_v4 = vpop.xlane.xlu1 %4798 }
 0xd67   : > { %v4802_v60 = vpop.xlane.xlu0 %4801 }
 0xd68   : > { %9190 = vrcp.f32 %v4802_v60 }
 0xd69   : > { %v4805_v6 = vpop.xlane.xlu1 %4804 }
 0xd6a   : > { %9192 = vrcp.f32 %v4805_v6 }
 0xd6b   : > { %9194 = vrcp.f32 %v4799_v4 }
 0xd6e   : > { %v9189_v22 = vpop.eup %9188 }
 0xd72   : > { %v9191_v12 = vpop.eup %9190 }
 0xd74   : > { %v9193_v16 = vpop.eup %9192 }
 0xd75   : > { %v9195_v25 = vpop.eup %9194 }
 0xdb0   : > { %v8195_v8 = vpop.f32.mrb[8].mxu1 }
 0xdb1   : > { %v4905_v37 = vpop.f32.mrb[9].mxu1  ;;  %v4934_v35 = vmul.f32 %v9191_v12, %v8195_v8 }
 0xdb2   : > { %v8196_v34 = vpop.f32.mrb[10].mxu1  ;;  %v4932_v51 = vmul.f32 %v9189_v22, %v4905_v37 }
 0xdb3   : > { %v4935_v41 = vmul.f32 %v9193_v16, %v8196_v34  ;;  %v4908_v43 = vpop.f32.mrb[11].mxu1  ;;  %v9101_v34 = vld [vmem:[#allocation24 + $0x8] sm:$0xff]  }
 0xdb4   : > { %v4933_v44 = vmul.f32 %v9195_v25, %v4908_v43  ;;  %v5227_v25 = vsel %vm4375_vm0, %v9101_v34, 0  ;;  %v9103_v43 = vld [vmem:[#allocation24 + $0x18] sm:$0xff]  }
 0xdb5   : > { %v4939_v45 = vpack.c.bf16 %v4935_v41, %v4934_v35  ;;  %v9102_v35 = vld [vmem:[#allocation24 + $0x10] sm:$0xff]  }
 0xdb6   : > { %v4938_v48 = vpack.c.bf16 %v4933_v44, %v4932_v51  ;;  %v5230_v41 = vsel %vm4375_vm0, %v9102_v35, 0  ;;  %v5233_v51 = vsel %vm4375_vm0, %v9103_v43, 0  ;;  %v5174_v44 = vld [vmem:[#allocation5] sm:$0xff] }
 0xdb7   : > { %8656 = vmatprep.subr.msk.bf16.mxu1 %vm4591_vm1, %v5174_v44 }
 0xdb8   : > { %8209 = vmatprep.mubr.msk.bf16.mxu1 %vm4591_vm1, %v4938_v48 }
 0xdb9   : > { %8210 = vmatmul.mubr.msk.bf16.vlgmr.msra.gmra.mrb[12].mxu1 %vm4591_vm1, %v4939_v45 }
 0xe15   : > { %v8203_v1 = vpop.f32.mrb[8].mxu0 }
 0xe16   : > { %v4992_v2 = vpop.f32.mrb[9].mxu0  ;;  %v5080_v19 = vsel %vm4375_vm0, %v8203_v1, 0.0 }
 0xe17   : > { %v8204_v55 = vpop.f32.mrb[10].mxu0  ;;  %v5074_v10 = vsel %vm4375_vm0, %v4992_v2, 0.0 }
 0xe18   : > { %v4995_v56 = vpop.f32.mrb[11].mxu0  ;;  %v5083_v23 = vsel %vm4375_vm0, %v8204_v55, 0.0 }
 0xe19   : > { %v5077_v14 = vsel %vm4375_vm0, %v4995_v56, 0.0 }
 0xe8c   : > { %v8211_v58 = vpop.f32.mrb[12].mxu1 }
 0xe8d   : > { %v5081_v27 = vsel %vm4375_vm0, %v8211_v58, 0.0  ;;  %v5059_v62 = vpop.f32.mrb[13].mxu1 }
 0xe8e   : > { %v5082_v53 = vadd.f32 %v5081_v27, %v5080_v19  ;;  %v5075_v57 = vsel %vm4375_vm0, %v5059_v62, 0.0  ;;  %v8212_v7 = vpop.f32.mrb[14].mxu1 }
 0xe8f   : > { %v5076_v61 = vadd.f32 %v5075_v57, %v5074_v10  ;;  %v5084_v13 = vsel %vm4375_vm0, %v8212_v7, 0.0  ;;  %v5062_v24 = vpop.f32.mrb[15].mxu1  ;;  %v7154_v57 = vld [vmem:[#allocation21] ss:$0 sm:$0xff] }
 0xe90   : > { %v5085_v15 = vadd.f32 %v5084_v13, %v5083_v23  ;;  %v5078_v40 = vsel %vm4375_vm0, %v5062_v24, 0.0  ;;  %v5094_v21 = vadd.f32 %v7153_v30, %v5082_v53 }
 0xe91   : > { %v5092_v54 = vadd.f32 %v7153_v30, %v5076_v61  ;;  %v5079_v49 = vadd.f32 %v5078_v40, %v5077_v14  ;;  %v7155_v14 = vld [vmem:[#allocation22] ss:$0 sm:$0xff] }
 0xe92   : > { %v5095_v11 = vadd.f32 %v7153_v30, %v5085_v15  ;;  %v11641_v9 = vadd.f32 %v5094_v21, %v11511_v20 }
 0xe93   : > { %v5093_v59 = vadd.f32 %v7153_v30, %v5079_v49  ;;  %v11633_v63 = vadd.f32 %v5092_v54, %v11509_v0 }
 0xe94   : > { %v11646_v46 = vadd.f32 %v5095_v11, %v11521_v50  ;;  %v5108_v0 = vsel %vm4375_vm0, %v11641_v9, 0.0 }
 0xe95   : > { %v5102_v17 = vsel %vm4375_vm0, %v11633_v63, 0.0  ;;  %v11638_v18 = vadd.f32 %v5093_v59, %v11513_v47  ;;  %v9100_v47 = vld [vmem:[#allocation24] sm:$0xff]  }
 0xe96   : > { %5103 = vadd.xlane.f32.xlu0 %v5102_v17  ;;  %v5111_v31 = vsel %vm4375_vm0, %v11646_v46, 0.0  ;;  %8652 = vmatprep.subr.msk.bf16.mxu0 %vm4375_vm0, %v9100_v47  ;;  %v5224_v20 = vsel %vm4375_vm0, %v9100_v47, 0 }
 0xe97   : > { %v5105_v42 = vsel %vm4375_vm0, %v11638_v18, 0.0  ;;  %8214 = vmatpush3.bf16.xpose.msra.mxu0 %v5224_v20  ;;  %v5311_v20 = vsel %vm4591_vm1, %v5174_v44, 0 }
 0xe98   : > { %5106 = vadd.xlane.f32.xlu1 %v5105_v42  ;;  %8653 = vmatprep.subr.msk.bf16.mxu0 %vm4375_vm0, %v9101_v34 }
 0xe99   : > { %8226 = vmatpush3.bf16.xpose.msra.mxu1 %v5311_v20 }
 0xe9a   : > { %5109 = vadd.xlane.f32.xlu0 %v5108_v0 }
 0xe9c   : > { %5112 = vadd.xlane.f32.xlu1 %v5111_v31 }
 0xe9f   : > { %8216 = vmatpush3.bf16.xpose.msra.mxu0 %v5227_v25 }
 0xea0   : > { %8654 = vmatprep.subr.msk.bf16.mxu0 %vm4375_vm0, %v9102_v35 }
 0xea7   : > { %8218 = vmatpush3.bf16.xpose.msra.mxu0 %v5230_v41 }
 0xea8   : > { %8655 = vmatprep.subr.msk.bf16.mxu0 %vm4375_vm0, %v9103_v43 }
 0xeaf   : > { %8220 = vmatpush3.bf16.xpose.msra.mxu0 %v5233_v51 }
 0xf23   : > { %v5104_v39 = vpop.xlane.xlu0 %5103 }
 0xf24   : > { %v5114_v52 = vmul.f32 0.015625, %v5104_v39  ;;  %v5175_v39 = vld [vmem:[#allocation5 + $0x8] sm:$0xff] }
 0xf25   : > { %v5107_v28 = vpop.xlane.xlu1 %5106  ;;  %8657 = vmatprep.subr.msk.bf16.mxu1 %vm4591_vm1, %v5175_v39 }
 0xf26   : > { %v5118_v50 = vsub.f32 %v11633_v63, %v5114_v52  ;;  %v5115_v5 = vmul.f32 0.015625, %v5107_v28 }
 0xf27   : > { %v5110_v36 = vpop.xlane.xlu0 %5109 }
 0xf28   : > { %v5119_v26 = vsub.f32 %v11638_v18, %v5115_v5  ;;  %v5116_v3 = vmul.f32 0.015625, %v5110_v36  ;;  %v5122_v29 = vmul.f32 %v5118_v50, %v5118_v50 }
 0xf29   : > { %v5113_v38 = vpop.xlane.xlu1 %5112 }
 0xf2a   : > { %v5120_v33 = vsub.f32 %v11641_v9, %v5116_v3  ;;  %v5117_v32 = vmul.f32 0.015625, %v5113_v38  ;;  %v5126_v4 = vsel %vm4375_vm0, %v5122_v29, 0.0  ;;  %v5123_v60 = vmul.f32 %v5119_v26, %v5119_v26 }
 0xf2b   : > { %5127 = vadd.xlane.f32.xlu0 %v5126_v4  ;;  %v5369_v38 = vsel %vm4591_vm1, %v5175_v39, 0 }
 0xf2c   : > { %v5121_v6 = vsub.f32 %v11646_v46, %v5117_v32  ;;  %v5129_v22 = vsel %vm4375_vm0, %v5123_v60, 0.0  ;;  %v5124_v8 = vmul.f32 %v5120_v33, %v5120_v33 }
 0xf2d   : > { %5130 = vadd.xlane.f32.xlu1 %v5129_v22 }
 0xf2e   : > { %v5132_v12 = vsel %vm4375_vm0, %v5124_v8, 0.0  ;;  %v5125_v37 = vmul.f32 %v5121_v6, %v5121_v6 }
 0xf2f   : > { %5133 = vadd.xlane.f32.xlu0 %v5132_v12 }
 0xf30   : > { %v5135_v16 = vsel %vm4375_vm0, %v5125_v37, 0.0 }
 0xf31   : > { %5136 = vadd.xlane.f32.xlu1 %v5135_v16 }
 0xfb8   : > { %v5128_v45 = vpop.xlane.xlu0 %5127 }
 0xfb9   : > { %v5138_v48 = vmul.f32 0.015625, %v5128_v45 }
 0xfba   : > { %v5131_v1 = vpop.xlane.xlu1 %5130 }
 0xfbb   : > { %v5142_v2 = vadd.f32 1e-05, %v5138_v48  ;;  %v5139_v55 = vmul.f32 0.015625, %v5131_v1 }
 0xfbc   : > { %v5134_v56 = vpop.xlane.xlu0 %5133 }
 0xfbd   : > { %9196 = vrsqrt.f32 %v5142_v2  ;;  %v5143_v58 = vadd.f32 1e-05, %v5139_v55  ;;  %v5140_v19 = vmul.f32 0.015625, %v5134_v56  ;;  %v5176_v2 = vld [vmem:[#allocation6] sm:$0xff] }
 0xfbe   : > { %v5137_v27 = vpop.xlane.xlu1 %5136 }
 0xfbf   : > { %9198 = vrsqrt.f32 %v5143_v58  ;;  %v5144_v62 = vadd.f32 1e-05, %v5140_v19  ;;  %v5141_v10 = vmul.f32 0.015625, %v5137_v27 }
 0xfc1   : > { %9200 = vrsqrt.f32 %v5144_v62  ;;  %v5145_v30 = vadd.f32 1e-05, %v5141_v10 }
 0xfc3   : > { %9202 = vrsqrt.f32 %v5145_v30 }
 0xfc7   : > { %v9197_v53 = vpop.eup %9196 }
 0xfc8   : > { %v5150_v7 = vmul.f32 %v9197_v53, %v5118_v50 }
 0xfc9   : > { %v9199_v23 = vpop.eup %9198 }
 0xfca   : > { %v5151_v61 = vmul.f32 %v9199_v23, %v5119_v26  ;;  %v5160_v13 = vmul.f32 %v7154_v57, %v5150_v7 }
 0xfcb   : > { %v9201_v24 = vpop.eup %9200 }
 0xfcc   : > { %v5152_v15 = vmul.f32 %v9201_v24, %v5120_v33  ;;  %v5161_v40 = vmul.f32 %v7154_v57, %v5151_v61  ;;  %v5170_v11 = vadd.f32 %v7155_v14, %v5160_v13 }
 0xfcd   : > { %v9203_v21 = vpop.eup %9202 }
 0xfce   : > { %v5162_v54 = vmul.f32 %v7154_v57, %v5152_v15  ;;  %v5153_v49 = vmul.f32 %v9203_v21, %v5121_v6  ;;  %v5171_v59 = vadd.f32 %v7155_v14, %v5161_v40 }
 0xfd0   : > { %v5163_v17 = vmul.f32 %v7154_v57, %v5153_v49  ;;  %v5195_v42 = vpack.c.bf16 %v5171_v59, %v5170_v11  ;;  %v5172_v0 = vadd.f32 %v7155_v14, %v5162_v54 }
 0xfd2   : > { %8221 = vmatprep.mubr.msk.bf16.mxu0 %vm4375_vm0, %v5195_v42  ;;  %v5173_v31 = vadd.f32 %v7155_v14, %v5163_v17  ;;  %v5177_v14 = vld [vmem:[#allocation6 + $0x8] sm:$0xff] }
 0xfd4   : > { %v5196_v47 = vpack.c.bf16 %v5173_v31, %v5172_v0 }
 0xfd6   : > { %8222 = vmatmul.mubr.msk.bf16.vlgmr.msra.gmra.mrb[12].mxu0 %vm4375_vm0, %v5196_v47 }
0x10a9   : > { %v8223_v52 = vpop.f32.mrb[12].mxu0 }
0x10aa   : > { %v5269_v28 = vpop.f32.mrb[13].mxu0 }
0x10ab   : > { %v8224_v50 = vpop.f32.mrb[14].mxu0 }
0x10ac   : > { %v9087_v5 = vpack.i.bf16 %v8224_v50, %v8223_v52  ;;  %v5301_v36 = vpack.c.bf16 %v8224_v50, %v8223_v52  ;;  %v5272_v26 = vpop.f32.mrb[15].mxu0 }
0x10ad   : > { %v9082_v3 = vpack.i.bf16 %v5272_v26, %v5269_v28  ;;  %v5300_v29 = vpack.c.bf16 %v5272_v26, %v5269_v28  ;;  %v9104_v26 = vld [vmem:[#allocation28] sm:$0xff]  }
0x10ae   : > { %9088 = vrot.lane.b32.xlu1 %v9087_v5, %s10000_s26  ;;  %8249 = vmatprep.subr.bf16.mxu0 %v9104_v26 }
0x10af   : > { %9083 = vrot.lane.b32.xlu0 %v9082_v3, %s10000_s26  ;;  %8227 = vmatprep.mubr.msk.bf16.mxu1 %vm4591_vm1, %v5300_v29  ;;  %v9105_v3 = vld [vmem:[#allocation28 + $0x8] sm:$0xff]   ;;  %s12109_s26 = sld [smem:[#allocation66_spill]] }
0x10b0   : > { %8228 = vmatmul.mubr.msk.bf16.vlgmr.msra.gmra.mrb[16].mxu1 %vm4591_vm1, %v5301_v36  ;;  %8250 = vmatpush3.bf16.msra.mxu0 %v9104_v26 }
0x10b1   : > { %8232 = vmatpush3.bf16.xpose.msra.mxu1 %v5369_v38  ;;  %8251 = vmatprep.subr.bf16.mxu0 %v9105_v3 }
0x10b2   : > { %8237 = vmatprep.subr.bf16.mxu1 %v5176_v2 }
0x10b4   : > { %8252 = vmatpush3.bf16.msra.mxu0 %v9105_v3 }
0x10b5   : > { %s12110_s0 = smov %s12109_s26 }
0x1120   : > { %v9089_v33 = vpop.permute.xlu1 %9088 }
0x1121   : > { %v9091_v32 = vunpack.i.h.bf16 %v9089_v33  ;;  %v9090_v4 = vunpack.i.l.bf16 %v9089_v33  ;;  %v9084_v60 = vpop.permute.xlu0 %9083 }
0x1122   : > { %v9086_v6 = vunpack.i.h.bf16 %v9084_v60  ;;  %v9085_v22 = vunpack.i.l.bf16 %v9084_v60 }
0x1123   : > { %v5303_v12 = vpack.c.bf16 %v9091_v32, %v9090_v4 }
0x1124   : > { %v5302_v8 = vpack.c.bf16 %v9086_v6, %v9085_v22 }
0x1126   : > { %8233 = vmatprep.mubr.msk.bf16.mxu1 %vm4591_vm1, %v5302_v8 }
0x1127   : > { %8234 = vmatmul.mubr.msk.bf16.vlgmr.msra.gmra.mrb[20].mxu1 %vm4591_vm1, %v5303_v12 }
0x1128   : > { %8238 = vmatpush3.bf16.msra.mxu1 %v5176_v2 }
0x1129   : > { %8243 = vmatprep.subr.bf16.mxu1 %v5177_v14 }
0x1183   : > { %v8229_v37 = vpop.f32.mrb[16].mxu1 }
0x1184   : > { %v5347_v16 = vpop.f32.mrb[17].mxu1  ;;  %v5422_v44 = vmul.f32 0.17677669, %v8229_v37 }
0x1185   : > { %v5420_v34 = vmul.f32 0.17677669, %v5347_v16  ;;  %v8230_v25 = vpop.f32.mrb[18].mxu1 }
0x1186   : > { %v5350_v35 = vpop.f32.mrb[19].mxu1  ;;  %v5423_v41 = vmul.f32 0.17677669, %v8230_v25  ;;  %v5435_v1 = vsel %vm5428_vm14, %v5422_v44, -inf }
0x1187   : > { %v5421_v43 = vmul.f32 0.17677669, %v5350_v35  ;;  %v5429_v51 = vsel %vm5428_vm14, %v5420_v34, -inf }
0x1188   : > { %5430 = vmax.xlane.f32.xlu1 %v5429_v51  ;;  %v5438_v48 = vsel %vm5428_vm14, %v5423_v41, -inf }
0x1189   : > { %v5432_v45 = vsel %vm5428_vm14, %v5421_v43, -inf }
0x118a   : > { %5433 = vmax.xlane.f32.xlu0 %v5432_v45 }
0x118c   : > { %5439 = vmax.xlane.f32.xlu1 %v5438_v48 }
0x118e   : > { %5436 = vmax.xlane.f32.xlu0 %v5435_v1 }
0x11fa   : > { %v8235_v55 = vpop.f32.mrb[20].mxu1 }
0x11fb   : > { %v5405_v56 = vpop.f32.mrb[21].mxu1  ;;  %v11684_v62 = vmul.f32 0.17677669, %v8235_v55 }
0x11fc   : > { %v5424_v58 = vmul.f32 0.17677669, %v5405_v56  ;;  %v8236_v19 = vpop.f32.mrb[22].mxu1 }
0x11fd   : > { %v5408_v27 = vpop.f32.mrb[23].mxu1  ;;  %v5427_v53 = vmul.f32 0.17677669, %v8236_v19  ;;  %v5447_v7 = vsel %vm5428_vm14, %v11684_v62, -inf  ;;  %v9106_v19 = vld [vmem:[#allocation28 + $0x10] sm:$0xff]  }
0x11fe   : > { %v5425_v10 = vmul.f32 0.17677669, %v5408_v27  ;;  %v5441_v30 = vsel %vm5428_vm14, %v5424_v58, -inf  ;;  %v9107_v27 = vld [vmem:[#allocation28 + $0x18] sm:$0xff]  }
0x11ff   : > { %5442 = vmax.xlane.f32.xlu0 %v5441_v30  ;;  %v5450_v23 = vsel %vm5428_vm14, %v5427_v53, -inf }
0x1200   : > { %v5444_v57 = vsel %vm5428_vm14, %v5425_v10, -inf }
0x1201   : > { %5445 = vmax.xlane.f32.xlu1 %v5444_v57 }
0x1203   : > { %5448 = vmax.xlane.f32.xlu0 %v5447_v7 }
0x1205   : > { %5451 = vmax.xlane.f32.xlu1 %v5450_v23 }
0x1215   : > { %v5431_v61 = vpop.xlane.xlu1 %5430 }
0x1216   : > { %v5453_v13 = vsub.f32 %v5420_v34, %v5431_v61 }
0x1217   : > { %v5434_v24 = vpop.xlane.xlu0 %5433 }
0x1218   : > { %v5461_v15 = vmul.f32 1.442695, %v5453_v13  ;;  %v5454_v40 = vsub.f32 %v5421_v43, %v5434_v24 }
0x1219   : > { %v5440_v21 = vpop.xlane.xlu1 %5439 }
0x121a   : > { %v5463_v54 = vmul.f32 1.442695, %v5454_v40  ;;  %v5456_v49 = vsub.f32 %v5423_v41, %v5440_v21  ;;  %9204 = vpow2.f32 %v5461_v15 }
0x121b   : > { %v5437_v11 = vpop.xlane.xlu0 %5436 }
0x121c   : > { %9206 = vpow2.f32 %v5463_v54  ;;  %v5467_v59 = vmul.f32 1.442695, %v5456_v49  ;;  %v5455_v17 = vsub.f32 %v5422_v44, %v5437_v11 }
0x121e   : > { %9208 = vpow2.f32 %v5467_v59  ;;  %v5465_v42 = vmul.f32 1.442695, %v5455_v17 }
0x1220   : > { %9210 = vpow2.f32 %v5465_v42 }
0x1224   : > { %v9205_v0 = vpop.eup %9204 }
0x1225   : > { %v5477_v36 = vsel %vm5428_vm14, %v9205_v0, 0.0 }
0x1226   : > { %v9207_v31 = vpop.eup %9206 }
0x1227   : > { %v5501_v47 = vpack.c.bf16 %v9207_v31, %v9205_v0  ;;  %v5480_v5 = vsel %vm5428_vm14, %v9207_v31, 0.0 }
0x1228   : > { %v9209_v20 = vpop.eup %9208 }
0x1229   : > { %8239 = vmatprep.mubr.msk.bf16.mxu1 %vm5428_vm14, %v5501_v47  ;;  %v5486_v39 = vsel %vm5428_vm14, %v9209_v20, 0.0 }
0x122a   : > { %v9211_v52 = vpop.eup %9210  ;;  %5487 = vadd.xlane.f32.xlu1 %v5486_v39 }
0x122b   : > { %v5483_v28 = vsel %vm5428_vm14, %v9211_v52, 0.0  ;;  %v5502_v50 = vpack.c.bf16 %v9209_v20, %v9211_v52 }
0x122c   : > { %5484 = vadd.xlane.f32.xlu0 %v5483_v28 }
0x122d   : > { %8240 = vmatmul.mubr.msk.bf16.vlgmr.msra.gmra.mrb[24].mxu1 %vm5428_vm14, %v5502_v50 }
0x122e   : > { %5481 = vadd.xlane.f32.xlu1 %v5480_v5  ;;  %8244 = vmatpush3.bf16.msra.mxu1 %v5177_v14 }
0x122f   : > { %8257 = vmatprep.subr.bf16.mxu1 %v9106_v19 }
0x1230   : > { %5478 = vadd.xlane.f32.xlu0 %v5477_v36 }
0x128c   : > { %v5443_v29 = vpop.xlane.xlu0 %5442 }
0x128d   : > { %v5457_v38 = vsub.f32 %v5424_v58, %v5443_v29 }
0x128e   : > { %v5446_v33 = vpop.xlane.xlu1 %5445 }
0x128f   : > { %v5469_v32 = vmul.f32 1.442695, %v5457_v38  ;;  %v5458_v4 = vsub.f32 %v5425_v10, %v5446_v33 }
0x1290   : > { %v5449_v60 = vpop.xlane.xlu0 %5448 }
0x1291   : > { %9212 = vpow2.f32 %v5469_v32  ;;  %v5471_v6 = vmul.f32 1.442695, %v5458_v4  ;;  %v5459_v22 = vsub.f32 %v11684_v62, %v5449_v60 }
0x1292   : > { %v5452_v8 = vpop.xlane.xlu1 %5451 }
0x1293   : > { %9214 = vpow2.f32 %v5471_v6  ;;  %v5473_v12 = vmul.f32 1.442695, %v5459_v22  ;;  %v5460_v37 = vsub.f32 %v5427_v53, %v5452_v8 }
0x1295   : > { %9216 = vpow2.f32 %v5473_v12  ;;  %v5475_v16 = vmul.f32 1.442695, %v5460_v37  ;;  %v7178_v12 = vld [vmem:[#allocation30] ss:$0 sm:$0xff] }
0x1297   : > { %9218 = vpow2.f32 %v5475_v16 }
0x129b   : > { %v9213_v34 = vpop.eup %9212 }
0x129c   : > { %v5489_v25 = vsel %vm5428_vm14, %v9213_v34, 0.0 }
0x129d   : > { %v9215_v35 = vpop.eup %9214  ;;  %5490 = vadd.xlane.f32.xlu0 %v5489_v25 }
0x129e   : > { %v5492_v41 = vsel %vm5428_vm14, %v9215_v35, 0.0  ;;  %v5503_v43 = vpack.c.bf16 %v9215_v35, %v9213_v34 }
0x129f   : > { %v9217_v51 = vpop.eup %9216  ;;  %5493 = vadd.xlane.f32.xlu1 %v5492_v41 }
0x12a0   : > { %8245 = vmatprep.mubr.msk.bf16.mxu1 %vm5428_vm14, %v5503_v43  ;;  %v5495_v44 = vsel %vm5428_vm14, %v9217_v51, 0.0 }
0x12a1   : > { %v9219_v45 = vpop.eup %9218  ;;  %5496 = vadd.xlane.f32.xlu0 %v5495_v44 }
0x12a2   : > { %v5498_v48 = vsel %vm5428_vm14, %v9219_v45, 0.0  ;;  %v5504_v1 = vpack.c.bf16 %v9219_v45, %v9217_v51 }
0x12a3   : > { %5499 = vadd.xlane.f32.xlu1 %v5498_v48 }
0x12a4   : > { %8246 = vmatmul.mubr.msk.bf16.vlgmr.msra.gmra.mrb[28].mxu1 %vm5428_vm14, %v5504_v1 }
0x12a5   : > { %8258 = vmatpush3.bf16.msra.mxu1 %v9106_v19 }
0x12a6   : > { %8259 = vmatprep.subr.bf16.mxu1 %v9107_v27 }
0x12a9   : > { %8260 = vmatpush3.bf16.msra.mxu1 %v9107_v27 }
0x12b7   : > { %v5488_v2 = vpop.xlane.xlu1 %5487 }
0x12b8   : > { %9220 = vrcp.f32 %v5488_v2 }
0x12b9   : > { %v5485_v55 = vpop.xlane.xlu0 %5484 }
0x12ba   : > { %9222 = vrcp.f32 %v5485_v55 }
0x12bb   : > { %v5482_v56 = vpop.xlane.xlu1 %5481 }
0x12bc   : > { %9224 = vrcp.f32 %v5482_v56 }
0x12bd   : > { %v5479_v58 = vpop.xlane.xlu0 %5478 }
0x12be   : > { %9226 = vrcp.f32 %v5479_v58 }
0x12c2   : > { %v9221_v62 = vpop.eup %9220 }
0x12c4   : > { %v9223_v30 = vpop.eup %9222 }
0x12c6   : > { %v9225_v57 = vpop.eup %9224 }
0x12c8   : > { %v9227_v23 = vpop.eup %9226 }
0x1300   : > { %v8241_v10 = vpop.f32.mrb[24].mxu1 }
0x1301   : > { %v5545_v53 = vpop.f32.mrb[25].mxu1  ;;  %v5625_v61 = vmul.f32 %v9223_v30, %v8241_v10 }
0x1302   : > { %v8242_v7 = vpop.f32.mrb[26].mxu1  ;;  %v5623_v14 = vmul.f32 %v9227_v23, %v5545_v53  ;;  %v9109_v53 = vld [vmem:[%s12107_s15 + $0x40] sm:$0xff]   ;;  %v9112_v23 = vld [vmem:[%s12106_s2 + $0x48] sm:$0xff]   ;;  %s12113_s15 = sld [smem:[#allocation64_spill]] }
0x1303   : > { %v5626_v13 = vmul.f32 %v9221_v62, %v8242_v7  ;;  %v5548_v24 = vpop.f32.mrb[27].mxu1  ;;  %v9111_v7 = vld [vmem:[%s12108_s10] sm:$0xff]   ;;  %8666 = vmatprep.subr.msk.bf16.mxu1 %vm4375_vm0, %v9109_v53 }
0x1304   : > { %v5624_v15 = vmul.f32 %v9225_v57, %v5548_v24  ;;  %v9110_v57 = vld [vmem:[%s12106_s2] sm:$0xff]   ;;  %v9114_v24 = vld [vmem:[%s12106_s2 + $0x8] sm:$0xff]  }
0x1305   : > { %v5632_v40 = vpack.c.bf16 %v5626_v13, %v5625_v61  ;;  %v6002_v61 = vsel %vm4375_vm0, %v9110_v57, 0  ;;  %v6227_v13 = vsel %vm4375_vm0, %v9111_v7, 0  ;;  %v9136_v57 = vld [vmem:[%s12106_s2 + $0x78] sm:$0xff]  }
0x1306   : > { %v5631_v21 = vpack.c.bf16 %v5624_v15, %v5623_v14  ;;  %v9115_v14 = vld [vmem:[%s12108_s10 + $0x8] sm:$0xff]   ;;  %v6005_v15 = vsel %vm4375_vm0, %v9114_v24, 0  ;;  %v9137_v7 = vld [vmem:[%s12108_s10 + $0x78] sm:$0xff]  }
0x1308   : > { %8253 = vmatprep.mubr.msk.bf16.mxu0 %vm4591_vm1, %v5631_v21  ;;  %v6230_v21 = vsel %vm4375_vm0, %v9115_v14, 0 }
0x1309   : > { %8254 = vmatmul.mubr.msk.bf16.vlgmr.msra.gmra.mrb[16].mxu0 %vm4591_vm1, %v5632_v40  ;;  %v9116_v40 = vld [vmem:[%s12106_s2 + $0x50] sm:$0xff]  }
0x132a   : > { %v5491_v54 = vpop.xlane.xlu0 %5490 }
0x132b   : > { %9228 = vrcp.f32 %v5491_v54  ;;  %v9117_v54 = vld [vmem:[%s12108_s10 + $0x50] sm:$0xff]  }
0x132c   : > { %v5494_v49 = vpop.xlane.xlu1 %5493 }
0x132e   : > { %v5497_v11 = vpop.xlane.xlu0 %5496 }
0x132f   : > { %9230 = vrcp.f32 %v5497_v11  ;;  %v9119_v11 = vld [vmem:[%s12108_s10 + $0x10] sm:$0xff]  }
0x1330   : > { %v5500_v59 = vpop.xlane.xlu1 %5499 }
0x1331   : > { %9232 = vrcp.f32 %v5500_v59 }
0x1332   : > { %9234 = vrcp.f32 %v5494_v49  ;;  %v9118_v49 = vld [vmem:[%s12106_s2 + $0x10] sm:$0xff]  }
0x1333   : > { %v6008_v59 = vsel %vm4375_vm0, %v9118_v49, 0 }
0x1335   : > { %v9229_v17 = vpop.eup %9228 }
0x1339   : > { %v9231_v0 = vpop.eup %9230 }
0x133b   : > { %v9233_v47 = vpop.eup %9232 }
0x133c   : > { %v9235_v39 = vpop.eup %9234 }
0x1377   : > { %v8247_v42 = vpop.f32.mrb[28].mxu1 }
0x1378   : > { %v5600_v31 = vpop.f32.mrb[29].mxu1  ;;  %v5629_v52 = vmul.f32 %v9231_v0, %v8247_v42  ;;  %v6233_v42 = vsel %vm4375_vm0, %v9119_v11, 0  ;;  %v9121_v0 = vld [vmem:[%s12108_s10 + $0x58] sm:$0xff]  }
0x1379   : > { %v8248_v20 = vpop.f32.mrb[30].mxu1  ;;  %v5627_v5 = vmul.f32 %v9229_v17, %v5600_v31  ;;  %v9120_v17 = vld [vmem:[%s12106_s2 + $0x58] sm:$0xff]  }
0x137a   : > { %v5630_v28 = vmul.f32 %v9233_v47, %v8248_v20  ;;  %v5603_v50 = vpop.f32.mrb[31].mxu1  ;;  %v9122_v31 = vld [vmem:[%s12106_s2 + $0x18] sm:$0xff]  }
0x137b   : > { %v5628_v36 = vmul.f32 %v9235_v39, %v5603_v50  ;;  %v9123_v47 = vld [vmem:[%s12108_s10 + $0x18] sm:$0xff]   ;;  %v6011_v20 = vsel %vm4375_vm0, %v9122_v31, 0  ;;  %v9124_v39 = vld [vmem:[%s12106_s2 + $0x60] sm:$0xff]  }
0x137c   : > { %v5634_v26 = vpack.c.bf16 %v5630_v28, %v5629_v52  ;;  %v6236_v52 = vsel %vm4375_vm0, %v9123_v47, 0  ;;  %v9125_v28 = vld [vmem:[%s12108_s10 + $0x60] sm:$0xff]   ;;  %v7179_v47 = vld [vmem:[#allocation31] ss:$0 sm:$0xff] }
0x137d   : > { %v5633_v3 = vpack.c.bf16 %v5628_v36, %v5627_v5  ;;  %v9126_v50 = vld [vmem:[%s12106_s2 + $0x20] sm:$0xff]  }
0x137e   : > { %v9127_v5 = vld [vmem:[%s12108_s10 + $0x20] sm:$0xff]   ;;  %v6014_v36 = vsel %vm4375_vm0, %v9126_v50, 0 }
0x137f   : > { %8261 = vmatprep.mubr.msk.bf16.mxu1 %vm4591_vm1, %v5633_v3 }
0x1380   : > { %8262 = vmatmul.mubr.msk.bf16.vlgmr.msra.gmra.mrb[32].mxu1 %vm4591_vm1, %v5634_v26  ;;  %v6239_v26 = vsel %vm4375_vm0, %v9127_v5, 0  ;;  %v7180_v5 = vld [vmem:[#allocation33] ss:$0 sm:$0xff] }
0x1381   : > { %7584 = vmatpush3.bf16.xpose.msra.mxu1 %v6227_v13 }
0x13dc   : > { %v8255_v29 = vpop.f32.mrb[16].mxu0 }
0x13dd   : > { %v5687_v38 = vpop.f32.mrb[17].mxu0  ;;  %v5775_v60 = vsel %vm4375_vm0, %v8255_v29, 0.0 }
0x13de   : > { %v8256_v33 = vpop.f32.mrb[18].mxu0  ;;  %v5769_v8 = vsel %vm4375_vm0, %v5687_v38, 0.0 }
0x13df   : > { %v5690_v32 = vpop.f32.mrb[19].mxu0  ;;  %v5778_v25 = vsel %vm4375_vm0, %v8256_v33, 0.0 }
0x13e0   : > { %v5772_v51 = vsel %vm4375_vm0, %v5690_v32, 0.0 }
0x1453   : > { %v8263_v4 = vpop.f32.mrb[32].mxu1 }
0x1454   : > { %v5776_v6 = vsel %vm4375_vm0, %v8263_v4, 0.0  ;;  %v5754_v22 = vpop.f32.mrb[33].mxu1 }
0x1455   : > { %v5777_v37 = vadd.f32 %v5776_v6, %v5775_v60  ;;  %v5770_v16 = vsel %vm4375_vm0, %v5754_v22, 0.0  ;;  %v8264_v34 = vpop.f32.mrb[34].mxu1 }
0x1456   : > { %v5771_v35 = vadd.f32 %v5770_v16, %v5769_v8  ;;  %v5779_v41 = vsel %vm4375_vm0, %v8264_v34, 0.0  ;;  %v5757_v43 = vpop.f32.mrb[35].mxu1 }
0x1457   : > { %v5780_v44 = vadd.f32 %v5779_v41, %v5778_v25  ;;  %v5773_v45 = vsel %vm4375_vm0, %v5757_v43, 0.0  ;;  %v5789_v48 = vadd.f32 %v7178_v12, %v5777_v37 }
0x1458   : > { %v5787_v1 = vadd.f32 %v7178_v12, %v5771_v35  ;;  %v5774_v2 = vadd.f32 %v5773_v45, %v5772_v51  ;;  %v9128_v45 = vld [vmem:[%s12106_s2 + $0x68] sm:$0xff]  }
0x1459   : > { %v5790_v55 = vadd.f32 %v7178_v12, %v5780_v44  ;;  %v11725_v62 = vadd.f32 %v5789_v48, %v11641_v9  ;;  %v9108_v9 = vld [vmem:[%s12105_s23 + $0x40] sm:$0xff]   ;;  %v9129_v48 = vld [vmem:[%s12108_s10 + $0x68] sm:$0xff]   ;;  %s12111_s23 = sld [smem:[#allocation67_spill]] }
0x145a   : > { %v5788_v56 = vadd.f32 %v7178_v12, %v5774_v2  ;;  %v11717_v58 = vadd.f32 %v5787_v1, %v11633_v63  ;;  %8658 = vmatprep.subr.msk.bf16.mxu0 %vm4375_vm0, %v9108_v9  ;;  %v9130_v1 = vld [vmem:[%s12106_s2 + $0x28] sm:$0xff]  }
0x145b   : > { %v11730_v30 = vadd.f32 %v5790_v55, %v11646_v46  ;;  %v5803_v63 = vsel %vm4375_vm0, %v11725_v62, 0.0  ;;  %v9113_v46 = vld [vmem:[%s12108_s10 + $0x48] sm:$0xff]   ;;  %7564 = vmatpush3.bf16.xpose.msra.mxu0 %v6002_v61  ;;  %v6017_v55 = vsel %vm4375_vm0, %v9130_v1, 0  ;;  %v5905_v1 = vlaneseq }
0x145c   : > { %v5797_v19 = vsel %vm4375_vm0, %v11717_v58, 0.0  ;;  %v11722_v27 = vadd.f32 %v5788_v56, %v11638_v18  ;;  %8659 = vmatprep.subr.msk.bf16.mxu0 %vm4375_vm0, %v9112_v23  ;;  %8667 = vmatprep.subr.msk.bf16.mxu1 %vm4375_vm0, %v9113_v46  ;;  %v9131_v2 = vld [vmem:[%s12108_s10 + $0x28] sm:$0xff]   ;;  %v9138_v23 = vld [vmem:[%s12106_s2 + $0x38] sm:$0xff]  }
0x145d   : > { %5798 = vadd.xlane.f32.xlu0 %v5797_v19  ;;  %v5806_v18 = vsel %vm4375_vm0, %v11730_v30, 0.0  ;;  %7586 = vmatpush3.bf16.xpose.msra.mxu1 %v6230_v21  ;;  %v6242_v56 = vsel %vm4375_vm0, %v9131_v2, 0  ;;  %v9132_v19 = vld [vmem:[%s12106_s2 + $0x70] sm:$0xff]   ;;  %v9139_v46 = vld [vmem:[%s12108_s10 + $0x38] sm:$0xff]   ;;  %v6023_v61 = vsel %vm4375_vm0, %v9138_v23, 0  ;;  %v11850_v2 = vshrl.u32 %v5905_v1, 7 }
0x145e   : > { %v5800_v10 = vsel %vm4375_vm0, %v11722_v27, 0.0  ;;  %8668 = vmatprep.subr.msk.bf16.mxu1 %vm4375_vm0, %v9117_v54  ;;  %v6248_v13 = vsel %vm4375_vm0, %v9139_v46, 0 }
0x145f   : > { %5801 = vadd.xlane.f32.xlu1 %v5800_v10  ;;  %v9133_v10 = vld [vmem:[%s12108_s10 + $0x70] sm:$0xff]   ;;  %s12112_s1 = smov %s12111_s23 }
0x1461   : > { %5804 = vadd.xlane.f32.xlu0 %v5803_v63  ;;  %v9134_v63 = vld [vmem:[%s12106_s2 + $0x30] sm:$0xff]  }
0x1462   : > { %v6020_v9 = vsel %vm4375_vm0, %v9134_v63, 0 }
0x1463   : > { %5807 = vadd.xlane.f32.xlu1 %v5806_v18  ;;  %7566 = vmatpush3.bf16.xpose.msra.mxu0 %v6005_v15  ;;  %v9135_v18 = vld [vmem:[%s12108_s10 + $0x30] sm:$0xff]  }
0x1464   : > { %8660 = vmatprep.subr.msk.bf16.mxu0 %vm4375_vm0, %v9116_v40  ;;  %v6245_v53 = vsel %vm4375_vm0, %v9135_v18, 0 }
0x1465   : > { %7588 = vmatpush3.bf16.xpose.msra.mxu1 %v6233_v42 }
0x1466   : > { %8669 = vmatprep.subr.msk.bf16.mxu1 %vm4375_vm0, %v9121_v0 }
0x146b   : > { %7568 = vmatpush3.bf16.xpose.msra.mxu0 %v6008_v59 }
0x146c   : > { %8661 = vmatprep.subr.msk.bf16.mxu0 %vm4375_vm0, %v9120_v17 }
0x146d   : > { %7590 = vmatpush3.bf16.xpose.msra.mxu1 %v6236_v52 }
0x146e   : > { %8670 = vmatprep.subr.msk.bf16.mxu1 %vm4375_vm0, %v9125_v28 }
0x1473   : > { %7570 = vmatpush3.bf16.xpose.msra.mxu0 %v6011_v20 }
0x1474   : > { %8662 = vmatprep.subr.msk.bf16.mxu0 %vm4375_vm0, %v9124_v39 }
0x1475   : > { %7592 = vmatpush3.bf16.xpose.msra.mxu1 %v6239_v26 }
0x1476   : > { %8671 = vmatprep.subr.msk.bf16.mxu1 %vm4375_vm0, %v9129_v48 }
0x147b   : > { %7572 = vmatpush3.bf16.xpose.msra.mxu0 %v6014_v36 }
0x147c   : > { %8663 = vmatprep.subr.msk.bf16.mxu0 %vm4375_vm0, %v9128_v45 }
0x147d   : > { %7594 = vmatpush3.bf16.xpose.msra.mxu1 %v6242_v56  ;;  %v6134_v56 = vld [vmem:[#allocation34] sm:$0x3] }
0x147e   : > { %8672 = vmatprep.subr.msk.bf16.mxu1 %vm4375_vm0, %v9133_v10 }
0x1483   : > { %7574 = vmatpush3.bf16.xpose.msra.mxu0 %v6017_v55  ;;  %v5907_v55 = vsub.s32 0, %v11850_v2 }
0x1484   : > { %8664 = vmatprep.subr.msk.bf16.mxu0 %vm4375_vm0, %v9132_v19  ;;  %v5911_v19 = vsub.s32 1, %v11850_v2 }
0x1485   : > { %7596 = vmatpush3.bf16.xpose.msra.mxu1 %v6245_v53  ;;  %v6139_v10 = vrot.slane %v6134_v56, %v5907_v55 }
0x1486   : > { %8673 = vmatprep.subr.msk.bf16.mxu1 %vm4375_vm0, %v9137_v7  ;;  %v6143_v63 = vrot.slane %v6134_v56, %v5911_v19 }
0x148b   : > { %7576 = vmatpush3.bf16.xpose.msra.mxu0 %v6020_v9 }
0x148c   : > { %8665 = vmatprep.subr.msk.bf16.mxu0 %vm4375_vm0, %v9136_v57 }
0x148d   : > { %7598 = vmatpush3.bf16.xpose.msra.mxu1 %v6248_v13 }
0x1493   : > { %7578 = vmatpush3.bf16.xpose.msra.mxu0 %v6023_v61 }
0x14ea   : > { %v5799_v3 = vpop.xlane.xlu0 %5798 }
0x14eb   : > { %v5809_v29 = vmul.f32 0.015625, %v5799_v3 }
0x14ec   : > { %v5802_v38 = vpop.xlane.xlu1 %5801 }
0x14ed   : > { %v11777_v33 = vsub.f32 %v11717_v58, %v5809_v29  ;;  %v5810_v32 = vmul.f32 0.015625, %v5802_v38 }
0x14ee   : > { %v5805_v4 = vpop.xlane.xlu0 %5804 }
0x14ef   : > { %v11780_v60 = vsub.f32 %v11722_v27, %v5810_v32  ;;  %v5811_v6 = vmul.f32 0.015625, %v5805_v4  ;;  %v5817_v22 = vmul.f32 %v11777_v33, %v11777_v33 }
0x14f0   : > { %v5808_v8 = vpop.xlane.xlu1 %5807 }
0x14f1   : > { %v11785_v12 = vsub.f32 %v11725_v62, %v5811_v6  ;;  %v5812_v37 = vmul.f32 0.015625, %v5808_v8  ;;  %v5821_v16 = vsel %vm4375_vm0, %v5817_v22, 0.0  ;;  %v5818_v34 = vmul.f32 %v11780_v60, %v11780_v60 }
0x14f2   : > { %5822 = vadd.xlane.f32.xlu0 %v5821_v16  ;;  %v9145_v16 = vld [vmem:[%s12110_s0 + $0x14] ss:$8 sps:$4 sm:$0xff]  }
0x14f3   : > { %v11791_v25 = vsub.f32 %v11730_v30, %v5812_v37  ;;  %v5824_v35 = vsel %vm4375_vm0, %v5818_v34, 0.0  ;;  %v5819_v41 = vmul.f32 %v11785_v12, %v11785_v12  ;;  %v9140_v37 = vld [vmem:[%s12110_s0] ss:$8 sps:$4 sm:$0xff]   ;;  %v9143_v34 = vld [vmem:[%s12110_s0 + $0x10] ss:$8 sps:$4 sm:$0xff]  }
0x14f4   : > { %5825 = vadd.xlane.f32.xlu1 %v5824_v35  ;;  %v9146_v35 = vld [vmem:[%s12110_s0 + $0x20] ss:$8 sps:$4 sm:$0xff]  }
0x14f5   : > { %v5827_v43 = vsel %vm4375_vm0, %v5819_v41, 0.0  ;;  %v5820_v51 = vmul.f32 %v11791_v25, %v11791_v25  ;;  %v9151_v41 = vld [vmem:[%s12110_s0 + $0x34] ss:$8 sps:$4 sm:$0xff]  }
0x14f6   : > { %5828 = vadd.xlane.f32.xlu0 %v5827_v43  ;;  %v9149_v43 = vld [vmem:[%s12110_s0 + $0x30] ss:$8 sps:$4 sm:$0xff]  }
0x14f7   : > { %v5830_v44 = vsel %vm4375_vm0, %v5820_v51, 0.0  ;;  %v9152_v51 = vld [vmem:[%s12111_s23] sm:$0xff]   ;;  %s7242_s23 = sshll.u32 %s12103_s17, 2 }
0x14f8   : > { %5831 = vadd.xlane.f32.xlu1 %v5830_v44  ;;  %v9153_v44 = vld [vmem:[%s12112_s1 + $0x8] sm:$0xff]   ;;  %8674 = vmatprep.subr.msk.bf16.mxu1 %vm4375_vm0, %v9152_v51  ;;  %v6547_v45 = vsel %vm4375_vm0, %v9152_v51, 0 }
0x14f9   : > { %v6550_v48 = vsel %vm4375_vm0, %v9153_v44, 0 }
0x157f   : > { %v5823_v24 = vpop.xlane.xlu0 %5822 }
0x1580   : > { %v5833_v14 = vmul.f32 0.015625, %v5823_v24 }
0x1581   : > { %v5826_v15 = vpop.xlane.xlu1 %5825 }
0x1582   : > { %v5837_v40 = vadd.f32 1e-05, %v5833_v14  ;;  %v5834_v21 = vmul.f32 0.015625, %v5826_v15 }
0x1583   : > { %v5829_v54 = vpop.xlane.xlu0 %5828 }
0x1584   : > { %9236 = vrsqrt.f32 %v5837_v40  ;;  %v5838_v49 = vadd.f32 1e-05, %v5834_v21  ;;  %v5835_v11 = vmul.f32 0.015625, %v5829_v54 }
0x1585   : > { %v5832_v59 = vpop.xlane.xlu1 %5831 }
0x1586   : > { %9238 = vrsqrt.f32 %v5838_v49  ;;  %v5839_v17 = vadd.f32 1e-05, %v5835_v11  ;;  %v5836_v42 = vmul.f32 0.015625, %v5832_v59 }
0x1588   : > { %9240 = vrsqrt.f32 %v5839_v17  ;;  %v5840_v0 = vadd.f32 1e-05, %v5836_v42 }
0x158a   : > { %9242 = vrsqrt.f32 %v5840_v0 }
0x158e   : > { %v9237_v31 = vpop.eup %9236 }
0x158f   : > { %v5845_v20 = vmul.f32 %v9237_v31, %v11777_v33 }
0x1590   : > { %v9239_v39 = vpop.eup %9238 }
0x1591   : > { %v5846_v52 = vmul.f32 %v9239_v39, %v11780_v60  ;;  %v5855_v28 = vmul.f32 %v7179_v47, %v5845_v20 }
0x1592   : > { %v9241_v50 = vpop.eup %9240 }
0x1593   : > { %v5847_v36 = vmul.f32 %v9241_v50, %v11785_v12  ;;  %v5856_v26 = vmul.f32 %v7179_v47, %v5846_v52  ;;  %v5865_v38 = vadd.f32 %v7180_v5, %v5855_v28  ;;  %v9142_v12 = vld [vmem:[%s12109_s26 + $0x4] ss:$8 sps:$4 sm:$0xff]   ;;  %s12114_s26 = sld [smem:[#allocation68_spill]] }
0x1594   : > { %v9243_v3 = vpop.eup %9242  ;;  %6450 = vmatprep.subr.bf16.mxu0 %v9142_v12 }
0x1595   : > { %v5848_v29 = vmul.f32 %v9243_v3, %v11791_v25  ;;  %v5866_v32 = vadd.f32 %v7180_v5, %v5856_v26  ;;  %v5857_v4 = vmul.f32 %v7179_v47, %v5847_v36  ;;  %v9148_v25 = vld [vmem:[%s12110_s0 + $0x24] ss:$8 sps:$4 sm:$0xff]   ;;  %s12115_s0 = sshll.u32 %s12103_s17, 5 }
0x1597   : > { %v5902_v6 = vpack.c.bf16 %v5866_v32, %v5865_v38  ;;  %v5858_v22 = vmul.f32 %v7179_v47, %v5848_v29  ;;  %v5867_v33 = vadd.f32 %v7180_v5, %v5857_v4 }
0x1599   : > { %7579 = vmatprep.mubr.msk.bf16.mxu0 %vm4375_vm0, %v5902_v6  ;;  %7599 = vmatprep.mubr.msk.bf16.mxu1 %vm4375_vm0, %v5902_v6  ;;  %v5868_v60 = vadd.f32 %v7180_v5, %v5858_v22 }
0x159a   : > { %7580 = vmatmul.mubr.msk.bf16.vlgmr.msra.gmra.mrb[20].mxu0 %vm4375_vm0, %v5902_v6  ;;  %7600 = vmatmul.mubr.msk.bf16.vlgmr.msra.gmra.mrb[36].mxu1 %vm4375_vm0, %v5902_v6 }
0x159b   : > { %v5903_v8 = vpack.c.bf16 %v5868_v60, %v5867_v33  ;;  %6451 = vmatpush1.bf16.xpose.msra.mxu0 %v9140_v37  ;;  %8266 = vmatpush3.bf16.xpose.msra.mxu1 %v6547_v45 }
0x159c   : > { %6452 = vmatprep.subr.bf16.mxu0 %v9145_v16  ;;  %8675 = vmatprep.subr.msk.bf16.mxu1 %vm4375_vm0, %v9153_v44 }
0x159d   : > { %7581 = vmatprep.mubr.msk.bf16.mxu0 %vm4375_vm0, %v5903_v8  ;;  %7601 = vmatprep.mubr.msk.bf16.mxu1 %vm4375_vm0, %v5903_v8 }
0x15a2   : > { %7582 = vmatmul.mubr.msk.bf16.gmra.mrb[24].mxu0 %vm4375_vm0, %v5903_v8  ;;  %7602 = vmatmul.mubr.msk.bf16.gmra.mrb[40].mxu1 %vm4375_vm0, %v5903_v8  ;;  %v5901_v8 = vld [vmem:[%s12113_s15] sm:$0x3]  ;;  %s7243_s15 = sshll.u32 %s9930_s22, 3  ;;  %s6631_s22 = sshll.u32 %s10578_s11, 4  ;;  %s11939_s22 = int_to_ptr.vmem [resolvable:$true] %s6631_s22 }
0x15a3   : > { %6453 = vmatpush1.bf16.xpose.msra.mxu0 %v9143_v34  ;;  %8268 = vmatpush3.bf16.xpose.msra.mxu1 %v6550_v48  ;;  %s6628_s2 = sadd.s32 %s7243_s15, %s7242_s23 }
0x15a4   : > { %6454 = vmatprep.subr.bf16.mxu0 %v9148_v25  ;;  %v5908_v25 = vrot.slane %v5901_v8, %v5907_v55  ;;  %s7244_s4 = sshll.u32 %s6628_s2, 7 }
0x15ab   : > { %6455 = vmatpush1.bf16.xpose.msra.mxu0 %v9146_v35 }
0x15ac   : > { %6456 = vmatprep.subr.bf16.mxu0 %v9151_v41 }
0x15b3   : > { %6457 = vmatpush1.bf16.xpose.msra.mxu0 %v9149_v43  ;;  %v5912_v43 = vrot.slane %v5901_v8, %v5911_v19 }
0x166d   : > { %v11856_v18 = vpop.f32.mrb[20].mxu0  ;;  %v6308_v9 = vpop.f32.mrb[36].mxu1 }
0x166e   : > { %v11858_v53 = vadd.f32 %v6308_v9, %v6139_v10  ;;  %v11860_v57 = vpop.f32.mrb[21].mxu0  ;;  %v6310_v7 = vpop.f32.mrb[37].mxu1  ;;  %v6084_v1 = vadd.f32 %v11856_v18, %v5908_v25 }
0x166f   : > { %v11862_v23 = vadd.f32 %v6310_v7, %v6143_v63  ;;  %v11864_v46 = vpop.f32.mrb[22].mxu0  ;;  %v6312_v61 = vpop.f32.mrb[38].mxu1  ;;  %v6086_v55 = vadd.f32 %v11860_v57, %v5912_v43 }
0x1670   : > { %v7217_v13 = vmul.f32 -1.442695, %v11858_v53  ;;  %v11867_v24 = vadd.f32 %v6312_v61, %v6139_v10  ;;  %v11869_v14 = vpop.f32.mrb[23].mxu0  ;;  %v6314_v15 = vpop.f32.mrb[39].mxu1  ;;  %v6088_v19 = vadd.f32 %v11864_v46, %v5908_v25 }
0x1671   : > { %v7218_v40 = vmul.f32 -1.442695, %v11862_v23  ;;  %v11872_v21 = vadd.f32 %v6314_v15, %v6143_v63 }
0x1672   : > { %9244 = vpow2.f32 %v7217_v13  ;;  %v7219_v54 = vmul.f32 -1.442695, %v11867_v24  ;;  %v6090_v13 = vadd.f32 %v11869_v14, %v5912_v43 }
0x1673   : > { %9246 = vpow2.f32 %v7218_v40  ;;  %v7220_v49 = vmul.f32 -1.442695, %v11872_v21 }
0x1674   : > { %9248 = vpow2.f32 %v7219_v54 }
0x1675   : > { %9250 = vpow2.f32 %v7220_v49  ;;  %v11876_v11 = vpop.f32.mrb[24].mxu0  ;;  %v6318_v59 = vpop.f32.mrb[40].mxu1 }
0x1676   : > { %v11878_v17 = vadd.f32 %v6318_v59, %v6139_v10  ;;  %v11880_v42 = vpop.f32.mrb[25].mxu0  ;;  %v6320_v0 = vpop.f32.mrb[41].mxu1  ;;  %v6094_v57 = vadd.f32 %v11876_v11, %v5908_v25 }
0x1677   : > { %v11882_v31 = vadd.f32 %v6320_v0, %v6143_v63  ;;  %v11884_v47 = vpop.f32.mrb[26].mxu0  ;;  %v6322_v20 = vpop.f32.mrb[42].mxu1  ;;  %v6096_v46 = vadd.f32 %v11880_v42, %v5912_v43 }
0x1678   : > { %v7221_v39 = vmul.f32 -1.442695, %v11878_v17  ;;  %v11887_v52 = vadd.f32 %v6322_v20, %v6139_v10  ;;  %v11889_v28 = vpop.f32.mrb[27].mxu0  ;;  %v6324_v50 = vpop.f32.mrb[43].mxu1 }
0x1679   : > { %v7222_v5 = vmul.f32 -1.442695, %v11882_v31  ;;  %v11892_v36 = vadd.f32 %v6324_v50, %v6143_v63  ;;  %v6100_v11 = vadd.f32 %v11889_v28, %v5912_v43  ;;  %v7225_v28 = vld [vmem:[#allocation36] ss:$0 sm:$0xff] }
0x167a   : > { %9252 = vpow2.f32 %v7221_v39  ;;  %v7223_v26 = vmul.f32 -1.442695, %v11887_v52 }
0x167b   : > { %9254 = vpow2.f32 %v7222_v5  ;;  %v7224_v3 = vmul.f32 -1.442695, %v11892_v36 }
0x167c   : > { %v9245_v29 = vpop.eup %9244  ;;  %9256 = vpow2.f32 %v7223_v26 }
0x167d   : > { %v9247_v38 = vpop.eup %9246  ;;  %v6351_v32 = vadd.f32 1.0, %v9245_v29  ;;  %9258 = vpow2.f32 %v7224_v3  ;;  %v9155_v29 = vld [vmem:[%s12112_s1 + $0x18] sm:$0xff]  }
0x167e   : > { %v9249_v4 = vpop.eup %9248  ;;  %v6352_v6 = vadd.f32 1.0, %v9247_v38 }
0x167f   : > { %v9251_v22 = vpop.eup %9250  ;;  %9260 = vrcp.f32 %v6351_v32  ;;  %v6353_v33 = vadd.f32 1.0, %v9249_v4 }
0x1680   : > { %9262 = vrcp.f32 %v6352_v6  ;;  %v6354_v60 = vadd.f32 1.0, %v9251_v22 }
0x1681   : > { %9264 = vrcp.f32 %v6353_v33 }
0x1682   : > { %9266 = vrcp.f32 %v6354_v60 }
0x1684   : > { %v9253_v12 = vpop.eup %9252 }
0x1685   : > { %v9255_v37 = vpop.eup %9254  ;;  %v6355_v16 = vadd.f32 1.0, %v9253_v12 }
0x1686   : > { %v9257_v34 = vpop.eup %9256  ;;  %v6356_v35 = vadd.f32 1.0, %v9255_v37 }
0x1687   : > { %v9259_v41 = vpop.eup %9258  ;;  %9268 = vrcp.f32 %v6355_v16  ;;  %v6357_v51 = vadd.f32 1.0, %v9257_v34 }
0x1688   : > { %9270 = vrcp.f32 %v6356_v35  ;;  %v6358_v44 = vadd.f32 1.0, %v9259_v41 }
0x1689   : > { %v9261_v45 = vpop.eup %9260  ;;  %9272 = vrcp.f32 %v6357_v51 }
0x168a   : > { %v9263_v48 = vpop.eup %9262  ;;  %v6375_v56 = vmul.f32 %v9261_v45, %v11858_v53  ;;  %9274 = vrcp.f32 %v6358_v44 }
0x168b   : > { %v9265_v10 = vpop.eup %9264  ;;  %v6376_v63 = vmul.f32 %v9263_v48, %v11862_v23 }
0x168c   : > { %v9267_v9 = vpop.eup %9266  ;;  %v6383_v2 = vmul.f32 %v6375_v56, %v6084_v1  ;;  %v6377_v7 = vmul.f32 %v9265_v10, %v11867_v24 }
0x168d   : > { %v6384_v61 = vmul.f32 %v6376_v63, %v6086_v55  ;;  %v6378_v15 = vmul.f32 %v9267_v9, %v11872_v21  ;;  %v6098_v21 = vadd.f32 %v11884_v47, %v5908_v25 }
0x168e   : > { %v6385_v18 = vmul.f32 %v6377_v7, %v6088_v19 }
0x168f   : > { %v6386_v40 = vmul.f32 %v6378_v15, %v6090_v13 }
0x1690   : > { %v6400_v53 = vpack.c.bf16 %v6385_v18, %v6383_v2 }
0x1691   : > { %v9269_v54 = vpop.eup %9268  ;;  %v6401_v49 = vpack.c.bf16 %v6386_v40, %v6384_v61 }
0x1692   : > { %v9271_v59 = vpop.eup %9270  ;;  %v6379_v23 = vmul.f32 %v9269_v54, %v11878_v17 }
0x1693   : > { %v9273_v0 = vpop.eup %9272  ;;  %v6380_v24 = vmul.f32 %v9271_v59, %v11882_v31  ;;  %6482 = vmatprep.mubr.bf16.mxu0 %v6401_v49  ;;  %v9154_v31 = vld [vmem:[%s12112_s1 + $0x10] sm:$0xff]   ;;  %s4363_s1 = scalar_lea.vmem %s10573_s6, %s12115_s0  ;;  %s11937_s6 = scalar_lea.hbm %s12116_s3, %s7244_s4 }
0x1694   : > { %v9275_v14 = vpop.eup %9274  ;;  %v6387_v20 = vmul.f32 %v6379_v23, %v6094_v57  ;;  %v6381_v39 = vmul.f32 %v9273_v0, %v11887_v52  ;;  %6483 = vmatmul.mubr.bf16.vlgmr.msra.gmra.mrb[28].mxu0 %v6400_v53  ;;  %8676 = vmatprep.subr.msk.bf16.mxu1 %vm4375_vm0, %v9154_v31  ;;  %v6553_v47 = vsel %vm4375_vm0, %v9154_v31, 0  ;;  %v6556_v52 = vsel %vm4375_vm0, %v9155_v29, 0  ;;  %v4364_v48 = vld [vmem:[%s4363_s1] sm:$0xff]  ;;  %v4365_v63 = vld [vmem:[%s4363_s1 + $0x8] sm:$0xff]  ;;  %s9808_s0 = scalar_lea.vmem %s11939_s22, 512  ;;  %s10001_s4 = smov [#allocation37]  }
0x1695   : > { %v6388_v50 = vmul.f32 %v6380_v24, %v6096_v46  ;;  %v6382_v17 = vmul.f32 %v9275_v14, %v11892_v36  ;;  %8270 = vmatpush3.bf16.xpose.msra.mxu1 %v6553_v47  ;;  %p9809_p5 = scmp.ne.s32.totalorder %s11939_s22, %s9808_s0  ;;  %s9812_s2 = sshll.u32 %s10001_s4, 4  ;;  %s9813_s2 = int_to_ptr.vmem [resolvable:$false] %s9812_s2 }
0x1696   : > { %v6389_v5 = vmul.f32 %v6381_v39, %v6098_v21  ;;  %8677 = vmatprep.subr.msk.bf16.mxu1 %vm4375_vm0, %v9155_v29  ;;  %p9815_p8 = scmp.lt.s32.totalorder %s11939_s22, %s9813_s2 }
0x1697   : > { %v6390_v26 = vmul.f32 %v6382_v17, %v6100_v11  ;;  %p9810_p7 = pnand %p9809_p5, %p12118_p6 }
0x1698   : > { %v6402_v42 = vpack.c.bf16 %v6389_v5, %v6387_v20 }
0x1699   : > { %v6403_v3 = vpack.c.bf16 %v6390_v26, %v6388_v50  ;;  %p9811_p3 = pneg %p9810_p7 }
0x169b   : > { %6490 = vmatprep.mubr.bf16.mxu0 %v6403_v3 }
0x169c   : > { %6491 = vmatmul.mubr.bf16.gmra.mrb[32].mxu0 %v6402_v42 }
0x169d   : > { %8272 = vmatpush3.bf16.xpose.msra.mxu1 %v6556_v52 }
0x1767   : > { %v6484_v36 = vpop.f32.mrb[28].mxu0 }
0x1768   : > { %v6485_v38 = vadd.f32 %v7225_v28, %v6484_v36  ;;  %v6486_v32 = vpop.f32.mrb[29].mxu0 }
0x1769   : > { %v6487_v4 = vpop.f32.mrb[30].mxu0 }
0x176a   : > { %v6488_v6 = vadd.f32 %v7225_v28, %v6487_v4  ;;  %v6489_v22 = vpop.f32.mrb[31].mxu0  ;;  %v6499_v33 = vadd.f32 %v6485_v38, %v11717_v58  ;;  %v7234_v58 = vld [vmem:[%s12114_s26] ss:$0 sm:$0xff]  ;;  %s9814_s26 = scalar_lea.vmem %s9813_s2, 1024 }
0x176b   : > { %p9816_p10 = scmp.lt.s32.totalorder %s9814_s26, %s9808_s0 }
0x176c   : > { %v6500_v60 = vadd.f32 %v6488_v6, %v11722_v27  ;;  %v4366_v27 = vld [vmem:[%s4363_s1 + $0x10] sm:$0xff] }
0x176d   : > { %p9817_p12 = por %p9816_p10, %p9815_p8 }
0x176e   : > { %v6512_v8 = vpack.c.bf16 %v6500_v60, %v6499_v33 }
0x176f   : > { %v6492_v12 = vpop.f32.mrb[32].mxu0  ;;  %p9818_p9 = pnand %p9817_p12, %p9811_p3 }
0x1770   : > { %v6493_v37 = vadd.f32 %v7225_v28, %v6492_v12  ;;  %v6494_v16 = vpop.f32.mrb[33].mxu0  ;;  %8273 = vmatprep.mubr.msk.bf16.mxu1 %vm4375_vm0, %v6512_v8 }
0x1771   : > { %v6495_v34 = vpop.f32.mrb[34].mxu0 }
0x1772   : > { %v6496_v25 = vadd.f32 %v7225_v28, %v6495_v34  ;;  %v6497_v35 = vpop.f32.mrb[35].mxu0  ;;  %v6501_v41 = vadd.f32 %v6493_v37, %v11725_v62 }
0x1774   : > { %v6502_v43 = vadd.f32 %v6496_v25, %v11730_v30  ;;  %v4367_v30 = vld [vmem:[%s4363_s1 + $0x18] sm:$0xff]  ;;  %s12117_s1 = sand.u32 1, %s9918_s16  }
0x1775   : > { %s11949_s17 = scalar_lea.sflag [#allocation9], %s12117_s1 }
0x1776   : > { %v6513_v51 = vpack.c.bf16 %v6502_v43, %v6501_v41 }
0x1778   : > { %8274 = vmatmul.mubr.msk.bf16.vlgmr.msra.gmra.mrb[44].mxu1 %vm4375_vm0, %v6513_v51 }
0x184b   : > { %v8275_v44 = vpop.f32.mrb[44].mxu1 }
0x184c   : > { %v6601_v45 = vadd.f32 %v8275_v44, %v7234_v58  ;;  %v6592_v1 = vpop.f32.mrb[45].mxu1 }
0x184d   : > { %v6593_v62 = vadd.f32 %v7234_v58, %v6592_v1  ;;  %v8276_v56 = vpop.f32.mrb[46].mxu1 }
0x184e   : > { %v6609_v10 = vadd.f32 %v6601_v45, %v4366_v27  ;;  %v6604_v55 = vadd.f32 %v8276_v56, %v7234_v58  ;;  %v6595_v9 = vpop.f32.mrb[47].mxu1 }
0x184f   : > { %v6607_v2 = vadd.f32 %v6593_v62, %v4364_v48  ;;  %v6596_v19 = vadd.f32 %v7234_v58, %v6595_v9 }
0x1850   : > { %6613 = vst.msk [vmem:[%s10578_s11 + $0x10] sm:$0xff] %vm4375_vm0, %v6609_v10  ;;  %v6610_v7 = vadd.f32 %v6604_v55, %v4367_v30 }
0x1851   : > { %6611 = vst.msk [vmem:[%s10578_s11] sm:$0xff] %vm4375_vm0, %v6607_v2  ;;  %v6608_v61 = vadd.f32 %v6596_v19, %v4365_v63 }
0x1852   : > { %6614 = vst.msk [vmem:[%s10578_s11 + $0x18] sm:$0xff] %vm4375_vm0, %v6610_v7 }
0x1853   : > { %6612 = vst.msk [vmem:[%s10578_s11 + $0x8] sm:$0xff] %vm4375_vm0, %v6608_v61 }
0x1854   : > { %9821 = shalt.err (!%p9818_p9)
}
0x1855   : > { %s9822_s11 = scalar_lea.hbm %s11937_s6, 512  ;;  %s9826_s23 = scalar_lea.hbm %s12116_s3, 2048 }
0x1856   : > { %p9823_p11 = scmp.ne.s32.totalorder %s11937_s6, %s9822_s11  ;;  %p9827_p4 = scmp.lt.u32.totalorder %s11937_s6, %s12116_s3 }
0x1857   : > { %p9828_p0 = scmp.lt.u32.totalorder %s9826_s23, %s9822_s11  ;;  %p9830_p5 = scmp.lt.u32.totalorder %s9822_s11, %s11937_s6 }
0x1858   : > { %p9824_p13 = pnand %p9823_p11, %p12118_p6 }
0x1859   : > { %p9829_p2 = por %p9828_p0, %p9827_p4 }
0x185a   : > { %p9825_p1 = pneg %p9824_p13 }
0x185b   : > { %p9831_p7 = por %p9830_p5, %p9829_p2 }
0x185d   : > { %p9832_p3 = pnand %p9831_p7, %p9825_p1 }
0x185f   : > { %9835 = shalt.err (!%p9832_p3)
}
0x1860   : > { %s10002_s15 = smov 128   ;;  %s10003_s1 = smov 8  }
0x1861   : > { %8754 = dma.vmem_to_hbm [thread:$0]  (%p12118_p6), %s11939_s22, 512, %s11937_s6, %s11949_s17, %s10002_s15, %s10002_s15, %s10003_s1  }
0x1862 PF: > { %s12119_s0 = sld [smem:[#allocation70_spill]]  ;;  %s12120_s4 = sld [smem:[#allocation76_spill]] }
0x1863   : > { %p8856_p8 = scmp.ge.s32.totalorder %s9942_s28, 2 }
0x1868   : > { %s6646_s2 = sand.u32 1, %s12119_s0   ;;  %p12121_p10 = scmp.ne.s32.totalorder %s12120_s4, 0 }
0x1869   : > { %s6647_s26 = scalar_lea.sflag [#allocation9], %s6646_s2 }
0x186a   : > { %p8815_p12 = pnand %p8856_p8, %p12121_p10 }
0x186c   : > { %9909 = dma.done.wait (!%p8815_p12), %s6647_s26, 512  }
0x186d   : > { %9911 = vsyncadd (!%p8815_p12), %s6647_s26, 4294966784  ;;  %s84_s28 = sadd.s32 1, %s9942_s28   ;;  %s12122_s11 = sld [smem:[#allocation77_spill]] }
0x186e   : > { %p81_p9 = scmp.ge.s32.totalorder %s84_s28, 6   ;;  %s12123_s0 = sld [smem:[#allocation72_spill]] }
0x186f   : > { %s12124_s22 = sld [smem:[#allocation73_spill]]  ;;  %s12125_s23 = sld [smem:[#allocation74_spill]] }
0x1870   : > { %s12126_s26 = sld [smem:[#allocation75_spill]]  ;;  %s12127_s15 = smov %s9918_s16 }
0x1871   : > { %s12128_s16 = smov %s9922_s18  ;;  %83 = sbr.rel (!%p81_p9) target bundleno = 75 (0x4b), region = 291 }
0x1873   : > { %s12129_s18 = smov %s12122_s11 }
0x1874   : > { %12130 = sst [smem:[#allocation70_spill]] %s12123_s0 }
0x1878   :  { %6652 = vsyncpa [#allocation8], 1 }
0x1879   :  { %6654 = vsyncpa [#allocation8 + $0x1], 1 }
0x187a   :  { %6655 = vsyncpa [#allocation11], 1 }
0x187b   :  { %6656 = vsyncpa [#allocation14], 1 }
0x187c   :  { %6657 = vsyncpa [#allocation17], 1 }
0x187d   :  { %6658 = vsyncpa [#allocation20], 1 }
0x187e   :  { %6659 = vsyncpa [#allocation23], 1 }
0x187f   :  { %6660 = vsyncpa [#allocation26], 1 }
0x1880   :  { %6661 = vsyncpa [#allocation29], 1 }
0x1881   :  { %6662 = vsyncpa [#allocation32], 1 }
0x1882   :  { %6663 = vsyncpa [#allocation35], 1 }
0x1883   :  { %6664 = vsyncpa [#allocation9], 1 }
0x1884   :  { %6666 = vsyncpa [#allocation9 + $0x1], 1 }

</bundles_post_ra>
